<compile_context>
chip_gen: v7x
topology: tpu7x:2x2x1
jax: 0.10.0
libtpu: 0.0.40
codegen_flags: <defaults>
</compile_context>

<pallas_src>
import functools

import jax
import jax.numpy as jnp
from jax.experimental import pallas as pl
from jax.experimental.pallas import tpu as pltpu


def _round_up(x, m):
    return ((x + m - 1) // m) * m


def _gelu_tanh(x):
    # tanh-approximate GELU, computed in f32 (VPU + EUP).  Keep f32: v5e has
    # no bf16 VPU/EUP path, and f32 avoids double rounding before fc2.
    c = 0.7978845608028654  # sqrt(2/pi)
    return 0.5 * x * (1.0 + jnp.tanh(c * (x + 0.044715 * x * x * x)))


def mlp_kernel(x_ref, w1_ref, b1_ref, w2_ref, b2_ref, o_ref):
    # fc1: (tm, D) @ (D, H) -- bf16 (or f32) operands, f32 MXU accumulation.
    h = jnp.dot(x_ref[...], w1_ref[...], preferred_element_type=jnp.float32)
    h = h + b1_ref[...]                        # bias add in f32
    h = _gelu_tanh(h)                          # f32 activation (DPA stand-in)
    # drop1: identity (p=0.0)
    # fc2: (tm, H) @ (H, D_out) -- f32 accumulation.
    o = jnp.dot(h.astype(w2_ref.dtype), w2_ref[...],
                preferred_element_type=jnp.float32)
    o = o + b2_ref[...]
    # drop2: identity (p=0.0)
    o_ref[...] = o.astype(o_ref.dtype)


@functools.partial(
    jax.jit,
    static_argnames=("tm", "compute_dtype", "single_buffer_weights"))
def _mlp_forward_impl(x, w1, b1, w2, b2, *, tm, compute_dtype,
                      single_buffer_weights):
    B, N, D = x.shape
    H = w1.shape[1]
    D_out = w2.shape[1]
    M = B * N

    # Effective row tile: don't tile wider than the (sublane-padded) token
    # count; pad tokens up to a multiple of the tile (handles ViT N=197 etc.).
    tm_eff = min(tm, _round_up(M, 8))
    M_pad = _round_up(M, tm_eff)
    grid = (M_pad // tm_eff,)

    x2 = x.reshape(M, D)
    if M_pad != M:
        x2 = jnp.pad(x2, ((0, M_pad - M), (0, 0)))

    x2 = x2.astype(compute_dtype)
    w1c = w1.astype(compute_dtype)
    w2c = w2.astype(compute_dtype)
    b1_2 = b1.reshape(1, H).astype(jnp.float32)       # biases stay f32
    b2_2 = b2.reshape(1, D_out).astype(jnp.float32)

    cbytes = jnp.dtype(compute_dtype).itemsize
    obytes = jnp.dtype(x.dtype).itemsize

    # VMEM budget: double-buffered x/out tiles, resident weights+biases
    # (1 or 2 buffers), f32 intermediates, plus headroom.  Capped at 64 MiB
    # (v7x physical); raises v5e's 16 MiB scoped default when needed.
    wbuf = 1 if single_buffer_weights else 2
    vmem_est = (2 * (tm_eff * D + tm_eff * D_out) * max(cbytes, obytes)
                + wbuf * (D * H + H * D_out) * cbytes
                + wbuf * (H + D_out) * 4
                + (tm_eff * H + tm_eff * D_out) * 4)
    vmem_limit = min(int(vmem_est * 1.5) + (2 << 20), 64 * 1024 * 1024)

    def const_spec(shape):
        zeros = (0,) * len(shape)
        if single_buffer_weights:
            # Constant index map -> no re-DMA; 1 buffer halves weight VMEM.
            return pl.BlockSpec(shape, lambda i: zeros,
                                pipeline_mode=pl.Buffered(1))
        return pl.BlockSpec(shape, lambda i: zeros)

    cost = pl.CostEstimate(
        flops=2 * M_pad * D * H + 2 * M_pad * H * D_out,
        transcendentals=M_pad * H,
        bytes_accessed=(M_pad * D * cbytes
                        + (D * H + H * D_out) * cbytes
                        + (H + D_out) * 4
                        + M_pad * D_out * obytes),
    )

    out2 = pl.pallas_call(
        mlp_kernel,
        out_shape=jax.ShapeDtypeStruct((M_pad, D_out), x.dtype),
        grid_spec=pltpu.PrefetchScalarGridSpec(
            num_scalar_prefetch=0,
            grid=grid,
            in_specs=[
                pl.BlockSpec((tm_eff, D), lambda i: (i, 0)),   # x row tile
                const_spec((D, H)),                            # W1 (resident)
                const_spec((1, H)),                            # b1 (f32)
                const_spec((H, D_out)),                        # W2 (resident)
                const_spec((1, D_out)),                        # b2 (f32)
            ],
            out_specs=pl.BlockSpec((tm_eff, D_out), lambda i: (i, 0)),
        ),
        compiler_params=pltpu.CompilerParams(
            dimension_semantics=("parallel",),
            vmem_limit_bytes=vmem_limit),
        cost_estimate=cost,
    )(x2, w1c, b1_2, w2c, b2_2)

    if M_pad != M:
        out2 = out2[:M]
    return out2.reshape(B, N, D_out)


def mlp_forward(x, w1, b1, w2, b2, *, tm=256, compute_dtype=jnp.bfloat16):
    """x: (B, N, D) -> (B, N, D_out).  tm=256 suits v6e/v7x, 128 suits v5e."""
    try:
        return _mlp_forward_impl(x, w1, b1, w2, b2, tm=tm,
                                 compute_dtype=compute_dtype,
                                 single_buffer_weights=True)
    except Exception:
        # Fallback if this JAX build does not accept pl.Buffered(1) on the
        # top-level pallas_call pipeline: default double-buffered weights.
        return _mlp_forward_impl(x, w1, b1, w2, b2, tm=tm,
                                 compute_dtype=compute_dtype,
                                 single_buffer_weights=False)


def mlp_reference(x, w1, b1, w2, b2, compute_dtype):
    """Plain-JAX reference using the same numeric recipe as the kernel."""
    B, N, D = x.shape
    x2 = x.reshape(B * N, D).astype(compute_dtype)
    h = jnp.dot(x2, w1.astype(compute_dtype),
                preferred_element_type=jnp.float32)
    h = _gelu_tanh(h + b1.astype(jnp.float32)[None, :])
    o = jnp.dot(h.astype(compute_dtype), w2.astype(compute_dtype),
                preferred_element_type=jnp.float32)
    o = o + b2.astype(jnp.float32)[None, :]
    return o.astype(x.dtype).reshape(B, N, -1)


def init_params(key, in_features, hidden_features, out_features,
                dtype=jnp.float32):
    """Deterministic init matching nn.Linear's uniform(-1/sqrt(fan_in), ...)."""
    k1, k2, k3, k4 = jax.random.split(key, 4)
    bound1 = 1.0 / (in_features ** 0.5)
    bound2 = 1.0 / (hidden_features ** 0.5)
    w1 = jax.random.uniform(k1, (in_features, hidden_features), dtype,
                            minval=-bound1, maxval=bound1)
    b1 = jax.random.uniform(k2, (hidden_features,), dtype,
                            minval=-bound1, maxval=bound1)
    w2 = jax.random.uniform(k3, (hidden_features, out_features), dtype,
                            minval=-bound2, maxval=bound2)
    b2 = jax.random.uniform(k4, (out_features,), dtype,
                            minval=-bound2, maxval=bound2)
    return w1, b1, w2, b2


if __name__ == "__main__":
    key = jax.random.PRNGKey(0)
    kx, kp = jax.random.split(key)

    # Small but ViT-shaped: 196 patches + CLS token -> N = 197 (exercises the
    # token-padding path); embed_dim=128, hidden=4*128=512 keep everything
    # lane-dense (multiples of 128).
    B, N = 2, 197
    D, H = 128, 512

    x = jax.random.normal(kx, (B, N, D), dtype=jnp.float32)
    w1, b1, w2, b2 = init_params(kp, D, H, D)

    # f32 datapath: tight check against plain-JAX reference.
    out_f32 = mlp_forward(x, w1, b1, w2, b2, tm=256,
                          compute_dtype=jnp.float32)
    out_f32 = jax.block_until_ready(out_f32)
    ref_f32 = mlp_reference(x, w1, b1, w2, b2, jnp.float32)
    assert out_f32.shape == (B, N, D)
    assert jnp.allclose(out_f32, ref_f32, atol=1e-4, rtol=1e-4), \
        "f32 kernel mismatch vs reference"

    # bf16 datapath (default: bf16 MXU operands, f32 accumulation).
    out_bf16 = mlp_forward(x, w1, b1, w2, b2, tm=256)
    out_bf16 = jax.block_until_ready(out_bf16)
    ref_bf16 = mlp_reference(x, w1, b1, w2, b2, jnp.bfloat16)
    assert jnp.allclose(out_bf16, ref_bf16, atol=2e-2, rtol=2e-2), \
        "bf16 kernel mismatch vs reference"

    print("KERNEL_OK")
</pallas_src>

<mosaic_0001>
module attributes {stable_mosaic.version = 11 : i64} {
  func.func @mlp_kernel(%arg0: i32, %arg1: memref<256x128xf32, #tpu.memory_space<vmem>>, %arg2: memref<128x512xf32, #tpu.memory_space<vmem>>, %arg3: memref<1x512xf32, #tpu.memory_space<vmem>>, %arg4: memref<512x128xf32, #tpu.memory_space<vmem>>, %arg5: memref<1x128xf32, #tpu.memory_space<vmem>>, %arg6: memref<256x128xf32, #tpu.memory_space<vmem>>) attributes {dimension_semantics = [#tpu.dimension_semantics<parallel>], iteration_bounds = array<i64: 2>, scalar_prefetch = 0 : i64, scratch_operands = 0 : i64, tpu.core_type = #tpu.core_type<tc>, window_params = [{transform_indices = @transform_0, window_bounds = array<i64: 256, 128>}, {pipeline_mode = #tpu.pipeline_mode<synchronous>, transform_indices = @transform_1, window_bounds = array<i64: 128, 512>}, {pipeline_mode = #tpu.pipeline_mode<synchronous>, transform_indices = @transform_2, window_bounds = array<i64: 1, 512>}, {pipeline_mode = #tpu.pipeline_mode<synchronous>, transform_indices = @transform_3, window_bounds = array<i64: 512, 128>}, {pipeline_mode = #tpu.pipeline_mode<synchronous>, transform_indices = @transform_4, window_bounds = array<i64: 1, 128>}, {transform_indices = @transform_5, window_bounds = array<i64: 256, 128>}]} {
    %c0 = arith.constant 0 : index
    %c0_0 = arith.constant 0 : index
    %0 = vector.load %arg1[%c0, %c0_0] : memref<256x128xf32, #tpu.memory_space<vmem>>, vector<256x128xf32>
    %c0_1 = arith.constant 0 : index
    %c0_2 = arith.constant 0 : index
    %1 = vector.load %arg2[%c0_1, %c0_2] : memref<128x512xf32, #tpu.memory_space<vmem>>, vector<128x512xf32>
    %cst = arith.constant dense<0.000000e+00> : vector<256x512xf32>
    %2 = tpu.matmul %0, %1, %cst {dimension_numbers = #tpu.dot_dimension_numbers<[1], [0], [0], [1], [0, 0, 1, 1], [], []>} : vector<256x128xf32>, vector<128x512xf32>, vector<256x512xf32> -> vector<256x512xf32>
    %c0_3 = arith.constant 0 : index
    %c0_4 = arith.constant 0 : index
    %3 = vector.load %arg3[%c0_3, %c0_4] : memref<1x512xf32, #tpu.memory_space<vmem>>, vector<1x512xf32>
    %4 = vector.broadcast %3 : vector<1x512xf32> to vector<256x512xf32>
    %5 = arith.addf %2, %4 : vector<256x512xf32>
    %cst_5 = arith.constant 5.000000e-01 : f32
    %6 = vector.broadcast %cst_5 : f32 to vector<256x512xf32>
    %7 = arith.mulf %6, %5 : vector<256x512xf32>
    %cst_6 = arith.constant 4.471500e-02 : f32
    %8 = vector.broadcast %cst_6 : f32 to vector<256x512xf32>
    %9 = arith.mulf %8, %5 : vector<256x512xf32>
    %10 = arith.mulf %9, %5 : vector<256x512xf32>
    %11 = arith.mulf %10, %5 : vector<256x512xf32>
    %12 = arith.addf %5, %11 : vector<256x512xf32>
    %cst_7 = arith.constant 0.797884583 : f32
    %13 = vector.broadcast %cst_7 : f32 to vector<256x512xf32>
    %14 = arith.mulf %13, %12 : vector<256x512xf32>
    %15 = math.tanh %14 : vector<256x512xf32>
    %cst_8 = arith.constant 1.000000e+00 : f32
    %16 = vector.broadcast %cst_8 : f32 to vector<256x512xf32>
    %17 = arith.addf %16, %15 : vector<256x512xf32>
    %18 = arith.mulf %7, %17 : vector<256x512xf32>
    %c0_9 = arith.constant 0 : index
    %c0_10 = arith.constant 0 : index
    %19 = vector.load %arg4[%c0_9, %c0_10] : memref<512x128xf32, #tpu.memory_space<vmem>>, vector<512x128xf32>
    %cst_11 = arith.constant dense<0.000000e+00> : vector<256x128xf32>
    %20 = tpu.matmul %18, %19, %cst_11 {dimension_numbers = #tpu.dot_dimension_numbers<[1], [0], [0], [1], [0, 0, 1, 1], [], []>} : vector<256x512xf32>, vector<512x128xf32>, vector<256x128xf32> -> vector<256x128xf32>
    %c0_12 = arith.constant 0 : index
    %c0_13 = arith.constant 0 : index
    %21 = vector.load %arg5[%c0_12, %c0_13] : memref<1x128xf32, #tpu.memory_space<vmem>>, vector<1x128xf32>
    %22 = vector.broadcast %21 : vector<1x128xf32> to vector<256x128xf32>
    %23 = arith.addf %20, %22 : vector<256x128xf32>
    %c0_14 = arith.constant 0 : index
    %c0_15 = arith.constant 0 : index
    %24 = vector.load %arg6[%c0_14, %c0_15] : memref<256x128xf32, #tpu.memory_space<vmem>>, vector<256x128xf32>
    tpu.vector_store %arg6[%c0_14, %c0_15], %23 {strides = array<i32>} : memref<256x128xf32, #tpu.memory_space<vmem>>, vector<256x128xf32>,
    return
  }
  func.func @transform_0(%arg0: i32) -> (i32, i32) {
    %c0_i32 = arith.constant 0 : i32
    %c0_i32_0 = arith.constant 0 : i32
    return %arg0, %c0_i32 : i32, i32
  }
  func.func @transform_1(%arg0: i32) -> (i32, i32) {
    %c0_i32 = arith.constant 0 : i32
    %c0_i32_0 = arith.constant 0 : i32
    %c0_i32_1 = arith.constant 0 : i32
    return %c0_i32, %c0_i32_0 : i32, i32
  }
  func.func @transform_2(%arg0: i32) -> (i32, i32) {
    %c0_i32 = arith.constant 0 : i32
    %c0_i32_0 = arith.constant 0 : i32
    %c0_i32_1 = arith.constant 0 : i32
    return %c0_i32, %c0_i32_0 : i32, i32
  }
  func.func @transform_3(%arg0: i32) -> (i32, i32) {
    %c0_i32 = arith.constant 0 : i32
    %c0_i32_0 = arith.constant 0 : i32
    %c0_i32_1 = arith.constant 0 : i32
    return %c0_i32, %c0_i32_0 : i32, i32
  }
  func.func @transform_4(%arg0: i32) -> (i32, i32) {
    %c0_i32 = arith.constant 0 : i32
    %c0_i32_0 = arith.constant 0 : i32
    %c0_i32_1 = arith.constant 0 : i32
    return %c0_i32, %c0_i32_0 : i32, i32
  }
  func.func @transform_5(%arg0: i32) -> (i32, i32) {
    %c0_i32 = arith.constant 0 : i32
    %c0_i32_0 = arith.constant 0 : i32
    return %arg0, %c0_i32 : i32, i32
  }
}

module attributes {stable_mosaic.version = 11 : i64} {
  func.func @mlp_kernel(%arg0: i32, %arg1: memref<256x128xf32, #tpu.memory_space<vmem>>, %arg2: memref<128x512xf32, #tpu.memory_space<vmem>>, %arg3: memref<1x512xf32, #tpu.memory_space<vmem>>, %arg4: memref<512x128xf32, #tpu.memory_space<vmem>>, %arg5: memref<1x128xf32, #tpu.memory_space<vmem>>, %arg6: memref<256x128xf32, #tpu.memory_space<vmem>>) attributes {dimension_semantics = [#tpu.dimension_semantics<parallel>], iteration_bounds = array<i64: 2>, scalar_prefetch = 0 : i64, scratch_operands = 0 : i64, tpu.core_type = #tpu.core_type<tc>, window_params = [{transform_indices = @transform_0, window_bounds = array<i64: 256, 128>}, {pipeline_mode = #tpu.pipeline_mode<synchronous>, transform_indices = @transform_1, window_bounds = array<i64: 128, 512>}, {pipeline_mode = #tpu.pipeline_mode<synchronous>, transform_indices = @transform_2, window_bounds = array<i64: 1, 512>}, {pipeline_mode = #tpu.pipeline_mode<synchronous>, transform_indices = @transform_3, window_bounds = array<i64: 512, 128>}, {pipeline_mode = #tpu.pipeline_mode<synchronous>, transform_indices = @transform_4, window_bounds = array<i64: 1, 128>}, {transform_indices = @transform_5, window_bounds = array<i64: 256, 128>}]} {
    %c0 = arith.constant 0 : index
    %c0_0 = arith.constant 0 : index
    %0 = vector.load %arg1[%c0, %c0_0] : memref<256x128xf32, #tpu.memory_space<vmem>>, vector<256x128xf32>
    %c0_1 = arith.constant 0 : index
    %c0_2 = arith.constant 0 : index
    %1 = vector.load %arg2[%c0_1, %c0_2] : memref<128x512xf32, #tpu.memory_space<vmem>>, vector<128x512xf32>
    %cst = arith.constant dense<0.000000e+00> : vector<256x512xf32>
    %2 = tpu.matmul %0, %1, %cst {dimension_numbers = #tpu.dot_dimension_numbers<[1], [0], [0], [1], [0, 0, 1, 1], [], []>} : vector<256x128xf32>, vector<128x512xf32>, vector<256x512xf32> -> vector<256x512xf32>
    %c0_3 = arith.constant 0 : index
    %c0_4 = arith.constant 0 : index
    %3 = vector.load %arg3[%c0_3, %c0_4] : memref<1x512xf32, #tpu.memory_space<vmem>>, vector<1x512xf32>
    %4 = vector.broadcast %3 : vector<1x512xf32> to vector<256x512xf32>
    %5 = arith.addf %2, %4 : vector<256x512xf32>
    %cst_5 = arith.constant 5.000000e-01 : f32
    %6 = vector.broadcast %cst_5 : f32 to vector<256x512xf32>
    %7 = arith.mulf %6, %5 : vector<256x512xf32>
    %cst_6 = arith.constant 4.471500e-02 : f32
    %8 = vector.broadcast %cst_6 : f32 to vector<256x512xf32>
    %9 = arith.mulf %8, %5 : vector<256x512xf32>
    %10 = arith.mulf %9, %5 : vector<256x512xf32>
    %11 = arith.mulf %10, %5 : vector<256x512xf32>
    %12 = arith.addf %5, %11 : vector<256x512xf32>
    %cst_7 = arith.constant 0.797884583 : f32
    %13 = vector.broadcast %cst_7 : f32 to vector<256x512xf32>
    %14 = arith.mulf %13, %12 : vector<256x512xf32>
    %15 = math.tanh %14 : vector<256x512xf32>
    %cst_8 = arith.constant 1.000000e+00 : f32
    %16 = vector.broadcast %cst_8 : f32 to vector<256x512xf32>
    %17 = arith.addf %16, %15 : vector<256x512xf32>
    %18 = arith.mulf %7, %17 : vector<256x512xf32>
    %c0_9 = arith.constant 0 : index
    %c0_10 = arith.constant 0 : index
    %19 = vector.load %arg4[%c0_9, %c0_10] : memref<512x128xf32, #tpu.memory_space<vmem>>, vector<512x128xf32>
    %cst_11 = arith.constant dense<0.000000e+00> : vector<256x128xf32>
    %20 = tpu.matmul %18, %19, %cst_11 {dimension_numbers = #tpu.dot_dimension_numbers<[1], [0], [0], [1], [0, 0, 1, 1], [], []>} : vector<256x512xf32>, vector<512x128xf32>, vector<256x128xf32> -> vector<256x128xf32>
    %c0_12 = arith.constant 0 : index
    %c0_13 = arith.constant 0 : index
    %21 = vector.load %arg5[%c0_12, %c0_13] : memref<1x128xf32, #tpu.memory_space<vmem>>, vector<1x128xf32>
    %22 = vector.broadcast %21 : vector<1x128xf32> to vector<256x128xf32>
    %23 = arith.addf %20, %22 : vector<256x128xf32>
    %c0_14 = arith.constant 0 : index
    %c0_15 = arith.constant 0 : index
    %24 = vector.load %arg6[%c0_14, %c0_15] : memref<256x128xf32, #tpu.memory_space<vmem>>, vector<256x128xf32>
    tpu.vector_store %arg6[%c0_14, %c0_15], %23 {strides = array<i32>} : memref<256x128xf32, #tpu.memory_space<vmem>>, vector<256x128xf32>,
    return
  }
  func.func @transform_0(%arg0: i32) -> (i32, i32) {
    %c0_i32 = arith.constant 0 : i32
    %c0_i32_0 = arith.constant 0 : i32
    return %arg0, %c0_i32 : i32, i32
  }
  func.func @transform_1(%arg0: i32) -> (i32, i32) {
    %c0_i32 = arith.constant 0 : i32
    %c0_i32_0 = arith.constant 0 : i32
    %c0_i32_1 = arith.constant 0 : i32
    return %c0_i32, %c0_i32_0 : i32, i32
  }
  func.func @transform_2(%arg0: i32) -> (i32, i32) {
    %c0_i32 = arith.constant 0 : i32
    %c0_i32_0 = arith.constant 0 : i32
    %c0_i32_1 = arith.constant 0 : i32
    return %c0_i32, %c0_i32_0 : i32, i32
  }
  func.func @transform_3(%arg0: i32) -> (i32, i32) {
    %c0_i32 = arith.constant 0 : i32
    %c0_i32_0 = arith.constant 0 : i32
    %c0_i32_1 = arith.constant 0 : i32
    return %c0_i32, %c0_i32_0 : i32, i32
  }
  func.func @transform_4(%arg0: i32) -> (i32, i32) {
    %c0_i32 = arith.constant 0 : i32
    %c0_i32_0 = arith.constant 0 : i32
    %c0_i32_1 = arith.constant 0 : i32
    return %c0_i32, %c0_i32_0 : i32, i32
  }
  func.func @transform_5(%arg0: i32) -> (i32, i32) {
    %c0_i32 = arith.constant 0 : i32
    %c0_i32_0 = arith.constant 0 : i32
    return %arg0, %c0_i32 : i32, i32
  }
}

</mosaic_0001>

<bundles_post_ra>
// kernel: _mlp_forward_impl.1
= control target key start
LH: loop header
LB: loop body
LE: loop exit
PB: predicated region body
PF: predicated region fallthrough
CT: control target
= control target key end

     0   :  { %s3163_s18 = smov 0   ;;  %s5619_s0 = inlined_call_operand.vmem [shape: f32[512,128], index: 0, kind: input, shape index: {}]   ;;  %s5620_s1 = inlined_call_operand.vmem [shape: f32[128,512], index: 1, kind: input, shape index: {}]   ;;  %s5621_s2 = inlined_call_operand.vmem [shape: f32[1,512], index: 2, kind: input, shape index: {}]   ;;  %s5622_s3 = inlined_call_operand.vmem [shape: f32[512,128], index: 3, kind: input, shape index: {}]   ;;  %s5623_s4 = inlined_call_operand.vmem [shape: f32[1,128], index: 4, kind: input, shape index: {}]   ;;  %s5624_s5 = inlined_call_operand.vmem [shape: f32[512,128], index: 5, kind: output, shape index: {}]  }
   0x1 LB: > { %s2621_s19 = sadd.s32 4294967295, %s3129_s18   ;;  %p2625_p0 = scmp.ge.s32.totalorder %s3129_s18, 1  ;;  %s3129_s18 = sphi %s3163_s18, %s15_s18  }
   0x2   : > { %p188_p1 = scmp.lt.s32.totalorder %s3129_s18, 3 }
   0x4   : > { %p189_p2 = pnand %p2625_p0, %p188_p1 }
   0x6   : > { %192 = sbr.rel (%p189_p2) target bundleno = 813 (0x32d), region = 40 }
   0xd   : > { %v261_v0 = vld [vmem:[%s5620_s1 + $0x8] sm:$0xff]  ;;  %v263_v2 = vld [vmem:[%s5620_s1 + $0x18] sm:$0xff]  ;;  %v260_v5 = vld [vmem:[%s5620_s1] sm:$0xff]  ;;  %v3131_v7 = vmov 0.0   ;;  %s3307_s14 = sshll.u32 %s2621_s19, 5 }
   0xe   : > { %v265_v1 = vld [vmem:[%s5620_s1 + $0x28] sm:$0xff]  ;;  %v267_v4 = vld [vmem:[%s5620_s1 + $0x38] sm:$0xff]  ;;  %v264_v6 = vld [vmem:[%s5620_s1 + $0x20] sm:$0xff]  ;;  %410 = vmatprep.mubr.f32.mxu0 %v3131_v7  ;;  %667 = vmatprep.mubr.f32.mxu1 %v3131_v7  ;;  %p217_p3 = scmp.lt.s32.totalorder %s3307_s14, 63 }
   0xf   : > { %v2633_v3 = vpack.c.bf16 %v265_v1, %v261_v0  ;;  %v2665_v8 = vpack.c.bf16 %v267_v4, %v263_v2  ;;  %v2635_v9 = vpack.c.bf16 %v264_v6, %v260_v5  ;;  %v262_v10 = vld [vmem:[%s5620_s1 + $0x10] sm:$0xff]  ;;  %v269_v12 = vld [vmem:[%s5620_s1 + $0x48] sm:$0xff]  ;;  %v271_v15 = vld [vmem:[%s5620_s1 + $0x58] sm:$0xff] }
  0x10   : > { %v266_v11 = vld [vmem:[%s5620_s1 + $0x30] sm:$0xff]  ;;  %v273_v14 = vld [vmem:[%s5620_s1 + $0x68] sm:$0xff]  ;;  %v275_v16 = vld [vmem:[%s5620_s1 + $0x78] sm:$0xff]  ;;  %s6070_s14 = smov (!%p217_p3, %s3307_s14), 63 }
  0x11   : > { %2634 = vmatprep.subr.bf16.mxu0 %v2633_v3  ;;  %v2667_v13 = vpack.c.bf16 %v266_v11, %v262_v10  ;;  %2666 = vmatprep.subr.bf16.mxu1 %v2665_v8  ;;  %v2637_v17 = vpack.c.bf16 %v273_v14, %v269_v12  ;;  %v2669_v18 = vpack.c.bf16 %v275_v16, %v271_v15  ;;  %v268_v19 = vld [vmem:[%s5620_s1 + $0x40] sm:$0xff]  ;;  %v270_v21 = vld [vmem:[%s5620_s1 + $0x50] sm:$0xff]  ;;  %v277_v24 = vld [vmem:[%s5620_s1 + $0x88] sm:$0xff]  ;;  %s2627_s8 = sshll.u32 %s6070_s14, 3 }
  0x12   : > { %2636 = vmatpush1.bf16.msra.mxu0 %v2635_v9  ;;  %v272_v20 = vld [vmem:[%s5620_s1 + $0x60] sm:$0xff]  ;;  %v274_v23 = vld [vmem:[%s5620_s1 + $0x70] sm:$0xff]  ;;  %v281_v25 = vld [vmem:[%s5620_s1 + $0xa8] sm:$0xff]  ;;  %s3381_s11 = scalar_lea.vmem %s5619_s0, %s2627_s8  ;;  %s5536_s22 = scalar_lea.vmem %s5624_s5, %s2627_s8 }
  0x13   : > { %2668 = vmatpush1.bf16.msra.mxu1 %v2667_v13  ;;  %v2639_v22 = vpack.c.bf16 %v272_v20, %v268_v19  ;;  %2638 = vmatprep.subr.bf16.mxu0 %v2637_v17  ;;  %v2671_v26 = vpack.c.bf16 %v274_v23, %v270_v21  ;;  %v2641_v27 = vpack.c.bf16 %v281_v25, %v277_v24  ;;  %v279_v28 = vld [vmem:[%s5620_s1 + $0x98] sm:$0xff]  ;;  %v276_v30 = vld [vmem:[%s5620_s1 + $0x80] sm:$0xff]  ;;  %v278_v33 = vld [vmem:[%s5620_s1 + $0x90] sm:$0xff] }
  0x14   : > { %2670 = vmatprep.subr.bf16.mxu1 %v2669_v18  ;;  %v283_v29 = vld [vmem:[%s5620_s1 + $0xb8] sm:$0xff]  ;;  %v280_v32 = vld [vmem:[%s5620_s1 + $0xa0] sm:$0xff]  ;;  %v282_v34 = vld [vmem:[%s5620_s1 + $0xb0] sm:$0xff] }
  0x15   : > { %v2673_v31 = vpack.c.bf16 %v283_v29, %v279_v28  ;;  %v2643_v35 = vpack.c.bf16 %v280_v32, %v276_v30  ;;  %v285_v36 = vld [vmem:[%s5620_s1 + $0xc8] sm:$0xff]  ;;  %v287_v38 = vld [vmem:[%s5620_s1 + $0xd8] sm:$0xff]  ;;  %v2675_v39 = vpack.c.bf16 %v282_v34, %v278_v33  ;;  %v284_v42 = vld [vmem:[%s5620_s1 + $0xc0] sm:$0xff] }
  0x16   : > { %2640 = vmatpush1.bf16.msra.mxu0 %v2639_v22  ;;  %v289_v37 = vld [vmem:[%s5620_s1 + $0xe8] sm:$0xff]  ;;  %v291_v41 = vld [vmem:[%s5620_s1 + $0xf8] sm:$0xff]  ;;  %v288_v43 = vld [vmem:[%s5620_s1 + $0xe0] sm:$0xff] }
  0x17   : > { %2672 = vmatpush1.bf16.msra.mxu1 %v2671_v26  ;;  %2642 = vmatprep.subr.bf16.mxu0 %v2641_v27  ;;  %v2645_v40 = vpack.c.bf16 %v289_v37, %v285_v36  ;;  %v2677_v44 = vpack.c.bf16 %v291_v41, %v287_v38  ;;  %v286_v45 = vld [vmem:[%s5620_s1 + $0xd0] sm:$0xff]  ;;  %v293_v47 = vld [vmem:[%s5620_s1 + $0x108] sm:$0xff]  ;;  %v295_v49 = vld [vmem:[%s5620_s1 + $0x118] sm:$0xff]  ;;  %v2647_v51 = vpack.c.bf16 %v288_v43, %v284_v42 }
  0x18   : > { %2674 = vmatprep.subr.bf16.mxu1 %v2673_v31  ;;  %v290_v46 = vld [vmem:[%s5620_s1 + $0xf0] sm:$0xff]  ;;  %v297_v48 = vld [vmem:[%s5620_s1 + $0x128] sm:$0xff]  ;;  %v299_v50 = vld [vmem:[%s5620_s1 + $0x138] sm:$0xff] }
  0x19   : > { %v2679_v52 = vpack.c.bf16 %v290_v46, %v286_v45  ;;  %v2649_v53 = vpack.c.bf16 %v297_v48, %v293_v47  ;;  %v292_v54 = vld [vmem:[%s5620_s1 + $0x100] sm:$0xff]  ;;  %v294_v56 = vld [vmem:[%s5620_s1 + $0x110] sm:$0xff]  ;;  %v2681_v57 = vpack.c.bf16 %v299_v50, %v295_v49  ;;  %v301_v59 = vld [vmem:[%s5620_s1 + $0x148] sm:$0xff] }
  0x1a   : > { %2644 = vmatpush1.bf16.msra.mxu0 %v2643_v35  ;;  %v296_v55 = vld [vmem:[%s5620_s1 + $0x120] sm:$0xff]  ;;  %v298_v58 = vld [vmem:[%s5620_s1 + $0x130] sm:$0xff]  ;;  %v305_v60 = vld [vmem:[%s5620_s1 + $0x168] sm:$0xff] }
  0x1b   : > { %2676 = vmatpush1.bf16.msra.mxu1 %v2675_v39  ;;  %2646 = vmatprep.subr.bf16.mxu0 %v2645_v40  ;;  %v303_v61 = vld [vmem:[%s5620_s1 + $0x158] sm:$0xff]  ;;  %v2651_v63 = vpack.c.bf16 %v296_v55, %v292_v54  ;;  %v2683_v0 = vpack.c.bf16 %v298_v58, %v294_v56  ;;  %v2653_v1 = vpack.c.bf16 %v305_v60, %v301_v59  ;;  %v300_v2 = vld [vmem:[%s5620_s1 + $0x140] sm:$0xff]  ;;  %v302_v4 = vld [vmem:[%s5620_s1 + $0x150] sm:$0xff]  ;;  %v3132_v40 = vmov 0.0|0.0  }
  0x1c   : > { %2678 = vmatprep.subr.bf16.mxu1 %v2677_v44  ;;  %v307_v62 = vld [vmem:[%s5620_s1 + $0x178] sm:$0xff]  ;;  %v304_v3 = vld [vmem:[%s5620_s1 + $0x160] sm:$0xff]  ;;  %v306_v6 = vld [vmem:[%s5620_s1 + $0x170] sm:$0xff] }
  0x1d   : > { %v2685_v5 = vpack.c.bf16 %v307_v62, %v303_v61  ;;  %v309_v8 = vld [vmem:[%s5620_s1 + $0x188] sm:$0xff]  ;;  %v311_v10 = vld [vmem:[%s5620_s1 + $0x198] sm:$0xff]  ;;  %v2655_v12 = vpack.c.bf16 %v304_v3, %v300_v2  ;;  %v2687_v13 = vpack.c.bf16 %v306_v6, %v302_v4  ;;  %v308_v15 = vld [vmem:[%s5620_s1 + $0x180] sm:$0xff] }
  0x1e   : > { %2648 = vmatpush1.bf16.msra.mxu0 %v2647_v51  ;;  %v313_v9 = vld [vmem:[%s5620_s1 + $0x1a8] sm:$0xff]  ;;  %v315_v11 = vld [vmem:[%s5620_s1 + $0x1b8] sm:$0xff]  ;;  %v312_v16 = vld [vmem:[%s5620_s1 + $0x1a0] sm:$0xff] }
  0x1f   : > { %2680 = vmatpush1.bf16.msra.mxu1 %v2679_v52  ;;  %2650 = vmatprep.subr.bf16.mxu0 %v2649_v53  ;;  %v2657_v14 = vpack.c.bf16 %v313_v9, %v309_v8  ;;  %v310_v17 = vld [vmem:[%s5620_s1 + $0x190] sm:$0xff]  ;;  %v2689_v18 = vpack.c.bf16 %v315_v11, %v311_v10  ;;  %v317_v20 = vld [vmem:[%s5620_s1 + $0x1c8] sm:$0xff]  ;;  %v319_v22 = vld [vmem:[%s5620_s1 + $0x1d8] sm:$0xff]  ;;  %v2659_v24 = vpack.c.bf16 %v312_v16, %v308_v15 }
  0x20   : > { %2682 = vmatprep.subr.bf16.mxu1 %v2681_v57  ;;  %v314_v19 = vld [vmem:[%s5620_s1 + $0x1b0] sm:$0xff]  ;;  %v321_v21 = vld [vmem:[%s5620_s1 + $0x1e8] sm:$0xff]  ;;  %v323_v23 = vld [vmem:[%s5620_s1 + $0x1f8] sm:$0xff] }
  0x21   : > { %v2691_v25 = vpack.c.bf16 %v314_v19, %v310_v17  ;;  %v2661_v26 = vpack.c.bf16 %v321_v21, %v317_v20  ;;  %v316_v27 = vld [vmem:[%s5620_s1 + $0x1c0] sm:$0xff]  ;;  %v2693_v29 = vpack.c.bf16 %v323_v23, %v319_v22  ;;  %v318_v30 = vld [vmem:[%s5620_s1 + $0x1d0] sm:$0xff]  ;;  %v2013_v35 = vld [vmem:[%s5622_s3 + $0x8] sm:$0xff] }
  0x22   : > { %2652 = vmatpush1.bf16.msra.mxu0 %v2651_v63  ;;  %v320_v28 = vld [vmem:[%s5620_s1 + $0x1e0] sm:$0xff]  ;;  %v322_v31 = vld [vmem:[%s5620_s1 + $0x1f0] sm:$0xff]  ;;  %v2045_v38 = vld [vmem:[%s5622_s3 + $0x108] sm:$0xff] }
  0x23   : > { %2684 = vmatpush1.bf16.msra.mxu1 %v2683_v0  ;;  %2654 = vmatprep.subr.bf16.mxu0 %v2653_v1  ;;  %v2663_v32 = vpack.c.bf16 %v320_v28, %v316_v27  ;;  %v2695_v33 = vpack.c.bf16 %v322_v31, %v318_v30  ;;  %v2012_v34 = vld [vmem:[%s5622_s3] sm:$0xff]  ;;  %v2014_v42 = vld [vmem:[%s5622_s3 + $0x10] sm:$0xff]  ;;  %v2015_v43 = vld [vmem:[%s5622_s3 + $0x18] sm:$0xff] }
  0x24   : > { %2686 = vmatprep.subr.bf16.mxu1 %v2685_v5  ;;  %v2044_v36 = vld [vmem:[%s5622_s3 + $0x100] sm:$0xff]  ;;  %v2698_v39 = vpack.c.bf16 %v2013_v35, %v2012_v34  ;;  %v2046_v44 = vld [vmem:[%s5622_s3 + $0x110] sm:$0xff]  ;;  %v2047_v45 = vld [vmem:[%s5622_s3 + $0x118] sm:$0xff]  ;;  %v2701_v47 = vpack.c.bf16 %v2015_v43, %v2014_v42 }
  0x25   : > { %v228_v37 = vld [vmem:[%s3381_s11] sm:$0xff]  ;;  %v2746_v41 = vpack.c.bf16 %v2045_v38, %v2044_v36  ;;  %v229_v46 = vld [vmem:[%s3381_s11 + $0x8] sm:$0xff]  ;;  %v2749_v48 = vpack.c.bf16 %v2047_v45, %v2046_v44  ;;  %v230_v53 = vld [vmem:[%s3381_s11 + $0x10] sm:$0xff] }
  0x26   : > { %2656 = vmatpush1.bf16.msra.mxu0 %v2655_v12  ;;  %v2016_v49 = vld [vmem:[%s5622_s3 + $0x20] sm:$0xff]  ;;  %v2017_v50 = vld [vmem:[%s5622_s3 + $0x28] sm:$0xff]  ;;  %v2018_v56 = vld [vmem:[%s5622_s3 + $0x30] sm:$0xff] }
  0x27   : > { %2688 = vmatpush1.bf16.msra.mxu1 %v2687_v13  ;;  %2658 = vmatprep.subr.bf16.mxu0 %v2657_v14  ;;  %v2048_v51 = vld [vmem:[%s5622_s3 + $0x120] sm:$0xff]  ;;  %v2049_v52 = vld [vmem:[%s5622_s3 + $0x128] sm:$0xff]  ;;  %v2704_v54 = vpack.c.bf16 %v2017_v50, %v2016_v49  ;;  %v2019_v57 = vld [vmem:[%s5622_s3 + $0x38] sm:$0xff] }
  0x28   : > { %2690 = vmatprep.subr.bf16.mxu1 %v2689_v18  ;;  %v2752_v55 = vpack.c.bf16 %v2049_v52, %v2048_v51  ;;  %v2050_v58 = vld [vmem:[%s5622_s3 + $0x130] sm:$0xff]  ;;  %v2051_v59 = vld [vmem:[%s5622_s3 + $0x138] sm:$0xff]  ;;  %v2707_v61 = vpack.c.bf16 %v2019_v57, %v2018_v56  ;;  %v2020_v63 = vld [vmem:[%s5622_s3 + $0x40] sm:$0xff] }
  0x29   : > { %v231_v60 = vld [vmem:[%s3381_s11 + $0x18] sm:$0xff]  ;;  %v2755_v62 = vpack.c.bf16 %v2051_v59, %v2050_v58  ;;  %v2021_v0 = vld [vmem:[%s5622_s3 + $0x48] sm:$0xff]  ;;  %v2052_v1 = vld [vmem:[%s5622_s3 + $0x140] sm:$0xff] }
  0x2a   : > { %2660 = vmatpush1.bf16.msra.mxu0 %v2659_v24  ;;  %v2053_v2 = vld [vmem:[%s5622_s3 + $0x148] sm:$0xff]  ;;  %v232_v3 = vld [vmem:[%s3381_s11 + $0x20] sm:$0xff]  ;;  %v2710_v4 = vpack.c.bf16 %v2021_v0, %v2020_v63  ;;  %v2022_v6 = vld [vmem:[%s5622_s3 + $0x50] sm:$0xff] }
  0x2b   : > { %2692 = vmatpush1.bf16.msra.mxu1 %v2691_v25  ;;  %2662 = vmatprep.subr.bf16.mxu0 %v2661_v26  ;;  %v2758_v5 = vpack.c.bf16 %v2053_v2, %v2052_v1  ;;  %v2023_v8 = vld [vmem:[%s5622_s3 + $0x58] sm:$0xff]  ;;  %v2054_v9 = vld [vmem:[%s5622_s3 + $0x150] sm:$0xff]  ;;  %v233_v11 = vld [vmem:[%s3381_s11 + $0x28] sm:$0xff] }
  0x2c   : > { %2694 = vmatprep.subr.bf16.mxu1 %v2693_v29  ;;  %v2055_v10 = vld [vmem:[%s5622_s3 + $0x158] sm:$0xff]  ;;  %v2713_v12 = vpack.c.bf16 %v2023_v8, %v2022_v6  ;;  %v2024_v14 = vld [vmem:[%s5622_s3 + $0x60] sm:$0xff]  ;;  %v2025_v15 = vld [vmem:[%s5622_s3 + $0x68] sm:$0xff] }
  0x2d   : > { %v2761_v13 = vpack.c.bf16 %v2055_v10, %v2054_v9  ;;  %v2056_v16 = vld [vmem:[%s5622_s3 + $0x160] sm:$0xff]  ;;  %v2057_v17 = vld [vmem:[%s5622_s3 + $0x168] sm:$0xff]  ;;  %v234_v18 = vld [vmem:[%s3381_s11 + $0x30] sm:$0xff]  ;;  %v2716_v19 = vpack.c.bf16 %v2025_v15, %v2024_v14 }
  0x2e   : > { %2664 = vmatpush1.bf16.msra.mxu0 %v2663_v32  ;;  %v2764_v20 = vpack.c.bf16 %v2057_v17, %v2056_v16  ;;  %v2026_v21 = vld [vmem:[%s5622_s3 + $0x70] sm:$0xff]  ;;  %v2027_v22 = vld [vmem:[%s5622_s3 + $0x78] sm:$0xff]  ;;  %v2028_v28 = vld [vmem:[%s5622_s3 + $0x80] sm:$0xff] }
  0x2f   : > { %2696 = vmatpush1.bf16.msra.mxu1 %v2695_v33  ;;  %2745 = vmatprep.subr.bf16.mxu0 %v3132_v40  ;;  %v2058_v23 = vld [vmem:[%s5622_s3 + $0x170] sm:$0xff]  ;;  %v2059_v24 = vld [vmem:[%s5622_s3 + $0x178] sm:$0xff]  ;;  %v2719_v26 = vpack.c.bf16 %v2027_v22, %v2026_v21  ;;  %v2029_v29 = vld [vmem:[%s5622_s3 + $0x88] sm:$0xff] }
  0x30   : > { %2697 = vmatprep.subr.bf16.mxu1 %v3132_v40  ;;  %v235_v25 = vld [vmem:[%s3381_s11 + $0x38] sm:$0xff]  ;;  %v2767_v27 = vpack.c.bf16 %v2059_v24, %v2058_v23  ;;  %v2060_v30 = vld [vmem:[%s5622_s3 + $0x180] sm:$0xff]  ;;  %v2061_v31 = vld [vmem:[%s5622_s3 + $0x188] sm:$0xff]  ;;  %v2722_v33 = vpack.c.bf16 %v2029_v29, %v2028_v28 }
  0x31   : > { %411 = vmatmul.mubr.f32.vlgmr.msra.gmra.mrb[0].mxu0 %v228_v37  ;;  %v236_v32 = vld [vmem:[%s3381_s11 + $0x40] sm:$0xff]  ;;  %v2770_v34 = vpack.c.bf16 %v2061_v31, %v2060_v30  ;;  %v2030_v35 = vld [vmem:[%s5622_s3 + $0x90] sm:$0xff]  ;;  %v2031_v36 = vld [vmem:[%s5622_s3 + $0x98] sm:$0xff] }
  0x32   : > { %668 = vmatmul.mubr.f32.vlgmr.msra.gmra.mrb[0].mxu1 %v228_v37  ;;  %416 = vmatprep.mubr.f32.mxu0 %v3131_v7  ;;  %v2062_v37 = vld [vmem:[%s5622_s3 + $0x190] sm:$0xff]  ;;  %v2063_v38 = vld [vmem:[%s5622_s3 + $0x198] sm:$0xff]  ;;  %v2032_v43 = vld [vmem:[%s5622_s3 + $0xa0] sm:$0xff] }
  0x33   : > { %673 = vmatprep.mubr.f32.mxu1 %v3131_v7  ;;  %2699 = vmatpush1.bf16.msra.mxu1 %v2698_v39  ;;  %v237_v39 = vld [vmem:[%s3381_s11 + $0x48] sm:$0xff]  ;;  %v2773_v42 = vpack.c.bf16 %v2063_v38, %v2062_v37  ;;  %v2064_v45 = vld [vmem:[%s5622_s3 + $0x1a0] sm:$0xff]  ;;  %v2034_v50 = vld [vmem:[%s5622_s3 + $0xb0] sm:$0xff]  ;;  %v326_v37 = vlaneseq }
  0x34   : > { %2747 = vmatpush1.bf16.msra.mxu0 %v2746_v41  ;;  %2700 = vmatprep.subr.bf16.mxu1 %v3132_v40  ;;  %v2725_v41 = vpack.c.bf16 %v2031_v36, %v2030_v35  ;;  %v2033_v44 = vld [vmem:[%s5622_s3 + $0xa8] sm:$0xff]  ;;  %v2035_v51 = vld [vmem:[%s5622_s3 + $0xb8] sm:$0xff]  ;;  %v2066_v52 = vld [vmem:[%s5622_s3 + $0x1b0] sm:$0xff] }
  0x35   : > { %417 = vmatmul.mubr.f32.gmra.mrb[2].mxu0 %v229_v46  ;;  %2748 = vmatprep.subr.bf16.mxu0 %v3132_v40  ;;  %v2036_v57 = vld [vmem:[%s5622_s3 + $0xc0] sm:$0xff]  ;;  %v2037_v58 = vld [vmem:[%s5622_s3 + $0xc8] sm:$0xff]  ;;  %v243_v63 = vld [vmem:[%s3381_s11 + $0x78] sm:$0xff]  ;;  %v327_v38 = vshrl.u32 %v326_v37, 7 }
  0x36   : > { %674 = vmatmul.mubr.f32.gmra.mrb[2].mxu1 %v229_v46  ;;  %422 = vmatprep.mubr.f32.mxu0 %v3131_v7  ;;  %v2065_v46 = vld [vmem:[%s5622_s3 + $0x1a8] sm:$0xff]  ;;  %v240_v59 = vld [vmem:[%s3381_s11 + $0x60] sm:$0xff]  ;;  %v246_v2 = vld [vmem:[%s3381_s11 + $0x90] sm:$0xff] }
  0x37   : > { %679 = vmatprep.mubr.f32.mxu1 %v3131_v7  ;;  %2702 = vmatpush1.bf16.msra.mxu1 %v2701_v47  ;;  %v238_v47 = vld [vmem:[%s3381_s11 + $0x50] sm:$0xff]  ;;  %v2776_v49 = vpack.c.bf16 %v2065_v46, %v2064_v45  ;;  %v244_v0 = vld [vmem:[%s3381_s11 + $0x80] sm:$0xff]  ;;  %v245_v1 = vld [vmem:[%s3381_s11 + $0x88] sm:$0xff] }
  0x38   : > { %2750 = vmatpush1.bf16.msra.mxu0 %v2749_v48  ;;  %2703 = vmatprep.subr.bf16.mxu1 %v3132_v40  ;;  %v2728_v48 = vpack.c.bf16 %v2033_v44, %v2032_v43  ;;  %v250_v6 = vld [vmem:[%s3381_s11 + $0xb0] sm:$0xff]  ;;  %v251_v8 = vld [vmem:[%s3381_s11 + $0xb8] sm:$0xff]  ;;  %v252_v9 = vld [vmem:[%s3381_s11 + $0xc0] sm:$0xff]  ;;  %v332_v43 = vsub.s32 1, %v327_v38  ;;  %v340_v44 = vsub.s32 3, %v327_v38 }
  0x39   : > { %423 = vmatmul.mubr.f32.gmra.mrb[4].mxu0 %v230_v53  ;;  %2751 = vmatprep.subr.bf16.mxu0 %v3132_v40  ;;  %v253_v10 = vld [vmem:[%s3381_s11 + $0xc8] sm:$0xff]  ;;  %v2038_v14 = vld [vmem:[%s5622_s3 + $0xd0] sm:$0xff]  ;;  %v2039_v15 = vld [vmem:[%s5622_s3 + $0xd8] sm:$0xff] }
  0x3a   : > { %680 = vmatmul.mubr.f32.gmra.mrb[4].mxu1 %v230_v53  ;;  %428 = vmatprep.mubr.f32.mxu0 %v3131_v7  ;;  %v2067_v53 = vld [vmem:[%s5622_s3 + $0x1b8] sm:$0xff]  ;;  %v2070_v16 = vld [vmem:[%s5622_s3 + $0x1d0] sm:$0xff]  ;;  %v2737_v17 = vpack.c.bf16 %v2039_v15, %v2038_v14  ;;  %v2040_v21 = vld [vmem:[%s5622_s3 + $0xe0] sm:$0xff] }
  0x3b   : > { %685 = vmatprep.mubr.f32.mxu1 %v3131_v7  ;;  %2705 = vmatpush1.bf16.msra.mxu1 %v2704_v54  ;;  %v239_v54 = vld [vmem:[%s3381_s11 + $0x58] sm:$0xff]  ;;  %v2779_v56 = vpack.c.bf16 %v2067_v53, %v2066_v52  ;;  %v2041_v22 = vld [vmem:[%s5622_s3 + $0xe8] sm:$0xff]  ;;  %v256_v28 = vld [vmem:[%s3381_s11 + $0xe0] sm:$0xff] }
  0x3c   : > { %2753 = vmatpush1.bf16.msra.mxu0 %v2752_v55  ;;  %2706 = vmatprep.subr.bf16.mxu1 %v3132_v40  ;;  %v2731_v55 = vpack.c.bf16 %v2035_v51, %v2034_v50  ;;  %v2740_v23 = vpack.c.bf16 %v2041_v22, %v2040_v21  ;;  %v255_v24 = vld [vmem:[%s3381_s11 + $0xd8] sm:$0xff]  ;;  %v2042_v29 = vld [vmem:[%s5622_s3 + $0xf0] sm:$0xff]  ;;  %v257_v35 = vld [vmem:[%s3381_s11 + $0xe8] sm:$0xff] }
  0x3d   : > { %429 = vmatmul.mubr.f32.gmra.mrb[6].mxu0 %v231_v60  ;;  %2754 = vmatprep.subr.bf16.mxu0 %v3132_v40  ;;  %v2043_v30 = vld [vmem:[%s5622_s3 + $0xf8] sm:$0xff]  ;;  %v2074_v31 = vld [vmem:[%s5622_s3 + $0x1f0] sm:$0xff] }
  0x3e   : > { %686 = vmatmul.mubr.f32.gmra.mrb[6].mxu1 %v231_v60  ;;  %434 = vmatprep.mubr.f32.mxu0 %v3131_v7  ;;  %v2734_v60 = vpack.c.bf16 %v2037_v58, %v2036_v57  ;;  %v258_v36 = vld [vmem:[%s3381_s11 + $0xf0] sm:$0xff] }
  0x3f   : > { %691 = vmatprep.mubr.f32.mxu1 %v3131_v7  ;;  %2708 = vmatpush1.bf16.msra.mxu1 %v2707_v61  ;;  %v241_v61 = vld [vmem:[%s3381_s11 + $0x68] sm:$0xff] }
  0x40   : > { %2756 = vmatpush1.bf16.msra.mxu0 %v2755_v62  ;;  %2709 = vmatprep.subr.bf16.mxu1 %v3132_v40  ;;  %v242_v62 = vld [vmem:[%s3381_s11 + $0x70] sm:$0xff] }
  0x41   : > { %435 = vmatmul.mubr.f32.gmra.mrb[8].mxu0 %v232_v3  ;;  %2757 = vmatprep.subr.bf16.mxu0 %v3132_v40 }
  0x42   : > { %692 = vmatmul.mubr.f32.gmra.mrb[8].mxu1 %v232_v3  ;;  %440 = vmatprep.mubr.f32.mxu0 %v3131_v7  ;;  %v247_v3 = vld [vmem:[%s3381_s11 + $0x98] sm:$0xff] }
  0x43   : > { %697 = vmatprep.mubr.f32.mxu1 %v3131_v7  ;;  %2711 = vmatpush1.bf16.msra.mxu1 %v2710_v4  ;;  %v248_v4 = vld [vmem:[%s3381_s11 + $0xa0] sm:$0xff] }
  0x44   : > { %2759 = vmatpush1.bf16.msra.mxu0 %v2758_v5  ;;  %2712 = vmatprep.subr.bf16.mxu1 %v3132_v40  ;;  %v249_v5 = vld [vmem:[%s3381_s11 + $0xa8] sm:$0xff] }
  0x45   : > { %441 = vmatmul.mubr.f32.gmra.mrb[10].mxu0 %v233_v11  ;;  %2760 = vmatprep.subr.bf16.mxu0 %v3132_v40 }
  0x46   : > { %698 = vmatmul.mubr.f32.gmra.mrb[10].mxu1 %v233_v11  ;;  %446 = vmatprep.mubr.f32.mxu0 %v3131_v7  ;;  %v2068_v11 = vld [vmem:[%s5622_s3 + $0x1c0] sm:$0xff] }
  0x47   : > { %703 = vmatprep.mubr.f32.mxu1 %v3131_v7  ;;  %2714 = vmatpush1.bf16.msra.mxu1 %v2713_v12  ;;  %v2069_v12 = vld [vmem:[%s5622_s3 + $0x1c8] sm:$0xff] }
  0x48   : > { %2762 = vmatpush1.bf16.msra.mxu0 %v2761_v13  ;;  %2715 = vmatprep.subr.bf16.mxu1 %v3132_v40  ;;  %v2782_v13 = vpack.c.bf16 %v2069_v12, %v2068_v11 }
  0x49   : > { %447 = vmatmul.mubr.f32.gmra.mrb[12].mxu0 %v234_v18  ;;  %2763 = vmatprep.subr.bf16.mxu0 %v3132_v40 }
  0x4a   : > { %704 = vmatmul.mubr.f32.gmra.mrb[12].mxu1 %v234_v18  ;;  %452 = vmatprep.mubr.f32.mxu0 %v3131_v7  ;;  %v2071_v18 = vld [vmem:[%s5622_s3 + $0x1d8] sm:$0xff] }
  0x4b   : > { %709 = vmatprep.mubr.f32.mxu1 %v3131_v7  ;;  %2717 = vmatpush1.bf16.msra.mxu1 %v2716_v19  ;;  %v2785_v19 = vpack.c.bf16 %v2071_v18, %v2070_v16 }
  0x4c   : > { %2765 = vmatpush1.bf16.msra.mxu0 %v2764_v20  ;;  %2718 = vmatprep.subr.bf16.mxu1 %v3132_v40  ;;  %v254_v20 = vld [vmem:[%s3381_s11 + $0xd0] sm:$0xff] }
  0x4d   : > { %453 = vmatmul.mubr.f32.gmra.mrb[14].mxu0 %v235_v25  ;;  %2766 = vmatprep.subr.bf16.mxu0 %v3132_v40 }
  0x4e   : > { %710 = vmatmul.mubr.f32.gmra.mrb[14].mxu1 %v235_v25  ;;  %458 = vmatprep.mubr.f32.mxu0 %v3131_v7  ;;  %v2072_v25 = vld [vmem:[%s5622_s3 + $0x1e0] sm:$0xff] }
  0x4f   : > { %715 = vmatprep.mubr.f32.mxu1 %v3131_v7  ;;  %2720 = vmatpush1.bf16.msra.mxu1 %v2719_v26  ;;  %v2073_v26 = vld [vmem:[%s5622_s3 + $0x1e8] sm:$0xff] }
  0x50   : > { %2768 = vmatpush1.bf16.msra.mxu0 %v2767_v27  ;;  %2721 = vmatprep.subr.bf16.mxu1 %v3132_v40  ;;  %v2788_v27 = vpack.c.bf16 %v2073_v26, %v2072_v25 }
  0x51   : > { %459 = vmatmul.mubr.f32.gmra.mrb[16].mxu0 %v236_v32  ;;  %2769 = vmatprep.subr.bf16.mxu0 %v3132_v40 }
  0x52   : > { %716 = vmatmul.mubr.f32.gmra.mrb[16].mxu1 %v236_v32  ;;  %464 = vmatprep.mubr.f32.mxu0 %v3131_v7  ;;  %v2743_v32 = vpack.c.bf16 %v2043_v30, %v2042_v29 }
  0x53   : > { %721 = vmatprep.mubr.f32.mxu1 %v3131_v7  ;;  %2723 = vmatpush1.bf16.msra.mxu1 %v2722_v33  ;;  %v2075_v33 = vld [vmem:[%s5622_s3 + $0x1f8] sm:$0xff] }
  0x54   : > { %2771 = vmatpush1.bf16.msra.mxu0 %v2770_v34  ;;  %2724 = vmatprep.subr.bf16.mxu1 %v3132_v40  ;;  %v2791_v34 = vpack.c.bf16 %v2075_v33, %v2074_v31 }
  0x55   : > { %465 = vmatmul.mubr.f32.gmra.mrb[18].mxu0 %v237_v39  ;;  %2772 = vmatprep.subr.bf16.mxu0 %v3132_v40 }
  0x56   : > { %722 = vmatmul.mubr.f32.gmra.mrb[18].mxu1 %v237_v39  ;;  %470 = vmatprep.mubr.f32.mxu0 %v3131_v7  ;;  %v328_v39 = vsub.s32 0, %v327_v38 }
  0x57   : > { %727 = vmatprep.mubr.f32.mxu1 %v3131_v7  ;;  %2726 = vmatpush1.bf16.msra.mxu1 %v2725_v41  ;;  %v324_v41 = vld [vmem:[%s5621_s2] sm:$0xf] }
  0x58   : > { %2774 = vmatpush1.bf16.msra.mxu0 %v2773_v42  ;;  %2727 = vmatprep.subr.bf16.mxu1 %v3132_v40  ;;  %v336_v42 = vsub.s32 2, %v327_v38  ;;  %v3704_v45 = vrot.slane %v324_v41, %v328_v39 }
  0x59   : > { %471 = vmatmul.mubr.f32.gmra.mrb[20].mxu0 %v238_v47  ;;  %2775 = vmatprep.subr.bf16.mxu0 %v3132_v40 }
  0x5a   : > { %728 = vmatmul.mubr.f32.gmra.mrb[20].mxu1 %v238_v47  ;;  %476 = vmatprep.mubr.f32.mxu0 %v3131_v7  ;;  %v3706_v46 = vrot.slane %v324_v41, %v336_v42  ;;  %v3708_v47 = vrot.slane %v324_v41, %v332_v43 }
  0x5b   : > { %733 = vmatprep.mubr.f32.mxu1 %v3131_v7  ;;  %2729 = vmatpush1.bf16.msra.mxu1 %v2728_v48  ;;  %v3710_v48 = vrot.slane %v324_v41, %v340_v44 }
  0x5c   : > { %2777 = vmatpush1.bf16.msra.mxu0 %v2776_v49  ;;  %2730 = vmatprep.subr.bf16.mxu1 %v3132_v40 }
  0x5d   : > { %477 = vmatmul.mubr.f32.gmra.mrb[22].mxu0 %v239_v54  ;;  %2778 = vmatprep.subr.bf16.mxu0 %v3132_v40 }
  0x5e   : > { %734 = vmatmul.mubr.f32.gmra.mrb[22].mxu1 %v239_v54  ;;  %482 = vmatprep.mubr.f32.mxu0 %v3131_v7 }
  0x5f   : > { %739 = vmatprep.mubr.f32.mxu1 %v3131_v7  ;;  %2732 = vmatpush1.bf16.msra.mxu1 %v2731_v55 }
  0x60   : > { %2780 = vmatpush1.bf16.msra.mxu0 %v2779_v56  ;;  %2733 = vmatprep.subr.bf16.mxu1 %v3132_v40 }
  0x61   : > { %483 = vmatmul.mubr.f32.gmra.mrb[24].mxu0 %v240_v59  ;;  %2781 = vmatprep.subr.bf16.mxu0 %v3132_v40 }
  0x62   : > { %740 = vmatmul.mubr.f32.gmra.mrb[24].mxu1 %v240_v59  ;;  %488 = vmatprep.mubr.f32.mxu0 %v3131_v7 }
  0x63   : > { %745 = vmatprep.mubr.f32.mxu1 %v3131_v7  ;;  %2735 = vmatpush1.bf16.msra.mxu1 %v2734_v60 }
  0x64   : > { %2736 = vmatprep.subr.bf16.mxu1 %v3132_v40  ;;  %2783 = vmatpush1.bf16.msra.mxu0 %v2782_v13 }
  0x65   : > { %489 = vmatmul.mubr.f32.gmra.mrb[26].mxu0 %v241_v61  ;;  %2784 = vmatprep.subr.bf16.mxu0 %v3132_v40 }
  0x66   : > { %746 = vmatmul.mubr.f32.gmra.mrb[26].mxu1 %v241_v61  ;;  %494 = vmatprep.mubr.f32.mxu0 %v3131_v7 }
  0x67   : > { %751 = vmatprep.mubr.f32.mxu1 %v3131_v7  ;;  %2738 = vmatpush1.bf16.msra.mxu1 %v2737_v17 }
  0x68   : > { %2786 = vmatpush1.bf16.msra.mxu0 %v2785_v19  ;;  %2739 = vmatprep.subr.bf16.mxu1 %v3132_v40 }
  0x69   : > { %495 = vmatmul.mubr.f32.gmra.mrb[28].mxu0 %v242_v62  ;;  %2787 = vmatprep.subr.bf16.mxu0 %v3132_v40 }
  0x6a   : > { %752 = vmatmul.mubr.f32.gmra.mrb[28].mxu1 %v242_v62  ;;  %500 = vmatprep.mubr.f32.mxu0 %v3131_v7 }
  0x6b   : > { %757 = vmatprep.mubr.f32.mxu1 %v3131_v7  ;;  %2741 = vmatpush1.bf16.msra.mxu1 %v2740_v23 }
  0x6c   : > { %2742 = vmatprep.subr.bf16.mxu1 %v3132_v40  ;;  %2789 = vmatpush1.bf16.msra.mxu0 %v2788_v27 }
  0x6d   : > { %501 = vmatmul.mubr.f32.gmra.mrb[30].mxu0 %v243_v63  ;;  %2790 = vmatprep.subr.bf16.mxu0 %v3132_v40  ;;  %v259_v40 = vld [vmem:[%s3381_s11 + $0xf8] sm:$0xff] }
  0x6e   : > { %758 = vmatmul.mubr.f32.gmra.mrb[30].mxu1 %v243_v63  ;;  %506 = vmatprep.mubr.f32.mxu0 %v3131_v7 }
  0x6f   : > { %763 = vmatprep.mubr.f32.mxu1 %v3131_v7  ;;  %2744 = vmatpush1.bf16.msra.mxu1 %v2743_v32 }
  0x70   : > { %2792 = vmatpush1.bf16.msra.mxu0 %v2791_v34 }
  0x71   : > { %507 = vmatmul.mubr.f32.gmra.mrb[32].mxu0 %v244_v0 }
  0x72   : > { %764 = vmatmul.mubr.f32.gmra.mrb[32].mxu1 %v244_v0  ;;  %512 = vmatprep.mubr.f32.mxu0 %v3131_v7 }
  0x73   : > { %769 = vmatprep.mubr.f32.mxu1 %v3131_v7 }
  0x75   : > { %513 = vmatmul.mubr.f32.gmra.mrb[34].mxu0 %v245_v1 }
  0x76   : > { %770 = vmatmul.mubr.f32.gmra.mrb[34].mxu1 %v245_v1  ;;  %518 = vmatprep.mubr.f32.mxu0 %v3131_v7 }
  0x77   : > { %775 = vmatprep.mubr.f32.mxu1 %v3131_v7 }
  0x79   : > { %519 = vmatmul.mubr.f32.gmra.mrb[36].mxu0 %v246_v2 }
  0x7a   : > { %776 = vmatmul.mubr.f32.gmra.mrb[36].mxu1 %v246_v2  ;;  %524 = vmatprep.mubr.f32.mxu0 %v3131_v7 }
  0x7b   : > { %781 = vmatprep.mubr.f32.mxu1 %v3131_v7 }
  0x7d   : > { %525 = vmatmul.mubr.f32.gmra.mrb[38].mxu0 %v247_v3 }
  0x7e   : > { %782 = vmatmul.mubr.f32.gmra.mrb[38].mxu1 %v247_v3  ;;  %530 = vmatprep.mubr.f32.mxu0 %v3131_v7 }
  0x7f   : > { %787 = vmatprep.mubr.f32.mxu1 %v3131_v7 }
  0x81   : > { %531 = vmatmul.mubr.f32.gmra.mrb[40].mxu0 %v248_v4 }
  0x82   : > { %788 = vmatmul.mubr.f32.gmra.mrb[40].mxu1 %v248_v4  ;;  %536 = vmatprep.mubr.f32.mxu0 %v3131_v7 }
  0x83   : > { %793 = vmatprep.mubr.f32.mxu1 %v3131_v7 }
  0x85   : > { %537 = vmatmul.mubr.f32.gmra.mrb[42].mxu0 %v249_v5 }
  0x86   : > { %794 = vmatmul.mubr.f32.gmra.mrb[42].mxu1 %v249_v5  ;;  %542 = vmatprep.mubr.f32.mxu0 %v3131_v7 }
  0x87   : > { %799 = vmatprep.mubr.f32.mxu1 %v3131_v7 }
  0x89   : > { %543 = vmatmul.mubr.f32.gmra.mrb[44].mxu0 %v250_v6 }
  0x8a   : > { %800 = vmatmul.mubr.f32.gmra.mrb[44].mxu1 %v250_v6  ;;  %548 = vmatprep.mubr.f32.mxu0 %v3131_v7 }
  0x8b   : > { %805 = vmatprep.mubr.f32.mxu1 %v3131_v7 }
  0x8d   : > { %549 = vmatmul.mubr.f32.gmra.mrb[46].mxu0 %v251_v8 }
  0x8e   : > { %806 = vmatmul.mubr.f32.gmra.mrb[46].mxu1 %v251_v8  ;;  %554 = vmatprep.mubr.f32.mxu0 %v3131_v7 }
  0x8f   : > { %811 = vmatprep.mubr.f32.mxu1 %v3131_v7 }
  0x91   : > { %555 = vmatmul.mubr.f32.gmra.mrb[48].mxu0 %v252_v9 }
  0x92   : > { %812 = vmatmul.mubr.f32.gmra.mrb[48].mxu1 %v252_v9  ;;  %560 = vmatprep.mubr.f32.mxu0 %v3131_v7 }
  0x93   : > { %817 = vmatprep.mubr.f32.mxu1 %v3131_v7 }
  0x95   : > { %561 = vmatmul.mubr.f32.gmra.mrb[50].mxu0 %v253_v10 }
  0x96   : > { %818 = vmatmul.mubr.f32.gmra.mrb[50].mxu1 %v253_v10  ;;  %566 = vmatprep.mubr.f32.mxu0 %v3131_v7 }
  0x97   : > { %823 = vmatprep.mubr.f32.mxu1 %v3131_v7 }
  0x99   : > { %567 = vmatmul.mubr.f32.gmra.mrb[52].mxu0 %v254_v20 }
  0x9a   : > { %824 = vmatmul.mubr.f32.gmra.mrb[52].mxu1 %v254_v20  ;;  %572 = vmatprep.mubr.f32.mxu0 %v3131_v7 }
  0x9b   : > { %829 = vmatprep.mubr.f32.mxu1 %v3131_v7 }
  0x9d   : > { %573 = vmatmul.mubr.f32.gmra.mrb[54].mxu0 %v255_v24 }
  0x9e   : > { %830 = vmatmul.mubr.f32.gmra.mrb[54].mxu1 %v255_v24  ;;  %578 = vmatprep.mubr.f32.mxu0 %v3131_v7 }
  0x9f   : > { %835 = vmatprep.mubr.f32.mxu1 %v3131_v7 }
  0xa1   : > { %579 = vmatmul.mubr.f32.gmra.mrb[56].mxu0 %v256_v28 }
  0xa2   : > { %836 = vmatmul.mubr.f32.gmra.mrb[56].mxu1 %v256_v28  ;;  %584 = vmatprep.mubr.f32.mxu0 %v3131_v7 }
  0xa3   : > { %841 = vmatprep.mubr.f32.mxu1 %v3131_v7 }
  0xa5   : > { %585 = vmatmul.mubr.f32.gmra.mrb[58].mxu0 %v257_v35 }
  0xa6   : > { %842 = vmatmul.mubr.f32.gmra.mrb[58].mxu1 %v257_v35  ;;  %590 = vmatprep.mubr.f32.mxu0 %v3131_v7 }
  0xa7   : > { %847 = vmatprep.mubr.f32.mxu1 %v3131_v7 }
  0xa9   : > { %591 = vmatmul.mubr.f32.gmra.mrb[60].mxu0 %v258_v36 }
  0xaa   : > { %848 = vmatmul.mubr.f32.gmra.mrb[60].mxu1 %v258_v36  ;;  %596 = vmatprep.mubr.f32.mxu0 %v3131_v7 }
  0xab   : > { %853 = vmatprep.mubr.f32.mxu1 %v3131_v7 }
  0xad   : > { %597 = vmatmul.mubr.f32.gmra.mrb[62].mxu0 %v259_v40 }
  0xae   : > { %854 = vmatmul.mubr.f32.gmra.mrb[62].mxu1 %v259_v40 }
 0x104   : > { %v412_v7 = vpop.f32.mrb[0].mxu0 }
 0x105   : > { %v413_v49 = vadd.f32 %v412_v7, %v3704_v45  ;;  %v669_v50 = vpop.f32.mrb[0].mxu1  ;;  %v414_v51 = vpop.f32.mrb[1].mxu0 }
 0x106   : > { %v670_v52 = vadd.f32 %v669_v50, %v3706_v46  ;;  %v415_v53 = vadd.f32 %v414_v51, %v3708_v47  ;;  %v671_v54 = vpop.f32.mrb[1].mxu1 }
 0x107   : > { %v988_v55 = vmul.f32 0.044715, %v413_v49  ;;  %v3716_v56 = vadd.f32 %v671_v54, %v3710_v48  ;;  %v3728_v8 = vmul.f32 0.5, %v413_v49 }
 0x108   : > { %v990_v57 = vmul.f32 0.044715, %v670_v52  ;;  %v989_v58 = vmul.f32 0.044715, %v415_v53  ;;  %v418_v59 = vpop.f32.mrb[2].mxu0  ;;  %v3738_v19 = vmul.f32 0.5, %v670_v52 }
 0x109   : > { %v1116_v60 = vmul.f32 %v988_v55, %v413_v49  ;;  %v3719_v61 = vadd.f32 %v418_v59, %v3704_v45  ;;  %v675_v62 = vpop.f32.mrb[2].mxu1  ;;  %v420_v63 = vpop.f32.mrb[3].mxu0  ;;  %v991_v6 = vmul.f32 0.044715, %v3716_v56  ;;  %v3748_v27 = vmul.f32 0.5, %v415_v53 }
 0x10a   : > { %v1118_v0 = vmul.f32 %v990_v57, %v670_v52  ;;  %v1117_v1 = vmul.f32 %v989_v58, %v415_v53  ;;  %v3722_v2 = vadd.f32 %v675_v62, %v3706_v46  ;;  %v3725_v3 = vadd.f32 %v420_v63, %v3708_v47  ;;  %v677_v4 = vpop.f32.mrb[3].mxu1 }
 0x10b   : > { %v1244_v5 = vmul.f32 %v1116_v60, %v413_v49  ;;  %v3731_v10 = vadd.f32 %v677_v4, %v3710_v48  ;;  %v992_v14 = vmul.f32 0.044715, %v3719_v61  ;;  %v1119_v25 = vmul.f32 %v991_v6, %v3716_v56 }
 0x10c   : > { %v1246_v9 = vmul.f32 %v1118_v0, %v670_v52  ;;  %v424_v11 = vpop.f32.mrb[4].mxu0  ;;  %v1245_v12 = vmul.f32 %v1117_v1, %v415_v53  ;;  %v994_v15 = vmul.f32 0.044715, %v3722_v2  ;;  %v993_v21 = vmul.f32 0.044715, %v3725_v3 }
 0x10d   : > { %v1372_v13 = vadd.f32 %v1244_v5, %v413_v49  ;;  %v3736_v16 = vadd.f32 %v424_v11, %v3704_v45  ;;  %v681_v17 = vpop.f32.mrb[4].mxu1  ;;  %v426_v18 = vpop.f32.mrb[5].mxu0  ;;  %v995_v28 = vmul.f32 0.044715, %v3731_v10  ;;  %v3756_v34 = vmul.f32 %v992_v14, %v3719_v61 }
 0x10e   : > { %v1374_v20 = vadd.f32 %v1246_v9, %v670_v52  ;;  %v3742_v22 = vadd.f32 %v681_v17, %v3706_v46  ;;  %v683_v23 = vpop.f32.mrb[5].mxu1  ;;  %v3746_v26 = vadd.f32 %v426_v18, %v3708_v47  ;;  %v1373_v32 = vadd.f32 %v1245_v12, %v415_v53 }
 0x10f   : > { %v1500_v24 = vmul.f32 0.7978846, %v1372_v13  ;;  %v996_v29 = vmul.f32 0.044715, %v3736_v16  ;;  %v3753_v30 = vadd.f32 %v683_v23, %v3710_v48  ;;  %v3759_v35 = vmul.f32 %v994_v15, %v3722_v2 }
 0x110   : > { %v430_v31 = vpop.f32.mrb[6].mxu0  ;;  %v1502_v33 = vmul.f32 0.7978846, %v1374_v20  ;;  %v1121_v38 = vmul.f32 %v993_v21, %v3725_v3  ;;  %v998_v39 = vmul.f32 0.044715, %v3742_v22  ;;  %v3778_v50 = vmul.f32 %v995_v28, %v3731_v10 }
 0x111   : > { %v3762_v36 = vadd.f32 %v430_v31, %v3704_v45  ;;  %v687_v40 = vpop.f32.mrb[6].mxu1  ;;  %v432_v37 = vpop.f32.mrb[7].mxu0  ;;  %2867 = vtanh.f32 %v1500_v24  ;;  %v997_v43 = vmul.f32 0.044715, %v3746_v26  ;;  %v999_v44 = vmul.f32 0.044715, %v3753_v30 }
 0x112   : > { %v3767_v41 = vadd.f32 %v687_v40, %v3706_v46  ;;  %v689_v42 = vpop.f32.mrb[7].mxu1  ;;  %v3772_v7 = vadd.f32 %v432_v37, %v3708_v47  ;;  %v3781_v51 = vmul.f32 %v996_v29, %v3736_v16  ;;  %v1501_v54 = vmul.f32 0.7978846, %v1373_v32 }
 0x113   : > { %v3775_v49 = vadd.f32 %v689_v42, %v3710_v48  ;;  %v1000_v52 = vmul.f32 0.044715, %v3762_v36  ;;  %2869 = vtanh.f32 %v1502_v33  ;;  %v3790_v62 = vmul.f32 %v998_v39, %v3742_v22 }
 0x114   : > { %v436_v53 = vpop.f32.mrb[8].mxu0  ;;  %v1002_v55 = vmul.f32 0.044715, %v3767_v41  ;;  %v1001_v57 = vmul.f32 0.044715, %v3772_v7  ;;  %2871 = vtanh.f32 %v1501_v54  ;;  %v3799_v4 = vmul.f32 %v997_v43, %v3746_v26 }
 0x115   : > { %v3787_v58 = vadd.f32 %v436_v53, %v3704_v45  ;;  %v693_v59 = vpop.f32.mrb[8].mxu1  ;;  %v438_v60 = vpop.f32.mrb[9].mxu0  ;;  %v3802_v5 = vmul.f32 %v999_v44, %v3753_v30  ;;  %v1003_v6 = vmul.f32 0.044715, %v3775_v49  ;;  %v3809_v11 = vmul.f32 %v1000_v52, %v3762_v36 }
 0x116   : > { %v3793_v63 = vadd.f32 %v693_v59, %v3706_v46  ;;  %v3796_v0 = vadd.f32 %v438_v60, %v3708_v47  ;;  %v695_v1 = vpop.f32.mrb[9].mxu1  ;;  %v3813_v14 = vmul.f32 0.5, %v3716_v56  ;;  %v1247_v15 = vmul.f32 %v1119_v25, %v3716_v56 }
 0x117   : > { %v3806_v9 = vadd.f32 %v695_v1, %v3710_v48  ;;  %v1004_v12 = vmul.f32 0.044715, %v3787_v58  ;;  %v3817_v17 = vmul.f32 %v1002_v55, %v3767_v41  ;;  %v3820_v18 = vmul.f32 %v1001_v57, %v3772_v7 }
 0x118   : > { %5731 = vst [vmem:[#allocation2_spill] sm:$0xff] %v3793_v63  ;;  %v442_v13 = vpop.f32.mrb[10].mxu0  ;;  %v1006_v20 = vmul.f32 0.044715, %v3793_v63  ;;  %v1005_v28 = vmul.f32 0.044715, %v3796_v0  ;;  %v3835_v33 = vmul.f32 %v1003_v6, %v3775_v49  ;;  %v1375_v37 = vadd.f32 %v1247_v15, %v3716_v56 }
 0x119   : > { %v3824_v21 = vadd.f32 %v442_v13, %v3704_v45  ;;  %v699_v23 = vpop.f32.mrb[10].mxu1  ;;  %v444_v24 = vpop.f32.mrb[11].mxu0  ;;  %v1007_v29 = vmul.f32 0.044715, %v3806_v9  ;;  %v3842_v39 = vmul.f32 0.5, %v3725_v3  ;;  %v3845_v43 = vmul.f32 %v1004_v12, %v3787_v58 }
 0x11a   : > { %v3829_v31 = vadd.f32 %v699_v23, %v3706_v46  ;;  %v3832_v25 = vadd.f32 %v444_v24, %v3708_v47  ;;  %v701_v32 = vpop.f32.mrb[11].mxu1  ;;  %v1249_v54 = vmul.f32 %v1121_v38, %v3725_v3  ;;  %v3851_v55 = vmul.f32 %v1006_v20, %v3793_v63 }
 0x11b   : > { %5732 = vst [vmem:[#allocation3_spill] sm:$0xff] %v3824_v21  ;;  %v3838_v40 = vadd.f32 %v701_v32, %v3710_v48  ;;  %v2868_v42 = vpop.eup %2867  ;;  %5735 = vst [vmem:[#allocation6_spill] sm:$0xff] %v3845_v43  ;;  %v1008_v44 = vmul.f32 0.044715, %v3824_v21  ;;  %v1503_v1 = vmul.f32 0.7978846, %v1375_v37  ;;  %v3858_v6 = vmul.f32 %v1005_v28, %v3796_v0 }
 0x11c   : > { %5733 = vst [vmem:[#allocation4_spill] sm:$0xff] %v3829_v31  ;;  %5734 = vst [vmem:[#allocation5_spill] sm:$0xff] %v3832_v25  ;;  %v1010_v52 = vmul.f32 0.044715, %v3829_v31  ;;  %v448_v53 = vpop.f32.mrb[12].mxu0  ;;  %v3861_v12 = vmul.f32 %v1007_v29, %v3806_v9  ;;  %v1756_v32 = vadd.f32 1.0, %v2868_v42 }
 0x11d   : > { %5736 = vst [vmem:[#allocation7_spill] sm:$0xff] %v3851_v55  ;;  %v1009_v57 = vmul.f32 0.044715, %v3832_v25  ;;  %v3855_v56 = vadd.f32 %v448_v53, %v3704_v45  ;;  %v705_v59 = vpop.f32.mrb[12].mxu1  ;;  %v450_v60 = vpop.f32.mrb[13].mxu0  ;;  %2873 = vtanh.f32 %v1503_v1  ;;  %v3874_v37 = vmul.f32 %v1008_v44, %v3824_v21 }
 0x11e   : > { %v3864_v13 = vadd.f32 %v705_v59, %v3706_v46  ;;  %v3867_v38 = vadd.f32 %v450_v60, %v3708_v47  ;;  %v707_v15 = vpop.f32.mrb[13].mxu1  ;;  %v2870_v20 = vpop.eup %2869  ;;  %v1011_v23 = vmul.f32 0.044715, %v3838_v40  ;;  %v3877_v29 = vmul.f32 %v1010_v52, %v3829_v31 }
 0x11f   : > { %5737 = vst [vmem:[#allocation8_spill] sm:$0xff] %v3855_v56  ;;  %v3871_v24 = vadd.f32 %v707_v15, %v3710_v48  ;;  %v2872_v28 = vpop.eup %2871  ;;  %5740 = vst [vmem:[#allocation11_spill] sm:$0xff] %v3874_v37  ;;  %v1012_v53 = vmul.f32 0.044715, %v3855_v56  ;;  %v1377_v60 = vadd.f32 %v1249_v54, %v3725_v3  ;;  %v3882_v55 = vmul.f32 %v1009_v57, %v3832_v25 }
 0x120   : > { %5738 = vst [vmem:[#allocation9_spill] sm:$0xff] %v3864_v13  ;;  %5741 = vst [vmem:[#allocation12_spill] sm:$0xff] %v3877_v29  ;;  %v454_v59 = vpop.f32.mrb[14].mxu0  ;;  %v1014_v15 = vmul.f32 0.044715, %v3864_v13  ;;  %v1757_v44 = vadd.f32 1.0, %v2872_v28  ;;  %v3897_v57 = vmul.f32 %v1011_v23, %v3838_v40  ;;  %v1884_v31 = vmul.f32 %v1756_v32, %v3728_v8 }
 0x121   : > { %5739 = vst [vmem:[#allocation10_spill] sm:$0xff] %v3871_v24  ;;  %5742 = vst [vmem:[#allocation13_spill] sm:$0xff] %v3882_v55  ;;  %v3886_v1 = vadd.f32 %v454_v59, %v3704_v45  ;;  %v711_v42 = vpop.f32.mrb[14].mxu1  ;;  %v456_v63 = vpop.f32.mrb[15].mxu0  ;;  %v1013_v37 = vmul.f32 0.044715, %v3867_v38  ;;  %v3902_v28 = vmul.f32 %v1012_v53, %v3855_v56 }
 0x122   : > { %v1015_v52 = vmul.f32 0.044715, %v3871_v24  ;;  %v3891_v29 = vadd.f32 %v711_v42, %v3706_v46  ;;  %v3894_v3 = vadd.f32 %v456_v63, %v3708_v47  ;;  %v713_v54 = vpop.f32.mrb[15].mxu1  ;;  %v1885_v59 = vmul.f32 %v1757_v44, %v3748_v27 }
 0x123   : > { %5743 = vst [vmem:[#allocation14_spill] sm:$0xff] %v3886_v1  ;;  %v1758_v21 = vadd.f32 1.0, %v2870_v20  ;;  %5746 = vst [vmem:[#allocation17_spill] sm:$0xff] %v3902_v28  ;;  %v1016_v55 = vmul.f32 0.044715, %v3886_v1  ;;  %v3907_v25 = vadd.f32 %v713_v54, %v3710_v48  ;;  %v3910_v43 = vmul.f32 %v1014_v15, %v3864_v13 }
 0x124   : > { %5744 = vst [vmem:[#allocation15_spill] sm:$0xff] %v3891_v29  ;;  %5745 = vst [vmem:[#allocation16_spill] sm:$0xff] %v3894_v3  ;;  %v1018_v42 = vmul.f32 0.044715, %v3891_v29  ;;  %v460_v63 = vpop.f32.mrb[16].mxu0  ;;  %2147 = vmatprep.mubr.f32.mxu1 %v1885_v59  ;;  %v3917_v53 = vmul.f32 %v1013_v37, %v3867_v38  ;;  %v3920_v44 = vmul.f32 %v1015_v52, %v3871_v24  ;;  %v3933_v37 = vmul.f32 0.5, %v3731_v10 }
 0x125   : > { %5747 = vst [vmem:[#allocation18_spill] sm:$0xff] %v3910_v43  ;;  %v1017_v23 = vmul.f32 0.044715, %v3894_v3  ;;  %v3914_v8 = vadd.f32 %v460_v63, %v3704_v45  ;;  %v717_v27 = vpop.f32.mrb[16].mxu1  ;;  %v462_v20 = vpop.f32.mrb[17].mxu0  ;;  %2148 = vmatmul.mubr.f32.vlgmr.msra.gmra.mrb[64].mxu1 %v1884_v31  ;;  %v1886_v63 = vmul.f32 %v1758_v21, %v3738_v19 }
 0x126   : > { %v1505_v32 = vmul.f32 0.7978846, %v1377_v60  ;;  %5749 = vst [vmem:[#allocation20_spill] sm:$0xff] %v3920_v44  ;;  %v3923_v54 = vadd.f32 %v717_v27, %v3706_v46  ;;  %v3926_v15 = vadd.f32 %v462_v20, %v3708_v47  ;;  %v719_v59 = vpop.f32.mrb[17].mxu1  ;;  %v3936_v60 = vmul.f32 %v1016_v55, %v3886_v1 }
 0x127   : > { %5748 = vst [vmem:[#allocation19_spill] sm:$0xff] %v3914_v8  ;;  %v3930_v43 = vadd.f32 %v719_v59, %v3710_v48  ;;  %v3939_v31 = vmul.f32 %v1018_v42, %v3891_v29  ;;  %v1019_v52 = vmul.f32 0.044715, %v3907_v25  ;;  %v1251_v27 = vmul.f32 %v3778_v50, %v3731_v10  ;;  %v2874_v19 = vpop.eup %2873 }
 0x128   : > { %5750 = vst [vmem:[#allocation21_spill] sm:$0xff] %v3923_v54  ;;  %2875 = vtanh.f32 %v1505_v32  ;;  %5751 = vst [vmem:[#allocation22_spill] sm:$0xff] %v3936_v60  ;;  %v466_v20 = vpop.f32.mrb[18].mxu0  ;;  %v3945_v21 = vmul.f32 %v1017_v23, %v3894_v3  ;;  %v1020_v32 = vmul.f32 0.044715, %v3914_v8  ;;  %v1248_v55 = vmul.f32 %v3756_v34, %v3719_v61 }
 0x129   : > { %5752 = vst [vmem:[#allocation23_spill] sm:$0xff] %v3939_v31  ;;  %v1022_v59 = vmul.f32 0.044715, %v3923_v54  ;;  %v723_v60 = vpop.f32.mrb[18].mxu1  ;;  %v468_v42 = vpop.f32.mrb[19].mxu0  ;;  %v1759_v31 = vadd.f32 1.0, %v2874_v19  ;;  %v1379_v1 = vadd.f32 %v1251_v27, %v3731_v10  ;;  %v1250_v3 = vmul.f32 %v3759_v35, %v3722_v2 }
 0x12a   : > { %5753 = vst [vmem:[#allocation24_spill] sm:$0xff] %v3945_v21  ;;  %v1021_v29 = vmul.f32 0.044715, %v3926_v15  ;;  %v3954_v50 = vmul.f32 0.5, %v3719_v61  ;;  %v725_v13 = vpop.f32.mrb[19].mxu1  ;;  %v1376_v21 = vadd.f32 %v1248_v55, %v3719_v61  ;;  %v3961_v34 = vadd.f32 %v466_v20, %v3704_v45 }
 0x12b   : > { %v1023_v23 = vmul.f32 0.044715, %v3930_v43  ;;  %v1887_v19 = vmul.f32 %v1759_v31, %v3813_v14  ;;  %v1507_v28 = vmul.f32 0.7978846, %v1379_v1  ;;  %v3965_v56 = vadd.f32 %v723_v60, %v3706_v46 }
 0x12c   : > { %5754 = vst [vmem:[#allocation25_spill] sm:$0xff] %v3961_v34  ;;  %v3968_v10 = vadd.f32 %v468_v42, %v3708_v47  ;;  %v472_v27 = vpop.f32.mrb[20].mxu0  ;;  %v3971_v44 = vmul.f32 %v1019_v52, %v3907_v25  ;;  %v1504_v61 = vmul.f32 0.7978846, %v1376_v21  ;;  %v1378_v55 = vadd.f32 %v1250_v3, %v3722_v2 }
 0x12d   : > { %5755 = vst [vmem:[#allocation26_spill] sm:$0xff] %v3965_v56  ;;  %v1024_v35 = vmul.f32 0.044715, %v3961_v34  ;;  %v729_v20 = vpop.f32.mrb[20].mxu1  ;;  %v474_v24 = vpop.f32.mrb[21].mxu0  ;;  %2372 = vmatprep.mubr.f32.mxu0 %v1887_v19  ;;  %v3976_v14 = vmul.f32 %v1020_v32, %v3914_v8  ;;  %2877 = vtanh.f32 %v1507_v28  ;;  %v3979_v1 = vmul.f32 0.5, %v3722_v2 }
 0x12e   : > { %v3982_v60 = vadd.f32 %v725_v13, %v3710_v48  ;;  %v731_v31 = vpop.f32.mrb[21].mxu1  ;;  %2373 = vmatmul.mubr.f32.vlgmr.msra.gmra.mrb[64].mxu0 %v1886_v63  ;;  %v3985_v52 = vmul.f32 %v1022_v59, %v3923_v54  ;;  %v3988_v3 = vmul.f32 %v1021_v29, %v3926_v15  ;;  %2879 = vtanh.f32 %v1504_v61 }
 0x12f   : > { %5756 = vst [vmem:[#allocation27_spill] sm:$0xff] %v3976_v14  ;;  %v1506_v21 = vmul.f32 0.7978846, %v1378_v55  ;;  %v3991_v32 = vmul.f32 %v1023_v23, %v3930_v43  ;;  %v1026_v28 = vmul.f32 0.044715, %v3965_v56  ;;  %v1253_v13 = vmul.f32 %v3799_v4, %v3746_v26 }
 0x130   : > { %5757 = vst [vmem:[#allocation28_spill] sm:$0xff] %v3982_v60  ;;  %5758 = vst [vmem:[#allocation29_spill] sm:$0xff] %v3985_v52  ;;  %v1025_v2 = vmul.f32 0.044715, %v3968_v10  ;;  %v3997_v42 = vpop.f32.mrb[22].mxu0  ;;  %v4000_v59 = vmul.f32 %v1024_v35, %v3961_v34  ;;  %v4003_v29 = vmul.f32 0.5, %v3746_v26  ;;  %v1255_v23 = vmul.f32 %v3802_v5, %v3753_v30 }
 0x131   : > { %2881 = vtanh.f32 %v1506_v21  ;;  %v4007_v19 = vpop.f32.mrb[22].mxu1  ;;  %v4009_v61 = vpop.f32.mrb[23].mxu0  ;;  %v1027_v4 = vmul.f32 0.044715, %v3982_v60  ;;  %v1381_v52 = vadd.f32 %v1253_v13, %v3746_v26  ;;  %v1252_v21 = vmul.f32 %v3781_v51, %v3736_v16 }
 0x132   : > { %v2876_v63 = vpop.eup %2875  ;;  %5759 = vst [vmem:[#allocation30_spill] sm:$0xff] %v4000_v59  ;;  %v4015_v35 = vpop.f32.mrb[23].mxu1  ;;  %v1383_v59 = vadd.f32 %v1255_v23, %v3753_v30  ;;  %v1254_v34 = vmul.f32 %v3790_v62, %v3742_v22  ;;  %v4021_v5 = vadd.f32 %v472_v27, %v3704_v45  ;;  %v4024_v54 = vadd.f32 %v729_v20, %v3706_v46 }
 0x133   : > { %v1761_v55 = vadd.f32 1.0, %v2876_v63  ;;  %v1509_v14 = vmul.f32 0.7978846, %v1381_v52  ;;  %v1380_v26 = vadd.f32 %v1252_v21, %v3736_v16  ;;  %v4029_v51 = vadd.f32 %v474_v24, %v3708_v47 }
 0x134   : > { %5760 = vst [vmem:[#allocation31_spill] sm:$0xff] %v4021_v5  ;;  %5761 = vst [vmem:[#allocation32_spill] sm:$0xff] %v4024_v54  ;;  %v4031_v13 = vpop.f32.mrb[24].mxu0  ;;  %v4034_v23 = vmul.f32 %v1026_v28, %v3965_v56  ;;  %v1511_v62 = vmul.f32 0.7978846, %v1383_v59  ;;  %v1382_v27 = vadd.f32 %v1254_v34, %v3742_v22  ;;  %v4039_v20 = vmul.f32 %v1025_v2, %v3968_v10 }
 0x135   : > { %v1889_v63 = vmul.f32 %v1761_v55, %v3842_v39  ;;  %v1028_v8 = vmul.f32 0.044715, %v4021_v5  ;;  %2883 = vtanh.f32 %v1509_v14  ;;  %v1508_v39 = vmul.f32 0.7978846, %v1380_v26  ;;  %v4042_v24 = vpop.f32.mrb[24].mxu1  ;;  %v4044_v55 = vpop.f32.mrb[25].mxu0 }
 0x136   : > { %5762 = vst [vmem:[#allocation33_spill] sm:$0xff] %v4034_v23  ;;  %5763 = vst [vmem:[#allocation34_spill] sm:$0xff] %v4039_v20  ;;  %v1030_v52 = vmul.f32 0.044715, %v4024_v54  ;;  %v4047_v28 = vmul.f32 0.5, %v3753_v30  ;;  %2885 = vtanh.f32 %v1511_v62  ;;  %v4050_v21 = vpop.f32.mrb[25].mxu1  ;;  %v4053_v2 = vmul.f32 %v1027_v4, %v3982_v60 }
 0x137   : > { %2152 = vmatprep.mubr.f32.mxu1 %v1889_v63  ;;  %v1510_v59 = vmul.f32 0.7978846, %v1382_v27  ;;  %v1029_v34 = vmul.f32 0.044715, %v4029_v51  ;;  %v2878_v63 = vpop.eup %2877  ;;  %v4056_v14 = vmul.f32 0.5, %v3736_v16  ;;  %2887 = vtanh.f32 %v1508_v39 }
 0x138   : > { %5764 = vst [vmem:[#allocation35_spill] sm:$0xff] %v4053_v2  ;;  %v4059_v26 = vmul.f32 0.5, %v3742_v22  ;;  %v4061_v23 = vpop.f32.mrb[26].mxu0  ;;  %v2880_v30 = vpop.eup %2879  ;;  %v1763_v62 = vadd.f32 1.0, %v2878_v63  ;;  %v4064_v27 = vadd.f32 %v731_v31, %v3710_v48  ;;  %v1257_v56 = vmul.f32 %v3820_v18, %v3772_v7 }
 0x139   : > { %2889 = vtanh.f32 %v1510_v59  ;;  %v4068_v4 = vpop.f32.mrb[26].mxu1  ;;  %v4070_v2 = vpop.f32.mrb[27].mxu0  ;;  %v1760_v16 = vadd.f32 1.0, %v2880_v30  ;;  %v4073_v39 = vmul.f32 %v1028_v8, %v4021_v5  ;;  %v4076_v22 = vmul.f32 %v1030_v52, %v4024_v54 }
 0x13a   : > { %5765 = vst [vmem:[#allocation36_spill] sm:$0xff] %v4064_v27  ;;  %v1259_v59 = vmul.f32 %v3835_v33, %v3775_v49  ;;  %v4080_v63 = vpop.f32.mrb[27].mxu1  ;;  %v1891_v60 = vmul.f32 %v1763_v62, %v3933_v37  ;;  %v4084_v18 = vmul.f32 %v1029_v34, %v4029_v51  ;;  %v1385_v20 = vadd.f32 %v1257_v56, %v3772_v7 }
 0x13b   : > { %5766 = vst [vmem:[#allocation37_spill] sm:$0xff] %v4073_v39  ;;  %5767 = vst [vmem:[#allocation38_spill] sm:$0xff] %v4076_v22  ;;  %v2882_v31 = vpop.eup %2881  ;;  %v1256_v8 = vmul.f32 %v3809_v11, %v3762_v36  ;;  %v1888_v30 = vmul.f32 %v1760_v16, %v3954_v50  ;;  %v1258_v33 = vmul.f32 %v3817_v17, %v3767_v41  ;;  %v1031_v37 = vmul.f32 0.044715, %v4064_v27 }
 0x13c   : > { %5768 = vst [vmem:[#allocation39_spill] sm:$0xff] %v4084_v18  ;;  %v1762_v52 = vadd.f32 1.0, %v2882_v31  ;;  %v1387_v22 = vadd.f32 %v1259_v59, %v3775_v49  ;;  %v4093_v54 = vpop.f32.mrb[28].mxu0  ;;  %2377 = vmatprep.mubr.f32.mxu0 %v1891_v60  ;;  %v1513_v34 = vmul.f32 0.7978846, %v1385_v20  ;;  %v4099_v56 = vadd.f32 %v3997_v42, %v3704_v45 }
 0x13d   : > { %v1384_v62 = vadd.f32 %v1256_v8, %v3762_v36  ;;  %v4101_v11 = vpop.f32.mrb[28].mxu1  ;;  %v4103_v50 = vpop.f32.mrb[29].mxu0  ;;  %2153 = vmatmul.mubr.f32.gmra.mrb[66].mxu1 %v1888_v30  ;;  %v1386_v59 = vadd.f32 %v1258_v33, %v3767_v41  ;;  %v4109_v60 = vadd.f32 %v4007_v19, %v3706_v46  ;;  %v4114_v31 = vmul.f32 0.5, %v3772_v7 }
 0x13e   : > { %5769 = vst [vmem:[#allocation40_spill] sm:$0xff] %v4099_v56  ;;  %v1890_v16 = vmul.f32 %v1762_v52, %v3979_v1  ;;  %v1515_v17 = vmul.f32 0.7978846, %v1387_v22  ;;  %v4111_v20 = vpop.f32.mrb[29].mxu1  ;;  %2891 = vtanh.f32 %v1513_v34  ;;  %v4118_v8 = vadd.f32 %v4009_v61, %v3708_v47 }
 0x13f   : > { %5770 = vst [vmem:[#allocation41_spill] sm:$0xff] %v4109_v60  ;;  %v1512_v42 = vmul.f32 0.7978846, %v1384_v62  ;;  %v2884_v30 = vpop.eup %2883  ;;  %v4121_v1 = vmul.f32 0.5, %v3775_v49  ;;  %v1514_v22 = vmul.f32 0.7978846, %v1386_v59  ;;  %v4127_v34 = vmul.f32 %v1031_v37, %v4064_v27 }
 0x140   : > { %5771 = vst [vmem:[#allocation42_spill] sm:$0xff] %v4118_v8  ;;  %2378 = vmatmul.mubr.f32.gmra.mrb[66].mxu0 %v1890_v16  ;;  %2893 = vtanh.f32 %v1515_v17  ;;  %v1032_v19 = vmul.f32 0.044715, %v4099_v56  ;;  %v4124_v52 = vpop.f32.mrb[30].mxu0  ;;  %v2886_v33 = vpop.eup %2885  ;;  %v1765_v7 = vadd.f32 1.0, %v2884_v30  ;;  %v4131_v61 = vadd.f32 %v4015_v35, %v3710_v48 }
 0x141   : > { %5772 = vst [vmem:[#allocation43_spill] sm:$0xff] %v4127_v34  ;;  %2895 = vtanh.f32 %v1512_v42  ;;  %v4133_v62 = vpop.f32.mrb[30].mxu1  ;;  %v4135_v49 = vpop.f32.mrb[31].mxu0  ;;  %v1767_v17 = vadd.f32 1.0, %v2886_v33  ;;  %v4138_v59 = vmul.f32 0.5, %v3762_v36  ;;  %v1261_v34 = vmul.f32 %v3858_v6, %v3796_v0 }
 0x142   : > { %5773 = vst [vmem:[#allocation44_spill] sm:$0xff] %v4131_v61  ;;  %v2888_v16 = vpop.eup %2887  ;;  %2897 = vtanh.f32 %v1514_v22  ;;  %v1034_v30 = vmul.f32 0.044715, %v4109_v60  ;;  %v4141_v39 = vpop.f32.mrb[31].mxu1  ;;  %v1893_v42 = vmul.f32 %v1765_v7, %v4003_v29  ;;  %v1033_v35 = vmul.f32 0.044715, %v4118_v8 }
 0x143   : > { %v2890_v37 = vpop.eup %2889  ;;  %v1764_v5 = vadd.f32 1.0, %v2888_v16  ;;  %v1895_v27 = vmul.f32 %v1767_v17, %v4047_v28  ;;  %v4149_v36 = vmul.f32 0.5, %v3767_v41  ;;  %v4152_v22 = vmul.f32 %v1032_v19, %v4099_v56 }
 0x144   : > { %v1766_v33 = vadd.f32 1.0, %v2890_v37  ;;  %v4154_v18 = vpop.f32.mrb[32].mxu0  ;;  %2157 = vmatprep.mubr.f32.mxu1 %v1893_v42  ;;  %v1035_v7 = vmul.f32 0.044715, %v4131_v61  ;;  %v1389_v16 = vadd.f32 %v1261_v34, %v3796_v0  ;;  %v1263_v6 = vmul.f32 %v3861_v12, %v3806_v9  ;;  %v5776_v37 = vld [vmem:[#allocation6_spill] sm:$0xff]  ;;  %v5778_v42 = vld [vmem:[#allocation7_spill] sm:$0xff] }
 0x145   : > { %5774 = vst [vmem:[#allocation45_spill] sm:$0xff] %v4152_v22  ;;  %v1892_v29 = vmul.f32 %v1764_v5, %v4056_v14  ;;  %v4161_v28 = vpop.f32.mrb[32].mxu1  ;;  %v4163_v17 = vpop.f32.mrb[33].mxu0  ;;  %2382 = vmatprep.mubr.f32.mxu0 %v1895_v27  ;;  %v4167_v19 = vmul.f32 %v1034_v30, %v4109_v60  ;;  %v1260_v5 = vmul.f32 %v5776_v37, %v3787_v58  ;;  %v5777_v14 = vld [vmem:[#allocation2_spill] sm:$0xff]  ;;  %v4184_v30 = vmul.f32 0.5, %v3796_v0 }
 0x146   : > { %v1894_v41 = vmul.f32 %v1766_v33, %v4059_v26  ;;  %v1262_v22 = vmul.f32 %v5778_v42, %v5777_v14  ;;  %v4173_v34 = vpop.f32.mrb[33].mxu1  ;;  %v4176_v12 = vmul.f32 %v1033_v35, %v4118_v8  ;;  %v1517_v56 = vmul.f32 0.7978846, %v1389_v16 }
 0x147   : > { %5775 = vst [vmem:[#allocation46_spill] sm:$0xff] %v4167_v19  ;;  %2158 = vmatmul.mubr.f32.gmra.mrb[68].mxu1 %v1892_v29  ;;  %v1391_v27 = vadd.f32 %v1263_v6, %v3806_v9  ;;  %v4181_v26 = vadd.f32 %v4031_v13, %v3704_v45  ;;  %v1388_v33 = vadd.f32 %v1260_v5, %v3787_v58 }
 0x148   : > { %5779 = vst [vmem:[#allocation6_spill] sm:$0xff] %v4176_v12  ;;  %2383 = vmatmul.mubr.f32.gmra.mrb[68].mxu0 %v1894_v41  ;;  %v1390_v37 = vadd.f32 %v1262_v22, %v5777_v14  ;;  %v4190_v29 = vadd.f32 %v4042_v24, %v3706_v46  ;;  %v4192_v35 = vpop.f32.mrb[34].mxu0  ;;  %v2892_v16 = vpop.eup %2891  ;;  %v4195_v6 = vmul.f32 %v1035_v7, %v4131_v61  ;;  %2899 = vtanh.f32 %v1517_v56 }
 0x149   : > { %5780 = vst [vmem:[#allocation2_spill] sm:$0xff] %v4181_v26  ;;  %v1519_v13 = vmul.f32 0.7978846, %v1391_v27  ;;  %v4199_v0 = vadd.f32 %v4044_v55, %v3708_v47  ;;  %v1769_v5 = vadd.f32 1.0, %v2892_v16  ;;  %v4202_v22 = vmul.f32 0.5, %v3806_v9  ;;  %v4209_v7 = vpop.f32.mrb[34].mxu1 }
 0x14a   : > { %5781 = vst [vmem:[#allocation7_spill] sm:$0xff] %v4190_v29  ;;  %5782 = vst [vmem:[#allocation47_spill] sm:$0xff] %v4195_v6  ;;  %v2894_v41 = vpop.eup %2893  ;;  %v1516_v42 = vmul.f32 0.7978846, %v1388_v33  ;;  %v1518_v24 = vmul.f32 0.7978846, %v1390_v37  ;;  %v4207_v56 = vadd.f32 %v4050_v21, %v3710_v48 }
 0x14b   : > { %5783 = vst [vmem:[#allocation48_spill] sm:$0xff] %v4199_v0  ;;  %v2896_v19 = vpop.eup %2895  ;;  %v1771_v60 = vadd.f32 1.0, %v2894_v41  ;;  %2901 = vtanh.f32 %v1519_v13  ;;  %v1036_v12 = vmul.f32 0.044715, %v4181_v26  ;;  %v4211_v55 = vpop.f32.mrb[35].mxu0  ;;  %v1897_v16 = vmul.f32 %v1769_v5, %v4114_v31 }
 0x14c   : > { %5784 = vst [vmem:[#allocation49_spill] sm:$0xff] %v4207_v56  ;;  %v2898_v27 = vpop.eup %2897  ;;  %v1768_v9 = vadd.f32 1.0, %v2896_v19  ;;  %2903 = vtanh.f32 %v1516_v42  ;;  %v1038_v33 = vmul.f32 0.044715, %v4190_v29  ;;  %v4215_v37 = vpop.f32.mrb[35].mxu1  ;;  %v876_v19 = vmul.f32 0.5, %v3787_v58 }
 0x14d   : > { %5785 = vst [vmem:[#allocation50_spill] sm:$0xff] %v4215_v37  ;;  %v4217_v13 = vpop.f32.mrb[36].mxu0  ;;  %v1899_v41 = vmul.f32 %v1771_v60, %v4121_v1  ;;  %v1770_v6 = vadd.f32 1.0, %v2898_v27  ;;  %2905 = vtanh.f32 %v1518_v24  ;;  %v1037_v21 = vmul.f32 0.044715, %v4199_v0  ;;  %v4221_v61 = vpop.f32.mrb[36].mxu1  ;;  %2162 = vmatprep.mubr.f32.mxu1 %v1897_v16 }
 0x14e   : > { %5786 = vst [vmem:[#allocation51_spill] sm:$0xff] %v4217_v13  ;;  %v4223_v8 = vpop.f32.mrb[37].mxu0  ;;  %v1896_v31 = vmul.f32 %v1768_v9, %v4138_v59  ;;  %v4228_v5 = vmul.f32 0.5, %v5777_v14  ;;  %v5787_v42 = vld [vmem:[#allocation5_spill] sm:$0xff]  ;;  %v4232_v60 = vpop.f32.mrb[37].mxu1  ;;  %v4236_v24 = vmul.f32 %v1036_v12, %v4181_v26  ;;  %v1267_v58 = vmul.f32 %v3897_v57, %v3838_v40  ;;  %v5791_v16 = vld [vmem:[#allocation3_spill] sm:$0xff] }
 0x14f   : > { %v5788_v13 = vld [vmem:[#allocation13_spill] sm:$0xff]  ;;  %2387 = vmatprep.mubr.f32.mxu0 %v1899_v41  ;;  %v1898_v1 = vmul.f32 %v1770_v6, %v4149_v36  ;;  %v4239_v27 = vmul.f32 0.5, %v5787_v42  ;;  %v4244_v59 = vmul.f32 %v1038_v33, %v4190_v29  ;;  %v5792_v9 = vld [vmem:[#allocation11_spill] sm:$0xff]  ;;  %v5793_v41 = vld [vmem:[#allocation4_spill] sm:$0xff]  ;;  %v1039_v57 = vmul.f32 0.044715, %v4207_v56 }
 0x150   : > { %v1265_v37 = vmul.f32 %v5788_v13, %v5787_v42  ;;  %5789 = vst [vmem:[#allocation5_spill] sm:$0xff] %v4236_v24  ;;  %2163 = vmatmul.mubr.f32.gmra.mrb[70].mxu1 %v1896_v31  ;;  %v1264_v13 = vmul.f32 %v5792_v9, %v5791_v16  ;;  %v5794_v36 = vld [vmem:[#allocation12_spill] sm:$0xff]  ;;  %v4251_v12 = vpop.f32.mrb[38].mxu0  ;;  %v4254_v24 = vmul.f32 %v1037_v21, %v4199_v0  ;;  %v4275_v29 = vmul.f32 0.5, %v3838_v40 }
 0x151   : > { %5790 = vst [vmem:[#allocation13_spill] sm:$0xff] %v4244_v59  ;;  %v1266_v6 = vmul.f32 %v5794_v36, %v5793_v41  ;;  %2388 = vmatmul.mubr.f32.gmra.mrb[70].mxu0 %v1898_v1  ;;  %v1395_v31 = vadd.f32 %v1267_v58, %v3838_v40  ;;  %v4260_v33 = vadd.f32 %v4061_v23, %v3704_v45 }
 0x152   : > { %v1393_v14 = vadd.f32 %v1265_v37, %v5787_v42  ;;  %5795 = vst [vmem:[#allocation3_spill] sm:$0xff] %v4254_v24  ;;  %v4262_v37 = vpop.f32.mrb[38].mxu1  ;;  %v4264_v42 = vpop.f32.mrb[39].mxu0  ;;  %v1392_v36 = vadd.f32 %v1264_v13, %v5791_v16  ;;  %v4270_v21 = vadd.f32 %v4068_v4, %v3706_v46  ;;  %v4279_v26 = vadd.f32 %v4070_v2, %v3708_v47 }
 0x153   : > { %5796 = vst [vmem:[#allocation11_spill] sm:$0xff] %v4260_v33  ;;  %v1394_v1 = vadd.f32 %v1266_v6, %v5793_v41  ;;  %v4272_v59 = vpop.f32.mrb[39].mxu1  ;;  %v2900_v58 = vpop.eup %2899  ;;  %v1523_v23 = vmul.f32 0.7978846, %v1395_v31  ;;  %v1040_v40 = vmul.f32 0.044715, %v4260_v33  ;;  %v4291_v2 = vadd.f32 %v4080_v63, %v3710_v48 }
 0x154   : > { %v1521_v9 = vmul.f32 0.7978846, %v1393_v14  ;;  %5797 = vst [vmem:[#allocation4_spill] sm:$0xff] %v4270_v21  ;;  %5798 = vst [vmem:[#allocation12_spill] sm:$0xff] %v4272_v59  ;;  %v1269_v14 = vmul.f32 %v3917_v53, %v3867_v38  ;;  %v1773_v13 = vadd.f32 1.0, %v2900_v58  ;;  %v4283_v4 = vpop.f32.mrb[40].mxu0  ;;  %v4286_v59 = vmul.f32 %v1039_v57, %v4207_v56 }
 0x155   : > { %v1520_v6 = vmul.f32 0.7978846, %v1392_v36  ;;  %v1522_v24 = vmul.f32 0.7978846, %v1394_v1  ;;  %5799 = vst [vmem:[#allocation52_spill] sm:$0xff] %v4283_v4  ;;  %v2902_v0 = vpop.eup %2901  ;;  %v4293_v31 = vpop.f32.mrb[40].mxu1 }
 0x156   : > { %2907 = vtanh.f32 %v1521_v9  ;;  %5800 = vst [vmem:[#allocation53_spill] sm:$0xff] %v4286_v59  ;;  %5801 = vst [vmem:[#allocation54_spill] sm:$0xff] %v4293_v31  ;;  %v4295_v53 = vpop.f32.mrb[41].mxu0  ;;  %v2904_v9 = vpop.eup %2903  ;;  %v1901_v36 = vmul.f32 %v1773_v13, %v4184_v30  ;;  %v1775_v1 = vadd.f32 1.0, %v2902_v0  ;;  %v1042_v58 = vmul.f32 0.044715, %v4270_v21 }
 0x157   : > { %2909 = vtanh.f32 %v1523_v23  ;;  %5802 = vst [vmem:[#allocation55_spill] sm:$0xff] %v4295_v53  ;;  %v4299_v57 = vpop.f32.mrb[41].mxu1  ;;  %v2906_v23 = vpop.eup %2905  ;;  %v1772_v4 = vadd.f32 1.0, %v2904_v9  ;;  %v4302_v59 = vmul.f32 0.5, %v5791_v16  ;;  %v1041_v63 = vmul.f32 0.044715, %v4279_v26 }
 0x158   : > { %2911 = vtanh.f32 %v1520_v6  ;;  %5803 = vst [vmem:[#allocation56_spill] sm:$0xff] %v4299_v57  ;;  %2167 = vmatprep.mubr.f32.mxu1 %v1901_v36  ;;  %v1903_v53 = vmul.f32 %v1775_v1, %v4202_v22  ;;  %v1774_v31 = vadd.f32 1.0, %v2906_v23  ;;  %v4307_v30 = vmul.f32 0.5, %v5793_v41  ;;  %v4310_v13 = vpop.f32.mrb[42].mxu0  ;;  %v5807_v57 = vld [vmem:[#allocation20_spill] sm:$0xff] }
 0x159   : > { %2913 = vtanh.f32 %v1522_v24  ;;  %v1397_v0 = vadd.f32 %v1269_v14, %v3867_v38  ;;  %5804 = vst [vmem:[#allocation57_spill] sm:$0xff] %v4310_v13  ;;  %v1900_v6 = vmul.f32 %v1772_v4, %v876_v19  ;;  %v4313_v9 = vmul.f32 %v1040_v40, %v4260_v33  ;;  %v5806_v24 = vld [vmem:[#allocation10_spill] sm:$0xff]  ;;  %v4318_v36 = vpop.f32.mrb[42].mxu1  ;;  %v4320_v22 = vpop.f32.mrb[43].mxu0  ;;  %v5811_v19 = vld [vmem:[#allocation8_spill] sm:$0xff]  ;;  %v5812_v4 = vld [vmem:[#allocation17_spill] sm:$0xff] }
 0x15a   : > { %v1043_v16 = vmul.f32 0.044715, %v4291_v2  ;;  %v1271_v56 = vmul.f32 %v5807_v57, %v5806_v24  ;;  %5808 = vst [vmem:[#allocation10_spill] sm:$0xff] %v4318_v36  ;;  %5809 = vst [vmem:[#allocation20_spill] sm:$0xff] %v4320_v22  ;;  %2392 = vmatprep.mubr.f32.mxu0 %v1903_v53  ;;  %v1902_v41 = vmul.f32 %v1774_v31, %v4228_v5  ;;  %v4328_v23 = vpop.f32.mrb[43].mxu1  ;;  %v5814_v36 = vld [vmem:[#allocation9_spill] sm:$0xff] }
 0x15b   : > { %5805 = vst [vmem:[#allocation58_spill] sm:$0xff] %v4313_v9  ;;  %v4324_v14 = vmul.f32 %v1042_v58, %v4270_v21  ;;  %v1525_v1 = vmul.f32 0.7978846, %v1397_v0  ;;  %v1268_v40 = vmul.f32 %v5812_v4, %v5811_v19  ;;  %5813 = vst [vmem:[#allocation8_spill] sm:$0xff] %v4328_v23  ;;  %2168 = vmatmul.mubr.f32.gmra.mrb[72].mxu1 %v1900_v6  ;;  %v5815_v22 = vld [vmem:[#allocation18_spill] sm:$0xff]  ;;  %v4341_v31 = vmul.f32 0.5, %v3867_v38 }
 0x15c   : > { %v4331_v13 = vmul.f32 %v1041_v63, %v4279_v26  ;;  %v1399_v57 = vadd.f32 %v1271_v56, %v5806_v24  ;;  %v1270_v53 = vmul.f32 %v5815_v22, %v5814_v36  ;;  %v4338_v5 = vadd.f32 %v4093_v54, %v3704_v45  ;;  %2393 = vmatmul.mubr.f32.gmra.mrb[72].mxu0 %v1902_v41  ;;  %v4348_v0 = vpop.f32.mrb[44].mxu0 }
 0x15d   : > { %5810 = vst [vmem:[#allocation59_spill] sm:$0xff] %v4324_v14  ;;  %2915 = vtanh.f32 %v1525_v1  ;;  %v1396_v58 = vadd.f32 %v1268_v40, %v5811_v19  ;;  %v4346_v63 = vadd.f32 %v4101_v11, %v3706_v46  ;;  %5816 = vst [vmem:[#allocation17_spill] sm:$0xff] %v4348_v0  ;;  %v4351_v56 = vmul.f32 %v1043_v16, %v4291_v2  ;;  %v5817_v11 = vld [vmem:[#allocation16_spill] sm:$0xff] }
 0x15e   : > { %v4354_v6 = vmul.f32 0.5, %v5806_v24  ;;  %v1527_v54 = vmul.f32 0.7978846, %v1399_v57  ;;  %v1398_v22 = vadd.f32 %v1270_v53, %v5814_v36  ;;  %v1044_v1 = vmul.f32 0.044715, %v4338_v5  ;;  %v5818_v40 = vld [vmem:[#allocation24_spill] sm:$0xff] }
 0x15f   : > { %v1524_v41 = vmul.f32 0.7978846, %v1396_v58  ;;  %v4360_v4 = vadd.f32 %v4103_v50, %v3708_v47  ;;  %v1273_v0 = vmul.f32 %v5818_v40, %v5817_v11  ;;  %v4366_v24 = vadd.f32 %v4111_v20, %v3710_v48  ;;  %v4368_v57 = vpop.f32.mrb[44].mxu1  ;;  %v4370_v53 = vpop.f32.mrb[45].mxu0 }
 0x160   : > { %v2908_v38 = vpop.eup %2907  ;;  %2917 = vtanh.f32 %v1527_v54  ;;  %v1526_v14 = vmul.f32 0.7978846, %v1398_v22  ;;  %5819 = vst [vmem:[#allocation9_spill] sm:$0xff] %v4368_v57  ;;  %5820 = vst [vmem:[#allocation18_spill] sm:$0xff] %v4370_v53  ;;  %v4373_v50 = vmul.f32 0.5, %v5811_v19  ;;  %v4376_v9 = vpop.f32.mrb[45].mxu1 }
 0x161   : > { %v2910_v23 = vpop.eup %2909  ;;  %v1777_v16 = vadd.f32 1.0, %v2908_v38  ;;  %2919 = vtanh.f32 %v1524_v41  ;;  %v1046_v40 = vmul.f32 0.044715, %v4346_v63  ;;  %5821 = vst [vmem:[#allocation16_spill] sm:$0xff] %v4376_v9  ;;  %v4378_v54 = vpop.f32.mrb[46].mxu0  ;;  %v4382_v57 = vmul.f32 0.5, %v5814_v36 }
 0x162   : > { %v2912_v58 = vpop.eup %2911  ;;  %v1779_v21 = vadd.f32 1.0, %v2910_v23  ;;  %5822 = vst [vmem:[#allocation24_spill] sm:$0xff] %v4378_v54  ;;  %2921 = vtanh.f32 %v1526_v14  ;;  %v4384_v53 = vpop.f32.mrb[46].mxu1  ;;  %v1045_v33 = vmul.f32 0.044715, %v4360_v4  ;;  %v1401_v9 = vadd.f32 %v1273_v0, %v5817_v11 }
 0x163   : > { %v2914_v22 = vpop.eup %2913  ;;  %v1905_v20 = vmul.f32 %v1777_v16, %v4239_v27  ;;  %v1776_v38 = vadd.f32 1.0, %v2912_v58  ;;  %5823 = vst [vmem:[#allocation60_spill] sm:$0xff] %v4384_v53  ;;  %v4386_v23 = vpop.f32.mrb[47].mxu0  ;;  %v4395_v36 = vmul.f32 %v1044_v1, %v4338_v5  ;;  %v1047_v14 = vmul.f32 0.044715, %v4366_v24  ;;  %v5826_v58 = vld [vmem:[#allocation14_spill] sm:$0xff] }
 0x164   : > { %5824 = vst [vmem:[#allocation61_spill] sm:$0xff] %v4386_v23  ;;  %v1907_v19 = vmul.f32 %v1779_v21, %v4275_v29  ;;  %v1778_v41 = vadd.f32 1.0, %v2914_v22  ;;  %v4391_v54 = vpop.f32.mrb[47].mxu1  ;;  %v1275_v16 = vmul.f32 %v3971_v44, %v3907_v25  ;;  %v4402_v21 = vmul.f32 %v1046_v40, %v4346_v63  ;;  %v5827_v22 = vld [vmem:[#allocation22_spill] sm:$0xff]  ;;  %v5829_v1 = vld [vmem:[#allocation15_spill] sm:$0xff] }
 0x165   : > { %5825 = vst [vmem:[#allocation62_spill] sm:$0xff] %v4391_v54  ;;  %2172 = vmatprep.mubr.f32.mxu1 %v1905_v20  ;;  %v1904_v27 = vmul.f32 %v1776_v38, %v4302_v59  ;;  %v1529_v0 = vmul.f32 0.7978846, %v1401_v9  ;;  %v1272_v20 = vmul.f32 %v5827_v22, %v5826_v58  ;;  %v4406_v54 = vpop.f32.mrb[48].mxu0  ;;  %v5830_v38 = vld [vmem:[#allocation23_spill] sm:$0xff]  ;;  %v4413_v44 = vadd.f32 %v4124_v52, %v3704_v45  ;;  %v4419_v9 = vpop.f32.mrb[48].mxu1 }
 0x166   : > { %2397 = vmatprep.mubr.f32.mxu0 %v1907_v19  ;;  %v1906_v29 = vmul.f32 %v1778_v41, %v4307_v30  ;;  %5828 = vst [vmem:[#allocation14_spill] sm:$0xff] %v4406_v54  ;;  %v1403_v59 = vadd.f32 %v1275_v16, %v3907_v25  ;;  %v1274_v23 = vmul.f32 %v5830_v38, %v5829_v1  ;;  %5831 = vst [vmem:[#allocation22_spill] sm:$0xff] %v4419_v9  ;;  %v4421_v40 = vpop.f32.mrb[49].mxu0  ;;  %v4431_v16 = vpop.f32.mrb[49].mxu1 }
 0x167   : > { %2173 = vmatmul.mubr.f32.gmra.mrb[74].mxu1 %v1904_v27  ;;  %v4417_v30 = vadd.f32 %v4133_v62, %v3706_v46  ;;  %5832 = vst [vmem:[#allocation15_spill] sm:$0xff] %v4421_v40  ;;  %v2916_v19 = vpop.eup %2915  ;;  %v4424_v41 = vmul.f32 %v1045_v33, %v4360_v4  ;;  %2923 = vtanh.f32 %v1529_v0  ;;  %v1400_v27 = vadd.f32 %v1272_v20, %v5826_v58 }
 0x168   : > { %2398 = vmatmul.mubr.f32.gmra.mrb[74].mxu0 %v1906_v29  ;;  %v4429_v52 = vadd.f32 %v4135_v49, %v3708_v47  ;;  %5833 = vst [vmem:[#allocation23_spill] sm:$0xff] %v4431_v16  ;;  %v1781_v62 = vadd.f32 1.0, %v2916_v19  ;;  %v4434_v22 = vmul.f32 %v1047_v14, %v4366_v24  ;;  %v1531_v38 = vmul.f32 0.7978846, %v1403_v59  ;;  %v4443_v14 = vpop.f32.mrb[50].mxu0 }
 0x169   : > { %v1402_v40 = vadd.f32 %v1274_v23, %v5829_v1  ;;  %v889_v29 = vmul.f32 0.5, %v5817_v11  ;;  %v1528_v33 = vmul.f32 0.7978846, %v1400_v27  ;;  %v1048_v0 = vmul.f32 0.044715, %v4413_v44  ;;  %5834 = vst [vmem:[#allocation63_spill] sm:$0xff] %v4443_v14 }
 0x16a   : > { %v1277_v20 = vmul.f32 %v3988_v3, %v3926_v15  ;;  %v2918_v9 = vpop.eup %2917  ;;  %v1909_v49 = vmul.f32 %v1781_v62, %v4341_v31  ;;  %2925 = vtanh.f32 %v1531_v38  ;;  %v1050_v19 = vmul.f32 0.044715, %v4417_v30  ;;  %v4445_v59 = vpop.f32.mrb[50].mxu1 }
 0x16b   : > { %v1530_v16 = vmul.f32 0.7978846, %v1402_v40  ;;  %5835 = vst [vmem:[#allocation64_spill] sm:$0xff] %v4445_v59  ;;  %v2920_v23 = vpop.eup %2919  ;;  %v1783_v54 = vadd.f32 1.0, %v2918_v9  ;;  %v4448_v11 = vmul.f32 0.5, %v3907_v25  ;;  %2927 = vtanh.f32 %v1528_v33  ;;  %v4451_v3 = vpop.f32.mrb[51].mxu0 }
 0x16c   : > { %v1049_v27 = vmul.f32 0.044715, %v4429_v52  ;;  %5836 = vst [vmem:[#allocation65_spill] sm:$0xff] %v4451_v3  ;;  %v4453_v53 = vpop.f32.mrb[51].mxu1  ;;  %v2922_v31 = vpop.eup %2921  ;;  %2177 = vmatprep.mubr.f32.mxu1 %v1909_v49  ;;  %v1780_v40 = vadd.f32 1.0, %v2920_v23  ;;  %v4456_v62 = vmul.f32 0.5, %v5826_v58  ;;  %v4464_v33 = vadd.f32 %v4141_v39, %v3710_v48 }
 0x16d   : > { %5837 = vst [vmem:[#allocation66_spill] sm:$0xff] %v4453_v53  ;;  %v4459_v38 = vmul.f32 0.5, %v5829_v1  ;;  %2929 = vtanh.f32 %v1530_v16  ;;  %v1911_v25 = vmul.f32 %v1783_v54, %v4354_v6  ;;  %v1782_v9 = vadd.f32 1.0, %v2922_v31  ;;  %v4467_v53 = vpop.f32.mrb[52].mxu0  ;;  %v4478_v54 = vpop.f32.mrb[52].mxu1  ;;  %v5842_v23 = vld [vmem:[#allocation19_spill] sm:$0xff] }
 0x16e   : > { %v1405_v3 = vadd.f32 %v1277_v20, %v3926_v15  ;;  %5838 = vst [vmem:[#allocation67_spill] sm:$0xff] %v4467_v53  ;;  %v1908_v49 = vmul.f32 %v1780_v40, %v4373_v50  ;;  %v4471_v58 = vmul.f32 %v1048_v0, %v4413_v44  ;;  %v4474_v1 = vmul.f32 %v1050_v19, %v4417_v30  ;;  %v4480_v16 = vpop.f32.mrb[53].mxu0  ;;  %v5843_v0 = vld [vmem:[#allocation27_spill] sm:$0xff]  ;;  %v4488_v40 = vpop.f32.mrb[53].mxu1  ;;  %v5846_v53 = vld [vmem:[#allocation29_spill] sm:$0xff] }
 0x16f   : > { %v1279_v6 = vmul.f32 %v3991_v32, %v3930_v43  ;;  %5840 = vst [vmem:[#allocation69_spill] sm:$0xff] %v4478_v54  ;;  %5841 = vst [vmem:[#allocation70_spill] sm:$0xff] %v4480_v16  ;;  %2402 = vmatprep.mubr.f32.mxu0 %v1911_v25  ;;  %v1910_v39 = vmul.f32 %v1782_v9, %v4382_v57  ;;  %v4484_v20 = vmul.f32 %v1049_v27, %v4429_v52  ;;  %v5845_v32 = vld [vmem:[#allocation21_spill] sm:$0xff] }
 0x170   : > { %5839 = vst [vmem:[#allocation68_spill] sm:$0xff] %v4474_v1  ;;  %v1533_v50 = vmul.f32 0.7978846, %v1405_v3  ;;  %v1276_v31 = vmul.f32 %v5843_v0, %v5842_v23  ;;  %5844 = vst [vmem:[#allocation19_spill] sm:$0xff] %v4488_v40  ;;  %2178 = vmatmul.mubr.f32.gmra.mrb[76].mxu1 %v1908_v49  ;;  %v1278_v54 = vmul.f32 %v5846_v53, %v5845_v32  ;;  %v1051_v3 = vmul.f32 0.044715, %v4464_v33 }
 0x171   : > { %v1407_v19 = vadd.f32 %v1279_v6, %v3930_v43  ;;  %v4495_v25 = vadd.f32 %v4154_v18, %v3704_v45  ;;  %v4499_v57 = vadd.f32 %v4161_v28, %v3706_v46  ;;  %v2924_v27 = vpop.eup %2923  ;;  %2403 = vmatmul.mubr.f32.gmra.mrb[76].mxu0 %v1910_v39  ;;  %v4505_v49 = vadd.f32 %v4163_v17, %v3708_v47  ;;  %v4516_v14 = vpop.f32.mrb[54].mxu0 }
 0x172   : > { %2931 = vtanh.f32 %v1533_v50  ;;  %v1404_v9 = vadd.f32 %v1276_v31, %v5842_v23  ;;  %v1785_v53 = vadd.f32 1.0, %v2924_v27  ;;  %v893_v6 = vmul.f32 0.5, %v3926_v15  ;;  %v5848_v50 = vld [vmem:[#allocation34_spill] sm:$0xff]  ;;  %5849 = vst [vmem:[#allocation21_spill] sm:$0xff] %v4516_v14  ;;  %v4518_v15 = vpop.f32.mrb[54].mxu1  ;;  %v4524_v1 = vpop.f32.mrb[55].mxu0 }
 0x173   : > { %5847 = vst [vmem:[#allocation27_spill] sm:$0xff] %v4499_v57  ;;  %v1535_v18 = vmul.f32 0.7978846, %v1407_v19  ;;  %v1406_v0 = vadd.f32 %v1278_v54, %v5845_v32  ;;  %v4510_v28 = vmul.f32 0.5, %v3930_v43  ;;  %v1052_v39 = vmul.f32 0.044715, %v4495_v25 }
 0x174   : > { %v1532_v40 = vmul.f32 0.7978846, %v1404_v9  ;;  %v1281_v16 = vmul.f32 %v5848_v50, %v3968_v10  ;;  %v2926_v31 = vpop.eup %2925  ;;  %v1913_v59 = vmul.f32 %v1785_v53, %v889_v29  ;;  %v1054_v27 = vmul.f32 0.044715, %v4499_v57  ;;  %5850 = vst [vmem:[#allocation29_spill] sm:$0xff] %v4518_v15  ;;  %5851 = vst [vmem:[#allocation34_spill] sm:$0xff] %v4524_v1 }
 0x175   : > { %2933 = vtanh.f32 %v1535_v18  ;;  %v1534_v17 = vmul.f32 0.7978846, %v1406_v0  ;;  %v2928_v54 = vpop.eup %2927  ;;  %v1787_v19 = vadd.f32 1.0, %v2926_v31  ;;  %v4521_v43 = vmul.f32 %v1051_v3, %v4464_v33  ;;  %v4526_v50 = vpop.f32.mrb[55].mxu1 }
 0x176   : > { %2935 = vtanh.f32 %v1532_v40  ;;  %v1053_v9 = vmul.f32 0.044715, %v4505_v49  ;;  %5852 = vst [vmem:[#allocation71_spill] sm:$0xff] %v4526_v50  ;;  %2182 = vmatprep.mubr.f32.mxu1 %v1913_v59  ;;  %v1784_v53 = vadd.f32 1.0, %v2928_v54  ;;  %v892_v18 = vmul.f32 0.5, %v5842_v23  ;;  %v5856_v54 = vld [vmem:[#allocation35_spill] sm:$0xff] }
 0x177   : > { %v2930_v29 = vpop.eup %2929  ;;  %v4530_v0 = vmul.f32 0.5, %v5845_v32  ;;  %2937 = vtanh.f32 %v1534_v17  ;;  %v1915_v31 = vmul.f32 %v1787_v19, %v4448_v11  ;;  %v4535_v40 = vadd.f32 %v4173_v34, %v3710_v48  ;;  %v5855_v32 = vld [vmem:[#allocation28_spill] sm:$0xff] }
 0x178   : > { %v1786_v3 = vadd.f32 1.0, %v2930_v29  ;;  %v1409_v1 = vadd.f32 %v1281_v16, %v3968_v10  ;;  %v1912_v50 = vmul.f32 %v1784_v53, %v4456_v62  ;;  %v4540_v59 = vmul.f32 %v1052_v39, %v4495_v25  ;;  %v5857_v29 = vld [vmem:[#allocation25_spill] sm:$0xff]  ;;  %v5858_v16 = vld [vmem:[#allocation30_spill] sm:$0xff] }
 0x179   : > { %v4543_v23 = vmul.f32 %v1054_v27, %v4499_v57  ;;  %v1283_v17 = vmul.f32 %v5856_v54, %v5855_v32  ;;  %2407 = vmatprep.mubr.f32.mxu0 %v1915_v31  ;;  %v4549_v19 = vmul.f32 %v1053_v9, %v4505_v49  ;;  %v1280_v15 = vmul.f32 %v5858_v16, %v5857_v29  ;;  %v5859_v39 = vld [vmem:[#allocation26_spill] sm:$0xff]  ;;  %v5860_v53 = vld [vmem:[#allocation33_spill] sm:$0xff]  ;;  %v4579_v57 = vpop.f32.mrb[56].mxu0 }
 0x17a   : > { %5853 = vst [vmem:[#allocation72_spill] sm:$0xff] %v4540_v59  ;;  %v1914_v11 = vmul.f32 %v1786_v3, %v4459_v38  ;;  %v1537_v34 = vmul.f32 0.7978846, %v1409_v1  ;;  %2183 = vmatmul.mubr.f32.gmra.mrb[78].mxu1 %v1912_v50  ;;  %v1282_v27 = vmul.f32 %v5860_v53, %v5859_v39  ;;  %v4558_v14 = vadd.f32 %v4192_v35, %v3704_v45  ;;  %v4587_v59 = vpop.f32.mrb[57].mxu0 }
 0x17b   : > { %5854 = vst [vmem:[#allocation73_spill] sm:$0xff] %v4543_v23  ;;  %v1411_v62 = vadd.f32 %v1283_v17, %v5855_v32  ;;  %v4562_v38 = vadd.f32 %v4209_v7, %v3706_v46  ;;  %v1055_v1 = vmul.f32 0.044715, %v4535_v40  ;;  %v1408_v50 = vadd.f32 %v1280_v15, %v5857_v29  ;;  %5865 = vst [vmem:[#allocation30_spill] sm:$0xff] %v4579_v57 }
 0x17c   : > { %5861 = vst [vmem:[#allocation28_spill] sm:$0xff] %v4558_v14  ;;  %v2932_v9 = vpop.eup %2931  ;;  %2408 = vmatmul.mubr.f32.gmra.mrb[78].mxu0 %v1914_v11  ;;  %2939 = vtanh.f32 %v1537_v34  ;;  %v4568_v31 = vadd.f32 %v4211_v55, %v3708_v47  ;;  %v897_v54 = vmul.f32 0.5, %v3968_v10  ;;  %v1410_v17 = vadd.f32 %v1282_v27, %v5859_v39  ;;  %v5864_v34 = vld [vmem:[#allocation39_spill] sm:$0xff]  ;;  %v4581_v10 = vpop.f32.mrb[56].mxu1  ;;  %5867 = vst [vmem:[#allocation33_spill] sm:$0xff] %v4587_v59 }
 0x17d   : > { %5862 = vst [vmem:[#allocation35_spill] sm:$0xff] %v4562_v38  ;;  %v1789_v3 = vadd.f32 1.0, %v2932_v9  ;;  %v1539_v35 = vmul.f32 0.7978846, %v1411_v62  ;;  %v4573_v7 = vmul.f32 0.5, %v5855_v32  ;;  %v1285_v53 = vmul.f32 %v5864_v34, %v4029_v51  ;;  %5866 = vst [vmem:[#allocation26_spill] sm:$0xff] %v4581_v10 }
 0x17e   : > { %5863 = vst [vmem:[#allocation25_spill] sm:$0xff] %v4568_v31  ;;  %v1536_v16 = vmul.f32 0.7978846, %v1408_v50  ;;  %v1056_v11 = vmul.f32 0.044715, %v4558_v14  ;;  %v4584_v32 = vmul.f32 %v1055_v1, %v4535_v40  ;;  %v4589_v34 = vpop.f32.mrb[57].mxu1 }
 0x17f   : > { %v2934_v15 = vpop.eup %2933  ;;  %v1917_v23 = vmul.f32 %v1789_v3, %v893_v6  ;;  %2941 = vtanh.f32 %v1539_v35  ;;  %v1538_v55 = vmul.f32 0.7978846, %v1410_v17  ;;  %v1058_v9 = vmul.f32 0.044715, %v4562_v38  ;;  %5868 = vst [vmem:[#allocation39_spill] sm:$0xff] %v4589_v34 }
 0x180   : > { %v2936_v62 = vpop.eup %2935  ;;  %v1791_v27 = vadd.f32 1.0, %v2934_v15  ;;  %2943 = vtanh.f32 %v1536_v16  ;;  %v1057_v50 = vmul.f32 0.044715, %v4568_v31  ;;  %v896_v35 = vmul.f32 0.5, %v5857_v29  ;;  %v5869_v16 = vld [vmem:[#allocation50_spill] sm:$0xff]  ;;  %v5872_v29 = vld [vmem:[#allocation36_spill] sm:$0xff] }
 0x181   : > { %v2938_v6 = vpop.eup %2937  ;;  %2187 = vmatprep.mubr.f32.mxu1 %v1917_v23  ;;  %v1788_v3 = vadd.f32 1.0, %v2936_v62  ;;  %v4593_v17 = vmul.f32 0.5, %v5859_v39  ;;  %2945 = vtanh.f32 %v1538_v55  ;;  %v4598_v10 = vadd.f32 %v5869_v16, %v3710_v48  ;;  %v5873_v39 = vld [vmem:[#allocation43_spill] sm:$0xff]  ;;  %v5876_v16 = vld [vmem:[#allocation37_spill] sm:$0xff] }
 0x182   : > { %v1919_v15 = vmul.f32 %v1791_v27, %v4510_v28  ;;  %v1790_v1 = vadd.f32 1.0, %v2938_v6  ;;  %v1413_v59 = vadd.f32 %v1285_v53, %v4029_v51  ;;  %v4602_v34 = vmul.f32 %v1056_v11, %v4558_v14  ;;  %v5875_v6 = vld [vmem:[#allocation31_spill] sm:$0xff]  ;;  %v5877_v11 = vld [vmem:[#allocation32_spill] sm:$0xff] }
 0x183   : > { %v1916_v57 = vmul.f32 %v1788_v3, %v892_v18  ;;  %v4605_v23 = vmul.f32 %v1058_v9, %v4562_v38  ;;  %v1287_v62 = vmul.f32 %v5873_v39, %v5872_v29  ;;  %v4611_v55 = vmul.f32 %v1057_v50, %v4568_v31  ;;  %v5878_v3 = vld [vmem:[#allocation38_spill] sm:$0xff] }
 0x184   : > { %5870 = vst [vmem:[#allocation50_spill] sm:$0xff] %v4602_v34  ;;  %2412 = vmatprep.mubr.f32.mxu0 %v1919_v15  ;;  %v1918_v28 = vmul.f32 %v1790_v1, %v4530_v0  ;;  %v1541_v27 = vmul.f32 0.7978846, %v1413_v59  ;;  %v1284_v53 = vmul.f32 %v5876_v16, %v5875_v6  ;;  %v1286_v9 = vmul.f32 %v5878_v3, %v5877_v11  ;;  %v5882_v3 = vld [vmem:[#allocation42_spill] sm:$0xff] }
 0x185   : > { %5871 = vst [vmem:[#allocation74_spill] sm:$0xff] %v4605_v23  ;;  %5874 = vst [vmem:[#allocation36_spill] sm:$0xff] %v4611_v55  ;;  %2188 = vmatmul.mubr.f32.gmra.mrb[80].mxu1 %v1916_v57  ;;  %v1415_v18 = vadd.f32 %v1287_v62, %v5872_v29  ;;  %v5879_v23 = vld [vmem:[#allocation51_spill] sm:$0xff]  ;;  %v4624_v0 = vadd.f32 %v4221_v61, %v3706_v46  ;;  %v1059_v59 = vmul.f32 0.044715, %v4598_v10  ;;  %v901_v39 = vmul.f32 0.5, %v4029_v51 }
 0x186   : > { %v4620_v38 = vadd.f32 %v5879_v23, %v3704_v45  ;;  %v2940_v50 = vpop.eup %2939  ;;  %2413 = vmatmul.mubr.f32.gmra.mrb[80].mxu0 %v1918_v28  ;;  %2947 = vtanh.f32 %v1541_v27  ;;  %v1412_v57 = vadd.f32 %v1284_v53, %v5875_v6  ;;  %v4630_v15 = vadd.f32 %v4223_v8, %v3708_v47  ;;  %v5883_v27 = vld [vmem:[#allocation6_spill] sm:$0xff]  ;;  %v4641_v55 = vpop.f32.mrb[58].mxu0 }
 0x187   : > { %5881 = vst [vmem:[#allocation31_spill] sm:$0xff] %v4624_v0  ;;  %v1793_v1 = vadd.f32 1.0, %v2940_v50  ;;  %v1543_v23 = vmul.f32 0.7978846, %v1415_v18  ;;  %v1414_v62 = vadd.f32 %v1286_v9, %v5877_v11  ;;  %v4635_v61 = vmul.f32 0.5, %v5872_v29  ;;  %5884 = vst [vmem:[#allocation37_spill] sm:$0xff] %v4641_v55 }
 0x188   : > { %5880 = vst [vmem:[#allocation43_spill] sm:$0xff] %v4620_v38  ;;  %v1540_v16 = vmul.f32 0.7978846, %v1412_v57  ;;  %v1060_v28 = vmul.f32 0.044715, %v4620_v38  ;;  %v1289_v34 = vmul.f32 %v5883_v27, %v5882_v3  ;;  %v4643_v51 = vpop.f32.mrb[58].mxu1  ;;  %v4646_v29 = vmul.f32 %v1059_v59, %v4598_v10 }
 0x189   : > { %v2942_v53 = vpop.eup %2941  ;;  %v1921_v14 = vmul.f32 %v1793_v1, %v897_v54  ;;  %2949 = vtanh.f32 %v1543_v23  ;;  %v1542_v8 = vmul.f32 0.7978846, %v1414_v62  ;;  %v1062_v50 = vmul.f32 0.044715, %v4624_v0  ;;  %5885 = vst [vmem:[#allocation32_spill] sm:$0xff] %v4643_v51  ;;  %v4649_v31 = vpop.f32.mrb[59].mxu0 }
 0x18a   : > { %v2944_v18 = vpop.eup %2943  ;;  %v1795_v9 = vadd.f32 1.0, %v2942_v53  ;;  %2951 = vtanh.f32 %v1540_v16  ;;  %v1061_v57 = vmul.f32 0.044715, %v4630_v15  ;;  %5886 = vst [vmem:[#allocation38_spill] sm:$0xff] %v4649_v31  ;;  %v4651_v27 = vpop.f32.mrb[59].mxu1  ;;  %v900_v23 = vmul.f32 0.5, %v5875_v6 }
 0x18b   : > { %5887 = vst [vmem:[#allocation51_spill] sm:$0xff] %v4651_v27  ;;  %v2946_v54 = vpop.eup %2945  ;;  %2192 = vmatprep.mubr.f32.mxu1 %v1921_v14  ;;  %v1792_v1 = vadd.f32 1.0, %v2944_v18  ;;  %v4655_v62 = vmul.f32 0.5, %v5877_v11  ;;  %2953 = vtanh.f32 %v1542_v8  ;;  %v4660_v16 = vadd.f32 %v4232_v60, %v3710_v48  ;;  %v5890_v6 = vld [vmem:[#allocation44_spill] sm:$0xff]  ;;  %v5891_v11 = vld [vmem:[#allocation47_spill] sm:$0xff] }
 0x18c   : > { %v1923_v53 = vmul.f32 %v1795_v9, %v4573_v7  ;;  %v1794_v59 = vadd.f32 1.0, %v2946_v54  ;;  %v1417_v31 = vadd.f32 %v1289_v34, %v5882_v3  ;;  %v4664_v27 = vmul.f32 %v1060_v28, %v4620_v38  ;;  %v5892_v9 = vld [vmem:[#allocation40_spill] sm:$0xff]  ;;  %v5893_v54 = vld [vmem:[#allocation45_spill] sm:$0xff] }
 0x18d   : > { %v1920_v51 = vmul.f32 %v1792_v1, %v896_v35  ;;  %v4667_v14 = vmul.f32 %v1062_v50, %v4624_v0  ;;  %v1291_v18 = vmul.f32 %v5891_v11, %v5890_v6  ;;  %v4673_v8 = vmul.f32 %v1061_v57, %v4630_v15  ;;  %v5894_v28 = vld [vmem:[#allocation41_spill] sm:$0xff]  ;;  %v5895_v1 = vld [vmem:[#allocation46_spill] sm:$0xff] }
 0x18e   : > { %5888 = vst [vmem:[#allocation42_spill] sm:$0xff] %v4664_v27  ;;  %2417 = vmatprep.mubr.f32.mxu0 %v1923_v53  ;;  %v1922_v7 = vmul.f32 %v1794_v59, %v4593_v17  ;;  %v1545_v60 = vmul.f32 0.7978846, %v1417_v31  ;;  %v1288_v34 = vmul.f32 %v5893_v54, %v5892_v9  ;;  %v1290_v50 = vmul.f32 %v5895_v1, %v5894_v28  ;;  %v5899_v1 = vld [vmem:[#allocation48_spill] sm:$0xff]  ;;  %v4703_v27 = vpop.f32.mrb[60].mxu0 }
 0x18f   : > { %5889 = vst [vmem:[#allocation6_spill] sm:$0xff] %v4667_v14  ;;  %2193 = vmatmul.mubr.f32.gmra.mrb[82].mxu1 %v1920_v51  ;;  %v1419_v35 = vadd.f32 %v1291_v18, %v5890_v6  ;;  %v4682_v55 = vadd.f32 %v4251_v12, %v3704_v45  ;;  %v4686_v17 = vadd.f32 %v4262_v37, %v3706_v46  ;;  %v1063_v31 = vmul.f32 0.044715, %v4660_v16  ;;  %v4711_v38 = vpop.f32.mrb[61].mxu0 }
 0x190   : > { %v2948_v57 = vpop.eup %2947  ;;  %2418 = vmatmul.mubr.f32.gmra.mrb[82].mxu0 %v1922_v7  ;;  %2955 = vtanh.f32 %v1545_v60  ;;  %v1416_v51 = vadd.f32 %v1288_v34, %v5892_v9  ;;  %v4692_v53 = vadd.f32 %v4264_v42, %v3708_v47  ;;  %v905_v11 = vmul.f32 0.5, %v5882_v3  ;;  %v5900_v60 = vld [vmem:[#allocation3_spill] sm:$0xff]  ;;  %5901 = vst [vmem:[#allocation45_spill] sm:$0xff] %v4703_v27  ;;  %v4705_v3 = vpop.f32.mrb[60].mxu1  ;;  %5903 = vst [vmem:[#allocation46_spill] sm:$0xff] %v4711_v38 }
 0x191   : > { %5896 = vst [vmem:[#allocation44_spill] sm:$0xff] %v4682_v55  ;;  %5897 = vst [vmem:[#allocation47_spill] sm:$0xff] %v4686_v17  ;;  %v1797_v59 = vadd.f32 1.0, %v2948_v57  ;;  %v1547_v12 = vmul.f32 0.7978846, %v1419_v35  ;;  %v1418_v18 = vadd.f32 %v1290_v50, %v5894_v28  ;;  %v4697_v37 = vmul.f32 0.5, %v5890_v6 }
 0x192   : > { %5898 = vst [vmem:[#allocation40_spill] sm:$0xff] %v4692_v53  ;;  %v1544_v54 = vmul.f32 0.7978846, %v1416_v51  ;;  %v1064_v7 = vmul.f32 0.044715, %v4682_v55  ;;  %v1293_v14 = vmul.f32 %v5900_v60, %v5899_v1  ;;  %5902 = vst [vmem:[#allocation41_spill] sm:$0xff] %v4705_v3  ;;  %v4708_v6 = vmul.f32 %v1063_v31, %v4660_v16 }
 0x193   : > { %v2950_v34 = vpop.eup %2949  ;;  %v1925_v0 = vmul.f32 %v1797_v59, %v901_v39  ;;  %2957 = vtanh.f32 %v1547_v12  ;;  %v1546_v42 = vmul.f32 0.7978846, %v1418_v18  ;;  %v1066_v57 = vmul.f32 0.044715, %v4686_v17  ;;  %v4713_v60 = vpop.f32.mrb[61].mxu1 }
 0x194   : > { %v2952_v35 = vpop.eup %2951  ;;  %v1799_v50 = vadd.f32 1.0, %v2950_v34  ;;  %2959 = vtanh.f32 %v1544_v54  ;;  %v1065_v51 = vmul.f32 0.044715, %v4692_v53  ;;  %5904 = vst [vmem:[#allocation48_spill] sm:$0xff] %v4713_v60  ;;  %v904_v12 = vmul.f32 0.5, %v5892_v9  ;;  %v5905_v54 = vld [vmem:[#allocation12_spill] sm:$0xff] }
 0x195   : > { %v2954_v39 = vpop.eup %2953  ;;  %2197 = vmatprep.mubr.f32.mxu1 %v1925_v0  ;;  %v1796_v59 = vadd.f32 1.0, %v2952_v35  ;;  %v4717_v18 = vmul.f32 0.5, %v5894_v28  ;;  %2961 = vtanh.f32 %v1546_v42  ;;  %v4722_v3 = vadd.f32 %v5905_v54, %v3710_v48  ;;  %v5908_v9 = vld [vmem:[#allocation49_spill] sm:$0xff] }
 0x196   : > { %v1927_v34 = vmul.f32 %v1799_v50, %v4635_v61  ;;  %v1798_v31 = vadd.f32 1.0, %v2954_v39  ;;  %v1421_v38 = vadd.f32 %v1293_v14, %v5899_v1  ;;  %v4726_v60 = vmul.f32 %v1064_v7, %v4682_v55  ;;  %v5909_v28 = vld [vmem:[#allocation53_spill] sm:$0xff]  ;;  %v5911_v39 = vld [vmem:[#allocation2_spill] sm:$0xff]  ;;  %v5913_v7 = vld [vmem:[#allocation7_spill] sm:$0xff] }
 0x197   : > { %v1924_v27 = vmul.f32 %v1796_v59, %v900_v23  ;;  %v4729_v0 = vmul.f32 %v1066_v57, %v4686_v17  ;;  %v1295_v35 = vmul.f32 %v5909_v28, %v5908_v9  ;;  %v4735_v42 = vmul.f32 %v1065_v51, %v4692_v53  ;;  %v5912_v54 = vld [vmem:[#allocation5_spill] sm:$0xff] }
 0x198   : > { %5906 = vst [vmem:[#allocation3_spill] sm:$0xff] %v4726_v60  ;;  %2422 = vmatprep.mubr.f32.mxu0 %v1927_v34  ;;  %v1926_v61 = vmul.f32 %v1798_v31, %v4655_v62  ;;  %v1549_v50 = vmul.f32 0.7978846, %v1421_v38  ;;  %v1292_v14 = vmul.f32 %v5912_v54, %v5911_v39  ;;  %v5914_v59 = vld [vmem:[#allocation13_spill] sm:$0xff]  ;;  %v5917_v34 = vld [vmem:[#allocation54_spill] sm:$0xff]  ;;  %v5919_v31 = vld [vmem:[#allocation55_spill] sm:$0xff] }
 0x199   : > { %5907 = vst [vmem:[#allocation12_spill] sm:$0xff] %v4729_v0  ;;  %5910 = vst [vmem:[#allocation49_spill] sm:$0xff] %v4735_v42  ;;  %2198 = vmatmul.mubr.f32.gmra.mrb[84].mxu1 %v1924_v27  ;;  %v1423_v23 = vadd.f32 %v1295_v35, %v5908_v9  ;;  %v1294_v57 = vmul.f32 %v5914_v59, %v5913_v7  ;;  %v5915_v0 = vld [vmem:[#allocation52_spill] sm:$0xff]  ;;  %v4748_v62 = vadd.f32 %v5917_v34, %v3706_v46  ;;  %v4765_v42 = vpop.f32.mrb[62].mxu0 }
 0x19a   : > { %v4744_v17 = vadd.f32 %v5915_v0, %v3704_v45  ;;  %v2956_v51 = vpop.eup %2955  ;;  %2423 = vmatmul.mubr.f32.gmra.mrb[84].mxu0 %v1926_v61  ;;  %v1067_v38 = vmul.f32 0.044715, %v4722_v3  ;;  %2963 = vtanh.f32 %v1549_v50  ;;  %v1420_v27 = vadd.f32 %v1292_v14, %v5911_v39  ;;  %5920 = vst [vmem:[#allocation5_spill] sm:$0xff] %v4765_v42  ;;  %v4773_v53 = vpop.f32.mrb[63].mxu0 }
 0x19b   : > { %5918 = vst [vmem:[#allocation2_spill] sm:$0xff] %v4748_v62  ;;  %v4754_v28 = vadd.f32 %v5919_v31, %v3708_v47  ;;  %v1801_v35 = vadd.f32 1.0, %v2956_v51  ;;  %v909_v54 = vmul.f32 0.5, %v5899_v1  ;;  %v1551_v0 = vmul.f32 0.7978846, %v1423_v23  ;;  %v4767_v1 = vpop.f32.mrb[62].mxu1 }
 0x19c   : > { %5916 = vst [vmem:[#allocation53_spill] sm:$0xff] %v4744_v17  ;;  %v1422_v59 = vadd.f32 %v1294_v57, %v5913_v7  ;;  %v4759_v34 = vmul.f32 0.5, %v5908_v9  ;;  %v1548_v60 = vmul.f32 0.7978846, %v1420_v27  ;;  %v1068_v61 = vmul.f32 0.044715, %v4744_v17 }
 0x19d   : > { %v1297_v50 = vmul.f32 %v4331_v13, %v4279_v26  ;;  %v2958_v14 = vpop.eup %2957  ;;  %v1929_v55 = vmul.f32 %v1801_v35, %v905_v11  ;;  %2965 = vtanh.f32 %v1551_v0  ;;  %v1070_v51 = vmul.f32 0.044715, %v4748_v62  ;;  %5921 = vst [vmem:[#allocation7_spill] sm:$0xff] %v4767_v1  ;;  %5922 = vst [vmem:[#allocation13_spill] sm:$0xff] %v4773_v53  ;;  %v4775_v13 = vpop.f32.mrb[63].mxu1 }
 0x19e   : > { %v1550_v31 = vmul.f32 0.7978846, %v1422_v59  ;;  %v2960_v23 = vpop.eup %2959  ;;  %v1803_v57 = vadd.f32 1.0, %v2958_v14  ;;  %v4770_v9 = vmul.f32 %v1067_v38, %v4722_v3  ;;  %2967 = vtanh.f32 %v1548_v60  ;;  %5923 = vst [vmem:[#allocation52_spill] sm:$0xff] %v4775_v13  ;;  %v5924_v38 = vld [vmem:[#allocation56_spill] sm:$0xff] }
 0x19f   : > { %v1069_v27 = vmul.f32 0.044715, %v4754_v28  ;;  %v2962_v11 = vpop.eup %2961  ;;  %2202 = vmatprep.mubr.f32.mxu1 %v1929_v55  ;;  %v1800_v35 = vadd.f32 1.0, %v2960_v23  ;;  %v908_v0 = vmul.f32 0.5, %v5911_v39  ;;  %v910_v59 = vmul.f32 0.5, %v5913_v7  ;;  %v5927_v23 = vld [vmem:[#allocation11_spill] sm:$0xff] }
 0x1a0   : > { %2969 = vtanh.f32 %v1550_v31  ;;  %v1931_v14 = vmul.f32 %v1803_v57, %v4697_v37  ;;  %v1802_v1 = vadd.f32 1.0, %v2962_v11  ;;  %v4782_v60 = vadd.f32 %v5924_v38, %v3710_v48  ;;  %v5928_v57 = vld [vmem:[#allocation58_spill] sm:$0xff]  ;;  %v5930_v11 = vld [vmem:[#allocation59_spill] sm:$0xff] }
 0x1a1   : > { %v1425_v42 = vadd.f32 %v1297_v50, %v4279_v26  ;;  %v1928_v53 = vmul.f32 %v1800_v35, %v904_v12  ;;  %v4786_v13 = vmul.f32 %v1068_v61, %v4744_v17  ;;  %v4789_v55 = vmul.f32 %v1070_v51, %v4748_v62  ;;  %v5929_v61 = vld [vmem:[#allocation4_spill] sm:$0xff]  ;;  %v5931_v35 = vld [vmem:[#allocation57_spill] sm:$0xff] }
 0x1a2   : > { %v1299_v39 = vmul.f32 %v4351_v56, %v4291_v2  ;;  %2427 = vmatprep.mubr.f32.mxu0 %v1931_v14  ;;  %v1930_v37 = vmul.f32 %v1802_v1, %v4717_v18  ;;  %v4795_v7 = vmul.f32 %v1069_v27, %v4754_v28  ;;  %v1296_v50 = vmul.f32 %v5928_v57, %v5927_v23  ;;  %v5932_v56 = vld [vmem:[#allocation10_spill] sm:$0xff]  ;;  %v5933_v27 = vld [vmem:[#allocation20_spill] sm:$0xff] }
 0x1a3   : > { %5925 = vst [vmem:[#allocation54_spill] sm:$0xff] %v4786_v13  ;;  %5926 = vst [vmem:[#allocation55_spill] sm:$0xff] %v4789_v55  ;;  %v1553_v31 = vmul.f32 0.7978846, %v1425_v42  ;;  %2203 = vmatmul.mubr.f32.gmra.mrb[86].mxu1 %v1928_v53  ;;  %v1298_v51 = vmul.f32 %v5930_v11, %v5929_v61  ;;  %v4804_v38 = vadd.f32 %v5931_v35, %v3704_v45  ;;  %v1071_v42 = vmul.f32 0.044715, %v4782_v60 }
 0x1a4   : > { %v1427_v12 = vadd.f32 %v1299_v39, %v4291_v2  ;;  %v4808_v18 = vadd.f32 %v5932_v56, %v3706_v46  ;;  %v2964_v1 = vpop.eup %2963  ;;  %2428 = vmatmul.mubr.f32.gmra.mrb[86].mxu0 %v1930_v37  ;;  %v1424_v53 = vadd.f32 %v1296_v50, %v5927_v23  ;;  %v4814_v14 = vadd.f32 %v5933_v27, %v3708_v47 }
 0x1a5   : > { %2971 = vtanh.f32 %v1553_v31  ;;  %v1805_v39 = vadd.f32 1.0, %v2964_v1  ;;  %v913_v57 = vmul.f32 0.5, %v4279_v26  ;;  %v1426_v35 = vadd.f32 %v1298_v51, %v5929_v61 }
 0x1a6   : > { %v1555_v11 = vmul.f32 0.7978846, %v1427_v12  ;;  %v4819_v56 = vmul.f32 0.5, %v4291_v2  ;;  %v1552_v55 = vmul.f32 0.7978846, %v1424_v53  ;;  %v1301_v31 = vmul.f32 %v4424_v41, %v4360_v4 }
 0x1a7   : > { %v1072_v37 = vmul.f32 0.044715, %v4804_v38  ;;  %v2966_v50 = vpop.eup %2965  ;;  %v1933_v62 = vmul.f32 %v1805_v39, %v909_v54  ;;  %v1554_v27 = vmul.f32 0.7978846, %v1426_v35  ;;  %v1074_v1 = vmul.f32 0.044715, %v4808_v18 }
 0x1a8   : > { %2973 = vtanh.f32 %v1555_v11  ;;  %v2968_v13 = vpop.eup %2967  ;;  %v1807_v26 = vadd.f32 1.0, %v2966_v50  ;;  %v4826_v12 = vmul.f32 %v1071_v42, %v4782_v60  ;;  %v1073_v2 = vmul.f32 0.044715, %v4814_v14  ;;  %v5934_v11 = vld [vmem:[#allocation8_spill] sm:$0xff] }
 0x1a9   : > { %2975 = vtanh.f32 %v1552_v55  ;;  %2207 = vmatprep.mubr.f32.mxu1 %v1933_v62  ;;  %v1804_v53 = vadd.f32 1.0, %v2968_v13  ;;  %v912_v17 = vmul.f32 0.5, %v5927_v23  ;;  %v914_v41 = vmul.f32 0.5, %v5929_v61 }
 0x1aa   : > { %v2970_v51 = vpop.eup %2969  ;;  %2977 = vtanh.f32 %v1554_v27  ;;  %v1935_v54 = vmul.f32 %v1807_v26, %v4759_v34  ;;  %v4834_v35 = vadd.f32 %v5934_v11, %v3710_v48  ;;  %v1429_v42 = vadd.f32 %v1301_v31, %v4360_v4  ;;  %v5935_v31 = vld [vmem:[#allocation17_spill] sm:$0xff] }
 0x1ab   : > { %v1806_v39 = vadd.f32 1.0, %v2970_v51  ;;  %v1932_v55 = vmul.f32 %v1804_v53, %v908_v0  ;;  %v4838_v50 = vmul.f32 %v1072_v37, %v4804_v38  ;;  %v4841_v62 = vmul.f32 %v1074_v1, %v4808_v18  ;;  %v5937_v51 = vld [vmem:[#allocation18_spill] sm:$0xff] }
 0x1ac   : > { %v1303_v13 = vmul.f32 %v4434_v22, %v4366_v24  ;;  %2432 = vmatprep.mubr.f32.mxu0 %v1935_v54  ;;  %v4846_v34 = vmul.f32 %v1073_v2, %v4814_v14  ;;  %v1557_v61 = vmul.f32 0.7978846, %v1429_v42  ;;  %v1300_v27 = vmul.f32 %v4395_v36, %v4338_v5  ;;  %v5936_v22 = vld [vmem:[#allocation9_spill] sm:$0xff] }
 0x1ad   : > { %v1934_v23 = vmul.f32 %v1806_v39, %v910_v59  ;;  %2208 = vmatmul.mubr.f32.gmra.mrb[88].mxu1 %v1932_v55  ;;  %v1302_v37 = vmul.f32 %v4402_v21, %v4346_v63  ;;  %v4855_v1 = vadd.f32 %v5935_v31, %v3704_v45  ;;  %v4859_v59 = vadd.f32 %v5936_v22, %v3706_v46 }
 0x1ae   : > { %v1431_v0 = vadd.f32 %v1303_v13, %v4366_v24  ;;  %v1075_v2 = vmul.f32 0.044715, %v4834_v35  ;;  %2979 = vtanh.f32 %v1557_v61  ;;  %v1428_v36 = vadd.f32 %v1300_v27, %v4338_v5 }
 0x1af   : > { %v2972_v26 = vpop.eup %2971  ;;  %2433 = vmatmul.mubr.f32.gmra.mrb[88].mxu0 %v1934_v23  ;;  %v4865_v53 = vadd.f32 %v5937_v51, %v3708_v47  ;;  %v917_v54 = vmul.f32 0.5, %v4360_v4  ;;  %v1430_v11 = vadd.f32 %v1302_v37, %v4346_v63  ;;  %v4870_v42 = vmul.f32 0.5, %v4366_v24 }
 0x1b0   : > { %v1809_v21 = vadd.f32 1.0, %v2972_v26  ;;  %v1559_v39 = vmul.f32 0.7978846, %v1431_v0  ;;  %v1556_v55 = vmul.f32 0.7978846, %v1428_v36  ;;  %v1305_v23 = vmul.f32 %v4484_v20, %v4429_v52 }
 0x1b1   : > { %v1076_v13 = vmul.f32 0.044715, %v4855_v1  ;;  %v1558_v31 = vmul.f32 0.7978846, %v1430_v11  ;;  %v1078_v22 = vmul.f32 0.044715, %v4859_v59  ;;  %v4877_v0 = vmul.f32 %v1075_v2, %v4834_v35 }
 0x1b2   : > { %v2974_v61 = vpop.eup %2973  ;;  %v1937_v27 = vmul.f32 %v1809_v21, %v913_v57  ;;  %2981 = vtanh.f32 %v1559_v39  ;;  %v1077_v24 = vmul.f32 0.044715, %v4865_v53  ;;  %v916_v51 = vmul.f32 0.5, %v4338_v5  ;;  %v5938_v39 = vld [vmem:[#allocation16_spill] sm:$0xff] }
 0x1b3   : > { %v2976_v26 = vpop.eup %2975  ;;  %v1811_v4 = vadd.f32 1.0, %v2974_v61  ;;  %2983 = vtanh.f32 %v1556_v55  ;;  %v918_v20 = vmul.f32 0.5, %v4346_v63  ;;  %v4885_v11 = vadd.f32 %v5938_v39, %v3710_v48 }
 0x1b4   : > { %v2978_v37 = vpop.eup %2977  ;;  %2212 = vmatprep.mubr.f32.mxu1 %v1937_v27  ;;  %v1808_v36 = vadd.f32 1.0, %v2976_v26  ;;  %2985 = vtanh.f32 %v1558_v31  ;;  %v1433_v2 = vadd.f32 %v1305_v23, %v4429_v52  ;;  %v4889_v61 = vmul.f32 %v1076_v13, %v4855_v1  ;;  %v5940_v13 = vld [vmem:[#allocation68_spill] sm:$0xff] }
 0x1b5   : > { %v1939_v57 = vmul.f32 %v1811_v4, %v4819_v56  ;;  %v1810_v21 = vadd.f32 1.0, %v2978_v37  ;;  %v4892_v27 = vmul.f32 %v1078_v22, %v4859_v59  ;;  %v1307_v5 = vmul.f32 %v4521_v43, %v4464_v33  ;;  %v5941_v22 = vld [vmem:[#allocation24_spill] sm:$0xff] }
 0x1b6   : > { %v1936_v55 = vmul.f32 %v1808_v36, %v912_v17  ;;  %v4897_v56 = vmul.f32 %v1077_v24, %v4865_v53  ;;  %v1561_v31 = vmul.f32 0.7978846, %v1433_v2  ;;  %v1304_v26 = vmul.f32 %v4471_v58, %v4413_v44  ;;  %v5943_v43 = vld [vmem:[#allocation60_spill] sm:$0xff]  ;;  %v5945_v36 = vld [vmem:[#allocation61_spill] sm:$0xff] }
 0x1b7   : > { %5939 = vst [vmem:[#allocation56_spill] sm:$0xff] %v4892_v27  ;;  %2437 = vmatprep.mubr.f32.mxu0 %v1939_v57  ;;  %v1938_v63 = vmul.f32 %v1810_v21, %v914_v41  ;;  %v1435_v17 = vadd.f32 %v1307_v5, %v4464_v33  ;;  %v1306_v23 = vmul.f32 %v5940_v13, %v4417_v30  ;;  %v1079_v37 = vmul.f32 0.044715, %v4885_v11 }
 0x1b8   : > { %2213 = vmatmul.mubr.f32.gmra.mrb[90].mxu1 %v1936_v55  ;;  %v4906_v4 = vadd.f32 %v5941_v22, %v3704_v45  ;;  %v4910_v41 = vadd.f32 %v5943_v43, %v3706_v46  ;;  %v2980_v24 = vpop.eup %2979  ;;  %2987 = vtanh.f32 %v1561_v31  ;;  %v1432_v58 = vadd.f32 %v1304_v26, %v4413_v44 }
 0x1b9   : > { %2438 = vmatmul.mubr.f32.gmra.mrb[90].mxu0 %v1938_v63  ;;  %v4916_v57 = vadd.f32 %v5945_v36, %v3708_v47  ;;  %v1813_v21 = vadd.f32 1.0, %v2980_v24  ;;  %v921_v39 = vmul.f32 0.5, %v4429_v52  ;;  %v1563_v2 = vmul.f32 0.7978846, %v1435_v17 }
 0x1ba   : > { %5942 = vst [vmem:[#allocation11_spill] sm:$0xff] %v4906_v4  ;;  %5944 = vst [vmem:[#allocation58_spill] sm:$0xff] %v4910_v41  ;;  %v1434_v55 = vadd.f32 %v1306_v23, %v4417_v30  ;;  %v4921_v5 = vmul.f32 0.5, %v4464_v33  ;;  %v1560_v13 = vmul.f32 0.7978846, %v1432_v58  ;;  %v1309_v31 = vmul.f32 %v4549_v19, %v4505_v49 }
 0x1bb   : > { %v1080_v63 = vmul.f32 0.044715, %v4906_v4  ;;  %v1941_v22 = vmul.f32 %v1813_v21, %v917_v54  ;;  %2989 = vtanh.f32 %v1563_v2  ;;  %v1082_v24 = vmul.f32 0.044715, %v4910_v41  ;;  %v5946_v2 = vld [vmem:[#allocation62_spill] sm:$0xff] }
 0x1bc   : > { %v2982_v26 = vpop.eup %2981  ;;  %v1562_v43 = vmul.f32 0.7978846, %v1434_v55  ;;  %v4928_v17 = vmul.f32 %v1079_v37, %v4885_v11  ;;  %2991 = vtanh.f32 %v1560_v13  ;;  %v1081_v33 = vmul.f32 0.044715, %v4916_v57 }
 0x1bd   : > { %v2984_v36 = vpop.eup %2983  ;;  %v1815_v52 = vadd.f32 1.0, %v2982_v26  ;;  %2217 = vmatprep.mubr.f32.mxu1 %v1941_v22  ;;  %v920_v27 = vmul.f32 0.5, %v4413_v44  ;;  %v922_v19 = vmul.f32 0.5, %v4417_v30  ;;  %v4936_v55 = vadd.f32 %v5946_v2, %v3710_v48  ;;  %v5957_v2 = vld [vmem:[#allocation15_spill] sm:$0xff] }
 0x1be   : > { %v2986_v23 = vpop.eup %2985  ;;  %v1812_v58 = vadd.f32 1.0, %v2984_v36  ;;  %2993 = vtanh.f32 %v1562_v43  ;;  %v1437_v37 = vadd.f32 %v1309_v31, %v4505_v49  ;;  %v4940_v26 = vmul.f32 %v1080_v63, %v4906_v4  ;;  %v5950_v36 = vld [vmem:[#allocation72_spill] sm:$0xff]  ;;  %v5951_v63 = vld [vmem:[#allocation27_spill] sm:$0xff]  ;;  %v5952_v31 = vld [vmem:[#allocation73_spill] sm:$0xff] }
 0x1bf   : > { %v1943_v54 = vmul.f32 %v1815_v52, %v4870_v42  ;;  %v1814_v21 = vadd.f32 1.0, %v2986_v23  ;;  %v4943_v22 = vmul.f32 %v1082_v24, %v4910_v41  ;;  %v1311_v44 = vmul.f32 %v4584_v32, %v4535_v40  ;;  %v5953_v24 = vld [vmem:[#allocation14_spill] sm:$0xff] }
 0x1c0   : > { %v1940_v13 = vmul.f32 %v1812_v58, %v916_v51  ;;  %5947 = vst [vmem:[#allocation4_spill] sm:$0xff] %v4940_v26  ;;  %v4948_v42 = vmul.f32 %v1081_v33, %v4916_v57  ;;  %v1565_v43 = vmul.f32 0.7978846, %v1437_v37  ;;  %v1308_v52 = vmul.f32 %v5950_v36, %v4495_v25  ;;  %v5955_v32 = vld [vmem:[#allocation22_spill] sm:$0xff] }
 0x1c1   : > { %5948 = vst [vmem:[#allocation59_spill] sm:$0xff] %v4943_v22  ;;  %2442 = vmatprep.mubr.f32.mxu0 %v1943_v54  ;;  %v1942_v30 = vmul.f32 %v1814_v21, %v918_v20  ;;  %v1439_v51 = vadd.f32 %v1311_v44, %v4535_v40  ;;  %v1310_v23 = vmul.f32 %v5952_v31, %v5951_v63  ;;  %v1083_v54 = vmul.f32 0.044715, %v4936_v55  ;;  %v5958_v22 = vld [vmem:[#allocation25_spill] sm:$0xff] }
 0x1c2   : > { %5949 = vst [vmem:[#allocation57_spill] sm:$0xff] %v4948_v42  ;;  %2218 = vmatmul.mubr.f32.gmra.mrb[92].mxu1 %v1940_v13  ;;  %v4957_v58 = vadd.f32 %v5953_v24, %v3704_v45  ;;  %v4961_v20 = vadd.f32 %v5955_v32, %v3706_v46  ;;  %v2988_v33 = vpop.eup %2987  ;;  %2995 = vtanh.f32 %v1565_v43  ;;  %v1436_v21 = vadd.f32 %v1308_v52, %v4495_v25  ;;  %v5959_v43 = vld [vmem:[#allocation36_spill] sm:$0xff] }
 0x1c3   : > { %2443 = vmatmul.mubr.f32.gmra.mrb[92].mxu0 %v1942_v30  ;;  %v4967_v37 = vadd.f32 %v5957_v2, %v3708_v47  ;;  %v1817_v13 = vadd.f32 1.0, %v2988_v33  ;;  %v925_v44 = vmul.f32 0.5, %v4505_v49  ;;  %v1567_v36 = vmul.f32 0.7978846, %v1439_v51 }
 0x1c4   : > { %5954 = vst [vmem:[#allocation10_spill] sm:$0xff] %v4957_v58  ;;  %5956 = vst [vmem:[#allocation20_spill] sm:$0xff] %v4961_v20  ;;  %v1438_v31 = vadd.f32 %v1310_v23, %v5951_v63  ;;  %v4972_v24 = vmul.f32 0.5, %v4535_v40  ;;  %v1564_v32 = vmul.f32 0.7978846, %v1436_v21  ;;  %v1313_v41 = vmul.f32 %v5959_v43, %v5958_v22 }
 0x1c5   : > { %v1084_v30 = vmul.f32 0.044715, %v4957_v58  ;;  %v2990_v52 = vpop.eup %2989  ;;  %v1945_v26 = vmul.f32 %v1817_v13, %v921_v39  ;;  %2997 = vtanh.f32 %v1567_v36  ;;  %v1086_v33 = vmul.f32 0.044715, %v4961_v20  ;;  %v5960_v36 = vld [vmem:[#allocation23_spill] sm:$0xff] }
 0x1c6   : > { %v1566_v2 = vmul.f32 0.7978846, %v1438_v31  ;;  %v2992_v4 = vpop.eup %2991  ;;  %v1819_v49 = vadd.f32 1.0, %v2990_v52  ;;  %v4979_v51 = vmul.f32 %v1083_v54, %v4936_v55  ;;  %2999 = vtanh.f32 %v1564_v32 }
 0x1c7   : > { %v1085_v40 = vmul.f32 0.044715, %v4967_v37  ;;  %2222 = vmatprep.mubr.f32.mxu1 %v1945_v26  ;;  %v1816_v21 = vadd.f32 1.0, %v2992_v4  ;;  %v924_v42 = vmul.f32 0.5, %v4495_v25  ;;  %v926_v43 = vmul.f32 0.5, %v5951_v63 }
 0x1c8   : > { %v2994_v23 = vpop.eup %2993  ;;  %3001 = vtanh.f32 %v1566_v2  ;;  %v1947_v39 = vmul.f32 %v1819_v49, %v4921_v5  ;;  %v4987_v31 = vadd.f32 %v5960_v36, %v3710_v48  ;;  %v1441_v54 = vadd.f32 %v1313_v41, %v5958_v22  ;;  %v5963_v2 = vld [vmem:[#allocation28_spill] sm:$0xff]  ;;  %v5964_v49 = vld [vmem:[#allocation50_spill] sm:$0xff]  ;;  %v5965_v41 = vld [vmem:[#allocation35_spill] sm:$0xff] }
 0x1c9   : > { %v1818_v13 = vadd.f32 1.0, %v2994_v23  ;;  %v1944_v32 = vmul.f32 %v1816_v21, %v920_v27  ;;  %v4991_v52 = vmul.f32 %v1084_v30, %v4957_v58  ;;  %v4994_v4 = vmul.f32 %v1086_v33, %v4961_v20  ;;  %v5966_v30 = vld [vmem:[#allocation74_spill] sm:$0xff]  ;;  %v5967_v33 = vld [vmem:[#allocation63_spill] sm:$0xff] }
 0x1ca   : > { %v1315_v25 = vmul.f32 %v4646_v29, %v4598_v10  ;;  %2447 = vmatprep.mubr.f32.mxu0 %v1947_v39  ;;  %v4999_v5 = vmul.f32 %v1085_v40, %v4967_v37  ;;  %v1569_v63 = vmul.f32 0.7978846, %v1441_v54  ;;  %v1312_v23 = vmul.f32 %v5964_v49, %v5963_v2  ;;  %v5969_v29 = vld [vmem:[#allocation64_spill] sm:$0xff]  ;;  %v5971_v54 = vld [vmem:[#allocation65_spill] sm:$0xff] }
 0x1cb   : > { %5961 = vst [vmem:[#allocation8_spill] sm:$0xff] %v4991_v52  ;;  %5962 = vst [vmem:[#allocation17_spill] sm:$0xff] %v4994_v4  ;;  %v1946_v26 = vmul.f32 %v1818_v13, %v922_v19  ;;  %2223 = vmatmul.mubr.f32.gmra.mrb[94].mxu1 %v1944_v32  ;;  %v1314_v21 = vmul.f32 %v5966_v30, %v5965_v41  ;;  %v5008_v36 = vadd.f32 %v5967_v33, %v3704_v45 }
 0x1cc   : > { %v1443_v27 = vadd.f32 %v1315_v25, %v4598_v10  ;;  %v5012_v19 = vadd.f32 %v5969_v29, %v3706_v46  ;;  %v2996_v40 = vpop.eup %2995  ;;  %v1087_v39 = vmul.f32 0.044715, %v4987_v31  ;;  %3003 = vtanh.f32 %v1569_v63 }
 0x1cd   : > { %5968 = vst [vmem:[#allocation9_spill] sm:$0xff] %v5008_v36  ;;  %2448 = vmatmul.mubr.f32.gmra.mrb[94].mxu0 %v1946_v26  ;;  %v1440_v13 = vadd.f32 %v1312_v23, %v5963_v2  ;;  %v5018_v32 = vadd.f32 %v5971_v54, %v3708_v47  ;;  %v1821_v25 = vadd.f32 1.0, %v2996_v40  ;;  %v929_v49 = vmul.f32 0.5, %v5958_v22 }
 0x1ce   : > { %5970 = vst [vmem:[#allocation18_spill] sm:$0xff] %v5012_v19  ;;  %v1571_v30 = vmul.f32 0.7978846, %v1443_v27  ;;  %v1442_v33 = vadd.f32 %v1314_v21, %v5965_v41  ;;  %v5023_v29 = vmul.f32 0.5, %v4598_v10  ;;  %v1088_v26 = vmul.f32 0.044715, %v5008_v36 }
 0x1cf   : > { %5972 = vst [vmem:[#allocation16_spill] sm:$0xff] %v5018_v32  ;;  %v1568_v4 = vmul.f32 0.7978846, %v1440_v13  ;;  %v1317_v63 = vmul.f32 %v4673_v8, %v4630_v15  ;;  %v2998_v23 = vpop.eup %2997  ;;  %v1949_v20 = vmul.f32 %v1821_v25, %v925_v44  ;;  %v1090_v40 = vmul.f32 0.044715, %v5012_v19 }
 0x1d0   : > { %3005 = vtanh.f32 %v1571_v30  ;;  %v1570_v54 = vmul.f32 0.7978846, %v1442_v33  ;;  %v3000_v52 = vpop.eup %2999  ;;  %v1823_v22 = vadd.f32 1.0, %v2998_v23  ;;  %v5030_v27 = vmul.f32 %v1087_v39, %v4987_v31  ;;  %v5973_v30 = vld [vmem:[#allocation66_spill] sm:$0xff] }
 0x1d1   : > { %3007 = vtanh.f32 %v1568_v4  ;;  %v1089_v10 = vmul.f32 0.044715, %v5018_v32  ;;  %2227 = vmatprep.mubr.f32.mxu1 %v1949_v20  ;;  %v1820_v13 = vadd.f32 1.0, %v3000_v52  ;;  %v928_v58 = vmul.f32 0.5, %v5963_v2 }
 0x1d2   : > { %v3002_v21 = vpop.eup %3001  ;;  %v930_v8 = vmul.f32 0.5, %v5965_v41  ;;  %3009 = vtanh.f32 %v1570_v54  ;;  %v1951_v44 = vmul.f32 %v1823_v22, %v4972_v24  ;;  %v5038_v33 = vadd.f32 %v5973_v30, %v3710_v48  ;;  %v5977_v54 = vld [vmem:[#allocation43_spill] sm:$0xff]  ;;  %v5978_v22 = vld [vmem:[#allocation42_spill] sm:$0xff] }
 0x1d3   : > { %v1822_v25 = vadd.f32 1.0, %v3002_v21  ;;  %v1445_v39 = vadd.f32 %v1317_v63, %v4630_v15  ;;  %v1948_v4 = vmul.f32 %v1820_v13, %v924_v42  ;;  %v5042_v23 = vmul.f32 %v1088_v26, %v5008_v36  ;;  %v5979_v26 = vld [vmem:[#allocation31_spill] sm:$0xff]  ;;  %v5980_v63 = vld [vmem:[#allocation6_spill] sm:$0xff] }
 0x1d4   : > { %v5045_v20 = vmul.f32 %v1090_v40, %v5012_v19  ;;  %v1319_v52 = vmul.f32 %v4708_v6, %v4660_v16  ;;  %2452 = vmatprep.mubr.f32.mxu0 %v1951_v44  ;;  %v5050_v24 = vmul.f32 %v1089_v10, %v5018_v32  ;;  %v1316_v21 = vmul.f32 %v5978_v22, %v5977_v54  ;;  %v5981_v40 = vld [vmem:[#allocation67_spill] sm:$0xff]  ;;  %v5983_v6 = vld [vmem:[#allocation69_spill] sm:$0xff]  ;;  %v5986_v19 = vld [vmem:[#allocation40_spill] sm:$0xff] }
 0x1d5   : > { %5974 = vst [vmem:[#allocation68_spill] sm:$0xff] %v5042_v23  ;;  %v1950_v2 = vmul.f32 %v1822_v25, %v926_v43  ;;  %v1573_v41 = vmul.f32 0.7978846, %v1445_v39  ;;  %2228 = vmatmul.mubr.f32.gmra.mrb[96].mxu1 %v1948_v4  ;;  %v1318_v13 = vmul.f32 %v5980_v63, %v5979_v26  ;;  %v5059_v30 = vadd.f32 %v5981_v40, %v3704_v45  ;;  %v5985_v39 = vld [vmem:[#allocation70_spill] sm:$0xff] }
 0x1d6   : > { %5975 = vst [vmem:[#allocation24_spill] sm:$0xff] %v5045_v20  ;;  %5976 = vst [vmem:[#allocation60_spill] sm:$0xff] %v5050_v24  ;;  %v1447_v42 = vadd.f32 %v1319_v52, %v4660_v16  ;;  %v5063_v43 = vadd.f32 %v5983_v6, %v3706_v46  ;;  %v3004_v10 = vpop.eup %3003  ;;  %v1091_v44 = vmul.f32 0.044715, %v5038_v33  ;;  %v1444_v25 = vadd.f32 %v1316_v21, %v5977_v54 }
 0x1d7   : > { %5982 = vst [vmem:[#allocation61_spill] sm:$0xff] %v5059_v30  ;;  %2453 = vmatmul.mubr.f32.gmra.mrb[96].mxu0 %v1950_v2  ;;  %3011 = vtanh.f32 %v1573_v41  ;;  %v5069_v4 = vadd.f32 %v5985_v39, %v3708_v47  ;;  %v1825_v52 = vadd.f32 1.0, %v3004_v10  ;;  %v933_v22 = vmul.f32 0.5, %v4630_v15  ;;  %v5987_v41 = vld [vmem:[#allocation49_spill] sm:$0xff] }
 0x1d8   : > { %5984 = vst [vmem:[#allocation62_spill] sm:$0xff] %v5063_v43  ;;  %v1575_v63 = vmul.f32 0.7978846, %v1447_v42  ;;  %v1446_v40 = vadd.f32 %v1318_v13, %v5979_v26  ;;  %v5074_v6 = vmul.f32 0.5, %v4660_v16  ;;  %v1572_v20 = vmul.f32 0.7978846, %v1444_v25 }
 0x1d9   : > { %v1092_v2 = vmul.f32 0.044715, %v5059_v30  ;;  %v1321_v23 = vmul.f32 %v5987_v41, %v5986_v19  ;;  %v1953_v36 = vmul.f32 %v1825_v52, %v929_v49  ;;  %v1094_v10 = vmul.f32 0.044715, %v5063_v43 }
 0x1da   : > { %v3006_v21 = vpop.eup %3005  ;;  %3013 = vtanh.f32 %v1575_v63  ;;  %v1574_v39 = vmul.f32 0.7978846, %v1446_v40  ;;  %v5081_v42 = vmul.f32 %v1091_v44, %v5038_v33  ;;  %v1093_v16 = vmul.f32 0.044715, %v5069_v4  ;;  %v5988_v63 = vld [vmem:[#allocation19_spill] sm:$0xff] }
 0x1db   : > { %v3008_v24 = vpop.eup %3007  ;;  %v1827_v15 = vadd.f32 1.0, %v3006_v21  ;;  %3015 = vtanh.f32 %v1572_v20  ;;  %2232 = vmatprep.mubr.f32.mxu1 %v1953_v36  ;;  %v932_v32 = vmul.f32 0.5, %v5977_v54  ;;  %v934_v41 = vmul.f32 0.5, %v5979_v26 }
 0x1dc   : > { %v3010_v13 = vpop.eup %3009  ;;  %v1824_v25 = vadd.f32 1.0, %v3008_v24  ;;  %3017 = vtanh.f32 %v1574_v39  ;;  %v5089_v40 = vadd.f32 %v5988_v63, %v3710_v48  ;;  %v1449_v44 = vadd.f32 %v1321_v23, %v5986_v19  ;;  %v5991_v39 = vld [vmem:[#allocation44_spill] sm:$0xff]  ;;  %v5993_v23 = vld [vmem:[#allocation47_spill] sm:$0xff] }
 0x1dd   : > { %v1955_v49 = vmul.f32 %v1827_v15, %v5023_v29  ;;  %v1826_v52 = vadd.f32 1.0, %v3010_v13  ;;  %v5093_v21 = vmul.f32 %v1092_v2, %v5059_v30  ;;  %v5096_v36 = vmul.f32 %v1094_v10, %v5063_v43  ;;  %v5992_v15 = vld [vmem:[#allocation3_spill] sm:$0xff]  ;;  %v5994_v2 = vld [vmem:[#allocation12_spill] sm:$0xff]  ;;  %v5995_v10 = vld [vmem:[#allocation21_spill] sm:$0xff] }
 0x1de   : > { %v1952_v20 = vmul.f32 %v1824_v25, %v928_v58  ;;  %v1323_v24 = vmul.f32 %v4770_v9, %v4722_v3  ;;  %v5101_v29 = vmul.f32 %v1093_v16, %v5069_v4  ;;  %v1577_v26 = vmul.f32 0.7978846, %v1449_v44  ;;  %v5997_v9 = vld [vmem:[#allocation29_spill] sm:$0xff]  ;;  %v5999_v44 = vld [vmem:[#allocation34_spill] sm:$0xff] }
 0x1df   : > { %5989 = vst [vmem:[#allocation72_spill] sm:$0xff] %v5093_v21  ;;  %5990 = vst [vmem:[#allocation27_spill] sm:$0xff] %v5096_v36  ;;  %2457 = vmatprep.mubr.f32.mxu0 %v1955_v49  ;;  %v1954_v54 = vmul.f32 %v1826_v52, %v930_v8  ;;  %v1320_v13 = vmul.f32 %v5992_v15, %v5991_v39  ;;  %v1322_v25 = vmul.f32 %v5994_v2, %v5993_v23 }
 0x1e0   : > { %2233 = vmatmul.mubr.f32.gmra.mrb[98].mxu1 %v1952_v20  ;;  %v1451_v58 = vadd.f32 %v1323_v24, %v4722_v3  ;;  %v5110_v63 = vadd.f32 %v5995_v10, %v3704_v45  ;;  %v5114_v8 = vadd.f32 %v5997_v9, %v3706_v46  ;;  %v1095_v49 = vmul.f32 0.044715, %v5089_v40 }
 0x1e1   : > { %v3012_v16 = vpop.eup %3011  ;;  %2458 = vmatmul.mubr.f32.gmra.mrb[98].mxu0 %v1954_v54  ;;  %3019 = vtanh.f32 %v1577_v26  ;;  %v1448_v52 = vadd.f32 %v1320_v13, %v5991_v39  ;;  %v5120_v20 = vadd.f32 %v5999_v44, %v3708_v47  ;;  %v937_v15 = vmul.f32 0.5, %v5986_v19 }
 0x1e2   : > { %5996 = vst [vmem:[#allocation73_spill] sm:$0xff] %v5110_v63  ;;  %5998 = vst [vmem:[#allocation14_spill] sm:$0xff] %v5114_v8  ;;  %v1829_v24 = vadd.f32 1.0, %v3012_v16  ;;  %v1579_v2 = vmul.f32 0.7978846, %v1451_v58  ;;  %v1450_v10 = vadd.f32 %v1322_v25, %v5993_v23  ;;  %v5125_v9 = vmul.f32 0.5, %v4722_v3 }
 0x1e3   : > { %v1576_v36 = vmul.f32 0.7978846, %v1448_v52  ;;  %v1096_v54 = vmul.f32 0.044715, %v5110_v63  ;;  %v1325_v26 = vmul.f32 %v4795_v7, %v4754_v28  ;;  %v1098_v16 = vmul.f32 0.044715, %v5114_v8 }
 0x1e4   : > { %v3014_v13 = vpop.eup %3013  ;;  %v1957_v43 = vmul.f32 %v1829_v24, %v933_v22  ;;  %3021 = vtanh.f32 %v1579_v2  ;;  %v1578_v44 = vmul.f32 0.7978846, %v1450_v10  ;;  %v5132_v58 = vmul.f32 %v1095_v49, %v5089_v40  ;;  %v6000_v2 = vld [vmem:[#allocation71_spill] sm:$0xff] }
 0x1e5   : > { %v3016_v21 = vpop.eup %3015  ;;  %v1831_v19 = vadd.f32 1.0, %v3014_v13  ;;  %3023 = vtanh.f32 %v1576_v36  ;;  %v1097_v3 = vmul.f32 0.044715, %v5120_v20  ;;  %v936_v30 = vmul.f32 0.5, %v5991_v39 }
 0x1e6   : > { %v3018_v25 = vpop.eup %3017  ;;  %2237 = vmatprep.mubr.f32.mxu1 %v1957_v43  ;;  %v1828_v52 = vadd.f32 1.0, %v3016_v21  ;;  %v938_v7 = vmul.f32 0.5, %v5993_v23  ;;  %3025 = vtanh.f32 %v1578_v44  ;;  %v5140_v10 = vadd.f32 %v6000_v2, %v3710_v48  ;;  %v6003_v44 = vld [vmem:[#allocation53_spill] sm:$0xff] }
 0x1e7   : > { %v1959_v22 = vmul.f32 %v1831_v19, %v5074_v6  ;;  %v1830_v24 = vadd.f32 1.0, %v3018_v25  ;;  %v1453_v49 = vadd.f32 %v1325_v26, %v4754_v28  ;;  %v5144_v13 = vmul.f32 %v1096_v54, %v5110_v63  ;;  %v6004_v19 = vld [vmem:[#allocation54_spill] sm:$0xff]  ;;  %v6006_v26 = vld [vmem:[#allocation55_spill] sm:$0xff] }
 0x1e8   : > { %v1956_v36 = vmul.f32 %v1828_v52, %v932_v32  ;;  %v5147_v43 = vmul.f32 %v1098_v16, %v5114_v8  ;;  %v1327_v21 = vmul.f32 %v4826_v12, %v4782_v60  ;;  %v5152_v6 = vmul.f32 %v1097_v3, %v5120_v20  ;;  %v6005_v54 = vld [vmem:[#allocation2_spill] sm:$0xff] }
 0x1e9   : > { %6001 = vst [vmem:[#allocation22_spill] sm:$0xff] %v5144_v13  ;;  %2462 = vmatprep.mubr.f32.mxu0 %v1959_v22  ;;  %v1958_v39 = vmul.f32 %v1830_v24, %v934_v41  ;;  %v1581_v23 = vmul.f32 0.7978846, %v1453_v49  ;;  %v1324_v25 = vmul.f32 %v6004_v19, %v6003_v44  ;;  %v1326_v52 = vmul.f32 %v6006_v26, %v6005_v54  ;;  %v6007_v16 = vld [vmem:[#allocation30_spill] sm:$0xff]  ;;  %v6009_v49 = vld [vmem:[#allocation33_spill] sm:$0xff] }
 0x1ea   : > { %6002 = vst [vmem:[#allocation15_spill] sm:$0xff] %v5147_v43  ;;  %2238 = vmatmul.mubr.f32.gmra.mrb[100].mxu1 %v1956_v36  ;;  %v1455_v32 = vadd.f32 %v1327_v21, %v4782_v60  ;;  %v5161_v2 = vadd.f32 %v6007_v16, %v3704_v45  ;;  %v6008_v12 = vld [vmem:[#allocation26_spill] sm:$0xff]  ;;  %v1099_v22 = vmul.f32 0.044715, %v5140_v10  ;;  %v5171_v36 = vadd.f32 %v6009_v49, %v3708_v47 }
 0x1eb   : > { %v5165_v41 = vadd.f32 %v6008_v12, %v3706_v46  ;;  %v3020_v3 = vpop.eup %3019  ;;  %2463 = vmatmul.mubr.f32.gmra.mrb[100].mxu0 %v1958_v39  ;;  %3027 = vtanh.f32 %v1581_v23  ;;  %v1452_v24 = vadd.f32 %v1324_v25, %v6003_v44  ;;  %v941_v19 = vmul.f32 0.5, %v4754_v28 }
 0x1ec   : > { %v1833_v21 = vadd.f32 1.0, %v3020_v3  ;;  %v1583_v26 = vmul.f32 0.7978846, %v1455_v32  ;;  %v1454_v16 = vadd.f32 %v1326_v52, %v6005_v54  ;;  %v5176_v12 = vmul.f32 0.5, %v4782_v60 }
 0x1ed   : > { %v1580_v43 = vmul.f32 0.7978846, %v1452_v24  ;;  %v1100_v39 = vmul.f32 0.044715, %v5161_v2  ;;  %v1329_v23 = vmul.f32 %v4846_v34, %v4814_v14  ;;  %v1102_v3 = vmul.f32 0.044715, %v5165_v41 }
 0x1ee   : > { %v3022_v25 = vpop.eup %3021  ;;  %v1961_v8 = vmul.f32 %v1833_v21, %v937_v15  ;;  %3029 = vtanh.f32 %v1583_v26  ;;  %v1582_v49 = vmul.f32 0.7978846, %v1454_v16  ;;  %v5183_v32 = vmul.f32 %v1099_v22, %v5140_v10  ;;  %v6010_v26 = vld [vmem:[#allocation39_spill] sm:$0xff] }
 0x1ef   : > { %v3024_v13 = vpop.eup %3023  ;;  %v1835_v28 = vadd.f32 1.0, %v3022_v25  ;;  %3031 = vtanh.f32 %v1580_v43  ;;  %v1101_v60 = vmul.f32 0.044715, %v5171_v36  ;;  %v940_v63 = vmul.f32 0.5, %v6003_v44 }
 0x1f0   : > { %v3026_v52 = vpop.eup %3025  ;;  %2242 = vmatprep.mubr.f32.mxu1 %v1961_v8  ;;  %v1832_v24 = vadd.f32 1.0, %v3024_v13  ;;  %v942_v34 = vmul.f32 0.5, %v6005_v54  ;;  %3033 = vtanh.f32 %v1582_v49  ;;  %v5191_v16 = vadd.f32 %v6010_v26, %v3710_v48 }
 0x1f1   : > { %v1963_v15 = vmul.f32 %v1835_v28, %v5125_v9  ;;  %v1834_v21 = vadd.f32 1.0, %v3026_v52  ;;  %v1457_v22 = vadd.f32 %v1329_v23, %v4814_v14  ;;  %v5195_v25 = vmul.f32 %v1100_v39, %v5161_v2  ;;  %v6011_v23 = vld [vmem:[#allocation37_spill] sm:$0xff]  ;;  %v6014_v52 = vld [vmem:[#allocation38_spill] sm:$0xff] }
 0x1f2   : > { %v1960_v43 = vmul.f32 %v1832_v24, %v936_v30  ;;  %v5198_v8 = vmul.f32 %v1102_v3, %v5165_v41  ;;  %v1331_v13 = vmul.f32 %v4877_v0, %v4834_v35  ;;  %v5203_v9 = vmul.f32 %v1101_v60, %v5171_v36  ;;  %v6012_v0 = vld [vmem:[#allocation32_spill] sm:$0xff] }
 0x1f3   : > { %2467 = vmatprep.mubr.f32.mxu0 %v1963_v15  ;;  %v1962_v44 = vmul.f32 %v1834_v21, %v938_v7  ;;  %v1585_v54 = vmul.f32 0.7978846, %v1457_v22  ;;  %v1328_v49 = vmul.f32 %v4838_v50, %v4804_v38  ;;  %v1330_v39 = vmul.f32 %v4841_v62, %v4808_v18 }
 0x1f4   : > { %2243 = vmatmul.mubr.f32.gmra.mrb[102].mxu1 %v1960_v43  ;;  %v1459_v30 = vadd.f32 %v1331_v13, %v4834_v35  ;;  %v5212_v3 = vadd.f32 %v6011_v23, %v3704_v45  ;;  %v5216_v7 = vadd.f32 %v6012_v0, %v3706_v46  ;;  %v1103_v60 = vmul.f32 0.044715, %v5191_v16 }
 0x1f5   : > { %v3028_v28 = vpop.eup %3027  ;;  %2468 = vmatmul.mubr.f32.gmra.mrb[102].mxu0 %v1962_v44  ;;  %3035 = vtanh.f32 %v1585_v54  ;;  %v1456_v50 = vadd.f32 %v1328_v49, %v4804_v38  ;;  %v5222_v24 = vadd.f32 %v6014_v52, %v3708_v47  ;;  %v945_v15 = vmul.f32 0.5, %v4814_v14 }
 0x1f6   : > { %6013 = vst [vmem:[#allocation25_spill] sm:$0xff] %v5216_v7  ;;  %v1837_v62 = vadd.f32 1.0, %v3028_v28  ;;  %v1587_v21 = vmul.f32 0.7978846, %v1459_v30  ;;  %v1458_v26 = vadd.f32 %v1330_v39, %v4808_v18  ;;  %v5227_v22 = vmul.f32 0.5, %v4834_v35 }
 0x1f7   : > { %v1584_v43 = vmul.f32 0.7978846, %v1456_v50  ;;  %v1104_v13 = vmul.f32 0.044715, %v5212_v3  ;;  %v1333_v44 = vmul.f32 %v4897_v56, %v4865_v53  ;;  %v1106_v0 = vmul.f32 0.044715, %v5216_v7 }
 0x1f8   : > { %v3030_v54 = vpop.eup %3029  ;;  %v1965_v49 = vmul.f32 %v1837_v62, %v941_v19  ;;  %3037 = vtanh.f32 %v1587_v21  ;;  %v1586_v23 = vmul.f32 0.7978846, %v1458_v26  ;;  %v5234_v30 = vmul.f32 %v1103_v60, %v5191_v16  ;;  %v6015_v21 = vld [vmem:[#allocation51_spill] sm:$0xff] }
 0x1f9   : > { %v3032_v28 = vpop.eup %3031  ;;  %v1839_v14 = vadd.f32 1.0, %v3030_v54  ;;  %3039 = vtanh.f32 %v1584_v43  ;;  %v1105_v35 = vmul.f32 0.044715, %v5222_v24  ;;  %v944_v52 = vmul.f32 0.5, %v4804_v38 }
 0x1fa   : > { %v3034_v39 = vpop.eup %3033  ;;  %2247 = vmatprep.mubr.f32.mxu1 %v1965_v49  ;;  %v1836_v50 = vadd.f32 1.0, %v3032_v28  ;;  %v5239_v56 = vmul.f32 0.5, %v4808_v18  ;;  %3041 = vtanh.f32 %v1586_v23  ;;  %v5244_v26 = vadd.f32 %v6015_v21, %v3710_v48  ;;  %v5255_v18 = vpop.f32.mrb[64].mxu1 }
 0x1fb   : > { %v1967_v19 = vmul.f32 %v1839_v14, %v5176_v12  ;;  %v1838_v62 = vadd.f32 1.0, %v3034_v39  ;;  %v1461_v60 = vadd.f32 %v1333_v44, %v4865_v53  ;;  %v5248_v54 = vmul.f32 %v1104_v13, %v5212_v3  ;;  %6017 = vst [vmem:[#allocation23_spill] sm:$0xff] %v5255_v18  ;;  %v2151_v44 = vpop.f32.mrb[65].mxu1 }
 0x1fc   : > { %v1964_v43 = vmul.f32 %v1836_v50, %v940_v63  ;;  %v5251_v49 = vmul.f32 %v1106_v0, %v5216_v7  ;;  %v1335_v38 = vmul.f32 %v4928_v17, %v4885_v11  ;;  %v5258_v23 = vmul.f32 %v1105_v35, %v5222_v24  ;;  %v6018_v0 = vld [vmem:[#allocation56_spill] sm:$0xff]  ;;  %v6019_v17 = vld [vmem:[#allocation45_spill] sm:$0xff] }
 0x1fd   : > { %2472 = vmatprep.mubr.f32.mxu0 %v1967_v19  ;;  %v1966_v12 = vmul.f32 %v1838_v62, %v942_v34  ;;  %v1589_v28 = vmul.f32 0.7978846, %v1461_v60  ;;  %v1332_v63 = vmul.f32 %v4889_v61, %v4855_v1  ;;  %v1334_v14 = vmul.f32 %v6018_v0, %v4859_v59  ;;  %v6020_v34 = vld [vmem:[#allocation41_spill] sm:$0xff]  ;;  %v6021_v62 = vld [vmem:[#allocation46_spill] sm:$0xff] }
 0x1fe   : > { %6016 = vst [vmem:[#allocation36_spill] sm:$0xff] %v5251_v49  ;;  %2248 = vmatmul.mubr.f32.gmra.mrb[104].mxu1 %v1964_v43  ;;  %v1463_v13 = vadd.f32 %v1335_v38, %v4885_v11  ;;  %v5267_v39 = vadd.f32 %v6019_v17, %v3704_v45  ;;  %v5271_v50 = vadd.f32 %v6020_v34, %v3706_v46  ;;  %v1107_v19 = vmul.f32 0.044715, %v5244_v26 }
 0x1ff   : > { %v3036_v35 = vpop.eup %3035  ;;  %2473 = vmatmul.mubr.f32.gmra.mrb[104].mxu0 %v1966_v12  ;;  %3043 = vtanh.f32 %v1589_v28  ;;  %v1460_v61 = vadd.f32 %v1332_v63, %v4855_v1  ;;  %v5277_v21 = vadd.f32 %v6021_v62, %v3708_v47  ;;  %v949_v43 = vmul.f32 0.5, %v4865_v53  ;;  %v6022_v28 = vld [vmem:[#allocation57_spill] sm:$0xff] }
 0x200   : > { %v1841_v60 = vadd.f32 1.0, %v3036_v35  ;;  %v1591_v38 = vmul.f32 0.7978846, %v1463_v13  ;;  %v1462_v44 = vadd.f32 %v1334_v14, %v4859_v59  ;;  %v5282_v0 = vmul.f32 0.5, %v4885_v11 }
 0x201   : > { %v1588_v17 = vmul.f32 0.7978846, %v1460_v61  ;;  %v1108_v12 = vmul.f32 0.044715, %v5267_v39  ;;  %v1337_v34 = vmul.f32 %v6022_v28, %v4916_v57  ;;  %v1110_v35 = vmul.f32 0.044715, %v5271_v50 }
 0x202   : > { %v3038_v63 = vpop.eup %3037  ;;  %v1969_v18 = vmul.f32 %v1841_v60, %v945_v15  ;;  %3045 = vtanh.f32 %v1591_v38  ;;  %v1590_v62 = vmul.f32 0.7978846, %v1462_v44  ;;  %v5289_v13 = vmul.f32 %v1107_v19, %v5244_v26  ;;  %v6023_v38 = vld [vmem:[#allocation48_spill] sm:$0xff] }
 0x203   : > { %v3040_v49 = vpop.eup %3039  ;;  %v1843_v53 = vadd.f32 1.0, %v3038_v63  ;;  %3047 = vtanh.f32 %v1588_v17  ;;  %v1109_v11 = vmul.f32 0.044715, %v5277_v21  ;;  %v948_v7 = vmul.f32 0.5, %v4855_v1  ;;  %v5300_v17 = vpop.f32.mrb[64].mxu0 }
 0x204   : > { %v3042_v14 = vpop.eup %3041  ;;  %2252 = vmatprep.mubr.f32.mxu1 %v1969_v18  ;;  %v1840_v61 = vadd.f32 1.0, %v3040_v49  ;;  %v950_v28 = vmul.f32 0.5, %v4859_v59  ;;  %3049 = vtanh.f32 %v1590_v62  ;;  %v5297_v44 = vadd.f32 %v6023_v38, %v3710_v48  ;;  %6024 = vst [vmem:[#allocation28_spill] sm:$0xff] %v5300_v17  ;;  %v6030_v17 = vld [vmem:[#allocation5_spill] sm:$0xff] }
 0x205   : > { %v1971_v15 = vmul.f32 %v1843_v53, %v5227_v22  ;;  %v1842_v60 = vadd.f32 1.0, %v3042_v14  ;;  %v1465_v19 = vadd.f32 %v1337_v34, %v4916_v57  ;;  %v5303_v18 = vmul.f32 %v1108_v12, %v5267_v39  ;;  %v2376_v22 = vpop.f32.mrb[65].mxu0  ;;  %v6026_v53 = vld [vmem:[#allocation11_spill] sm:$0xff]  ;;  %v6027_v14 = vld [vmem:[#allocation4_spill] sm:$0xff] }
 0x206   : > { %v1968_v63 = vmul.f32 %v1840_v61, %v944_v52  ;;  %v5306_v1 = vmul.f32 %v1110_v35, %v5271_v50  ;;  %v1339_v59 = vmul.f32 %v4979_v51, %v4936_v55  ;;  %v5312_v62 = vmul.f32 %v1109_v11, %v5277_v21  ;;  %v6028_v61 = vld [vmem:[#allocation58_spill] sm:$0xff]  ;;  %v6029_v35 = vld [vmem:[#allocation59_spill] sm:$0xff] }
 0x207   : > { %2477 = vmatprep.mubr.f32.mxu0 %v1971_v15  ;;  %v1970_v49 = vmul.f32 %v1842_v60, %v5239_v56  ;;  %v1593_v34 = vmul.f32 0.7978846, %v1465_v19  ;;  %v1336_v52 = vmul.f32 %v6027_v14, %v6026_v53  ;;  %v1338_v38 = vmul.f32 %v6029_v35, %v6028_v61  ;;  %v6032_v15 = vld [vmem:[#allocation7_spill] sm:$0xff] }
 0x208   : > { %6025 = vst [vmem:[#allocation50_spill] sm:$0xff] %v5306_v1  ;;  %2253 = vmatmul.mubr.f32.gmra.mrb[106].mxu1 %v1968_v63  ;;  %v1467_v12 = vadd.f32 %v1339_v59, %v4936_v55  ;;  %v5321_v51 = vadd.f32 %v6030_v17, %v3704_v45  ;;  %v5325_v56 = vadd.f32 %v6032_v15, %v3706_v46  ;;  %v1111_v60 = vmul.f32 0.044715, %v5297_v44  ;;  %v6034_v63 = vld [vmem:[#allocation13_spill] sm:$0xff] }
 0x209   : > { %v3044_v11 = vpop.eup %3043  ;;  %2478 = vmatmul.mubr.f32.gmra.mrb[106].mxu0 %v1970_v49  ;;  %3051 = vtanh.f32 %v1593_v34  ;;  %v1464_v19 = vadd.f32 %v1336_v52, %v6026_v53  ;;  %v5331_v59 = vadd.f32 %v6034_v63, %v3708_v47  ;;  %v953_v14 = vmul.f32 0.5, %v4916_v57 }
 0x20a   : > { %6031 = vst [vmem:[#allocation35_spill] sm:$0xff] %v5321_v51  ;;  %6033 = vst [vmem:[#allocation74_spill] sm:$0xff] %v5325_v56  ;;  %v1845_v22 = vadd.f32 1.0, %v3044_v11  ;;  %v1595_v45 = vmul.f32 0.7978846, %v1467_v12  ;;  %v1466_v17 = vadd.f32 %v1338_v38, %v6028_v61  ;;  %v5336_v46 = vmul.f32 0.5, %v4936_v55 }
 0x20b   : > { %v1592_v35 = vmul.f32 0.7978846, %v1464_v19  ;;  %v1112_v49 = vmul.f32 0.044715, %v5321_v51  ;;  %v1341_v34 = vmul.f32 %v4999_v5, %v4967_v37  ;;  %v1114_v11 = vmul.f32 0.044715, %v5325_v56 }
 0x20c   : > { %v3046_v52 = vpop.eup %3045  ;;  %v1973_v15 = vmul.f32 %v1845_v22, %v949_v43  ;;  %3053 = vtanh.f32 %v1595_v45  ;;  %v1594_v47 = vmul.f32 0.7978846, %v1466_v17  ;;  %v5343_v12 = vmul.f32 %v1111_v60, %v5297_v44  ;;  %v6035_v5 = vld [vmem:[#allocation52_spill] sm:$0xff] }
 0x20d   : > { %v3048_v63 = vpop.eup %3047  ;;  %v1847_v57 = vadd.f32 1.0, %v3046_v52  ;;  %3055 = vtanh.f32 %v1592_v35  ;;  %v1113_v55 = vmul.f32 0.044715, %v5331_v59  ;;  %v952_v1 = vmul.f32 0.5, %v6026_v53 }
 0x20e   : > { %v3050_v38 = vpop.eup %3049  ;;  %2257 = vmatprep.mubr.f32.mxu1 %v1973_v15  ;;  %v1844_v19 = vadd.f32 1.0, %v3048_v63  ;;  %3057 = vtanh.f32 %v1594_v47  ;;  %v5349_v43 = vadd.f32 %v6035_v5, %v3710_v48  ;;  %v954_v17 = vmul.f32 0.5, %v6028_v61  ;;  %v6039_v63 = vld [vmem:[#allocation10_spill] sm:$0xff]  ;;  %v6040_v61 = vld [vmem:[#allocation8_spill] sm:$0xff] }
 0x20f   : > { %v1975_v22 = vmul.f32 %v1847_v57, %v5282_v0  ;;  %v1846_v45 = vadd.f32 1.0, %v3050_v38  ;;  %v1469_v60 = vadd.f32 %v1341_v34, %v4967_v37  ;;  %v5355_v52 = vmul.f32 %v1112_v49, %v5321_v51  ;;  %v6041_v34 = vld [vmem:[#allocation20_spill] sm:$0xff] }
 0x210   : > { %v1972_v35 = vmul.f32 %v1844_v19, %v948_v7  ;;  %v5358_v15 = vmul.f32 %v1114_v11, %v5325_v56  ;;  %v1343_v53 = vmul.f32 %v5030_v27, %v4987_v31  ;;  %v5363_v47 = vmul.f32 %v1113_v55, %v5331_v59  ;;  %v6042_v11 = vld [vmem:[#allocation17_spill] sm:$0xff]  ;;  %v6043_v19 = vld [vmem:[#allocation16_spill] sm:$0xff] }
 0x211   : > { %6036 = vst [vmem:[#allocation63_spill] sm:$0xff] %v5355_v52  ;;  %2482 = vmatprep.mubr.f32.mxu0 %v1975_v22  ;;  %v1974_v48 = vmul.f32 %v1846_v45, %v950_v28  ;;  %v1597_v0 = vmul.f32 0.7978846, %v1469_v60  ;;  %v1340_v57 = vmul.f32 %v6040_v61, %v6039_v63  ;;  %v1115_v7 = vmul.f32 0.044715, %v5349_v43  ;;  %v6044_v5 = vld [vmem:[#allocation60_spill] sm:$0xff] }
 0x212   : > { %6037 = vst [vmem:[#allocation64_spill] sm:$0xff] %v5358_v15  ;;  %6038 = vst [vmem:[#allocation65_spill] sm:$0xff] %v5363_v47  ;;  %2258 = vmatmul.mubr.f32.gmra.mrb[108].mxu1 %v1972_v35  ;;  %v1471_v49 = vadd.f32 %v1343_v53, %v4987_v31  ;;  %v1342_v38 = vmul.f32 %v6042_v11, %v6041_v34  ;;  %v1345_v27 = vmul.f32 %v6044_v5, %v6043_v19  ;;  %v5381_v11 = vpop.f32.mrb[66].mxu1  ;;  %v6047_v15 = vld [vmem:[#allocation68_spill] sm:$0xff] }
 0x213   : > { %v3052_v22 = vpop.eup %3051  ;;  %2483 = vmatmul.mubr.f32.gmra.mrb[108].mxu0 %v1974_v48  ;;  %v5374_v28 = vmul.f32 0.5, %v4967_v37  ;;  %3059 = vtanh.f32 %v1597_v0  ;;  %v1468_v55 = vadd.f32 %v1340_v57, %v6039_v63  ;;  %v1347_v45 = vmul.f32 %v5081_v42, %v5038_v33  ;;  %6045 = vst [vmem:[#allocation66_spill] sm:$0xff] %v5381_v11  ;;  %v6046_v0 = vld [vmem:[#allocation9_spill] sm:$0xff]  ;;  %v2156_v56 = vpop.f32.mrb[67].mxu1 }
 0x214   : > { %v1849_v60 = vadd.f32 1.0, %v3052_v22  ;;  %v1599_v35 = vmul.f32 0.7978846, %v1471_v49  ;;  %v1470_v53 = vadd.f32 %v1342_v38, %v6041_v34  ;;  %v1473_v61 = vadd.f32 %v1345_v27, %v6043_v19  ;;  %v5389_v38 = vpop.f32.mrb[66].mxu0  ;;  %v6048_v56 = vld [vmem:[#allocation18_spill] sm:$0xff] }
 0x215   : > { %v5384_v5 = vmul.f32 0.5, %v4987_v31  ;;  %v1596_v48 = vmul.f32 0.7978846, %v1468_v55  ;;  %v1475_v37 = vadd.f32 %v1347_v45, %v5038_v33  ;;  %v1344_v57 = vmul.f32 %v6047_v15, %v6046_v0  ;;  %v2381_v55 = vpop.f32.mrb[67].mxu0 }
 0x216   : > { %v3054_v52 = vpop.eup %3053  ;;  %v1977_v42 = vmul.f32 %v1849_v60, %v953_v14  ;;  %3061 = vtanh.f32 %v1599_v35  ;;  %v1598_v49 = vmul.f32 0.7978846, %v1470_v53  ;;  %v1601_v22 = vmul.f32 0.7978846, %v1473_v61  ;;  %v6049_v14 = vld [vmem:[#allocation24_spill] sm:$0xff] }
 0x217   : > { %v3056_v27 = vpop.eup %3055  ;;  %v1851_v51 = vadd.f32 1.0, %v3054_v52  ;;  %3063 = vtanh.f32 %v1596_v48  ;;  %v1603_v11 = vmul.f32 0.7978846, %v1475_v37  ;;  %v1472_v31 = vadd.f32 %v1344_v57, %v6046_v0 }
 0x218   : > { %v3058_v47 = vpop.eup %3057  ;;  %2262 = vmatprep.mubr.f32.mxu1 %v1977_v42  ;;  %v1848_v45 = vadd.f32 1.0, %v3056_v27  ;;  %v5393_v15 = vmul.f32 %v1115_v7, %v5349_v43  ;;  %3065 = vtanh.f32 %v1598_v49  ;;  %v1346_v60 = vmul.f32 %v6049_v14, %v6048_v56  ;;  %v6052_v27 = vld [vmem:[#allocation62_spill] sm:$0xff] }
 0x219   : > { %v1979_v35 = vmul.f32 %v1851_v51, %v5336_v46  ;;  %v1850_v53 = vadd.f32 1.0, %v3058_v47  ;;  %3067 = vtanh.f32 %v1601_v22  ;;  %v1600_v52 = vmul.f32 0.7978846, %v1472_v31  ;;  %v6050_v47 = vld [vmem:[#allocation61_spill] sm:$0xff] }
 0x21a   : > { %v1976_v61 = vmul.f32 %v1848_v45, %v952_v1  ;;  %v956_v48 = vmul.f32 0.5, %v6039_v63  ;;  %3069 = vtanh.f32 %v1603_v11  ;;  %v1474_v37 = vadd.f32 %v1346_v60, %v6048_v56  ;;  %v6051_v63 = vld [vmem:[#allocation72_spill] sm:$0xff]  ;;  %v5413_v55 = vpop.f32.mrb[68].mxu1 }
 0x21b   : > { %2487 = vmatprep.mubr.f32.mxu0 %v1979_v35  ;;  %v1978_v57 = vmul.f32 %v1850_v53, %v954_v17  ;;  %v958_v7 = vmul.f32 0.5, %v6041_v34  ;;  %3071 = vtanh.f32 %v1600_v52  ;;  %v1349_v42 = vmul.f32 %v5101_v29, %v5069_v4  ;;  %v6053_v29 = vld [vmem:[#allocation27_spill] sm:$0xff]  ;;  %v5417_v14 = vpop.f32.mrb[68].mxu0  ;;  %v2161_v60 = vpop.f32.mrb[69].mxu1 }
 0x21c   : > { %2263 = vmatmul.mubr.f32.gmra.mrb[110].mxu1 %v1976_v61  ;;  %v961_v51 = vmul.f32 0.5, %v6043_v19  ;;  %v1602_v46 = vmul.f32 0.7978846, %v1474_v37  ;;  %v1351_v1 = vmul.f32 %v5132_v58, %v5089_v40  ;;  %v1348_v11 = vmul.f32 %v6051_v63, %v6050_v47  ;;  %v2386_v52 = vpop.f32.mrb[69].mxu0 }
 0x21d   : > { %v3060_v49 = vpop.eup %3059  ;;  %2488 = vmatmul.mubr.f32.gmra.mrb[110].mxu0 %v1978_v57  ;;  %v963_v17 = vmul.f32 0.5, %v5038_v33  ;;  %v960_v34 = vmul.f32 0.5, %v6046_v0  ;;  %v1477_v22 = vadd.f32 %v1349_v42, %v5069_v4  ;;  %v1350_v31 = vmul.f32 %v6053_v29, %v6052_v27 }
 0x21e   : > { %v1853_v19 = vadd.f32 1.0, %v3060_v49  ;;  %3073 = vtanh.f32 %v1602_v46  ;;  %v1479_v58 = vadd.f32 %v1351_v1, %v5089_v40  ;;  %v1476_v45 = vadd.f32 %v1348_v11, %v6050_v47 }
 0x21f   : > { %v5420_v33 = vmul.f32 0.5, %v6048_v56  ;;  %v1605_v0 = vmul.f32 0.7978846, %v1477_v22  ;;  %v1478_v35 = vadd.f32 %v1350_v31, %v6052_v27  ;;  %v1353_v53 = vmul.f32 %v5152_v6, %v5120_v20 }
 0x220   : > { %v3062_v61 = vpop.eup %3061  ;;  %v1981_v37 = vmul.f32 %v1853_v19, %v5374_v28  ;;  %v1607_v57 = vmul.f32 0.7978846, %v1479_v58  ;;  %v1604_v42 = vmul.f32 0.7978846, %v1476_v45  ;;  %v1355_v46 = vmul.f32 %v5183_v32, %v5140_v10 }
 0x221   : > { %v3064_v1 = vpop.eup %3063  ;;  %v1855_v63 = vadd.f32 1.0, %v3062_v61  ;;  %3075 = vtanh.f32 %v1605_v0  ;;  %v1606_v56 = vmul.f32 0.7978846, %v1478_v35  ;;  %v1481_v11 = vadd.f32 %v1353_v53, %v5120_v20  ;;  %v6055_v61 = vld [vmem:[#allocation22_spill] sm:$0xff] }
 0x222   : > { %v3066_v49 = vpop.eup %3065  ;;  %2267 = vmatprep.mubr.f32.mxu1 %v1981_v37  ;;  %v1852_v22 = vadd.f32 1.0, %v3064_v1  ;;  %v5430_v6 = vmul.f32 0.5, %v5069_v4  ;;  %3077 = vtanh.f32 %v1607_v57  ;;  %v1483_v28 = vadd.f32 %v1355_v46, %v5140_v10  ;;  %v6054_v4 = vld [vmem:[#allocation73_spill] sm:$0xff] }
 0x223   : > { %v3068_v29 = vpop.eup %3067  ;;  %v1983_v31 = vmul.f32 %v1855_v63, %v5384_v5  ;;  %v1854_v19 = vadd.f32 1.0, %v3066_v49  ;;  %3079 = vtanh.f32 %v1604_v42  ;;  %v1609_v32 = vmul.f32 0.7978846, %v1481_v11  ;;  %v5437_v42 = vpop.f32.mrb[70].mxu1 }
 0x224   : > { %v3070_v58 = vpop.eup %3069  ;;  %v1980_v45 = vmul.f32 %v1852_v22, %v956_v48  ;;  %v1857_v60 = vadd.f32 1.0, %v3068_v29  ;;  %3081 = vtanh.f32 %v1606_v56  ;;  %v1611_v0 = vmul.f32 0.7978846, %v1483_v28  ;;  %v6057_v56 = vld [vmem:[#allocation15_spill] sm:$0xff]  ;;  %v5443_v49 = vpop.f32.mrb[70].mxu0 }
 0x225   : > { %v3072_v35 = vpop.eup %3071  ;;  %2492 = vmatprep.mubr.f32.mxu0 %v1983_v31  ;;  %v1982_v53 = vmul.f32 %v1854_v19, %v958_v7  ;;  %v1859_v52 = vadd.f32 1.0, %v3070_v58  ;;  %3083 = vtanh.f32 %v1609_v32  ;;  %v1352_v37 = vmul.f32 %v6055_v61, %v6054_v4  ;;  %v6056_v7 = vld [vmem:[#allocation14_spill] sm:$0xff]  ;;  %v2166_v22 = vpop.f32.mrb[71].mxu1 }
 0x226   : > { %2268 = vmatmul.mubr.f32.gmra.mrb[112].mxu1 %v1980_v45  ;;  %v1985_v57 = vmul.f32 %v1857_v60, %v961_v51  ;;  %v1856_v46 = vadd.f32 1.0, %v3072_v35  ;;  %v967_v5 = vmul.f32 0.5, %v5089_v40  ;;  %3085 = vtanh.f32 %v1611_v0 }
 0x227   : > { %2493 = vmatmul.mubr.f32.gmra.mrb[112].mxu0 %v1982_v53  ;;  %v1987_v48 = vmul.f32 %v1859_v52, %v963_v17  ;;  %v964_v1 = vmul.f32 0.5, %v6050_v47  ;;  %v1480_v63 = vadd.f32 %v1352_v37, %v6054_v4  ;;  %v1354_v11 = vmul.f32 %v6057_v56, %v6056_v7  ;;  %v2391_v47 = vpop.f32.mrb[71].mxu0 }
 0x228   : > { %v3074_v28 = vpop.eup %3073  ;;  %2272 = vmatprep.mubr.f32.mxu1 %v1985_v57  ;;  %v1984_v51 = vmul.f32 %v1856_v46, %v960_v34  ;;  %v966_v40 = vmul.f32 0.5, %v6052_v27  ;;  %v1357_v29 = vmul.f32 %v5203_v9, %v5171_v36  ;;  %v1359_v17 = vmul.f32 %v5234_v30, %v5191_v16 }
 0x229   : > { %2497 = vmatprep.mubr.f32.mxu0 %v1987_v48  ;;  %v1858_v31 = vadd.f32 1.0, %v3074_v28  ;;  %v969_v19 = vmul.f32 0.5, %v5120_v20  ;;  %v1608_v32 = vmul.f32 0.7978846, %v1480_v63  ;;  %v1482_v58 = vadd.f32 %v1354_v11, %v6056_v7 }
 0x22a   : > { %2273 = vmatmul.mubr.f32.gmra.mrb[114].mxu1 %v1984_v51  ;;  %v971_v45 = vmul.f32 0.5, %v5140_v10  ;;  %v1485_v34 = vadd.f32 %v1357_v29, %v5171_v36  ;;  %v1487_v27 = vadd.f32 %v1359_v17, %v5191_v16  ;;  %v1356_v9 = vmul.f32 %v5195_v25, %v5161_v2 }
 0x22b   : > { %v3076_v60 = vpop.eup %3075  ;;  %v1986_v30 = vmul.f32 %v1858_v31, %v5420_v33  ;;  %3087 = vtanh.f32 %v1608_v32  ;;  %v1610_v0 = vmul.f32 0.7978846, %v1482_v58  ;;  %v1358_v20 = vmul.f32 %v5198_v8, %v5165_v41 }
 0x22c   : > { %v3078_v35 = vpop.eup %3077  ;;  %v1861_v53 = vadd.f32 1.0, %v3076_v60  ;;  %v1613_v52 = vmul.f32 0.7978846, %v1485_v34  ;;  %v1615_v61 = vmul.f32 0.7978846, %v1487_v27  ;;  %v1484_v10 = vadd.f32 %v1356_v9, %v5161_v2  ;;  %v6058_v60 = vld [vmem:[#allocation25_spill] sm:$0xff] }
 0x22d   : > { %v3080_v37 = vpop.eup %3079  ;;  %2498 = vmatmul.mubr.f32.gmra.mrb[114].mxu0 %v1986_v30  ;;  %v1863_v57 = vadd.f32 1.0, %v3078_v35  ;;  %v968_v46 = vmul.f32 0.5, %v6054_v4  ;;  %3089 = vtanh.f32 %v1610_v0  ;;  %v1486_v25 = vadd.f32 %v1358_v20, %v5165_v41  ;;  %v6059_v30 = vld [vmem:[#allocation36_spill] sm:$0xff] }
 0x22e   : > { %v3082_v33 = vpop.eup %3081  ;;  %v1989_v48 = vmul.f32 %v1861_v53, %v5430_v6  ;;  %v1860_v63 = vadd.f32 1.0, %v3080_v37  ;;  %3091 = vtanh.f32 %v1613_v52  ;;  %v1612_v8 = vmul.f32 0.7978846, %v1484_v10  ;;  %v5467_v32 = vpop.f32.mrb[72].mxu1 }
 0x22f   : > { %v3084_v56 = vpop.eup %3083  ;;  %v1991_v11 = vmul.f32 %v1863_v57, %v967_v5  ;;  %v1862_v22 = vadd.f32 1.0, %v3082_v33  ;;  %3093 = vtanh.f32 %v1615_v61  ;;  %v1614_v28 = vmul.f32 0.7978846, %v1486_v25  ;;  %v5473_v27 = vpop.f32.mrb[72].mxu0 }
 0x230   : > { %v3086_v51 = vpop.eup %3085  ;;  %2277 = vmatprep.mubr.f32.mxu1 %v1989_v48  ;;  %v1988_v29 = vmul.f32 %v1860_v63, %v964_v1  ;;  %v1865_v17 = vadd.f32 1.0, %v3084_v56  ;;  %3095 = vtanh.f32 %v1612_v8  ;;  %v1361_v4 = vmul.f32 %v5258_v23, %v5222_v24  ;;  %v2171_v23 = vpop.f32.mrb[73].mxu1 }
 0x231   : > { %2502 = vmatprep.mubr.f32.mxu0 %v1991_v11  ;;  %v1990_v47 = vmul.f32 %v1862_v22, %v966_v40  ;;  %v1867_v31 = vadd.f32 1.0, %v3086_v51  ;;  %v970_v6 = vmul.f32 0.5, %v6056_v7  ;;  %3097 = vtanh.f32 %v1614_v28  ;;  %v2396_v0 = vpop.f32.mrb[73].mxu0 }
 0x232   : > { %2278 = vmatmul.mubr.f32.gmra.mrb[116].mxu1 %v1988_v29  ;;  %v1993_v5 = vmul.f32 %v1865_v17, %v969_v19  ;;  %v973_v58 = vmul.f32 0.5, %v5171_v36  ;;  %v1489_v34 = vadd.f32 %v1361_v4, %v5222_v24  ;;  %v1363_v1 = vmul.f32 %v5289_v13, %v5244_v26 }
 0x233   : > { %2503 = vmatmul.mubr.f32.gmra.mrb[116].mxu0 %v1990_v47  ;;  %v1995_v40 = vmul.f32 %v1867_v31, %v971_v45  ;;  %v975_v9 = vmul.f32 0.5, %v5191_v16  ;;  %v1360_v7 = vmul.f32 %v5248_v54, %v5212_v3  ;;  %v1362_v19 = vmul.f32 %v6059_v30, %v6058_v60 }
 0x234   : > { %2282 = vmatprep.mubr.f32.mxu1 %v1993_v5  ;;  %v972_v36 = vmul.f32 0.5, %v5161_v2  ;;  %v1617_v20 = vmul.f32 0.7978846, %v1489_v34  ;;  %v1491_v13 = vadd.f32 %v1363_v1, %v5244_v26  ;;  %v1365_v35 = vmul.f32 %v5312_v62, %v5277_v21 }
 0x235   : > { %v3088_v53 = vpop.eup %3087  ;;  %2507 = vmatprep.mubr.f32.mxu0 %v1995_v40  ;;  %v974_v16 = vmul.f32 0.5, %v5165_v41  ;;  %v1488_v45 = vadd.f32 %v1360_v7, %v5212_v3  ;;  %v1490_v54 = vadd.f32 %v1362_v19, %v6058_v60  ;;  %v1367_v52 = vmul.f32 %v5343_v12, %v5297_v44  ;;  %v6061_v7 = vld [vmem:[#allocation65_spill] sm:$0xff] }
 0x236   : > { %v1864_v61 = vadd.f32 1.0, %v3088_v53  ;;  %3099 = vtanh.f32 %v1617_v20  ;;  %v1619_v2 = vmul.f32 0.7978846, %v1491_v13  ;;  %v1493_v10 = vadd.f32 %v1365_v35, %v5277_v21  ;;  %v6062_v53 = vld [vmem:[#allocation35_spill] sm:$0xff] }
 0x237   : > { %v3090_v37 = vpop.eup %3089  ;;  %v5491_v57 = vmul.f32 0.5, %v5222_v24  ;;  %v1616_v62 = vmul.f32 0.7978846, %v1488_v45  ;;  %v1618_v25 = vmul.f32 0.7978846, %v1490_v54  ;;  %v1495_v41 = vadd.f32 %v1367_v52, %v5297_v44 }
 0x238   : > { %v3092_v33 = vpop.eup %3091  ;;  %v1992_v48 = vmul.f32 %v1864_v61, %v968_v46  ;;  %v1866_v63 = vadd.f32 1.0, %v3090_v37  ;;  %3101 = vtanh.f32 %v1619_v2  ;;  %v1621_v8 = vmul.f32 0.7978846, %v1493_v10  ;;  %v6064_v61 = vld [vmem:[#allocation74_spill] sm:$0xff]  ;;  %v6065_v2 = vld [vmem:[#allocation64_spill] sm:$0xff] }
 0x239   : > { %v3094_v56 = vpop.eup %3093  ;;  %v1869_v12 = vadd.f32 1.0, %v3092_v33  ;;  %3103 = vtanh.f32 %v1616_v62  ;;  %v1623_v11 = vmul.f32 0.7978846, %v1495_v41  ;;  %v1364_v22 = vmul.f32 %v5303_v18, %v5267_v39  ;;  %v6060_v18 = vld [vmem:[#allocation50_spill] sm:$0xff] }
 0x23a   : > { %v3096_v28 = vpop.eup %3095  ;;  %2283 = vmatmul.mubr.f32.gmra.mrb[118].mxu1 %v1992_v48  ;;  %v1994_v24 = vmul.f32 %v1866_v63, %v970_v6  ;;  %v1871_v51 = vadd.f32 1.0, %v3094_v56  ;;  %v979_v29 = vmul.f32 0.5, %v5244_v26  ;;  %3105 = vtanh.f32 %v1618_v25  ;;  %v5498_v31 = vpop.f32.mrb[74].mxu1  ;;  %v6066_v25 = vld [vmem:[#allocation23_spill] sm:$0xff] }
 0x23b   : > { %v3098_v17 = vpop.eup %3097  ;;  %v1997_v4 = vmul.f32 %v1869_v12, %v973_v58  ;;  %v1868_v46 = vadd.f32 1.0, %v3096_v28  ;;  %3107 = vtanh.f32 %v1621_v8  ;;  %v1492_v47 = vadd.f32 %v1364_v22, %v5267_v39  ;;  %v5502_v6 = vpop.f32.mrb[74].mxu0 }
 0x23c   : > { %2508 = vmatmul.mubr.f32.gmra.mrb[118].mxu0 %v1994_v24  ;;  %v1999_v5 = vmul.f32 %v1871_v51, %v975_v9  ;;  %v1870_v34 = vadd.f32 1.0, %v3098_v17  ;;  %3109 = vtanh.f32 %v1623_v11  ;;  %v1366_v1 = vmul.f32 %v6060_v18, %v5271_v50  ;;  %v2176_v23 = vpop.f32.mrb[75].mxu1  ;;  %v2401_v19 = vpop.f32.mrb[75].mxu0  ;;  %v6068_v17 = vld [vmem:[#allocation28_spill] sm:$0xff] }
 0x23d   : > { %2287 = vmatprep.mubr.f32.mxu1 %v1997_v4  ;;  %v1996_v26 = vmul.f32 %v1868_v46, %v972_v36  ;;  %v976_v58 = vmul.f32 0.5, %v5212_v3  ;;  %v1620_v40 = vmul.f32 0.7978846, %v1492_v47  ;;  %v1369_v30 = vmul.f32 %v6061_v7, %v5331_v59  ;;  %v5514_v36 = vld [vmem:[%s5623_s4] ss:$0 sm:$0xff] }
 0x23e   : > { %2512 = vmatprep.mubr.f32.mxu0 %v1999_v5  ;;  %v1998_v0 = vmul.f32 %v1870_v34, %v974_v16  ;;  %v978_v9 = vmul.f32 0.5, %v6058_v60  ;;  %v1494_v20 = vadd.f32 %v1366_v1, %v5271_v50  ;;  %v1371_v13 = vmul.f32 %v5393_v15, %v5349_v43  ;;  %v6063_v16 = vld [vmem:[#allocation63_spill] sm:$0xff] }
 0x23f   : > { %2288 = vmatmul.mubr.f32.gmra.mrb[120].mxu1 %v1996_v26  ;;  %v981_v3 = vmul.f32 0.5, %v5277_v21  ;;  %3111 = vtanh.f32 %v1620_v40  ;;  %v1497_v35 = vadd.f32 %v1369_v30, %v5331_v59  ;;  %v1368_v45 = vmul.f32 %v6063_v16, %v6062_v53 }
 0x240   : > { %v3100_v60 = vpop.eup %3099  ;;  %2513 = vmatmul.mubr.f32.gmra.mrb[120].mxu0 %v1998_v0  ;;  %v983_v54 = vmul.f32 0.5, %v5297_v44  ;;  %v1622_v52 = vmul.f32 0.7978846, %v1494_v20  ;;  %v1499_v15 = vadd.f32 %v1371_v13, %v5349_v43  ;;  %v1370_v10 = vmul.f32 %v6065_v2, %v6064_v61  ;;  %v6067_v44 = vld [vmem:[#allocation66_spill] sm:$0xff] }
 0x241   : > { %v1873_v37 = vadd.f32 1.0, %v3100_v60  ;;  %v1625_v62 = vmul.f32 0.7978846, %v1497_v35  ;;  %v1496_v21 = vadd.f32 %v1368_v45, %v6062_v53  ;;  %v2150_v41 = vadd.f32 %v5514_v36, %v6066_v25 }
 0x242   : > { %v3102_v33 = vpop.eup %3101  ;;  %3113 = vtanh.f32 %v1622_v52  ;;  %v1627_v48 = vmul.f32 0.7978846, %v1499_v15  ;;  %v1498_v63 = vadd.f32 %v1370_v10, %v6064_v61  ;;  %v2155_v8 = vadd.f32 %v5514_v36, %v6067_v44 }
 0x243   : > { %v3104_v56 = vpop.eup %3103  ;;  %v2001_v12 = vmul.f32 %v1873_v37, %v5491_v57  ;;  %v1875_v11 = vadd.f32 1.0, %v3102_v33  ;;  %3115 = vtanh.f32 %v1625_v62  ;;  %v1624_v22 = vmul.f32 0.7978846, %v1496_v21  ;;  %v2179_v34 = vpop.f32.mrb[76].mxu1 }
 0x244   : > { %v3106_v28 = vpop.eup %3105  ;;  %v1872_v24 = vadd.f32 1.0, %v3104_v56  ;;  %3117 = vtanh.f32 %v1627_v48  ;;  %v1626_v51 = vmul.f32 0.7978846, %v1498_v63  ;;  %v2375_v4 = vadd.f32 %v6068_v17, %v2150_v41  ;;  %v2404_v40 = vpop.f32.mrb[76].mxu0 }
 0x245   : > { %v3108_v46 = vpop.eup %3107  ;;  %2292 = vmatprep.mubr.f32.mxu1 %v2001_v12  ;;  %v2003_v47 = vmul.f32 %v1875_v11, %v979_v29  ;;  %v1874_v57 = vadd.f32 1.0, %v3106_v28  ;;  %3119 = vtanh.f32 %v1624_v22  ;;  %v2380_v5 = vadd.f32 %v5389_v38, %v2155_v8  ;;  %v2181_v7 = vpop.f32.mrb[77].mxu1 }
 0x246   : > { %v3110_v18 = vpop.eup %3109  ;;  %v2000_v1 = vmul.f32 %v1872_v24, %v976_v58  ;;  %v1877_v23 = vadd.f32 1.0, %v3108_v46  ;;  %3121 = vtanh.f32 %v1626_v51  ;;  %2533 = vst [vmem:[%s5536_s22] sm:$0xff] %v2375_v4  ;;  %v2160_v26 = vadd.f32 %v5514_v36, %v5413_v55  ;;  %v2406_v58 = vpop.f32.mrb[77].mxu0 }
 0x247   : > { %2517 = vmatprep.mubr.f32.mxu0 %v2003_v47  ;;  %v2002_v30 = vmul.f32 %v1874_v57, %v978_v9  ;;  %v1879_v19 = vadd.f32 1.0, %v3110_v18  ;;  %2534 = vst [vmem:[%s5536_s22 + $0x8] sm:$0xff] %v2380_v5  ;;  %v2165_v29 = vadd.f32 %v5514_v36, %v5437_v42  ;;  %v2170_v38 = vadd.f32 %v5514_v36, %v5467_v32 }
 0x248   : > { %2293 = vmatmul.mubr.f32.gmra.mrb[122].mxu1 %v2000_v1  ;;  %v2005_v0 = vmul.f32 %v1877_v23, %v981_v3  ;;  %v2385_v20 = vadd.f32 %v5417_v14, %v2160_v26  ;;  %v2175_v55 = vadd.f32 %v5514_v36, %v5498_v31  ;;  %v2180_v9 = vadd.f32 %v5514_v36, %v2179_v34 }
 0x249   : > { %v3112_v13 = vpop.eup %3111  ;;  %2518 = vmatmul.mubr.f32.gmra.mrb[122].mxu0 %v2002_v30  ;;  %v2007_v42 = vmul.f32 %v1879_v19, %v983_v54  ;;  %v2390_v35 = vadd.f32 %v5443_v49, %v2165_v29  ;;  %v2395_v32 = vadd.f32 %v5473_v27, %v2170_v38  ;;  %v980_v3 = vmul.f32 0.5, %v5267_v39 }
 0x24a   : > { %2297 = vmatprep.mubr.f32.mxu1 %v2005_v0  ;;  %v1876_v16 = vadd.f32 1.0, %v3112_v13  ;;  %2535 = vst [vmem:[%s5536_s22 + $0x10] sm:$0xff] %v2385_v20  ;;  %v2400_v14 = vadd.f32 %v5502_v6, %v2175_v55  ;;  %v2405_v45 = vadd.f32 %v2404_v40, %v2180_v9  ;;  %v982_v49 = vmul.f32 0.5, %v5271_v50 }
 0x24b   : > { %2522 = vmatprep.mubr.f32.mxu0 %v2007_v42  ;;  %2536 = vst [vmem:[%s5536_s22 + $0x18] sm:$0xff] %v2390_v35  ;;  %2537 = vst [vmem:[%s5536_s22 + $0x20] sm:$0xff] %v2395_v32  ;;  %v985_v39 = vmul.f32 0.5, %v5331_v59  ;;  %v987_v6 = vmul.f32 0.5, %v5349_v43  ;;  %v984_v41 = vmul.f32 0.5, %v6062_v53  ;;  %v986_v59 = vmul.f32 0.5, %v6064_v61 }
 0x24c   : > { %v3114_v31 = vpop.eup %3113  ;;  %v2004_v60 = vmul.f32 %v1876_v16, %v980_v3  ;;  %2538 = vst [vmem:[%s5536_s22 + $0x28] sm:$0xff] %v2400_v14  ;;  %2539 = vst [vmem:[%s5536_s22 + $0x30] sm:$0xff] %v2405_v45 }
 0x24d   : > { %v3116_v54 = vpop.eup %3115  ;;  %v1878_v52 = vadd.f32 1.0, %v3114_v31  ;;  %v2184_v62 = vpop.f32.mrb[78].mxu1 }
 0x24e   : > { %v3118_v27 = vpop.eup %3117  ;;  %2298 = vmatmul.mubr.f32.gmra.mrb[124].mxu1 %v2004_v60  ;;  %v1881_v15 = vadd.f32 1.0, %v3116_v54  ;;  %v2185_v50 = vadd.f32 %v5514_v36, %v2184_v62  ;;  %v2186_v63 = vpop.f32.mrb[79].mxu1 }
 0x24f   : > { %v3120_v2 = vpop.eup %3119  ;;  %v2006_v10 = vmul.f32 %v1878_v52, %v982_v49  ;;  %v1883_v37 = vadd.f32 1.0, %v3118_v27  ;;  %v2409_v48 = vpop.f32.mrb[78].mxu0 }
 0x250   : > { %v3122_v21 = vpop.eup %3121  ;;  %v2009_v25 = vmul.f32 %v1881_v15, %v985_v39  ;;  %v1880_v33 = vadd.f32 1.0, %v3120_v2  ;;  %v2411_v56 = vpop.f32.mrb[79].mxu0  ;;  %v2410_v12 = vadd.f32 %v2409_v48, %v2185_v50 }
 0x251   : > { %2523 = vmatmul.mubr.f32.gmra.mrb[124].mxu0 %v2006_v10  ;;  %v2011_v44 = vmul.f32 %v1883_v37, %v987_v6  ;;  %v1882_v8 = vadd.f32 1.0, %v3122_v21 }
 0x252   : > { %2302 = vmatprep.mubr.f32.mxu1 %v2009_v25  ;;  %v2008_v43 = vmul.f32 %v1880_v33, %v984_v41  ;;  %2540 = vst [vmem:[%s5536_s22 + $0x38] sm:$0xff] %v2410_v12 }
 0x253   : > { %2527 = vmatprep.mubr.f32.mxu0 %v2011_v44  ;;  %v2010_v11 = vmul.f32 %v1882_v8, %v986_v59 }
 0x254   : > { %2303 = vmatmul.mubr.f32.gmra.mrb[126].mxu1 %v2008_v43 }
 0x255   : > { %2528 = vmatmul.mubr.f32.gmra.mrb[126].mxu0 %v2010_v11 }
 0x258   : > { %v2189_v53 = vpop.f32.mrb[80].mxu1 }
 0x259   : > { %v2190_v22 = vadd.f32 %v5514_v36, %v2189_v53  ;;  %v2414_v28 = vpop.f32.mrb[80].mxu0  ;;  %v2191_v24 = vpop.f32.mrb[81].mxu1 }
 0x25a   : > { %v2416_v51 = vpop.f32.mrb[81].mxu0 }
 0x25b   : > { %v2415_v61 = vadd.f32 %v2414_v28, %v2190_v22 }
 0x25d   : > { %2541 = vst [vmem:[%s5536_s22 + $0x40] sm:$0xff] %v2415_v61 }
 0x262   : > { %v2194_v17 = vpop.f32.mrb[82].mxu1 }
 0x263   : > { %v2195_v4 = vadd.f32 %v5514_v36, %v2194_v17  ;;  %v2419_v46 = vpop.f32.mrb[82].mxu0  ;;  %v2196_v47 = vpop.f32.mrb[83].mxu1 }
 0x264   : > { %v2421_v57 = vpop.f32.mrb[83].mxu0 }
 0x265   : > { %v2420_v5 = vadd.f32 %v2419_v46, %v2195_v4 }
 0x267   : > { %2542 = vst [vmem:[%s5536_s22 + $0x48] sm:$0xff] %v2420_v5 }
 0x26c   : > { %v2199_v34 = vpop.f32.mrb[84].mxu1 }
 0x26d   : > { %v2200_v18 = vadd.f32 %v5514_v36, %v2199_v34  ;;  %v2424_v1 = vpop.f32.mrb[84].mxu0  ;;  %v2201_v23 = vpop.f32.mrb[85].mxu1 }
 0x26e   : > { %v2426_v26 = vpop.f32.mrb[85].mxu0 }
 0x26f   : > { %v2425_v40 = vadd.f32 %v2424_v1, %v2200_v18 }
 0x271   : > { %2543 = vst [vmem:[%s5536_s22 + $0x50] sm:$0xff] %v2425_v40 }
 0x276   : > { %v2204_v7 = vpop.f32.mrb[86].mxu1 }
 0x277   : > { %v2205_v30 = vadd.f32 %v5514_v36, %v2204_v7  ;;  %v2429_v19 = vpop.f32.mrb[86].mxu0  ;;  %v2206_v29 = vpop.f32.mrb[87].mxu1 }
 0x278   : > { %v2431_v38 = vpop.f32.mrb[87].mxu0 }
 0x279   : > { %v2430_v58 = vadd.f32 %v2429_v19, %v2205_v30 }
 0x27b   : > { %2544 = vst [vmem:[%s5536_s22 + $0x58] sm:$0xff] %v2430_v58 }
 0x280   : > { %v2209_v0 = vpop.f32.mrb[88].mxu1 }
 0x281   : > { %v2210_v20 = vadd.f32 %v5514_v36, %v2209_v0  ;;  %v2211_v9 = vpop.f32.mrb[89].mxu1 }
 0x282   : > { %v2434_v55 = vpop.f32.mrb[88].mxu0 }
 0x283   : > { %v2436_v13 = vpop.f32.mrb[89].mxu0  ;;  %v2435_v42 = vadd.f32 %v2434_v55, %v2210_v20 }
 0x285   : > { %2545 = vst [vmem:[%s5536_s22 + $0x60] sm:$0xff] %v2435_v42 }
 0x28b   : > { %v2214_v35 = vpop.f32.mrb[90].mxu1 }
 0x28c   : > { %v2215_v32 = vadd.f32 %v5514_v36, %v2214_v35  ;;  %v2439_v3 = vpop.f32.mrb[90].mxu0  ;;  %v2216_v16 = vpop.f32.mrb[91].mxu1 }
 0x28d   : > { %v2441_v14 = vpop.f32.mrb[91].mxu0 }
 0x28e   : > { %v2440_v45 = vadd.f32 %v2439_v3, %v2215_v32 }
 0x290   : > { %2546 = vst [vmem:[%s5536_s22 + $0x68] sm:$0xff] %v2440_v45 }
 0x295   : > { %v2219_v31 = vpop.f32.mrb[92].mxu1 }
 0x296   : > { %v2220_v60 = vadd.f32 %v5514_v36, %v2219_v31  ;;  %v2444_v54 = vpop.f32.mrb[92].mxu0  ;;  %v2221_v49 = vpop.f32.mrb[93].mxu1 }
 0x297   : > { %v2446_v52 = vpop.f32.mrb[93].mxu0 }
 0x298   : > { %v2445_v27 = vadd.f32 %v2444_v54, %v2220_v60 }
 0x29a   : > { %2547 = vst [vmem:[%s5536_s22 + $0x70] sm:$0xff] %v2445_v27 }
 0x29e   : > { %v2224_v39 = vpop.f32.mrb[94].mxu1 }
 0x29f   : > { %v2225_v15 = vadd.f32 %v5514_v36, %v2224_v39  ;;  %v2226_v10 = vpop.f32.mrb[95].mxu1 }
 0x2a0   : > { %v2449_v2 = vpop.f32.mrb[94].mxu0 }
 0x2a1   : > { %v2451_v6 = vpop.f32.mrb[95].mxu0  ;;  %v2450_v37 = vadd.f32 %v2449_v2, %v2225_v15 }
 0x2a3   : > { %2548 = vst [vmem:[%s5536_s22 + $0x78] sm:$0xff] %v2450_v37 }
 0x2a8   : > { %v2229_v62 = vpop.f32.mrb[96].mxu1 }
 0x2a9   : > { %v2230_v21 = vadd.f32 %v5514_v36, %v2229_v62  ;;  %v2231_v41 = vpop.f32.mrb[97].mxu1 }
 0x2aa   : > { %v2454_v25 = vpop.f32.mrb[96].mxu0 }
 0x2ab   : > { %v2456_v33 = vpop.f32.mrb[97].mxu0  ;;  %v2455_v50 = vadd.f32 %v2454_v25, %v2230_v21 }
 0x2ad   : > { %2549 = vst [vmem:[%s5536_s22 + $0x80] sm:$0xff] %v2455_v50 }
 0x2b3   : > { %v2234_v48 = vpop.f32.mrb[98].mxu1 }
 0x2b4   : > { %v2235_v63 = vadd.f32 %v5514_v36, %v2234_v48  ;;  %v2459_v44 = vpop.f32.mrb[98].mxu0  ;;  %v2236_v59 = vpop.f32.mrb[99].mxu1 }
 0x2b5   : > { %v2461_v8 = vpop.f32.mrb[99].mxu0 }
 0x2b6   : > { %v2460_v56 = vadd.f32 %v2459_v44, %v2235_v63 }
 0x2b8   : > { %2550 = vst [vmem:[%s5536_s22 + $0x88] sm:$0xff] %v2460_v56 }
 0x2bd   : > { %v2239_v43 = vpop.f32.mrb[100].mxu1 }
 0x2be   : > { %v2240_v12 = vadd.f32 %v5514_v36, %v2239_v43  ;;  %v2464_v11 = vpop.f32.mrb[100].mxu0  ;;  %v2241_v53 = vpop.f32.mrb[101].mxu1 }
 0x2bf   : > { %v2466_v22 = vpop.f32.mrb[101].mxu0 }
 0x2c0   : > { %v2465_v28 = vadd.f32 %v2464_v11, %v2240_v12 }
 0x2c2   : > { %2551 = vst [vmem:[%s5536_s22 + $0x90] sm:$0xff] %v2465_v28 }
 0x2c7   : > { %v2244_v24 = vpop.f32.mrb[102].mxu1 }
 0x2c8   : > { %v2245_v51 = vadd.f32 %v5514_v36, %v2244_v24  ;;  %v2469_v61 = vpop.f32.mrb[102].mxu0  ;;  %v2246_v17 = vpop.f32.mrb[103].mxu1 }
 0x2c9   : > { %v2471_v4 = vpop.f32.mrb[103].mxu0 }
 0x2ca   : > { %v2470_v46 = vadd.f32 %v2469_v61, %v2245_v51 }
 0x2cc   : > { %2552 = vst [vmem:[%s5536_s22 + $0x98] sm:$0xff] %v2470_v46 }
 0x2d1   : > { %v2249_v47 = vpop.f32.mrb[104].mxu1 }
 0x2d2   : > { %v2250_v57 = vadd.f32 %v5514_v36, %v2249_v47  ;;  %v2474_v5 = vpop.f32.mrb[104].mxu0  ;;  %v2251_v34 = vpop.f32.mrb[105].mxu1 }
 0x2d3   : > { %v2476_v18 = vpop.f32.mrb[105].mxu0 }
 0x2d4   : > { %v2475_v1 = vadd.f32 %v2474_v5, %v2250_v57 }
 0x2d6   : > { %2553 = vst [vmem:[%s5536_s22 + $0xa0] sm:$0xff] %v2475_v1 }
 0x2db   : > { %v2254_v23 = vpop.f32.mrb[106].mxu1 }
 0x2dc   : > { %v2255_v26 = vadd.f32 %v5514_v36, %v2254_v23  ;;  %v2479_v40 = vpop.f32.mrb[106].mxu0  ;;  %v2256_v7 = vpop.f32.mrb[107].mxu1 }
 0x2dd   : > { %v2481_v30 = vpop.f32.mrb[107].mxu0 }
 0x2de   : > { %v2480_v19 = vadd.f32 %v2479_v40, %v2255_v26 }
 0x2e0   : > { %2554 = vst [vmem:[%s5536_s22 + $0xa8] sm:$0xff] %v2480_v19 }
 0x2e5   : > { %v2259_v29 = vpop.f32.mrb[108].mxu1 }
 0x2e6   : > { %v2260_v38 = vadd.f32 %v5514_v36, %v2259_v29  ;;  %v2484_v58 = vpop.f32.mrb[108].mxu0  ;;  %v2261_v0 = vpop.f32.mrb[109].mxu1 }
 0x2e7   : > { %v2486_v20 = vpop.f32.mrb[109].mxu0 }
 0x2e8   : > { %v2485_v55 = vadd.f32 %v2484_v58, %v2260_v38 }
 0x2ea   : > { %2555 = vst [vmem:[%s5536_s22 + $0xb0] sm:$0xff] %v2485_v55 }
 0x2ef   : > { %v2264_v9 = vpop.f32.mrb[110].mxu1 }
 0x2f0   : > { %v2265_v13 = vadd.f32 %v5514_v36, %v2264_v9  ;;  %v2489_v42 = vpop.f32.mrb[110].mxu0  ;;  %v2266_v35 = vpop.f32.mrb[111].mxu1 }
 0x2f1   : > { %v2491_v32 = vpop.f32.mrb[111].mxu0 }
 0x2f2   : > { %v2490_v3 = vadd.f32 %v2489_v42, %v2265_v13 }
 0x2f4   : > { %2556 = vst [vmem:[%s5536_s22 + $0xb8] sm:$0xff] %v2490_v3 }
 0x2f9   : > { %v2269_v16 = vpop.f32.mrb[112].mxu1 }
 0x2fa   : > { %v2270_v14 = vadd.f32 %v5514_v36, %v2269_v16  ;;  %v2494_v45 = vpop.f32.mrb[112].mxu0  ;;  %v2271_v31 = vpop.f32.mrb[113].mxu1 }
 0x2fb   : > { %v2496_v60 = vpop.f32.mrb[113].mxu0 }
 0x2fc   : > { %v2495_v54 = vadd.f32 %v2494_v45, %v2270_v14 }
 0x2fd   : > { %v2274_v49 = vpop.f32.mrb[114].mxu1 }
 0x2fe   : > { %2557 = vst [vmem:[%s5536_s22 + $0xc0] sm:$0xff] %v2495_v54  ;;  %v2275_v52 = vadd.f32 %v5514_v36, %v2274_v49  ;;  %v2276_v27 = vpop.f32.mrb[115].mxu1 }
 0x300   : > { %v2499_v39 = vpop.f32.mrb[114].mxu0 }
 0x301   : > { %v2500_v15 = vadd.f32 %v2499_v39, %v2275_v52  ;;  %v2501_v2 = vpop.f32.mrb[115].mxu0 }
 0x303   : > { %2558 = vst [vmem:[%s5536_s22 + $0xc8] sm:$0xff] %v2500_v15 }
 0x305   : > { %v2279_v10 = vpop.f32.mrb[116].mxu1 }
 0x306   : > { %v2280_v6 = vadd.f32 %v5514_v36, %v2279_v10  ;;  %v2504_v37 = vpop.f32.mrb[116].mxu0  ;;  %v2281_v62 = vpop.f32.mrb[117].mxu1 }
 0x307   : > { %v2506_v21 = vpop.f32.mrb[117].mxu0 }
 0x308   : > { %v2505_v25 = vadd.f32 %v2504_v37, %v2280_v6 }
 0x30a   : > { %2559 = vst [vmem:[%s5536_s22 + $0xd0] sm:$0xff] %v2505_v25 }
 0x30d   : > { %v2284_v41 = vpop.f32.mrb[118].mxu1 }
 0x30e   : > { %v2285_v33 = vadd.f32 %v5514_v36, %v2284_v41  ;;  %v2286_v50 = vpop.f32.mrb[119].mxu1 }
 0x30f   : > { %v2509_v48 = vpop.f32.mrb[118].mxu0 }
 0x310   : > { %v2510_v63 = vadd.f32 %v2509_v48, %v2285_v33  ;;  %v2511_v44 = vpop.f32.mrb[119].mxu0 }
 0x312   : > { %2560 = vst [vmem:[%s5536_s22 + $0xd8] sm:$0xff] %v2510_v63  ;;  %v2289_v59 = vpop.f32.mrb[120].mxu1 }
 0x313   : > { %v2290_v8 = vadd.f32 %v5514_v36, %v2289_v59  ;;  %v2514_v56 = vpop.f32.mrb[120].mxu0  ;;  %v2291_v43 = vpop.f32.mrb[121].mxu1 }
 0x314   : > { %v2516_v12 = vpop.f32.mrb[121].mxu0 }
 0x315   : > { %v2515_v11 = vadd.f32 %v2514_v56, %v2290_v8 }
 0x317   : > { %2561 = vst [vmem:[%s5536_s22 + $0xe0] sm:$0xff] %v2515_v11 }
 0x31b   : > { %v2294_v53 = vpop.f32.mrb[122].mxu1 }
 0x31c   : > { %v2295_v22 = vadd.f32 %v5514_v36, %v2294_v53  ;;  %v2519_v28 = vpop.f32.mrb[122].mxu0  ;;  %v2296_v24 = vpop.f32.mrb[123].mxu1 }
 0x31d   : > { %v2521_v51 = vpop.f32.mrb[123].mxu0 }
 0x31e   : > { %v2520_v61 = vadd.f32 %v2519_v28, %v2295_v22 }
 0x320   : > { %2562 = vst [vmem:[%s5536_s22 + $0xe8] sm:$0xff] %v2520_v61 }
 0x321   : > { %v2299_v17 = vpop.f32.mrb[124].mxu1 }
 0x322   : > { %v2300_v4 = vadd.f32 %v5514_v36, %v2299_v17  ;;  %v2301_v46 = vpop.f32.mrb[125].mxu1 }
 0x324   : > { %v2524_v47 = vpop.f32.mrb[124].mxu0 }
 0x325   : > { %v2525_v57 = vadd.f32 %v2524_v47, %v2300_v4  ;;  %v2526_v5 = vpop.f32.mrb[125].mxu0 }
 0x327   : > { %2563 = vst [vmem:[%s5536_s22 + $0xf0] sm:$0xff] %v2525_v57  ;;  %v2304_v34 = vpop.f32.mrb[126].mxu1 }
 0x328   : > { %v2305_v18 = vadd.f32 %v5514_v36, %v2304_v34  ;;  %v2529_v1 = vpop.f32.mrb[126].mxu0  ;;  %v2306_v23 = vpop.f32.mrb[127].mxu1 }
 0x329   : > { %v2531_v26 = vpop.f32.mrb[127].mxu0 }
 0x32a   : > { %v2530_v40 = vadd.f32 %v2529_v1, %v2305_v18 }
 0x32c   : > { %2564 = vst [vmem:[%s5536_s22 + $0xf8] sm:$0xff] %v2530_v40 }
 0x32d PF: > { %s15_s18 = sadd.s32 1, %s3129_s18  }
 0x32e   : > { %p12_p4 = scmp.ge.s32.totalorder %s15_s18, 4  }
 0x330   :  { %14 = sbr.rel (!%p12_p4) target bundleno = 1 (0x1), region = 70 }

// kernel: _mlp_forward_impl.1
= control target key start
LH: loop header
LB: loop body
LE: loop exit
PB: predicated region body
PF: predicated region fallthrough
CT: control target
= control target key end

     0   :  { %s3163_s18 = smov 0   ;;  %s5619_s0 = inlined_call_operand.vmem [shape: f32[512,128], index: 0, kind: input, shape index: {}]   ;;  %s5620_s1 = inlined_call_operand.vmem [shape: f32[128,512], index: 1, kind: input, shape index: {}]   ;;  %s5621_s2 = inlined_call_operand.vmem [shape: f32[1,512], index: 2, kind: input, shape index: {}]   ;;  %s5622_s3 = inlined_call_operand.vmem [shape: f32[512,128], index: 3, kind: input, shape index: {}]   ;;  %s5623_s4 = inlined_call_operand.vmem [shape: f32[1,128], index: 4, kind: input, shape index: {}]   ;;  %s5624_s5 = inlined_call_operand.vmem [shape: f32[512,128], index: 5, kind: output, shape index: {}]  }
   0x1 LB: > { %s2621_s19 = sadd.s32 4294967295, %s3129_s18   ;;  %p2625_p0 = scmp.ge.s32.totalorder %s3129_s18, 1  ;;  %s3129_s18 = sphi %s3163_s18, %s15_s18  }
   0x2   : > { %p188_p1 = scmp.lt.s32.totalorder %s3129_s18, 3 }
   0x4   : > { %p189_p2 = pnand %p2625_p0, %p188_p1 }
   0x6   : > { %192 = sbr.rel (%p189_p2) target bundleno = 813 (0x32d), region = 40 }
   0xd   : > { %v261_v0 = vld [vmem:[%s5620_s1 + $0x8] sm:$0xff]  ;;  %v263_v2 = vld [vmem:[%s5620_s1 + $0x18] sm:$0xff]  ;;  %v260_v5 = vld [vmem:[%s5620_s1] sm:$0xff]  ;;  %v3131_v7 = vmov 0.0   ;;  %s3307_s14 = sshll.u32 %s2621_s19, 5 }
   0xe   : > { %v265_v1 = vld [vmem:[%s5620_s1 + $0x28] sm:$0xff]  ;;  %v267_v4 = vld [vmem:[%s5620_s1 + $0x38] sm:$0xff]  ;;  %v264_v6 = vld [vmem:[%s5620_s1 + $0x20] sm:$0xff]  ;;  %410 = vmatprep.mubr.f32.mxu0 %v3131_v7  ;;  %667 = vmatprep.mubr.f32.mxu1 %v3131_v7  ;;  %p217_p3 = scmp.lt.s32.totalorder %s3307_s14, 63 }
   0xf   : > { %v2633_v3 = vpack.c.bf16 %v265_v1, %v261_v0  ;;  %v2665_v8 = vpack.c.bf16 %v267_v4, %v263_v2  ;;  %v2635_v9 = vpack.c.bf16 %v264_v6, %v260_v5  ;;  %v262_v10 = vld [vmem:[%s5620_s1 + $0x10] sm:$0xff]  ;;  %v269_v12 = vld [vmem:[%s5620_s1 + $0x48] sm:$0xff]  ;;  %v271_v15 = vld [vmem:[%s5620_s1 + $0x58] sm:$0xff] }
  0x10   : > { %v266_v11 = vld [vmem:[%s5620_s1 + $0x30] sm:$0xff]  ;;  %v273_v14 = vld [vmem:[%s5620_s1 + $0x68] sm:$0xff]  ;;  %v275_v16 = vld [vmem:[%s5620_s1 + $0x78] sm:$0xff]  ;;  %s6070_s14 = smov (!%p217_p3, %s3307_s14), 63 }
  0x11   : > { %2634 = vmatprep.subr.bf16.mxu0 %v2633_v3  ;;  %v2667_v13 = vpack.c.bf16 %v266_v11, %v262_v10  ;;  %2666 = vmatprep.subr.bf16.mxu1 %v2665_v8  ;;  %v2637_v17 = vpack.c.bf16 %v273_v14, %v269_v12  ;;  %v2669_v18 = vpack.c.bf16 %v275_v16, %v271_v15  ;;  %v268_v19 = vld [vmem:[%s5620_s1 + $0x40] sm:$0xff]  ;;  %v270_v21 = vld [vmem:[%s5620_s1 + $0x50] sm:$0xff]  ;;  %v277_v24 = vld [vmem:[%s5620_s1 + $0x88] sm:$0xff]  ;;  %s2627_s8 = sshll.u32 %s6070_s14, 3 }
  0x12   : > { %2636 = vmatpush1.bf16.msra.mxu0 %v2635_v9  ;;  %v272_v20 = vld [vmem:[%s5620_s1 + $0x60] sm:$0xff]  ;;  %v274_v23 = vld [vmem:[%s5620_s1 + $0x70] sm:$0xff]  ;;  %v281_v25 = vld [vmem:[%s5620_s1 + $0xa8] sm:$0xff]  ;;  %s3381_s11 = scalar_lea.vmem %s5619_s0, %s2627_s8  ;;  %s5536_s22 = scalar_lea.vmem %s5624_s5, %s2627_s8 }
  0x13   : > { %2668 = vmatpush1.bf16.msra.mxu1 %v2667_v13  ;;  %v2639_v22 = vpack.c.bf16 %v272_v20, %v268_v19  ;;  %2638 = vmatprep.subr.bf16.mxu0 %v2637_v17  ;;  %v2671_v26 = vpack.c.bf16 %v274_v23, %v270_v21  ;;  %v2641_v27 = vpack.c.bf16 %v281_v25, %v277_v24  ;;  %v279_v28 = vld [vmem:[%s5620_s1 + $0x98] sm:$0xff]  ;;  %v276_v30 = vld [vmem:[%s5620_s1 + $0x80] sm:$0xff]  ;;  %v278_v33 = vld [vmem:[%s5620_s1 + $0x90] sm:$0xff] }
  0x14   : > { %2670 = vmatprep.subr.bf16.mxu1 %v2669_v18  ;;  %v283_v29 = vld [vmem:[%s5620_s1 + $0xb8] sm:$0xff]  ;;  %v280_v32 = vld [vmem:[%s5620_s1 + $0xa0] sm:$0xff]  ;;  %v282_v34 = vld [vmem:[%s5620_s1 + $0xb0] sm:$0xff] }
  0x15   : > { %v2673_v31 = vpack.c.bf16 %v283_v29, %v279_v28  ;;  %v2643_v35 = vpack.c.bf16 %v280_v32, %v276_v30  ;;  %v285_v36 = vld [vmem:[%s5620_s1 + $0xc8] sm:$0xff]  ;;  %v287_v38 = vld [vmem:[%s5620_s1 + $0xd8] sm:$0xff]  ;;  %v2675_v39 = vpack.c.bf16 %v282_v34, %v278_v33  ;;  %v284_v42 = vld [vmem:[%s5620_s1 + $0xc0] sm:$0xff] }
  0x16   : > { %2640 = vmatpush1.bf16.msra.mxu0 %v2639_v22  ;;  %v289_v37 = vld [vmem:[%s5620_s1 + $0xe8] sm:$0xff]  ;;  %v291_v41 = vld [vmem:[%s5620_s1 + $0xf8] sm:$0xff]  ;;  %v288_v43 = vld [vmem:[%s5620_s1 + $0xe0] sm:$0xff] }
  0x17   : > { %2672 = vmatpush1.bf16.msra.mxu1 %v2671_v26  ;;  %2642 = vmatprep.subr.bf16.mxu0 %v2641_v27  ;;  %v2645_v40 = vpack.c.bf16 %v289_v37, %v285_v36  ;;  %v2677_v44 = vpack.c.bf16 %v291_v41, %v287_v38  ;;  %v286_v45 = vld [vmem:[%s5620_s1 + $0xd0] sm:$0xff]  ;;  %v293_v47 = vld [vmem:[%s5620_s1 + $0x108] sm:$0xff]  ;;  %v295_v49 = vld [vmem:[%s5620_s1 + $0x118] sm:$0xff]  ;;  %v2647_v51 = vpack.c.bf16 %v288_v43, %v284_v42 }
  0x18   : > { %2674 = vmatprep.subr.bf16.mxu1 %v2673_v31  ;;  %v290_v46 = vld [vmem:[%s5620_s1 + $0xf0] sm:$0xff]  ;;  %v297_v48 = vld [vmem:[%s5620_s1 + $0x128] sm:$0xff]  ;;  %v299_v50 = vld [vmem:[%s5620_s1 + $0x138] sm:$0xff] }
  0x19   : > { %v2679_v52 = vpack.c.bf16 %v290_v46, %v286_v45  ;;  %v2649_v53 = vpack.c.bf16 %v297_v48, %v293_v47  ;;  %v292_v54 = vld [vmem:[%s5620_s1 + $0x100] sm:$0xff]  ;;  %v294_v56 = vld [vmem:[%s5620_s1 + $0x110] sm:$0xff]  ;;  %v2681_v57 = vpack.c.bf16 %v299_v50, %v295_v49  ;;  %v301_v59 = vld [vmem:[%s5620_s1 + $0x148] sm:$0xff] }
  0x1a   : > { %2644 = vmatpush1.bf16.msra.mxu0 %v2643_v35  ;;  %v296_v55 = vld [vmem:[%s5620_s1 + $0x120] sm:$0xff]  ;;  %v298_v58 = vld [vmem:[%s5620_s1 + $0x130] sm:$0xff]  ;;  %v305_v60 = vld [vmem:[%s5620_s1 + $0x168] sm:$0xff] }
  0x1b   : > { %2676 = vmatpush1.bf16.msra.mxu1 %v2675_v39  ;;  %2646 = vmatprep.subr.bf16.mxu0 %v2645_v40  ;;  %v303_v61 = vld [vmem:[%s5620_s1 + $0x158] sm:$0xff]  ;;  %v2651_v63 = vpack.c.bf16 %v296_v55, %v292_v54  ;;  %v2683_v0 = vpack.c.bf16 %v298_v58, %v294_v56  ;;  %v2653_v1 = vpack.c.bf16 %v305_v60, %v301_v59  ;;  %v300_v2 = vld [vmem:[%s5620_s1 + $0x140] sm:$0xff]  ;;  %v302_v4 = vld [vmem:[%s5620_s1 + $0x150] sm:$0xff]  ;;  %v3132_v40 = vmov 0.0|0.0  }
  0x1c   : > { %2678 = vmatprep.subr.bf16.mxu1 %v2677_v44  ;;  %v307_v62 = vld [vmem:[%s5620_s1 + $0x178] sm:$0xff]  ;;  %v304_v3 = vld [vmem:[%s5620_s1 + $0x160] sm:$0xff]  ;;  %v306_v6 = vld [vmem:[%s5620_s1 + $0x170] sm:$0xff] }
  0x1d   : > { %v2685_v5 = vpack.c.bf16 %v307_v62, %v303_v61  ;;  %v309_v8 = vld [vmem:[%s5620_s1 + $0x188] sm:$0xff]  ;;  %v311_v10 = vld [vmem:[%s5620_s1 + $0x198] sm:$0xff]  ;;  %v2655_v12 = vpack.c.bf16 %v304_v3, %v300_v2  ;;  %v2687_v13 = vpack.c.bf16 %v306_v6, %v302_v4  ;;  %v308_v15 = vld [vmem:[%s5620_s1 + $0x180] sm:$0xff] }
  0x1e   : > { %2648 = vmatpush1.bf16.msra.mxu0 %v2647_v51  ;;  %v313_v9 = vld [vmem:[%s5620_s1 + $0x1a8] sm:$0xff]  ;;  %v315_v11 = vld [vmem:[%s5620_s1 + $0x1b8] sm:$0xff]  ;;  %v312_v16 = vld [vmem:[%s5620_s1 + $0x1a0] sm:$0xff] }
  0x1f   : > { %2680 = vmatpush1.bf16.msra.mxu1 %v2679_v52  ;;  %2650 = vmatprep.subr.bf16.mxu0 %v2649_v53  ;;  %v2657_v14 = vpack.c.bf16 %v313_v9, %v309_v8  ;;  %v310_v17 = vld [vmem:[%s5620_s1 + $0x190] sm:$0xff]  ;;  %v2689_v18 = vpack.c.bf16 %v315_v11, %v311_v10  ;;  %v317_v20 = vld [vmem:[%s5620_s1 + $0x1c8] sm:$0xff]  ;;  %v319_v22 = vld [vmem:[%s5620_s1 + $0x1d8] sm:$0xff]  ;;  %v2659_v24 = vpack.c.bf16 %v312_v16, %v308_v15 }
  0x20   : > { %2682 = vmatprep.subr.bf16.mxu1 %v2681_v57  ;;  %v314_v19 = vld [vmem:[%s5620_s1 + $0x1b0] sm:$0xff]  ;;  %v321_v21 = vld [vmem:[%s5620_s1 + $0x1e8] sm:$0xff]  ;;  %v323_v23 = vld [vmem:[%s5620_s1 + $0x1f8] sm:$0xff] }
  0x21   : > { %v2691_v25 = vpack.c.bf16 %v314_v19, %v310_v17  ;;  %v2661_v26 = vpack.c.bf16 %v321_v21, %v317_v20  ;;  %v316_v27 = vld [vmem:[%s5620_s1 + $0x1c0] sm:$0xff]  ;;  %v2693_v29 = vpack.c.bf16 %v323_v23, %v319_v22  ;;  %v318_v30 = vld [vmem:[%s5620_s1 + $0x1d0] sm:$0xff]  ;;  %v2013_v35 = vld [vmem:[%s5622_s3 + $0x8] sm:$0xff] }
  0x22   : > { %2652 = vmatpush1.bf16.msra.mxu0 %v2651_v63  ;;  %v320_v28 = vld [vmem:[%s5620_s1 + $0x1e0] sm:$0xff]  ;;  %v322_v31 = vld [vmem:[%s5620_s1 + $0x1f0] sm:$0xff]  ;;  %v2045_v38 = vld [vmem:[%s5622_s3 + $0x108] sm:$0xff] }
  0x23   : > { %2684 = vmatpush1.bf16.msra.mxu1 %v2683_v0  ;;  %2654 = vmatprep.subr.bf16.mxu0 %v2653_v1  ;;  %v2663_v32 = vpack.c.bf16 %v320_v28, %v316_v27  ;;  %v2695_v33 = vpack.c.bf16 %v322_v31, %v318_v30  ;;  %v2012_v34 = vld [vmem:[%s5622_s3] sm:$0xff]  ;;  %v2014_v42 = vld [vmem:[%s5622_s3 + $0x10] sm:$0xff]  ;;  %v2015_v43 = vld [vmem:[%s5622_s3 + $0x18] sm:$0xff] }
  0x24   : > { %2686 = vmatprep.subr.bf16.mxu1 %v2685_v5  ;;  %v2044_v36 = vld [vmem:[%s5622_s3 + $0x100] sm:$0xff]  ;;  %v2698_v39 = vpack.c.bf16 %v2013_v35, %v2012_v34  ;;  %v2046_v44 = vld [vmem:[%s5622_s3 + $0x110] sm:$0xff]  ;;  %v2047_v45 = vld [vmem:[%s5622_s3 + $0x118] sm:$0xff]  ;;  %v2701_v47 = vpack.c.bf16 %v2015_v43, %v2014_v42 }
  0x25   : > { %v228_v37 = vld [vmem:[%s3381_s11] sm:$0xff]  ;;  %v2746_v41 = vpack.c.bf16 %v2045_v38, %v2044_v36  ;;  %v229_v46 = vld [vmem:[%s3381_s11 + $0x8] sm:$0xff]  ;;  %v2749_v48 = vpack.c.bf16 %v2047_v45, %v2046_v44  ;;  %v230_v53 = vld [vmem:[%s3381_s11 + $0x10] sm:$0xff] }
  0x26   : > { %2656 = vmatpush1.bf16.msra.mxu0 %v2655_v12  ;;  %v2016_v49 = vld [vmem:[%s5622_s3 + $0x20] sm:$0xff]  ;;  %v2017_v50 = vld [vmem:[%s5622_s3 + $0x28] sm:$0xff]  ;;  %v2018_v56 = vld [vmem:[%s5622_s3 + $0x30] sm:$0xff] }
  0x27   : > { %2688 = vmatpush1.bf16.msra.mxu1 %v2687_v13  ;;  %2658 = vmatprep.subr.bf16.mxu0 %v2657_v14  ;;  %v2048_v51 = vld [vmem:[%s5622_s3 + $0x120] sm:$0xff]  ;;  %v2049_v52 = vld [vmem:[%s5622_s3 + $0x128] sm:$0xff]  ;;  %v2704_v54 = vpack.c.bf16 %v2017_v50, %v2016_v49  ;;  %v2019_v57 = vld [vmem:[%s5622_s3 + $0x38] sm:$0xff] }
  0x28   : > { %2690 = vmatprep.subr.bf16.mxu1 %v2689_v18  ;;  %v2752_v55 = vpack.c.bf16 %v2049_v52, %v2048_v51  ;;  %v2050_v58 = vld [vmem:[%s5622_s3 + $0x130] sm:$0xff]  ;;  %v2051_v59 = vld [vmem:[%s5622_s3 + $0x138] sm:$0xff]  ;;  %v2707_v61 = vpack.c.bf16 %v2019_v57, %v2018_v56  ;;  %v2020_v63 = vld [vmem:[%s5622_s3 + $0x40] sm:$0xff] }
  0x29   : > { %v231_v60 = vld [vmem:[%s3381_s11 + $0x18] sm:$0xff]  ;;  %v2755_v62 = vpack.c.bf16 %v2051_v59, %v2050_v58  ;;  %v2021_v0 = vld [vmem:[%s5622_s3 + $0x48] sm:$0xff]  ;;  %v2052_v1 = vld [vmem:[%s5622_s3 + $0x140] sm:$0xff] }
  0x2a   : > { %2660 = vmatpush1.bf16.msra.mxu0 %v2659_v24  ;;  %v2053_v2 = vld [vmem:[%s5622_s3 + $0x148] sm:$0xff]  ;;  %v232_v3 = vld [vmem:[%s3381_s11 + $0x20] sm:$0xff]  ;;  %v2710_v4 = vpack.c.bf16 %v2021_v0, %v2020_v63  ;;  %v2022_v6 = vld [vmem:[%s5622_s3 + $0x50] sm:$0xff] }
  0x2b   : > { %2692 = vmatpush1.bf16.msra.mxu1 %v2691_v25  ;;  %2662 = vmatprep.subr.bf16.mxu0 %v2661_v26  ;;  %v2758_v5 = vpack.c.bf16 %v2053_v2, %v2052_v1  ;;  %v2023_v8 = vld [vmem:[%s5622_s3 + $0x58] sm:$0xff]  ;;  %v2054_v9 = vld [vmem:[%s5622_s3 + $0x150] sm:$0xff]  ;;  %v233_v11 = vld [vmem:[%s3381_s11 + $0x28] sm:$0xff] }
  0x2c   : > { %2694 = vmatprep.subr.bf16.mxu1 %v2693_v29  ;;  %v2055_v10 = vld [vmem:[%s5622_s3 + $0x158] sm:$0xff]  ;;  %v2713_v12 = vpack.c.bf16 %v2023_v8, %v2022_v6  ;;  %v2024_v14 = vld [vmem:[%s5622_s3 + $0x60] sm:$0xff]  ;;  %v2025_v15 = vld [vmem:[%s5622_s3 + $0x68] sm:$0xff] }
  0x2d   : > { %v2761_v13 = vpack.c.bf16 %v2055_v10, %v2054_v9  ;;  %v2056_v16 = vld [vmem:[%s5622_s3 + $0x160] sm:$0xff]  ;;  %v2057_v17 = vld [vmem:[%s5622_s3 + $0x168] sm:$0xff]  ;;  %v234_v18 = vld [vmem:[%s3381_s11 + $0x30] sm:$0xff]  ;;  %v2716_v19 = vpack.c.bf16 %v2025_v15, %v2024_v14 }
  0x2e   : > { %2664 = vmatpush1.bf16.msra.mxu0 %v2663_v32  ;;  %v2764_v20 = vpack.c.bf16 %v2057_v17, %v2056_v16  ;;  %v2026_v21 = vld [vmem:[%s5622_s3 + $0x70] sm:$0xff]  ;;  %v2027_v22 = vld [vmem:[%s5622_s3 + $0x78] sm:$0xff]  ;;  %v2028_v28 = vld [vmem:[%s5622_s3 + $0x80] sm:$0xff] }
  0x2f   : > { %2696 = vmatpush1.bf16.msra.mxu1 %v2695_v33  ;;  %2745 = vmatprep.subr.bf16.mxu0 %v3132_v40  ;;  %v2058_v23 = vld [vmem:[%s5622_s3 + $0x170] sm:$0xff]  ;;  %v2059_v24 = vld [vmem:[%s5622_s3 + $0x178] sm:$0xff]  ;;  %v2719_v26 = vpack.c.bf16 %v2027_v22, %v2026_v21  ;;  %v2029_v29 = vld [vmem:[%s5622_s3 + $0x88] sm:$0xff] }
  0x30   : > { %2697 = vmatprep.subr.bf16.mxu1 %v3132_v40  ;;  %v235_v25 = vld [vmem:[%s3381_s11 + $0x38] sm:$0xff]  ;;  %v2767_v27 = vpack.c.bf16 %v2059_v24, %v2058_v23  ;;  %v2060_v30 = vld [vmem:[%s5622_s3 + $0x180] sm:$0xff]  ;;  %v2061_v31 = vld [vmem:[%s5622_s3 + $0x188] sm:$0xff]  ;;  %v2722_v33 = vpack.c.bf16 %v2029_v29, %v2028_v28 }
  0x31   : > { %411 = vmatmul.mubr.f32.vlgmr.msra.gmra.mrb[0].mxu0 %v228_v37  ;;  %v236_v32 = vld [vmem:[%s3381_s11 + $0x40] sm:$0xff]  ;;  %v2770_v34 = vpack.c.bf16 %v2061_v31, %v2060_v30  ;;  %v2030_v35 = vld [vmem:[%s5622_s3 + $0x90] sm:$0xff]  ;;  %v2031_v36 = vld [vmem:[%s5622_s3 + $0x98] sm:$0xff] }
  0x32   : > { %668 = vmatmul.mubr.f32.vlgmr.msra.gmra.mrb[0].mxu1 %v228_v37  ;;  %416 = vmatprep.mubr.f32.mxu0 %v3131_v7  ;;  %v2062_v37 = vld [vmem:[%s5622_s3 + $0x190] sm:$0xff]  ;;  %v2063_v38 = vld [vmem:[%s5622_s3 + $0x198] sm:$0xff]  ;;  %v2032_v43 = vld [vmem:[%s5622_s3 + $0xa0] sm:$0xff] }
  0x33   : > { %673 = vmatprep.mubr.f32.mxu1 %v3131_v7  ;;  %2699 = vmatpush1.bf16.msra.mxu1 %v2698_v39  ;;  %v237_v39 = vld [vmem:[%s3381_s11 + $0x48] sm:$0xff]  ;;  %v2773_v42 = vpack.c.bf16 %v2063_v38, %v2062_v37  ;;  %v2064_v45 = vld [vmem:[%s5622_s3 + $0x1a0] sm:$0xff]  ;;  %v2034_v50 = vld [vmem:[%s5622_s3 + $0xb0] sm:$0xff]  ;;  %v326_v37 = vlaneseq }
  0x34   : > { %2747 = vmatpush1.bf16.msra.mxu0 %v2746_v41  ;;  %2700 = vmatprep.subr.bf16.mxu1 %v3132_v40  ;;  %v2725_v41 = vpack.c.bf16 %v2031_v36, %v2030_v35  ;;  %v2033_v44 = vld [vmem:[%s5622_s3 + $0xa8] sm:$0xff]  ;;  %v2035_v51 = vld [vmem:[%s5622_s3 + $0xb8] sm:$0xff]  ;;  %v2066_v52 = vld [vmem:[%s5622_s3 + $0x1b0] sm:$0xff] }
  0x35   : > { %417 = vmatmul.mubr.f32.gmra.mrb[2].mxu0 %v229_v46  ;;  %2748 = vmatprep.subr.bf16.mxu0 %v3132_v40  ;;  %v2036_v57 = vld [vmem:[%s5622_s3 + $0xc0] sm:$0xff]  ;;  %v2037_v58 = vld [vmem:[%s5622_s3 + $0xc8] sm:$0xff]  ;;  %v243_v63 = vld [vmem:[%s3381_s11 + $0x78] sm:$0xff]  ;;  %v327_v38 = vshrl.u32 %v326_v37, 7 }
  0x36   : > { %674 = vmatmul.mubr.f32.gmra.mrb[2].mxu1 %v229_v46  ;;  %422 = vmatprep.mubr.f32.mxu0 %v3131_v7  ;;  %v2065_v46 = vld [vmem:[%s5622_s3 + $0x1a8] sm:$0xff]  ;;  %v240_v59 = vld [vmem:[%s3381_s11 + $0x60] sm:$0xff]  ;;  %v246_v2 = vld [vmem:[%s3381_s11 + $0x90] sm:$0xff] }
  0x37   : > { %679 = vmatprep.mubr.f32.mxu1 %v3131_v7  ;;  %2702 = vmatpush1.bf16.msra.mxu1 %v2701_v47  ;;  %v238_v47 = vld [vmem:[%s3381_s11 + $0x50] sm:$0xff]  ;;  %v2776_v49 = vpack.c.bf16 %v2065_v46, %v2064_v45  ;;  %v244_v0 = vld [vmem:[%s3381_s11 + $0x80] sm:$0xff]  ;;  %v245_v1 = vld [vmem:[%s3381_s11 + $0x88] sm:$0xff] }
  0x38   : > { %2750 = vmatpush1.bf16.msra.mxu0 %v2749_v48  ;;  %2703 = vmatprep.subr.bf16.mxu1 %v3132_v40  ;;  %v2728_v48 = vpack.c.bf16 %v2033_v44, %v2032_v43  ;;  %v250_v6 = vld [vmem:[%s3381_s11 + $0xb0] sm:$0xff]  ;;  %v251_v8 = vld [vmem:[%s3381_s11 + $0xb8] sm:$0xff]  ;;  %v252_v9 = vld [vmem:[%s3381_s11 + $0xc0] sm:$0xff]  ;;  %v332_v43 = vsub.s32 1, %v327_v38  ;;  %v340_v44 = vsub.s32 3, %v327_v38 }
  0x39   : > { %423 = vmatmul.mubr.f32.gmra.mrb[4].mxu0 %v230_v53  ;;  %2751 = vmatprep.subr.bf16.mxu0 %v3132_v40  ;;  %v253_v10 = vld [vmem:[%s3381_s11 + $0xc8] sm:$0xff]  ;;  %v2038_v14 = vld [vmem:[%s5622_s3 + $0xd0] sm:$0xff]  ;;  %v2039_v15 = vld [vmem:[%s5622_s3 + $0xd8] sm:$0xff] }
  0x3a   : > { %680 = vmatmul.mubr.f32.gmra.mrb[4].mxu1 %v230_v53  ;;  %428 = vmatprep.mubr.f32.mxu0 %v3131_v7  ;;  %v2067_v53 = vld [vmem:[%s5622_s3 + $0x1b8] sm:$0xff]  ;;  %v2070_v16 = vld [vmem:[%s5622_s3 + $0x1d0] sm:$0xff]  ;;  %v2737_v17 = vpack.c.bf16 %v2039_v15, %v2038_v14  ;;  %v2040_v21 = vld [vmem:[%s5622_s3 + $0xe0] sm:$0xff] }
  0x3b   : > { %685 = vmatprep.mubr.f32.mxu1 %v3131_v7  ;;  %2705 = vmatpush1.bf16.msra.mxu1 %v2704_v54  ;;  %v239_v54 = vld [vmem:[%s3381_s11 + $0x58] sm:$0xff]  ;;  %v2779_v56 = vpack.c.bf16 %v2067_v53, %v2066_v52  ;;  %v2041_v22 = vld [vmem:[%s5622_s3 + $0xe8] sm:$0xff]  ;;  %v256_v28 = vld [vmem:[%s3381_s11 + $0xe0] sm:$0xff] }
  0x3c   : > { %2753 = vmatpush1.bf16.msra.mxu0 %v2752_v55  ;;  %2706 = vmatprep.subr.bf16.mxu1 %v3132_v40  ;;  %v2731_v55 = vpack.c.bf16 %v2035_v51, %v2034_v50  ;;  %v2740_v23 = vpack.c.bf16 %v2041_v22, %v2040_v21  ;;  %v255_v24 = vld [vmem:[%s3381_s11 + $0xd8] sm:$0xff]  ;;  %v2042_v29 = vld [vmem:[%s5622_s3 + $0xf0] sm:$0xff]  ;;  %v257_v35 = vld [vmem:[%s3381_s11 + $0xe8] sm:$0xff] }
  0x3d   : > { %429 = vmatmul.mubr.f32.gmra.mrb[6].mxu0 %v231_v60  ;;  %2754 = vmatprep.subr.bf16.mxu0 %v3132_v40  ;;  %v2043_v30 = vld [vmem:[%s5622_s3 + $0xf8] sm:$0xff]  ;;  %v2074_v31 = vld [vmem:[%s5622_s3 + $0x1f0] sm:$0xff] }
  0x3e   : > { %686 = vmatmul.mubr.f32.gmra.mrb[6].mxu1 %v231_v60  ;;  %434 = vmatprep.mubr.f32.mxu0 %v3131_v7  ;;  %v2734_v60 = vpack.c.bf16 %v2037_v58, %v2036_v57  ;;  %v258_v36 = vld [vmem:[%s3381_s11 + $0xf0] sm:$0xff] }
  0x3f   : > { %691 = vmatprep.mubr.f32.mxu1 %v3131_v7  ;;  %2708 = vmatpush1.bf16.msra.mxu1 %v2707_v61  ;;  %v241_v61 = vld [vmem:[%s3381_s11 + $0x68] sm:$0xff] }
  0x40   : > { %2756 = vmatpush1.bf16.msra.mxu0 %v2755_v62  ;;  %2709 = vmatprep.subr.bf16.mxu1 %v3132_v40  ;;  %v242_v62 = vld [vmem:[%s3381_s11 + $0x70] sm:$0xff] }
  0x41   : > { %435 = vmatmul.mubr.f32.gmra.mrb[8].mxu0 %v232_v3  ;;  %2757 = vmatprep.subr.bf16.mxu0 %v3132_v40 }
  0x42   : > { %692 = vmatmul.mubr.f32.gmra.mrb[8].mxu1 %v232_v3  ;;  %440 = vmatprep.mubr.f32.mxu0 %v3131_v7  ;;  %v247_v3 = vld [vmem:[%s3381_s11 + $0x98] sm:$0xff] }
  0x43   : > { %697 = vmatprep.mubr.f32.mxu1 %v3131_v7  ;;  %2711 = vmatpush1.bf16.msra.mxu1 %v2710_v4  ;;  %v248_v4 = vld [vmem:[%s3381_s11 + $0xa0] sm:$0xff] }
  0x44   : > { %2759 = vmatpush1.bf16.msra.mxu0 %v2758_v5  ;;  %2712 = vmatprep.subr.bf16.mxu1 %v3132_v40  ;;  %v249_v5 = vld [vmem:[%s3381_s11 + $0xa8] sm:$0xff] }
  0x45   : > { %441 = vmatmul.mubr.f32.gmra.mrb[10].mxu0 %v233_v11  ;;  %2760 = vmatprep.subr.bf16.mxu0 %v3132_v40 }
  0x46   : > { %698 = vmatmul.mubr.f32.gmra.mrb[10].mxu1 %v233_v11  ;;  %446 = vmatprep.mubr.f32.mxu0 %v3131_v7  ;;  %v2068_v11 = vld [vmem:[%s5622_s3 + $0x1c0] sm:$0xff] }
  0x47   : > { %703 = vmatprep.mubr.f32.mxu1 %v3131_v7  ;;  %2714 = vmatpush1.bf16.msra.mxu1 %v2713_v12  ;;  %v2069_v12 = vld [vmem:[%s5622_s3 + $0x1c8] sm:$0xff] }
  0x48   : > { %2762 = vmatpush1.bf16.msra.mxu0 %v2761_v13  ;;  %2715 = vmatprep.subr.bf16.mxu1 %v3132_v40  ;;  %v2782_v13 = vpack.c.bf16 %v2069_v12, %v2068_v11 }
  0x49   : > { %447 = vmatmul.mubr.f32.gmra.mrb[12].mxu0 %v234_v18  ;;  %2763 = vmatprep.subr.bf16.mxu0 %v3132_v40 }
  0x4a   : > { %704 = vmatmul.mubr.f32.gmra.mrb[12].mxu1 %v234_v18  ;;  %452 = vmatprep.mubr.f32.mxu0 %v3131_v7  ;;  %v2071_v18 = vld [vmem:[%s5622_s3 + $0x1d8] sm:$0xff] }
  0x4b   : > { %709 = vmatprep.mubr.f32.mxu1 %v3131_v7  ;;  %2717 = vmatpush1.bf16.msra.mxu1 %v2716_v19  ;;  %v2785_v19 = vpack.c.bf16 %v2071_v18, %v2070_v16 }
  0x4c   : > { %2765 = vmatpush1.bf16.msra.mxu0 %v2764_v20  ;;  %2718 = vmatprep.subr.bf16.mxu1 %v3132_v40  ;;  %v254_v20 = vld [vmem:[%s3381_s11 + $0xd0] sm:$0xff] }
  0x4d   : > { %453 = vmatmul.mubr.f32.gmra.mrb[14].mxu0 %v235_v25  ;;  %2766 = vmatprep.subr.bf16.mxu0 %v3132_v40 }
  0x4e   : > { %710 = vmatmul.mubr.f32.gmra.mrb[14].mxu1 %v235_v25  ;;  %458 = vmatprep.mubr.f32.mxu0 %v3131_v7  ;;  %v2072_v25 = vld [vmem:[%s5622_s3 + $0x1e0] sm:$0xff] }
  0x4f   : > { %715 = vmatprep.mubr.f32.mxu1 %v3131_v7  ;;  %2720 = vmatpush1.bf16.msra.mxu1 %v2719_v26  ;;  %v2073_v26 = vld [vmem:[%s5622_s3 + $0x1e8] sm:$0xff] }
  0x50   : > { %2768 = vmatpush1.bf16.msra.mxu0 %v2767_v27  ;;  %2721 = vmatprep.subr.bf16.mxu1 %v3132_v40  ;;  %v2788_v27 = vpack.c.bf16 %v2073_v26, %v2072_v25 }
  0x51   : > { %459 = vmatmul.mubr.f32.gmra.mrb[16].mxu0 %v236_v32  ;;  %2769 = vmatprep.subr.bf16.mxu0 %v3132_v40 }
  0x52   : > { %716 = vmatmul.mubr.f32.gmra.mrb[16].mxu1 %v236_v32  ;;  %464 = vmatprep.mubr.f32.mxu0 %v3131_v7  ;;  %v2743_v32 = vpack.c.bf16 %v2043_v30, %v2042_v29 }
  0x53   : > { %721 = vmatprep.mubr.f32.mxu1 %v3131_v7  ;;  %2723 = vmatpush1.bf16.msra.mxu1 %v2722_v33  ;;  %v2075_v33 = vld [vmem:[%s5622_s3 + $0x1f8] sm:$0xff] }
  0x54   : > { %2771 = vmatpush1.bf16.msra.mxu0 %v2770_v34  ;;  %2724 = vmatprep.subr.bf16.mxu1 %v3132_v40  ;;  %v2791_v34 = vpack.c.bf16 %v2075_v33, %v2074_v31 }
  0x55   : > { %465 = vmatmul.mubr.f32.gmra.mrb[18].mxu0 %v237_v39  ;;  %2772 = vmatprep.subr.bf16.mxu0 %v3132_v40 }
  0x56   : > { %722 = vmatmul.mubr.f32.gmra.mrb[18].mxu1 %v237_v39  ;;  %470 = vmatprep.mubr.f32.mxu0 %v3131_v7  ;;  %v328_v39 = vsub.s32 0, %v327_v38 }
  0x57   : > { %727 = vmatprep.mubr.f32.mxu1 %v3131_v7  ;;  %2726 = vmatpush1.bf16.msra.mxu1 %v2725_v41  ;;  %v324_v41 = vld [vmem:[%s5621_s2] sm:$0xf] }
  0x58   : > { %2774 = vmatpush1.bf16.msra.mxu0 %v2773_v42  ;;  %2727 = vmatprep.subr.bf16.mxu1 %v3132_v40  ;;  %v336_v42 = vsub.s32 2, %v327_v38  ;;  %v3704_v45 = vrot.slane %v324_v41, %v328_v39 }
  0x59   : > { %471 = vmatmul.mubr.f32.gmra.mrb[20].mxu0 %v238_v47  ;;  %2775 = vmatprep.subr.bf16.mxu0 %v3132_v40 }
  0x5a   : > { %728 = vmatmul.mubr.f32.gmra.mrb[20].mxu1 %v238_v47  ;;  %476 = vmatprep.mubr.f32.mxu0 %v3131_v7  ;;  %v3706_v46 = vrot.slane %v324_v41, %v336_v42  ;;  %v3708_v47 = vrot.slane %v324_v41, %v332_v43 }
  0x5b   : > { %733 = vmatprep.mubr.f32.mxu1 %v3131_v7  ;;  %2729 = vmatpush1.bf16.msra.mxu1 %v2728_v48  ;;  %v3710_v48 = vrot.slane %v324_v41, %v340_v44 }
  0x5c   : > { %2777 = vmatpush1.bf16.msra.mxu0 %v2776_v49  ;;  %2730 = vmatprep.subr.bf16.mxu1 %v3132_v40 }
  0x5d   : > { %477 = vmatmul.mubr.f32.gmra.mrb[22].mxu0 %v239_v54  ;;  %2778 = vmatprep.subr.bf16.mxu0 %v3132_v40 }
  0x5e   : > { %734 = vmatmul.mubr.f32.gmra.mrb[22].mxu1 %v239_v54  ;;  %482 = vmatprep.mubr.f32.mxu0 %v3131_v7 }
  0x5f   : > { %739 = vmatprep.mubr.f32.mxu1 %v3131_v7  ;;  %2732 = vmatpush1.bf16.msra.mxu1 %v2731_v55 }
  0x60   : > { %2780 = vmatpush1.bf16.msra.mxu0 %v2779_v56  ;;  %2733 = vmatprep.subr.bf16.mxu1 %v3132_v40 }
  0x61   : > { %483 = vmatmul.mubr.f32.gmra.mrb[24].mxu0 %v240_v59  ;;  %2781 = vmatprep.subr.bf16.mxu0 %v3132_v40 }
  0x62   : > { %740 = vmatmul.mubr.f32.gmra.mrb[24].mxu1 %v240_v59  ;;  %488 = vmatprep.mubr.f32.mxu0 %v3131_v7 }
  0x63   : > { %745 = vmatprep.mubr.f32.mxu1 %v3131_v7  ;;  %2735 = vmatpush1.bf16.msra.mxu1 %v2734_v60 }
  0x64   : > { %2736 = vmatprep.subr.bf16.mxu1 %v3132_v40  ;;  %2783 = vmatpush1.bf16.msra.mxu0 %v2782_v13 }
  0x65   : > { %489 = vmatmul.mubr.f32.gmra.mrb[26].mxu0 %v241_v61  ;;  %2784 = vmatprep.subr.bf16.mxu0 %v3132_v40 }
  0x66   : > { %746 = vmatmul.mubr.f32.gmra.mrb[26].mxu1 %v241_v61  ;;  %494 = vmatprep.mubr.f32.mxu0 %v3131_v7 }
  0x67   : > { %751 = vmatprep.mubr.f32.mxu1 %v3131_v7  ;;  %2738 = vmatpush1.bf16.msra.mxu1 %v2737_v17 }
  0x68   : > { %2786 = vmatpush1.bf16.msra.mxu0 %v2785_v19  ;;  %2739 = vmatprep.subr.bf16.mxu1 %v3132_v40 }
  0x69   : > { %495 = vmatmul.mubr.f32.gmra.mrb[28].mxu0 %v242_v62  ;;  %2787 = vmatprep.subr.bf16.mxu0 %v3132_v40 }
  0x6a   : > { %752 = vmatmul.mubr.f32.gmra.mrb[28].mxu1 %v242_v62  ;;  %500 = vmatprep.mubr.f32.mxu0 %v3131_v7 }
  0x6b   : > { %757 = vmatprep.mubr.f32.mxu1 %v3131_v7  ;;  %2741 = vmatpush1.bf16.msra.mxu1 %v2740_v23 }
  0x6c   : > { %2742 = vmatprep.subr.bf16.mxu1 %v3132_v40  ;;  %2789 = vmatpush1.bf16.msra.mxu0 %v2788_v27 }
  0x6d   : > { %501 = vmatmul.mubr.f32.gmra.mrb[30].mxu0 %v243_v63  ;;  %2790 = vmatprep.subr.bf16.mxu0 %v3132_v40  ;;  %v259_v40 = vld [vmem:[%s3381_s11 + $0xf8] sm:$0xff] }
  0x6e   : > { %758 = vmatmul.mubr.f32.gmra.mrb[30].mxu1 %v243_v63  ;;  %506 = vmatprep.mubr.f32.mxu0 %v3131_v7 }
  0x6f   : > { %763 = vmatprep.mubr.f32.mxu1 %v3131_v7  ;;  %2744 = vmatpush1.bf16.msra.mxu1 %v2743_v32 }
  0x70   : > { %2792 = vmatpush1.bf16.msra.mxu0 %v2791_v34 }
  0x71   : > { %507 = vmatmul.mubr.f32.gmra.mrb[32].mxu0 %v244_v0 }
  0x72   : > { %764 = vmatmul.mubr.f32.gmra.mrb[32].mxu1 %v244_v0  ;;  %512 = vmatprep.mubr.f32.mxu0 %v3131_v7 }
  0x73   : > { %769 = vmatprep.mubr.f32.mxu1 %v3131_v7 }
  0x75   : > { %513 = vmatmul.mubr.f32.gmra.mrb[34].mxu0 %v245_v1 }
  0x76   : > { %770 = vmatmul.mubr.f32.gmra.mrb[34].mxu1 %v245_v1  ;;  %518 = vmatprep.mubr.f32.mxu0 %v3131_v7 }
  0x77   : > { %775 = vmatprep.mubr.f32.mxu1 %v3131_v7 }
  0x79   : > { %519 = vmatmul.mubr.f32.gmra.mrb[36].mxu0 %v246_v2 }
  0x7a   : > { %776 = vmatmul.mubr.f32.gmra.mrb[36].mxu1 %v246_v2  ;;  %524 = vmatprep.mubr.f32.mxu0 %v3131_v7 }
  0x7b   : > { %781 = vmatprep.mubr.f32.mxu1 %v3131_v7 }
  0x7d   : > { %525 = vmatmul.mubr.f32.gmra.mrb[38].mxu0 %v247_v3 }
  0x7e   : > { %782 = vmatmul.mubr.f32.gmra.mrb[38].mxu1 %v247_v3  ;;  %530 = vmatprep.mubr.f32.mxu0 %v3131_v7 }
  0x7f   : > { %787 = vmatprep.mubr.f32.mxu1 %v3131_v7 }
  0x81   : > { %531 = vmatmul.mubr.f32.gmra.mrb[40].mxu0 %v248_v4 }
  0x82   : > { %788 = vmatmul.mubr.f32.gmra.mrb[40].mxu1 %v248_v4  ;;  %536 = vmatprep.mubr.f32.mxu0 %v3131_v7 }
  0x83   : > { %793 = vmatprep.mubr.f32.mxu1 %v3131_v7 }
  0x85   : > { %537 = vmatmul.mubr.f32.gmra.mrb[42].mxu0 %v249_v5 }
  0x86   : > { %794 = vmatmul.mubr.f32.gmra.mrb[42].mxu1 %v249_v5  ;;  %542 = vmatprep.mubr.f32.mxu0 %v3131_v7 }
  0x87   : > { %799 = vmatprep.mubr.f32.mxu1 %v3131_v7 }
  0x89   : > { %543 = vmatmul.mubr.f32.gmra.mrb[44].mxu0 %v250_v6 }
  0x8a   : > { %800 = vmatmul.mubr.f32.gmra.mrb[44].mxu1 %v250_v6  ;;  %548 = vmatprep.mubr.f32.mxu0 %v3131_v7 }
  0x8b   : > { %805 = vmatprep.mubr.f32.mxu1 %v3131_v7 }
  0x8d   : > { %549 = vmatmul.mubr.f32.gmra.mrb[46].mxu0 %v251_v8 }
  0x8e   : > { %806 = vmatmul.mubr.f32.gmra.mrb[46].mxu1 %v251_v8  ;;  %554 = vmatprep.mubr.f32.mxu0 %v3131_v7 }
  0x8f   : > { %811 = vmatprep.mubr.f32.mxu1 %v3131_v7 }
  0x91   : > { %555 = vmatmul.mubr.f32.gmra.mrb[48].mxu0 %v252_v9 }
  0x92   : > { %812 = vmatmul.mubr.f32.gmra.mrb[48].mxu1 %v252_v9  ;;  %560 = vmatprep.mubr.f32.mxu0 %v3131_v7 }
  0x93   : > { %817 = vmatprep.mubr.f32.mxu1 %v3131_v7 }
  0x95   : > { %561 = vmatmul.mubr.f32.gmra.mrb[50].mxu0 %v253_v10 }
  0x96   : > { %818 = vmatmul.mubr.f32.gmra.mrb[50].mxu1 %v253_v10  ;;  %566 = vmatprep.mubr.f32.mxu0 %v3131_v7 }
  0x97   : > { %823 = vmatprep.mubr.f32.mxu1 %v3131_v7 }
  0x99   : > { %567 = vmatmul.mubr.f32.gmra.mrb[52].mxu0 %v254_v20 }
  0x9a   : > { %824 = vmatmul.mubr.f32.gmra.mrb[52].mxu1 %v254_v20  ;;  %572 = vmatprep.mubr.f32.mxu0 %v3131_v7 }
  0x9b   : > { %829 = vmatprep.mubr.f32.mxu1 %v3131_v7 }
  0x9d   : > { %573 = vmatmul.mubr.f32.gmra.mrb[54].mxu0 %v255_v24 }
  0x9e   : > { %830 = vmatmul.mubr.f32.gmra.mrb[54].mxu1 %v255_v24  ;;  %578 = vmatprep.mubr.f32.mxu0 %v3131_v7 }
  0x9f   : > { %835 = vmatprep.mubr.f32.mxu1 %v3131_v7 }
  0xa1   : > { %579 = vmatmul.mubr.f32.gmra.mrb[56].mxu0 %v256_v28 }
  0xa2   : > { %836 = vmatmul.mubr.f32.gmra.mrb[56].mxu1 %v256_v28  ;;  %584 = vmatprep.mubr.f32.mxu0 %v3131_v7 }
  0xa3   : > { %841 = vmatprep.mubr.f32.mxu1 %v3131_v7 }
  0xa5   : > { %585 = vmatmul.mubr.f32.gmra.mrb[58].mxu0 %v257_v35 }
  0xa6   : > { %842 = vmatmul.mubr.f32.gmra.mrb[58].mxu1 %v257_v35  ;;  %590 = vmatprep.mubr.f32.mxu0 %v3131_v7 }
  0xa7   : > { %847 = vmatprep.mubr.f32.mxu1 %v3131_v7 }
  0xa9   : > { %591 = vmatmul.mubr.f32.gmra.mrb[60].mxu0 %v258_v36 }
  0xaa   : > { %848 = vmatmul.mubr.f32.gmra.mrb[60].mxu1 %v258_v36  ;;  %596 = vmatprep.mubr.f32.mxu0 %v3131_v7 }
  0xab   : > { %853 = vmatprep.mubr.f32.mxu1 %v3131_v7 }
  0xad   : > { %597 = vmatmul.mubr.f32.gmra.mrb[62].mxu0 %v259_v40 }
  0xae   : > { %854 = vmatmul.mubr.f32.gmra.mrb[62].mxu1 %v259_v40 }
 0x104   : > { %v412_v7 = vpop.f32.mrb[0].mxu0 }
 0x105   : > { %v413_v49 = vadd.f32 %v412_v7, %v3704_v45  ;;  %v669_v50 = vpop.f32.mrb[0].mxu1  ;;  %v414_v51 = vpop.f32.mrb[1].mxu0 }
 0x106   : > { %v670_v52 = vadd.f32 %v669_v50, %v3706_v46  ;;  %v415_v53 = vadd.f32 %v414_v51, %v3708_v47  ;;  %v671_v54 = vpop.f32.mrb[1].mxu1 }
 0x107   : > { %v988_v55 = vmul.f32 0.044715, %v413_v49  ;;  %v3716_v56 = vadd.f32 %v671_v54, %v3710_v48  ;;  %v3728_v8 = vmul.f32 0.5, %v413_v49 }
 0x108   : > { %v990_v57 = vmul.f32 0.044715, %v670_v52  ;;  %v989_v58 = vmul.f32 0.044715, %v415_v53  ;;  %v418_v59 = vpop.f32.mrb[2].mxu0  ;;  %v3738_v19 = vmul.f32 0.5, %v670_v52 }
 0x109   : > { %v1116_v60 = vmul.f32 %v988_v55, %v413_v49  ;;  %v3719_v61 = vadd.f32 %v418_v59, %v3704_v45  ;;  %v675_v62 = vpop.f32.mrb[2].mxu1  ;;  %v420_v63 = vpop.f32.mrb[3].mxu0  ;;  %v991_v6 = vmul.f32 0.044715, %v3716_v56  ;;  %v3748_v27 = vmul.f32 0.5, %v415_v53 }
 0x10a   : > { %v1118_v0 = vmul.f32 %v990_v57, %v670_v52  ;;  %v1117_v1 = vmul.f32 %v989_v58, %v415_v53  ;;  %v3722_v2 = vadd.f32 %v675_v62, %v3706_v46  ;;  %v3725_v3 = vadd.f32 %v420_v63, %v3708_v47  ;;  %v677_v4 = vpop.f32.mrb[3].mxu1 }
 0x10b   : > { %v1244_v5 = vmul.f32 %v1116_v60, %v413_v49  ;;  %v3731_v10 = vadd.f32 %v677_v4, %v3710_v48  ;;  %v992_v14 = vmul.f32 0.044715, %v3719_v61  ;;  %v1119_v25 = vmul.f32 %v991_v6, %v3716_v56 }
 0x10c   : > { %v1246_v9 = vmul.f32 %v1118_v0, %v670_v52  ;;  %v424_v11 = vpop.f32.mrb[4].mxu0  ;;  %v1245_v12 = vmul.f32 %v1117_v1, %v415_v53  ;;  %v994_v15 = vmul.f32 0.044715, %v3722_v2  ;;  %v993_v21 = vmul.f32 0.044715, %v3725_v3 }
 0x10d   : > { %v1372_v13 = vadd.f32 %v1244_v5, %v413_v49  ;;  %v3736_v16 = vadd.f32 %v424_v11, %v3704_v45  ;;  %v681_v17 = vpop.f32.mrb[4].mxu1  ;;  %v426_v18 = vpop.f32.mrb[5].mxu0  ;;  %v995_v28 = vmul.f32 0.044715, %v3731_v10  ;;  %v3756_v34 = vmul.f32 %v992_v14, %v3719_v61 }
 0x10e   : > { %v1374_v20 = vadd.f32 %v1246_v9, %v670_v52  ;;  %v3742_v22 = vadd.f32 %v681_v17, %v3706_v46  ;;  %v683_v23 = vpop.f32.mrb[5].mxu1  ;;  %v3746_v26 = vadd.f32 %v426_v18, %v3708_v47  ;;  %v1373_v32 = vadd.f32 %v1245_v12, %v415_v53 }
 0x10f   : > { %v1500_v24 = vmul.f32 0.7978846, %v1372_v13  ;;  %v996_v29 = vmul.f32 0.044715, %v3736_v16  ;;  %v3753_v30 = vadd.f32 %v683_v23, %v3710_v48  ;;  %v3759_v35 = vmul.f32 %v994_v15, %v3722_v2 }
 0x110   : > { %v430_v31 = vpop.f32.mrb[6].mxu0  ;;  %v1502_v33 = vmul.f32 0.7978846, %v1374_v20  ;;  %v1121_v38 = vmul.f32 %v993_v21, %v3725_v3  ;;  %v998_v39 = vmul.f32 0.044715, %v3742_v22  ;;  %v3778_v50 = vmul.f32 %v995_v28, %v3731_v10 }
 0x111   : > { %v3762_v36 = vadd.f32 %v430_v31, %v3704_v45  ;;  %v687_v40 = vpop.f32.mrb[6].mxu1  ;;  %v432_v37 = vpop.f32.mrb[7].mxu0  ;;  %2867 = vtanh.f32 %v1500_v24  ;;  %v997_v43 = vmul.f32 0.044715, %v3746_v26  ;;  %v999_v44 = vmul.f32 0.044715, %v3753_v30 }
 0x112   : > { %v3767_v41 = vadd.f32 %v687_v40, %v3706_v46  ;;  %v689_v42 = vpop.f32.mrb[7].mxu1  ;;  %v3772_v7 = vadd.f32 %v432_v37, %v3708_v47  ;;  %v3781_v51 = vmul.f32 %v996_v29, %v3736_v16  ;;  %v1501_v54 = vmul.f32 0.7978846, %v1373_v32 }
 0x113   : > { %v3775_v49 = vadd.f32 %v689_v42, %v3710_v48  ;;  %v1000_v52 = vmul.f32 0.044715, %v3762_v36  ;;  %2869 = vtanh.f32 %v1502_v33  ;;  %v3790_v62 = vmul.f32 %v998_v39, %v3742_v22 }
 0x114   : > { %v436_v53 = vpop.f32.mrb[8].mxu0  ;;  %v1002_v55 = vmul.f32 0.044715, %v3767_v41  ;;  %v1001_v57 = vmul.f32 0.044715, %v3772_v7  ;;  %2871 = vtanh.f32 %v1501_v54  ;;  %v3799_v4 = vmul.f32 %v997_v43, %v3746_v26 }
 0x115   : > { %v3787_v58 = vadd.f32 %v436_v53, %v3704_v45  ;;  %v693_v59 = vpop.f32.mrb[8].mxu1  ;;  %v438_v60 = vpop.f32.mrb[9].mxu0  ;;  %v3802_v5 = vmul.f32 %v999_v44, %v3753_v30  ;;  %v1003_v6 = vmul.f32 0.044715, %v3775_v49  ;;  %v3809_v11 = vmul.f32 %v1000_v52, %v3762_v36 }
 0x116   : > { %v3793_v63 = vadd.f32 %v693_v59, %v3706_v46  ;;  %v3796_v0 = vadd.f32 %v438_v60, %v3708_v47  ;;  %v695_v1 = vpop.f32.mrb[9].mxu1  ;;  %v3813_v14 = vmul.f32 0.5, %v3716_v56  ;;  %v1247_v15 = vmul.f32 %v1119_v25, %v3716_v56 }
 0x117   : > { %v3806_v9 = vadd.f32 %v695_v1, %v3710_v48  ;;  %v1004_v12 = vmul.f32 0.044715, %v3787_v58  ;;  %v3817_v17 = vmul.f32 %v1002_v55, %v3767_v41  ;;  %v3820_v18 = vmul.f32 %v1001_v57, %v3772_v7 }
 0x118   : > { %5731 = vst [vmem:[#allocation2_spill] sm:$0xff] %v3793_v63  ;;  %v442_v13 = vpop.f32.mrb[10].mxu0  ;;  %v1006_v20 = vmul.f32 0.044715, %v3793_v63  ;;  %v1005_v28 = vmul.f32 0.044715, %v3796_v0  ;;  %v3835_v33 = vmul.f32 %v1003_v6, %v3775_v49  ;;  %v1375_v37 = vadd.f32 %v1247_v15, %v3716_v56 }
 0x119   : > { %v3824_v21 = vadd.f32 %v442_v13, %v3704_v45  ;;  %v699_v23 = vpop.f32.mrb[10].mxu1  ;;  %v444_v24 = vpop.f32.mrb[11].mxu0  ;;  %v1007_v29 = vmul.f32 0.044715, %v3806_v9  ;;  %v3842_v39 = vmul.f32 0.5, %v3725_v3  ;;  %v3845_v43 = vmul.f32 %v1004_v12, %v3787_v58 }
 0x11a   : > { %v3829_v31 = vadd.f32 %v699_v23, %v3706_v46  ;;  %v3832_v25 = vadd.f32 %v444_v24, %v3708_v47  ;;  %v701_v32 = vpop.f32.mrb[11].mxu1  ;;  %v1249_v54 = vmul.f32 %v1121_v38, %v3725_v3  ;;  %v3851_v55 = vmul.f32 %v1006_v20, %v3793_v63 }
 0x11b   : > { %5732 = vst [vmem:[#allocation3_spill] sm:$0xff] %v3824_v21  ;;  %v3838_v40 = vadd.f32 %v701_v32, %v3710_v48  ;;  %v2868_v42 = vpop.eup %2867  ;;  %5735 = vst [vmem:[#allocation6_spill] sm:$0xff] %v3845_v43  ;;  %v1008_v44 = vmul.f32 0.044715, %v3824_v21  ;;  %v1503_v1 = vmul.f32 0.7978846, %v1375_v37  ;;  %v3858_v6 = vmul.f32 %v1005_v28, %v3796_v0 }
 0x11c   : > { %5733 = vst [vmem:[#allocation4_spill] sm:$0xff] %v3829_v31  ;;  %5734 = vst [vmem:[#allocation5_spill] sm:$0xff] %v3832_v25  ;;  %v1010_v52 = vmul.f32 0.044715, %v3829_v31  ;;  %v448_v53 = vpop.f32.mrb[12].mxu0  ;;  %v3861_v12 = vmul.f32 %v1007_v29, %v3806_v9  ;;  %v1756_v32 = vadd.f32 1.0, %v2868_v42 }
 0x11d   : > { %5736 = vst [vmem:[#allocation7_spill] sm:$0xff] %v3851_v55  ;;  %v1009_v57 = vmul.f32 0.044715, %v3832_v25  ;;  %v3855_v56 = vadd.f32 %v448_v53, %v3704_v45  ;;  %v705_v59 = vpop.f32.mrb[12].mxu1  ;;  %v450_v60 = vpop.f32.mrb[13].mxu0  ;;  %2873 = vtanh.f32 %v1503_v1  ;;  %v3874_v37 = vmul.f32 %v1008_v44, %v3824_v21 }
 0x11e   : > { %v3864_v13 = vadd.f32 %v705_v59, %v3706_v46  ;;  %v3867_v38 = vadd.f32 %v450_v60, %v3708_v47  ;;  %v707_v15 = vpop.f32.mrb[13].mxu1  ;;  %v2870_v20 = vpop.eup %2869  ;;  %v1011_v23 = vmul.f32 0.044715, %v3838_v40  ;;  %v3877_v29 = vmul.f32 %v1010_v52, %v3829_v31 }
 0x11f   : > { %5737 = vst [vmem:[#allocation8_spill] sm:$0xff] %v3855_v56  ;;  %v3871_v24 = vadd.f32 %v707_v15, %v3710_v48  ;;  %v2872_v28 = vpop.eup %2871  ;;  %5740 = vst [vmem:[#allocation11_spill] sm:$0xff] %v3874_v37  ;;  %v1012_v53 = vmul.f32 0.044715, %v3855_v56  ;;  %v1377_v60 = vadd.f32 %v1249_v54, %v3725_v3  ;;  %v3882_v55 = vmul.f32 %v1009_v57, %v3832_v25 }
 0x120   : > { %5738 = vst [vmem:[#allocation9_spill] sm:$0xff] %v3864_v13  ;;  %5741 = vst [vmem:[#allocation12_spill] sm:$0xff] %v3877_v29  ;;  %v454_v59 = vpop.f32.mrb[14].mxu0  ;;  %v1014_v15 = vmul.f32 0.044715, %v3864_v13  ;;  %v1757_v44 = vadd.f32 1.0, %v2872_v28  ;;  %v3897_v57 = vmul.f32 %v1011_v23, %v3838_v40  ;;  %v1884_v31 = vmul.f32 %v1756_v32, %v3728_v8 }
 0x121   : > { %5739 = vst [vmem:[#allocation10_spill] sm:$0xff] %v3871_v24  ;;  %5742 = vst [vmem:[#allocation13_spill] sm:$0xff] %v3882_v55  ;;  %v3886_v1 = vadd.f32 %v454_v59, %v3704_v45  ;;  %v711_v42 = vpop.f32.mrb[14].mxu1  ;;  %v456_v63 = vpop.f32.mrb[15].mxu0  ;;  %v1013_v37 = vmul.f32 0.044715, %v3867_v38  ;;  %v3902_v28 = vmul.f32 %v1012_v53, %v3855_v56 }
 0x122   : > { %v1015_v52 = vmul.f32 0.044715, %v3871_v24  ;;  %v3891_v29 = vadd.f32 %v711_v42, %v3706_v46  ;;  %v3894_v3 = vadd.f32 %v456_v63, %v3708_v47  ;;  %v713_v54 = vpop.f32.mrb[15].mxu1  ;;  %v1885_v59 = vmul.f32 %v1757_v44, %v3748_v27 }
 0x123   : > { %5743 = vst [vmem:[#allocation14_spill] sm:$0xff] %v3886_v1  ;;  %v1758_v21 = vadd.f32 1.0, %v2870_v20  ;;  %5746 = vst [vmem:[#allocation17_spill] sm:$0xff] %v3902_v28  ;;  %v1016_v55 = vmul.f32 0.044715, %v3886_v1  ;;  %v3907_v25 = vadd.f32 %v713_v54, %v3710_v48  ;;  %v3910_v43 = vmul.f32 %v1014_v15, %v3864_v13 }
 0x124   : > { %5744 = vst [vmem:[#allocation15_spill] sm:$0xff] %v3891_v29  ;;  %5745 = vst [vmem:[#allocation16_spill] sm:$0xff] %v3894_v3  ;;  %v1018_v42 = vmul.f32 0.044715, %v3891_v29  ;;  %v460_v63 = vpop.f32.mrb[16].mxu0  ;;  %2147 = vmatprep.mubr.f32.mxu1 %v1885_v59  ;;  %v3917_v53 = vmul.f32 %v1013_v37, %v3867_v38  ;;  %v3920_v44 = vmul.f32 %v1015_v52, %v3871_v24  ;;  %v3933_v37 = vmul.f32 0.5, %v3731_v10 }
 0x125   : > { %5747 = vst [vmem:[#allocation18_spill] sm:$0xff] %v3910_v43  ;;  %v1017_v23 = vmul.f32 0.044715, %v3894_v3  ;;  %v3914_v8 = vadd.f32 %v460_v63, %v3704_v45  ;;  %v717_v27 = vpop.f32.mrb[16].mxu1  ;;  %v462_v20 = vpop.f32.mrb[17].mxu0  ;;  %2148 = vmatmul.mubr.f32.vlgmr.msra.gmra.mrb[64].mxu1 %v1884_v31  ;;  %v1886_v63 = vmul.f32 %v1758_v21, %v3738_v19 }
 0x126   : > { %v1505_v32 = vmul.f32 0.7978846, %v1377_v60  ;;  %5749 = vst [vmem:[#allocation20_spill] sm:$0xff] %v3920_v44  ;;  %v3923_v54 = vadd.f32 %v717_v27, %v3706_v46  ;;  %v3926_v15 = vadd.f32 %v462_v20, %v3708_v47  ;;  %v719_v59 = vpop.f32.mrb[17].mxu1  ;;  %v3936_v60 = vmul.f32 %v1016_v55, %v3886_v1 }
 0x127   : > { %5748 = vst [vmem:[#allocation19_spill] sm:$0xff] %v3914_v8  ;;  %v3930_v43 = vadd.f32 %v719_v59, %v3710_v48  ;;  %v3939_v31 = vmul.f32 %v1018_v42, %v3891_v29  ;;  %v1019_v52 = vmul.f32 0.044715, %v3907_v25  ;;  %v1251_v27 = vmul.f32 %v3778_v50, %v3731_v10  ;;  %v2874_v19 = vpop.eup %2873 }
 0x128   : > { %5750 = vst [vmem:[#allocation21_spill] sm:$0xff] %v3923_v54  ;;  %2875 = vtanh.f32 %v1505_v32  ;;  %5751 = vst [vmem:[#allocation22_spill] sm:$0xff] %v3936_v60  ;;  %v466_v20 = vpop.f32.mrb[18].mxu0  ;;  %v3945_v21 = vmul.f32 %v1017_v23, %v3894_v3  ;;  %v1020_v32 = vmul.f32 0.044715, %v3914_v8  ;;  %v1248_v55 = vmul.f32 %v3756_v34, %v3719_v61 }
 0x129   : > { %5752 = vst [vmem:[#allocation23_spill] sm:$0xff] %v3939_v31  ;;  %v1022_v59 = vmul.f32 0.044715, %v3923_v54  ;;  %v723_v60 = vpop.f32.mrb[18].mxu1  ;;  %v468_v42 = vpop.f32.mrb[19].mxu0  ;;  %v1759_v31 = vadd.f32 1.0, %v2874_v19  ;;  %v1379_v1 = vadd.f32 %v1251_v27, %v3731_v10  ;;  %v1250_v3 = vmul.f32 %v3759_v35, %v3722_v2 }
 0x12a   : > { %5753 = vst [vmem:[#allocation24_spill] sm:$0xff] %v3945_v21  ;;  %v1021_v29 = vmul.f32 0.044715, %v3926_v15  ;;  %v3954_v50 = vmul.f32 0.5, %v3719_v61  ;;  %v725_v13 = vpop.f32.mrb[19].mxu1  ;;  %v1376_v21 = vadd.f32 %v1248_v55, %v3719_v61  ;;  %v3961_v34 = vadd.f32 %v466_v20, %v3704_v45 }
 0x12b   : > { %v1023_v23 = vmul.f32 0.044715, %v3930_v43  ;;  %v1887_v19 = vmul.f32 %v1759_v31, %v3813_v14  ;;  %v1507_v28 = vmul.f32 0.7978846, %v1379_v1  ;;  %v3965_v56 = vadd.f32 %v723_v60, %v3706_v46 }
 0x12c   : > { %5754 = vst [vmem:[#allocation25_spill] sm:$0xff] %v3961_v34  ;;  %v3968_v10 = vadd.f32 %v468_v42, %v3708_v47  ;;  %v472_v27 = vpop.f32.mrb[20].mxu0  ;;  %v3971_v44 = vmul.f32 %v1019_v52, %v3907_v25  ;;  %v1504_v61 = vmul.f32 0.7978846, %v1376_v21  ;;  %v1378_v55 = vadd.f32 %v1250_v3, %v3722_v2 }
 0x12d   : > { %5755 = vst [vmem:[#allocation26_spill] sm:$0xff] %v3965_v56  ;;  %v1024_v35 = vmul.f32 0.044715, %v3961_v34  ;;  %v729_v20 = vpop.f32.mrb[20].mxu1  ;;  %v474_v24 = vpop.f32.mrb[21].mxu0  ;;  %2372 = vmatprep.mubr.f32.mxu0 %v1887_v19  ;;  %v3976_v14 = vmul.f32 %v1020_v32, %v3914_v8  ;;  %2877 = vtanh.f32 %v1507_v28  ;;  %v3979_v1 = vmul.f32 0.5, %v3722_v2 }
 0x12e   : > { %v3982_v60 = vadd.f32 %v725_v13, %v3710_v48  ;;  %v731_v31 = vpop.f32.mrb[21].mxu1  ;;  %2373 = vmatmul.mubr.f32.vlgmr.msra.gmra.mrb[64].mxu0 %v1886_v63  ;;  %v3985_v52 = vmul.f32 %v1022_v59, %v3923_v54  ;;  %v3988_v3 = vmul.f32 %v1021_v29, %v3926_v15  ;;  %2879 = vtanh.f32 %v1504_v61 }
 0x12f   : > { %5756 = vst [vmem:[#allocation27_spill] sm:$0xff] %v3976_v14  ;;  %v1506_v21 = vmul.f32 0.7978846, %v1378_v55  ;;  %v3991_v32 = vmul.f32 %v1023_v23, %v3930_v43  ;;  %v1026_v28 = vmul.f32 0.044715, %v3965_v56  ;;  %v1253_v13 = vmul.f32 %v3799_v4, %v3746_v26 }
 0x130   : > { %5757 = vst [vmem:[#allocation28_spill] sm:$0xff] %v3982_v60  ;;  %5758 = vst [vmem:[#allocation29_spill] sm:$0xff] %v3985_v52  ;;  %v1025_v2 = vmul.f32 0.044715, %v3968_v10  ;;  %v3997_v42 = vpop.f32.mrb[22].mxu0  ;;  %v4000_v59 = vmul.f32 %v1024_v35, %v3961_v34  ;;  %v4003_v29 = vmul.f32 0.5, %v3746_v26  ;;  %v1255_v23 = vmul.f32 %v3802_v5, %v3753_v30 }
 0x131   : > { %2881 = vtanh.f32 %v1506_v21  ;;  %v4007_v19 = vpop.f32.mrb[22].mxu1  ;;  %v4009_v61 = vpop.f32.mrb[23].mxu0  ;;  %v1027_v4 = vmul.f32 0.044715, %v3982_v60  ;;  %v1381_v52 = vadd.f32 %v1253_v13, %v3746_v26  ;;  %v1252_v21 = vmul.f32 %v3781_v51, %v3736_v16 }
 0x132   : > { %v2876_v63 = vpop.eup %2875  ;;  %5759 = vst [vmem:[#allocation30_spill] sm:$0xff] %v4000_v59  ;;  %v4015_v35 = vpop.f32.mrb[23].mxu1  ;;  %v1383_v59 = vadd.f32 %v1255_v23, %v3753_v30  ;;  %v1254_v34 = vmul.f32 %v3790_v62, %v3742_v22  ;;  %v4021_v5 = vadd.f32 %v472_v27, %v3704_v45  ;;  %v4024_v54 = vadd.f32 %v729_v20, %v3706_v46 }
 0x133   : > { %v1761_v55 = vadd.f32 1.0, %v2876_v63  ;;  %v1509_v14 = vmul.f32 0.7978846, %v1381_v52  ;;  %v1380_v26 = vadd.f32 %v1252_v21, %v3736_v16  ;;  %v4029_v51 = vadd.f32 %v474_v24, %v3708_v47 }
 0x134   : > { %5760 = vst [vmem:[#allocation31_spill] sm:$0xff] %v4021_v5  ;;  %5761 = vst [vmem:[#allocation32_spill] sm:$0xff] %v4024_v54  ;;  %v4031_v13 = vpop.f32.mrb[24].mxu0  ;;  %v4034_v23 = vmul.f32 %v1026_v28, %v3965_v56  ;;  %v1511_v62 = vmul.f32 0.7978846, %v1383_v59  ;;  %v1382_v27 = vadd.f32 %v1254_v34, %v3742_v22  ;;  %v4039_v20 = vmul.f32 %v1025_v2, %v3968_v10 }
 0x135   : > { %v1889_v63 = vmul.f32 %v1761_v55, %v3842_v39  ;;  %v1028_v8 = vmul.f32 0.044715, %v4021_v5  ;;  %2883 = vtanh.f32 %v1509_v14  ;;  %v1508_v39 = vmul.f32 0.7978846, %v1380_v26  ;;  %v4042_v24 = vpop.f32.mrb[24].mxu1  ;;  %v4044_v55 = vpop.f32.mrb[25].mxu0 }
 0x136   : > { %5762 = vst [vmem:[#allocation33_spill] sm:$0xff] %v4034_v23  ;;  %5763 = vst [vmem:[#allocation34_spill] sm:$0xff] %v4039_v20  ;;  %v1030_v52 = vmul.f32 0.044715, %v4024_v54  ;;  %v4047_v28 = vmul.f32 0.5, %v3753_v30  ;;  %2885 = vtanh.f32 %v1511_v62  ;;  %v4050_v21 = vpop.f32.mrb[25].mxu1  ;;  %v4053_v2 = vmul.f32 %v1027_v4, %v3982_v60 }
 0x137   : > { %2152 = vmatprep.mubr.f32.mxu1 %v1889_v63  ;;  %v1510_v59 = vmul.f32 0.7978846, %v1382_v27  ;;  %v1029_v34 = vmul.f32 0.044715, %v4029_v51  ;;  %v2878_v63 = vpop.eup %2877  ;;  %v4056_v14 = vmul.f32 0.5, %v3736_v16  ;;  %2887 = vtanh.f32 %v1508_v39 }
 0x138   : > { %5764 = vst [vmem:[#allocation35_spill] sm:$0xff] %v4053_v2  ;;  %v4059_v26 = vmul.f32 0.5, %v3742_v22  ;;  %v4061_v23 = vpop.f32.mrb[26].mxu0  ;;  %v2880_v30 = vpop.eup %2879  ;;  %v1763_v62 = vadd.f32 1.0, %v2878_v63  ;;  %v4064_v27 = vadd.f32 %v731_v31, %v3710_v48  ;;  %v1257_v56 = vmul.f32 %v3820_v18, %v3772_v7 }
 0x139   : > { %2889 = vtanh.f32 %v1510_v59  ;;  %v4068_v4 = vpop.f32.mrb[26].mxu1  ;;  %v4070_v2 = vpop.f32.mrb[27].mxu0  ;;  %v1760_v16 = vadd.f32 1.0, %v2880_v30  ;;  %v4073_v39 = vmul.f32 %v1028_v8, %v4021_v5  ;;  %v4076_v22 = vmul.f32 %v1030_v52, %v4024_v54 }
 0x13a   : > { %5765 = vst [vmem:[#allocation36_spill] sm:$0xff] %v4064_v27  ;;  %v1259_v59 = vmul.f32 %v3835_v33, %v3775_v49  ;;  %v4080_v63 = vpop.f32.mrb[27].mxu1  ;;  %v1891_v60 = vmul.f32 %v1763_v62, %v3933_v37  ;;  %v4084_v18 = vmul.f32 %v1029_v34, %v4029_v51  ;;  %v1385_v20 = vadd.f32 %v1257_v56, %v3772_v7 }
 0x13b   : > { %5766 = vst [vmem:[#allocation37_spill] sm:$0xff] %v4073_v39  ;;  %5767 = vst [vmem:[#allocation38_spill] sm:$0xff] %v4076_v22  ;;  %v2882_v31 = vpop.eup %2881  ;;  %v1256_v8 = vmul.f32 %v3809_v11, %v3762_v36  ;;  %v1888_v30 = vmul.f32 %v1760_v16, %v3954_v50  ;;  %v1258_v33 = vmul.f32 %v3817_v17, %v3767_v41  ;;  %v1031_v37 = vmul.f32 0.044715, %v4064_v27 }
 0x13c   : > { %5768 = vst [vmem:[#allocation39_spill] sm:$0xff] %v4084_v18  ;;  %v1762_v52 = vadd.f32 1.0, %v2882_v31  ;;  %v1387_v22 = vadd.f32 %v1259_v59, %v3775_v49  ;;  %v4093_v54 = vpop.f32.mrb[28].mxu0  ;;  %2377 = vmatprep.mubr.f32.mxu0 %v1891_v60  ;;  %v1513_v34 = vmul.f32 0.7978846, %v1385_v20  ;;  %v4099_v56 = vadd.f32 %v3997_v42, %v3704_v45 }
 0x13d   : > { %v1384_v62 = vadd.f32 %v1256_v8, %v3762_v36  ;;  %v4101_v11 = vpop.f32.mrb[28].mxu1  ;;  %v4103_v50 = vpop.f32.mrb[29].mxu0  ;;  %2153 = vmatmul.mubr.f32.gmra.mrb[66].mxu1 %v1888_v30  ;;  %v1386_v59 = vadd.f32 %v1258_v33, %v3767_v41  ;;  %v4109_v60 = vadd.f32 %v4007_v19, %v3706_v46  ;;  %v4114_v31 = vmul.f32 0.5, %v3772_v7 }
 0x13e   : > { %5769 = vst [vmem:[#allocation40_spill] sm:$0xff] %v4099_v56  ;;  %v1890_v16 = vmul.f32 %v1762_v52, %v3979_v1  ;;  %v1515_v17 = vmul.f32 0.7978846, %v1387_v22  ;;  %v4111_v20 = vpop.f32.mrb[29].mxu1  ;;  %2891 = vtanh.f32 %v1513_v34  ;;  %v4118_v8 = vadd.f32 %v4009_v61, %v3708_v47 }
 0x13f   : > { %5770 = vst [vmem:[#allocation41_spill] sm:$0xff] %v4109_v60  ;;  %v1512_v42 = vmul.f32 0.7978846, %v1384_v62  ;;  %v2884_v30 = vpop.eup %2883  ;;  %v4121_v1 = vmul.f32 0.5, %v3775_v49  ;;  %v1514_v22 = vmul.f32 0.7978846, %v1386_v59  ;;  %v4127_v34 = vmul.f32 %v1031_v37, %v4064_v27 }
 0x140   : > { %5771 = vst [vmem:[#allocation42_spill] sm:$0xff] %v4118_v8  ;;  %2378 = vmatmul.mubr.f32.gmra.mrb[66].mxu0 %v1890_v16  ;;  %2893 = vtanh.f32 %v1515_v17  ;;  %v1032_v19 = vmul.f32 0.044715, %v4099_v56  ;;  %v4124_v52 = vpop.f32.mrb[30].mxu0  ;;  %v2886_v33 = vpop.eup %2885  ;;  %v1765_v7 = vadd.f32 1.0, %v2884_v30  ;;  %v4131_v61 = vadd.f32 %v4015_v35, %v3710_v48 }
 0x141   : > { %5772 = vst [vmem:[#allocation43_spill] sm:$0xff] %v4127_v34  ;;  %2895 = vtanh.f32 %v1512_v42  ;;  %v4133_v62 = vpop.f32.mrb[30].mxu1  ;;  %v4135_v49 = vpop.f32.mrb[31].mxu0  ;;  %v1767_v17 = vadd.f32 1.0, %v2886_v33  ;;  %v4138_v59 = vmul.f32 0.5, %v3762_v36  ;;  %v1261_v34 = vmul.f32 %v3858_v6, %v3796_v0 }
 0x142   : > { %5773 = vst [vmem:[#allocation44_spill] sm:$0xff] %v4131_v61  ;;  %v2888_v16 = vpop.eup %2887  ;;  %2897 = vtanh.f32 %v1514_v22  ;;  %v1034_v30 = vmul.f32 0.044715, %v4109_v60  ;;  %v4141_v39 = vpop.f32.mrb[31].mxu1  ;;  %v1893_v42 = vmul.f32 %v1765_v7, %v4003_v29  ;;  %v1033_v35 = vmul.f32 0.044715, %v4118_v8 }
 0x143   : > { %v2890_v37 = vpop.eup %2889  ;;  %v1764_v5 = vadd.f32 1.0, %v2888_v16  ;;  %v1895_v27 = vmul.f32 %v1767_v17, %v4047_v28  ;;  %v4149_v36 = vmul.f32 0.5, %v3767_v41  ;;  %v4152_v22 = vmul.f32 %v1032_v19, %v4099_v56 }
 0x144   : > { %v1766_v33 = vadd.f32 1.0, %v2890_v37  ;;  %v4154_v18 = vpop.f32.mrb[32].mxu0  ;;  %2157 = vmatprep.mubr.f32.mxu1 %v1893_v42  ;;  %v1035_v7 = vmul.f32 0.044715, %v4131_v61  ;;  %v1389_v16 = vadd.f32 %v1261_v34, %v3796_v0  ;;  %v1263_v6 = vmul.f32 %v3861_v12, %v3806_v9  ;;  %v5776_v37 = vld [vmem:[#allocation6_spill] sm:$0xff]  ;;  %v5778_v42 = vld [vmem:[#allocation7_spill] sm:$0xff] }
 0x145   : > { %5774 = vst [vmem:[#allocation45_spill] sm:$0xff] %v4152_v22  ;;  %v1892_v29 = vmul.f32 %v1764_v5, %v4056_v14  ;;  %v4161_v28 = vpop.f32.mrb[32].mxu1  ;;  %v4163_v17 = vpop.f32.mrb[33].mxu0  ;;  %2382 = vmatprep.mubr.f32.mxu0 %v1895_v27  ;;  %v4167_v19 = vmul.f32 %v1034_v30, %v4109_v60  ;;  %v1260_v5 = vmul.f32 %v5776_v37, %v3787_v58  ;;  %v5777_v14 = vld [vmem:[#allocation2_spill] sm:$0xff]  ;;  %v4184_v30 = vmul.f32 0.5, %v3796_v0 }
 0x146   : > { %v1894_v41 = vmul.f32 %v1766_v33, %v4059_v26  ;;  %v1262_v22 = vmul.f32 %v5778_v42, %v5777_v14  ;;  %v4173_v34 = vpop.f32.mrb[33].mxu1  ;;  %v4176_v12 = vmul.f32 %v1033_v35, %v4118_v8  ;;  %v1517_v56 = vmul.f32 0.7978846, %v1389_v16 }
 0x147   : > { %5775 = vst [vmem:[#allocation46_spill] sm:$0xff] %v4167_v19  ;;  %2158 = vmatmul.mubr.f32.gmra.mrb[68].mxu1 %v1892_v29  ;;  %v1391_v27 = vadd.f32 %v1263_v6, %v3806_v9  ;;  %v4181_v26 = vadd.f32 %v4031_v13, %v3704_v45  ;;  %v1388_v33 = vadd.f32 %v1260_v5, %v3787_v58 }
 0x148   : > { %5779 = vst [vmem:[#allocation6_spill] sm:$0xff] %v4176_v12  ;;  %2383 = vmatmul.mubr.f32.gmra.mrb[68].mxu0 %v1894_v41  ;;  %v1390_v37 = vadd.f32 %v1262_v22, %v5777_v14  ;;  %v4190_v29 = vadd.f32 %v4042_v24, %v3706_v46  ;;  %v4192_v35 = vpop.f32.mrb[34].mxu0  ;;  %v2892_v16 = vpop.eup %2891  ;;  %v4195_v6 = vmul.f32 %v1035_v7, %v4131_v61  ;;  %2899 = vtanh.f32 %v1517_v56 }
 0x149   : > { %5780 = vst [vmem:[#allocation2_spill] sm:$0xff] %v4181_v26  ;;  %v1519_v13 = vmul.f32 0.7978846, %v1391_v27  ;;  %v4199_v0 = vadd.f32 %v4044_v55, %v3708_v47  ;;  %v1769_v5 = vadd.f32 1.0, %v2892_v16  ;;  %v4202_v22 = vmul.f32 0.5, %v3806_v9  ;;  %v4209_v7 = vpop.f32.mrb[34].mxu1 }
 0x14a   : > { %5781 = vst [vmem:[#allocation7_spill] sm:$0xff] %v4190_v29  ;;  %5782 = vst [vmem:[#allocation47_spill] sm:$0xff] %v4195_v6  ;;  %v2894_v41 = vpop.eup %2893  ;;  %v1516_v42 = vmul.f32 0.7978846, %v1388_v33  ;;  %v1518_v24 = vmul.f32 0.7978846, %v1390_v37  ;;  %v4207_v56 = vadd.f32 %v4050_v21, %v3710_v48 }
 0x14b   : > { %5783 = vst [vmem:[#allocation48_spill] sm:$0xff] %v4199_v0  ;;  %v2896_v19 = vpop.eup %2895  ;;  %v1771_v60 = vadd.f32 1.0, %v2894_v41  ;;  %2901 = vtanh.f32 %v1519_v13  ;;  %v1036_v12 = vmul.f32 0.044715, %v4181_v26  ;;  %v4211_v55 = vpop.f32.mrb[35].mxu0  ;;  %v1897_v16 = vmul.f32 %v1769_v5, %v4114_v31 }
 0x14c   : > { %5784 = vst [vmem:[#allocation49_spill] sm:$0xff] %v4207_v56  ;;  %v2898_v27 = vpop.eup %2897  ;;  %v1768_v9 = vadd.f32 1.0, %v2896_v19  ;;  %2903 = vtanh.f32 %v1516_v42  ;;  %v1038_v33 = vmul.f32 0.044715, %v4190_v29  ;;  %v4215_v37 = vpop.f32.mrb[35].mxu1  ;;  %v876_v19 = vmul.f32 0.5, %v3787_v58 }
 0x14d   : > { %5785 = vst [vmem:[#allocation50_spill] sm:$0xff] %v4215_v37  ;;  %v4217_v13 = vpop.f32.mrb[36].mxu0  ;;  %v1899_v41 = vmul.f32 %v1771_v60, %v4121_v1  ;;  %v1770_v6 = vadd.f32 1.0, %v2898_v27  ;;  %2905 = vtanh.f32 %v1518_v24  ;;  %v1037_v21 = vmul.f32 0.044715, %v4199_v0  ;;  %v4221_v61 = vpop.f32.mrb[36].mxu1  ;;  %2162 = vmatprep.mubr.f32.mxu1 %v1897_v16 }
 0x14e   : > { %5786 = vst [vmem:[#allocation51_spill] sm:$0xff] %v4217_v13  ;;  %v4223_v8 = vpop.f32.mrb[37].mxu0  ;;  %v1896_v31 = vmul.f32 %v1768_v9, %v4138_v59  ;;  %v4228_v5 = vmul.f32 0.5, %v5777_v14  ;;  %v5787_v42 = vld [vmem:[#allocation5_spill] sm:$0xff]  ;;  %v4232_v60 = vpop.f32.mrb[37].mxu1  ;;  %v4236_v24 = vmul.f32 %v1036_v12, %v4181_v26  ;;  %v1267_v58 = vmul.f32 %v3897_v57, %v3838_v40  ;;  %v5791_v16 = vld [vmem:[#allocation3_spill] sm:$0xff] }
 0x14f   : > { %v5788_v13 = vld [vmem:[#allocation13_spill] sm:$0xff]  ;;  %2387 = vmatprep.mubr.f32.mxu0 %v1899_v41  ;;  %v1898_v1 = vmul.f32 %v1770_v6, %v4149_v36  ;;  %v4239_v27 = vmul.f32 0.5, %v5787_v42  ;;  %v4244_v59 = vmul.f32 %v1038_v33, %v4190_v29  ;;  %v5792_v9 = vld [vmem:[#allocation11_spill] sm:$0xff]  ;;  %v5793_v41 = vld [vmem:[#allocation4_spill] sm:$0xff]  ;;  %v1039_v57 = vmul.f32 0.044715, %v4207_v56 }
 0x150   : > { %v1265_v37 = vmul.f32 %v5788_v13, %v5787_v42  ;;  %5789 = vst [vmem:[#allocation5_spill] sm:$0xff] %v4236_v24  ;;  %2163 = vmatmul.mubr.f32.gmra.mrb[70].mxu1 %v1896_v31  ;;  %v1264_v13 = vmul.f32 %v5792_v9, %v5791_v16  ;;  %v5794_v36 = vld [vmem:[#allocation12_spill] sm:$0xff]  ;;  %v4251_v12 = vpop.f32.mrb[38].mxu0  ;;  %v4254_v24 = vmul.f32 %v1037_v21, %v4199_v0  ;;  %v4275_v29 = vmul.f32 0.5, %v3838_v40 }
 0x151   : > { %5790 = vst [vmem:[#allocation13_spill] sm:$0xff] %v4244_v59  ;;  %v1266_v6 = vmul.f32 %v5794_v36, %v5793_v41  ;;  %2388 = vmatmul.mubr.f32.gmra.mrb[70].mxu0 %v1898_v1  ;;  %v1395_v31 = vadd.f32 %v1267_v58, %v3838_v40  ;;  %v4260_v33 = vadd.f32 %v4061_v23, %v3704_v45 }
 0x152   : > { %v1393_v14 = vadd.f32 %v1265_v37, %v5787_v42  ;;  %5795 = vst [vmem:[#allocation3_spill] sm:$0xff] %v4254_v24  ;;  %v4262_v37 = vpop.f32.mrb[38].mxu1  ;;  %v4264_v42 = vpop.f32.mrb[39].mxu0  ;;  %v1392_v36 = vadd.f32 %v1264_v13, %v5791_v16  ;;  %v4270_v21 = vadd.f32 %v4068_v4, %v3706_v46  ;;  %v4279_v26 = vadd.f32 %v4070_v2, %v3708_v47 }
 0x153   : > { %5796 = vst [vmem:[#allocation11_spill] sm:$0xff] %v4260_v33  ;;  %v1394_v1 = vadd.f32 %v1266_v6, %v5793_v41  ;;  %v4272_v59 = vpop.f32.mrb[39].mxu1  ;;  %v2900_v58 = vpop.eup %2899  ;;  %v1523_v23 = vmul.f32 0.7978846, %v1395_v31  ;;  %v1040_v40 = vmul.f32 0.044715, %v4260_v33  ;;  %v4291_v2 = vadd.f32 %v4080_v63, %v3710_v48 }
 0x154   : > { %v1521_v9 = vmul.f32 0.7978846, %v1393_v14  ;;  %5797 = vst [vmem:[#allocation4_spill] sm:$0xff] %v4270_v21  ;;  %5798 = vst [vmem:[#allocation12_spill] sm:$0xff] %v4272_v59  ;;  %v1269_v14 = vmul.f32 %v3917_v53, %v3867_v38  ;;  %v1773_v13 = vadd.f32 1.0, %v2900_v58  ;;  %v4283_v4 = vpop.f32.mrb[40].mxu0  ;;  %v4286_v59 = vmul.f32 %v1039_v57, %v4207_v56 }
 0x155   : > { %v1520_v6 = vmul.f32 0.7978846, %v1392_v36  ;;  %v1522_v24 = vmul.f32 0.7978846, %v1394_v1  ;;  %5799 = vst [vmem:[#allocation52_spill] sm:$0xff] %v4283_v4  ;;  %v2902_v0 = vpop.eup %2901  ;;  %v4293_v31 = vpop.f32.mrb[40].mxu1 }
 0x156   : > { %2907 = vtanh.f32 %v1521_v9  ;;  %5800 = vst [vmem:[#allocation53_spill] sm:$0xff] %v4286_v59  ;;  %5801 = vst [vmem:[#allocation54_spill] sm:$0xff] %v4293_v31  ;;  %v4295_v53 = vpop.f32.mrb[41].mxu0  ;;  %v2904_v9 = vpop.eup %2903  ;;  %v1901_v36 = vmul.f32 %v1773_v13, %v4184_v30  ;;  %v1775_v1 = vadd.f32 1.0, %v2902_v0  ;;  %v1042_v58 = vmul.f32 0.044715, %v4270_v21 }
 0x157   : > { %2909 = vtanh.f32 %v1523_v23  ;;  %5802 = vst [vmem:[#allocation55_spill] sm:$0xff] %v4295_v53  ;;  %v4299_v57 = vpop.f32.mrb[41].mxu1  ;;  %v2906_v23 = vpop.eup %2905  ;;  %v1772_v4 = vadd.f32 1.0, %v2904_v9  ;;  %v4302_v59 = vmul.f32 0.5, %v5791_v16  ;;  %v1041_v63 = vmul.f32 0.044715, %v4279_v26 }
 0x158   : > { %2911 = vtanh.f32 %v1520_v6  ;;  %5803 = vst [vmem:[#allocation56_spill] sm:$0xff] %v4299_v57  ;;  %2167 = vmatprep.mubr.f32.mxu1 %v1901_v36  ;;  %v1903_v53 = vmul.f32 %v1775_v1, %v4202_v22  ;;  %v1774_v31 = vadd.f32 1.0, %v2906_v23  ;;  %v4307_v30 = vmul.f32 0.5, %v5793_v41  ;;  %v4310_v13 = vpop.f32.mrb[42].mxu0  ;;  %v5807_v57 = vld [vmem:[#allocation20_spill] sm:$0xff] }
 0x159   : > { %2913 = vtanh.f32 %v1522_v24  ;;  %v1397_v0 = vadd.f32 %v1269_v14, %v3867_v38  ;;  %5804 = vst [vmem:[#allocation57_spill] sm:$0xff] %v4310_v13  ;;  %v1900_v6 = vmul.f32 %v1772_v4, %v876_v19  ;;  %v4313_v9 = vmul.f32 %v1040_v40, %v4260_v33  ;;  %v5806_v24 = vld [vmem:[#allocation10_spill] sm:$0xff]  ;;  %v4318_v36 = vpop.f32.mrb[42].mxu1  ;;  %v4320_v22 = vpop.f32.mrb[43].mxu0  ;;  %v5811_v19 = vld [vmem:[#allocation8_spill] sm:$0xff]  ;;  %v5812_v4 = vld [vmem:[#allocation17_spill] sm:$0xff] }
 0x15a   : > { %v1043_v16 = vmul.f32 0.044715, %v4291_v2  ;;  %v1271_v56 = vmul.f32 %v5807_v57, %v5806_v24  ;;  %5808 = vst [vmem:[#allocation10_spill] sm:$0xff] %v4318_v36  ;;  %5809 = vst [vmem:[#allocation20_spill] sm:$0xff] %v4320_v22  ;;  %2392 = vmatprep.mubr.f32.mxu0 %v1903_v53  ;;  %v1902_v41 = vmul.f32 %v1774_v31, %v4228_v5  ;;  %v4328_v23 = vpop.f32.mrb[43].mxu1  ;;  %v5814_v36 = vld [vmem:[#allocation9_spill] sm:$0xff] }
 0x15b   : > { %5805 = vst [vmem:[#allocation58_spill] sm:$0xff] %v4313_v9  ;;  %v4324_v14 = vmul.f32 %v1042_v58, %v4270_v21  ;;  %v1525_v1 = vmul.f32 0.7978846, %v1397_v0  ;;  %v1268_v40 = vmul.f32 %v5812_v4, %v5811_v19  ;;  %5813 = vst [vmem:[#allocation8_spill] sm:$0xff] %v4328_v23  ;;  %2168 = vmatmul.mubr.f32.gmra.mrb[72].mxu1 %v1900_v6  ;;  %v5815_v22 = vld [vmem:[#allocation18_spill] sm:$0xff]  ;;  %v4341_v31 = vmul.f32 0.5, %v3867_v38 }
 0x15c   : > { %v4331_v13 = vmul.f32 %v1041_v63, %v4279_v26  ;;  %v1399_v57 = vadd.f32 %v1271_v56, %v5806_v24  ;;  %v1270_v53 = vmul.f32 %v5815_v22, %v5814_v36  ;;  %v4338_v5 = vadd.f32 %v4093_v54, %v3704_v45  ;;  %2393 = vmatmul.mubr.f32.gmra.mrb[72].mxu0 %v1902_v41  ;;  %v4348_v0 = vpop.f32.mrb[44].mxu0 }
 0x15d   : > { %5810 = vst [vmem:[#allocation59_spill] sm:$0xff] %v4324_v14  ;;  %2915 = vtanh.f32 %v1525_v1  ;;  %v1396_v58 = vadd.f32 %v1268_v40, %v5811_v19  ;;  %v4346_v63 = vadd.f32 %v4101_v11, %v3706_v46  ;;  %5816 = vst [vmem:[#allocation17_spill] sm:$0xff] %v4348_v0  ;;  %v4351_v56 = vmul.f32 %v1043_v16, %v4291_v2  ;;  %v5817_v11 = vld [vmem:[#allocation16_spill] sm:$0xff] }
 0x15e   : > { %v4354_v6 = vmul.f32 0.5, %v5806_v24  ;;  %v1527_v54 = vmul.f32 0.7978846, %v1399_v57  ;;  %v1398_v22 = vadd.f32 %v1270_v53, %v5814_v36  ;;  %v1044_v1 = vmul.f32 0.044715, %v4338_v5  ;;  %v5818_v40 = vld [vmem:[#allocation24_spill] sm:$0xff] }
 0x15f   : > { %v1524_v41 = vmul.f32 0.7978846, %v1396_v58  ;;  %v4360_v4 = vadd.f32 %v4103_v50, %v3708_v47  ;;  %v1273_v0 = vmul.f32 %v5818_v40, %v5817_v11  ;;  %v4366_v24 = vadd.f32 %v4111_v20, %v3710_v48  ;;  %v4368_v57 = vpop.f32.mrb[44].mxu1  ;;  %v4370_v53 = vpop.f32.mrb[45].mxu0 }
 0x160   : > { %v2908_v38 = vpop.eup %2907  ;;  %2917 = vtanh.f32 %v1527_v54  ;;  %v1526_v14 = vmul.f32 0.7978846, %v1398_v22  ;;  %5819 = vst [vmem:[#allocation9_spill] sm:$0xff] %v4368_v57  ;;  %5820 = vst [vmem:[#allocation18_spill] sm:$0xff] %v4370_v53  ;;  %v4373_v50 = vmul.f32 0.5, %v5811_v19  ;;  %v4376_v9 = vpop.f32.mrb[45].mxu1 }
 0x161   : > { %v2910_v23 = vpop.eup %2909  ;;  %v1777_v16 = vadd.f32 1.0, %v2908_v38  ;;  %2919 = vtanh.f32 %v1524_v41  ;;  %v1046_v40 = vmul.f32 0.044715, %v4346_v63  ;;  %5821 = vst [vmem:[#allocation16_spill] sm:$0xff] %v4376_v9  ;;  %v4378_v54 = vpop.f32.mrb[46].mxu0  ;;  %v4382_v57 = vmul.f32 0.5, %v5814_v36 }
 0x162   : > { %v2912_v58 = vpop.eup %2911  ;;  %v1779_v21 = vadd.f32 1.0, %v2910_v23  ;;  %5822 = vst [vmem:[#allocation24_spill] sm:$0xff] %v4378_v54  ;;  %2921 = vtanh.f32 %v1526_v14  ;;  %v4384_v53 = vpop.f32.mrb[46].mxu1  ;;  %v1045_v33 = vmul.f32 0.044715, %v4360_v4  ;;  %v1401_v9 = vadd.f32 %v1273_v0, %v5817_v11 }
 0x163   : > { %v2914_v22 = vpop.eup %2913  ;;  %v1905_v20 = vmul.f32 %v1777_v16, %v4239_v27  ;;  %v1776_v38 = vadd.f32 1.0, %v2912_v58  ;;  %5823 = vst [vmem:[#allocation60_spill] sm:$0xff] %v4384_v53  ;;  %v4386_v23 = vpop.f32.mrb[47].mxu0  ;;  %v4395_v36 = vmul.f32 %v1044_v1, %v4338_v5  ;;  %v1047_v14 = vmul.f32 0.044715, %v4366_v24  ;;  %v5826_v58 = vld [vmem:[#allocation14_spill] sm:$0xff] }
 0x164   : > { %5824 = vst [vmem:[#allocation61_spill] sm:$0xff] %v4386_v23  ;;  %v1907_v19 = vmul.f32 %v1779_v21, %v4275_v29  ;;  %v1778_v41 = vadd.f32 1.0, %v2914_v22  ;;  %v4391_v54 = vpop.f32.mrb[47].mxu1  ;;  %v1275_v16 = vmul.f32 %v3971_v44, %v3907_v25  ;;  %v4402_v21 = vmul.f32 %v1046_v40, %v4346_v63  ;;  %v5827_v22 = vld [vmem:[#allocation22_spill] sm:$0xff]  ;;  %v5829_v1 = vld [vmem:[#allocation15_spill] sm:$0xff] }
 0x165   : > { %5825 = vst [vmem:[#allocation62_spill] sm:$0xff] %v4391_v54  ;;  %2172 = vmatprep.mubr.f32.mxu1 %v1905_v20  ;;  %v1904_v27 = vmul.f32 %v1776_v38, %v4302_v59  ;;  %v1529_v0 = vmul.f32 0.7978846, %v1401_v9  ;;  %v1272_v20 = vmul.f32 %v5827_v22, %v5826_v58  ;;  %v4406_v54 = vpop.f32.mrb[48].mxu0  ;;  %v5830_v38 = vld [vmem:[#allocation23_spill] sm:$0xff]  ;;  %v4413_v44 = vadd.f32 %v4124_v52, %v3704_v45  ;;  %v4419_v9 = vpop.f32.mrb[48].mxu1 }
 0x166   : > { %2397 = vmatprep.mubr.f32.mxu0 %v1907_v19  ;;  %v1906_v29 = vmul.f32 %v1778_v41, %v4307_v30  ;;  %5828 = vst [vmem:[#allocation14_spill] sm:$0xff] %v4406_v54  ;;  %v1403_v59 = vadd.f32 %v1275_v16, %v3907_v25  ;;  %v1274_v23 = vmul.f32 %v5830_v38, %v5829_v1  ;;  %5831 = vst [vmem:[#allocation22_spill] sm:$0xff] %v4419_v9  ;;  %v4421_v40 = vpop.f32.mrb[49].mxu0  ;;  %v4431_v16 = vpop.f32.mrb[49].mxu1 }
 0x167   : > { %2173 = vmatmul.mubr.f32.gmra.mrb[74].mxu1 %v1904_v27  ;;  %v4417_v30 = vadd.f32 %v4133_v62, %v3706_v46  ;;  %5832 = vst [vmem:[#allocation15_spill] sm:$0xff] %v4421_v40  ;;  %v2916_v19 = vpop.eup %2915  ;;  %v4424_v41 = vmul.f32 %v1045_v33, %v4360_v4  ;;  %2923 = vtanh.f32 %v1529_v0  ;;  %v1400_v27 = vadd.f32 %v1272_v20, %v5826_v58 }
 0x168   : > { %2398 = vmatmul.mubr.f32.gmra.mrb[74].mxu0 %v1906_v29  ;;  %v4429_v52 = vadd.f32 %v4135_v49, %v3708_v47  ;;  %5833 = vst [vmem:[#allocation23_spill] sm:$0xff] %v4431_v16  ;;  %v1781_v62 = vadd.f32 1.0, %v2916_v19  ;;  %v4434_v22 = vmul.f32 %v1047_v14, %v4366_v24  ;;  %v1531_v38 = vmul.f32 0.7978846, %v1403_v59  ;;  %v4443_v14 = vpop.f32.mrb[50].mxu0 }
 0x169   : > { %v1402_v40 = vadd.f32 %v1274_v23, %v5829_v1  ;;  %v889_v29 = vmul.f32 0.5, %v5817_v11  ;;  %v1528_v33 = vmul.f32 0.7978846, %v1400_v27  ;;  %v1048_v0 = vmul.f32 0.044715, %v4413_v44  ;;  %5834 = vst [vmem:[#allocation63_spill] sm:$0xff] %v4443_v14 }
 0x16a   : > { %v1277_v20 = vmul.f32 %v3988_v3, %v3926_v15  ;;  %v2918_v9 = vpop.eup %2917  ;;  %v1909_v49 = vmul.f32 %v1781_v62, %v4341_v31  ;;  %2925 = vtanh.f32 %v1531_v38  ;;  %v1050_v19 = vmul.f32 0.044715, %v4417_v30  ;;  %v4445_v59 = vpop.f32.mrb[50].mxu1 }
 0x16b   : > { %v1530_v16 = vmul.f32 0.7978846, %v1402_v40  ;;  %5835 = vst [vmem:[#allocation64_spill] sm:$0xff] %v4445_v59  ;;  %v2920_v23 = vpop.eup %2919  ;;  %v1783_v54 = vadd.f32 1.0, %v2918_v9  ;;  %v4448_v11 = vmul.f32 0.5, %v3907_v25  ;;  %2927 = vtanh.f32 %v1528_v33  ;;  %v4451_v3 = vpop.f32.mrb[51].mxu0 }
 0x16c   : > { %v1049_v27 = vmul.f32 0.044715, %v4429_v52  ;;  %5836 = vst [vmem:[#allocation65_spill] sm:$0xff] %v4451_v3  ;;  %v4453_v53 = vpop.f32.mrb[51].mxu1  ;;  %v2922_v31 = vpop.eup %2921  ;;  %2177 = vmatprep.mubr.f32.mxu1 %v1909_v49  ;;  %v1780_v40 = vadd.f32 1.0, %v2920_v23  ;;  %v4456_v62 = vmul.f32 0.5, %v5826_v58  ;;  %v4464_v33 = vadd.f32 %v4141_v39, %v3710_v48 }
 0x16d   : > { %5837 = vst [vmem:[#allocation66_spill] sm:$0xff] %v4453_v53  ;;  %v4459_v38 = vmul.f32 0.5, %v5829_v1  ;;  %2929 = vtanh.f32 %v1530_v16  ;;  %v1911_v25 = vmul.f32 %v1783_v54, %v4354_v6  ;;  %v1782_v9 = vadd.f32 1.0, %v2922_v31  ;;  %v4467_v53 = vpop.f32.mrb[52].mxu0  ;;  %v4478_v54 = vpop.f32.mrb[52].mxu1  ;;  %v5842_v23 = vld [vmem:[#allocation19_spill] sm:$0xff] }
 0x16e   : > { %v1405_v3 = vadd.f32 %v1277_v20, %v3926_v15  ;;  %5838 = vst [vmem:[#allocation67_spill] sm:$0xff] %v4467_v53  ;;  %v1908_v49 = vmul.f32 %v1780_v40, %v4373_v50  ;;  %v4471_v58 = vmul.f32 %v1048_v0, %v4413_v44  ;;  %v4474_v1 = vmul.f32 %v1050_v19, %v4417_v30  ;;  %v4480_v16 = vpop.f32.mrb[53].mxu0  ;;  %v5843_v0 = vld [vmem:[#allocation27_spill] sm:$0xff]  ;;  %v4488_v40 = vpop.f32.mrb[53].mxu1  ;;  %v5846_v53 = vld [vmem:[#allocation29_spill] sm:$0xff] }
 0x16f   : > { %v1279_v6 = vmul.f32 %v3991_v32, %v3930_v43  ;;  %5840 = vst [vmem:[#allocation69_spill] sm:$0xff] %v4478_v54  ;;  %5841 = vst [vmem:[#allocation70_spill] sm:$0xff] %v4480_v16  ;;  %2402 = vmatprep.mubr.f32.mxu0 %v1911_v25  ;;  %v1910_v39 = vmul.f32 %v1782_v9, %v4382_v57  ;;  %v4484_v20 = vmul.f32 %v1049_v27, %v4429_v52  ;;  %v5845_v32 = vld [vmem:[#allocation21_spill] sm:$0xff] }
 0x170   : > { %5839 = vst [vmem:[#allocation68_spill] sm:$0xff] %v4474_v1  ;;  %v1533_v50 = vmul.f32 0.7978846, %v1405_v3  ;;  %v1276_v31 = vmul.f32 %v5843_v0, %v5842_v23  ;;  %5844 = vst [vmem:[#allocation19_spill] sm:$0xff] %v4488_v40  ;;  %2178 = vmatmul.mubr.f32.gmra.mrb[76].mxu1 %v1908_v49  ;;  %v1278_v54 = vmul.f32 %v5846_v53, %v5845_v32  ;;  %v1051_v3 = vmul.f32 0.044715, %v4464_v33 }
 0x171   : > { %v1407_v19 = vadd.f32 %v1279_v6, %v3930_v43  ;;  %v4495_v25 = vadd.f32 %v4154_v18, %v3704_v45  ;;  %v4499_v57 = vadd.f32 %v4161_v28, %v3706_v46  ;;  %v2924_v27 = vpop.eup %2923  ;;  %2403 = vmatmul.mubr.f32.gmra.mrb[76].mxu0 %v1910_v39  ;;  %v4505_v49 = vadd.f32 %v4163_v17, %v3708_v47  ;;  %v4516_v14 = vpop.f32.mrb[54].mxu0 }
 0x172   : > { %2931 = vtanh.f32 %v1533_v50  ;;  %v1404_v9 = vadd.f32 %v1276_v31, %v5842_v23  ;;  %v1785_v53 = vadd.f32 1.0, %v2924_v27  ;;  %v893_v6 = vmul.f32 0.5, %v3926_v15  ;;  %v5848_v50 = vld [vmem:[#allocation34_spill] sm:$0xff]  ;;  %5849 = vst [vmem:[#allocation21_spill] sm:$0xff] %v4516_v14  ;;  %v4518_v15 = vpop.f32.mrb[54].mxu1  ;;  %v4524_v1 = vpop.f32.mrb[55].mxu0 }
 0x173   : > { %5847 = vst [vmem:[#allocation27_spill] sm:$0xff] %v4499_v57  ;;  %v1535_v18 = vmul.f32 0.7978846, %v1407_v19  ;;  %v1406_v0 = vadd.f32 %v1278_v54, %v5845_v32  ;;  %v4510_v28 = vmul.f32 0.5, %v3930_v43  ;;  %v1052_v39 = vmul.f32 0.044715, %v4495_v25 }
 0x174   : > { %v1532_v40 = vmul.f32 0.7978846, %v1404_v9  ;;  %v1281_v16 = vmul.f32 %v5848_v50, %v3968_v10  ;;  %v2926_v31 = vpop.eup %2925  ;;  %v1913_v59 = vmul.f32 %v1785_v53, %v889_v29  ;;  %v1054_v27 = vmul.f32 0.044715, %v4499_v57  ;;  %5850 = vst [vmem:[#allocation29_spill] sm:$0xff] %v4518_v15  ;;  %5851 = vst [vmem:[#allocation34_spill] sm:$0xff] %v4524_v1 }
 0x175   : > { %2933 = vtanh.f32 %v1535_v18  ;;  %v1534_v17 = vmul.f32 0.7978846, %v1406_v0  ;;  %v2928_v54 = vpop.eup %2927  ;;  %v1787_v19 = vadd.f32 1.0, %v2926_v31  ;;  %v4521_v43 = vmul.f32 %v1051_v3, %v4464_v33  ;;  %v4526_v50 = vpop.f32.mrb[55].mxu1 }
 0x176   : > { %2935 = vtanh.f32 %v1532_v40  ;;  %v1053_v9 = vmul.f32 0.044715, %v4505_v49  ;;  %5852 = vst [vmem:[#allocation71_spill] sm:$0xff] %v4526_v50  ;;  %2182 = vmatprep.mubr.f32.mxu1 %v1913_v59  ;;  %v1784_v53 = vadd.f32 1.0, %v2928_v54  ;;  %v892_v18 = vmul.f32 0.5, %v5842_v23  ;;  %v5856_v54 = vld [vmem:[#allocation35_spill] sm:$0xff] }
 0x177   : > { %v2930_v29 = vpop.eup %2929  ;;  %v4530_v0 = vmul.f32 0.5, %v5845_v32  ;;  %2937 = vtanh.f32 %v1534_v17  ;;  %v1915_v31 = vmul.f32 %v1787_v19, %v4448_v11  ;;  %v4535_v40 = vadd.f32 %v4173_v34, %v3710_v48  ;;  %v5855_v32 = vld [vmem:[#allocation28_spill] sm:$0xff] }
 0x178   : > { %v1786_v3 = vadd.f32 1.0, %v2930_v29  ;;  %v1409_v1 = vadd.f32 %v1281_v16, %v3968_v10  ;;  %v1912_v50 = vmul.f32 %v1784_v53, %v4456_v62  ;;  %v4540_v59 = vmul.f32 %v1052_v39, %v4495_v25  ;;  %v5857_v29 = vld [vmem:[#allocation25_spill] sm:$0xff]  ;;  %v5858_v16 = vld [vmem:[#allocation30_spill] sm:$0xff] }
 0x179   : > { %v4543_v23 = vmul.f32 %v1054_v27, %v4499_v57  ;;  %v1283_v17 = vmul.f32 %v5856_v54, %v5855_v32  ;;  %2407 = vmatprep.mubr.f32.mxu0 %v1915_v31  ;;  %v4549_v19 = vmul.f32 %v1053_v9, %v4505_v49  ;;  %v1280_v15 = vmul.f32 %v5858_v16, %v5857_v29  ;;  %v5859_v39 = vld [vmem:[#allocation26_spill] sm:$0xff]  ;;  %v5860_v53 = vld [vmem:[#allocation33_spill] sm:$0xff]  ;;  %v4579_v57 = vpop.f32.mrb[56].mxu0 }
 0x17a   : > { %5853 = vst [vmem:[#allocation72_spill] sm:$0xff] %v4540_v59  ;;  %v1914_v11 = vmul.f32 %v1786_v3, %v4459_v38  ;;  %v1537_v34 = vmul.f32 0.7978846, %v1409_v1  ;;  %2183 = vmatmul.mubr.f32.gmra.mrb[78].mxu1 %v1912_v50  ;;  %v1282_v27 = vmul.f32 %v5860_v53, %v5859_v39  ;;  %v4558_v14 = vadd.f32 %v4192_v35, %v3704_v45  ;;  %v4587_v59 = vpop.f32.mrb[57].mxu0 }
 0x17b   : > { %5854 = vst [vmem:[#allocation73_spill] sm:$0xff] %v4543_v23  ;;  %v1411_v62 = vadd.f32 %v1283_v17, %v5855_v32  ;;  %v4562_v38 = vadd.f32 %v4209_v7, %v3706_v46  ;;  %v1055_v1 = vmul.f32 0.044715, %v4535_v40  ;;  %v1408_v50 = vadd.f32 %v1280_v15, %v5857_v29  ;;  %5865 = vst [vmem:[#allocation30_spill] sm:$0xff] %v4579_v57 }
 0x17c   : > { %5861 = vst [vmem:[#allocation28_spill] sm:$0xff] %v4558_v14  ;;  %v2932_v9 = vpop.eup %2931  ;;  %2408 = vmatmul.mubr.f32.gmra.mrb[78].mxu0 %v1914_v11  ;;  %2939 = vtanh.f32 %v1537_v34  ;;  %v4568_v31 = vadd.f32 %v4211_v55, %v3708_v47  ;;  %v897_v54 = vmul.f32 0.5, %v3968_v10  ;;  %v1410_v17 = vadd.f32 %v1282_v27, %v5859_v39  ;;  %v5864_v34 = vld [vmem:[#allocation39_spill] sm:$0xff]  ;;  %v4581_v10 = vpop.f32.mrb[56].mxu1  ;;  %5867 = vst [vmem:[#allocation33_spill] sm:$0xff] %v4587_v59 }
 0x17d   : > { %5862 = vst [vmem:[#allocation35_spill] sm:$0xff] %v4562_v38  ;;  %v1789_v3 = vadd.f32 1.0, %v2932_v9  ;;  %v1539_v35 = vmul.f32 0.7978846, %v1411_v62  ;;  %v4573_v7 = vmul.f32 0.5, %v5855_v32  ;;  %v1285_v53 = vmul.f32 %v5864_v34, %v4029_v51  ;;  %5866 = vst [vmem:[#allocation26_spill] sm:$0xff] %v4581_v10 }
 0x17e   : > { %5863 = vst [vmem:[#allocation25_spill] sm:$0xff] %v4568_v31  ;;  %v1536_v16 = vmul.f32 0.7978846, %v1408_v50  ;;  %v1056_v11 = vmul.f32 0.044715, %v4558_v14  ;;  %v4584_v32 = vmul.f32 %v1055_v1, %v4535_v40  ;;  %v4589_v34 = vpop.f32.mrb[57].mxu1 }
 0x17f   : > { %v2934_v15 = vpop.eup %2933  ;;  %v1917_v23 = vmul.f32 %v1789_v3, %v893_v6  ;;  %2941 = vtanh.f32 %v1539_v35  ;;  %v1538_v55 = vmul.f32 0.7978846, %v1410_v17  ;;  %v1058_v9 = vmul.f32 0.044715, %v4562_v38  ;;  %5868 = vst [vmem:[#allocation39_spill] sm:$0xff] %v4589_v34 }
 0x180   : > { %v2936_v62 = vpop.eup %2935  ;;  %v1791_v27 = vadd.f32 1.0, %v2934_v15  ;;  %2943 = vtanh.f32 %v1536_v16  ;;  %v1057_v50 = vmul.f32 0.044715, %v4568_v31  ;;  %v896_v35 = vmul.f32 0.5, %v5857_v29  ;;  %v5869_v16 = vld [vmem:[#allocation50_spill] sm:$0xff]  ;;  %v5872_v29 = vld [vmem:[#allocation36_spill] sm:$0xff] }
 0x181   : > { %v2938_v6 = vpop.eup %2937  ;;  %2187 = vmatprep.mubr.f32.mxu1 %v1917_v23  ;;  %v1788_v3 = vadd.f32 1.0, %v2936_v62  ;;  %v4593_v17 = vmul.f32 0.5, %v5859_v39  ;;  %2945 = vtanh.f32 %v1538_v55  ;;  %v4598_v10 = vadd.f32 %v5869_v16, %v3710_v48  ;;  %v5873_v39 = vld [vmem:[#allocation43_spill] sm:$0xff]  ;;  %v5876_v16 = vld [vmem:[#allocation37_spill] sm:$0xff] }
 0x182   : > { %v1919_v15 = vmul.f32 %v1791_v27, %v4510_v28  ;;  %v1790_v1 = vadd.f32 1.0, %v2938_v6  ;;  %v1413_v59 = vadd.f32 %v1285_v53, %v4029_v51  ;;  %v4602_v34 = vmul.f32 %v1056_v11, %v4558_v14  ;;  %v5875_v6 = vld [vmem:[#allocation31_spill] sm:$0xff]  ;;  %v5877_v11 = vld [vmem:[#allocation32_spill] sm:$0xff] }
 0x183   : > { %v1916_v57 = vmul.f32 %v1788_v3, %v892_v18  ;;  %v4605_v23 = vmul.f32 %v1058_v9, %v4562_v38  ;;  %v1287_v62 = vmul.f32 %v5873_v39, %v5872_v29  ;;  %v4611_v55 = vmul.f32 %v1057_v50, %v4568_v31  ;;  %v5878_v3 = vld [vmem:[#allocation38_spill] sm:$0xff] }
 0x184   : > { %5870 = vst [vmem:[#allocation50_spill] sm:$0xff] %v4602_v34  ;;  %2412 = vmatprep.mubr.f32.mxu0 %v1919_v15  ;;  %v1918_v28 = vmul.f32 %v1790_v1, %v4530_v0  ;;  %v1541_v27 = vmul.f32 0.7978846, %v1413_v59  ;;  %v1284_v53 = vmul.f32 %v5876_v16, %v5875_v6  ;;  %v1286_v9 = vmul.f32 %v5878_v3, %v5877_v11  ;;  %v5882_v3 = vld [vmem:[#allocation42_spill] sm:$0xff] }
 0x185   : > { %5871 = vst [vmem:[#allocation74_spill] sm:$0xff] %v4605_v23  ;;  %5874 = vst [vmem:[#allocation36_spill] sm:$0xff] %v4611_v55  ;;  %2188 = vmatmul.mubr.f32.gmra.mrb[80].mxu1 %v1916_v57  ;;  %v1415_v18 = vadd.f32 %v1287_v62, %v5872_v29  ;;  %v5879_v23 = vld [vmem:[#allocation51_spill] sm:$0xff]  ;;  %v4624_v0 = vadd.f32 %v4221_v61, %v3706_v46  ;;  %v1059_v59 = vmul.f32 0.044715, %v4598_v10  ;;  %v901_v39 = vmul.f32 0.5, %v4029_v51 }
 0x186   : > { %v4620_v38 = vadd.f32 %v5879_v23, %v3704_v45  ;;  %v2940_v50 = vpop.eup %2939  ;;  %2413 = vmatmul.mubr.f32.gmra.mrb[80].mxu0 %v1918_v28  ;;  %2947 = vtanh.f32 %v1541_v27  ;;  %v1412_v57 = vadd.f32 %v1284_v53, %v5875_v6  ;;  %v4630_v15 = vadd.f32 %v4223_v8, %v3708_v47  ;;  %v5883_v27 = vld [vmem:[#allocation6_spill] sm:$0xff]  ;;  %v4641_v55 = vpop.f32.mrb[58].mxu0 }
 0x187   : > { %5881 = vst [vmem:[#allocation31_spill] sm:$0xff] %v4624_v0  ;;  %v1793_v1 = vadd.f32 1.0, %v2940_v50  ;;  %v1543_v23 = vmul.f32 0.7978846, %v1415_v18  ;;  %v1414_v62 = vadd.f32 %v1286_v9, %v5877_v11  ;;  %v4635_v61 = vmul.f32 0.5, %v5872_v29  ;;  %5884 = vst [vmem:[#allocation37_spill] sm:$0xff] %v4641_v55 }
 0x188   : > { %5880 = vst [vmem:[#allocation43_spill] sm:$0xff] %v4620_v38  ;;  %v1540_v16 = vmul.f32 0.7978846, %v1412_v57  ;;  %v1060_v28 = vmul.f32 0.044715, %v4620_v38  ;;  %v1289_v34 = vmul.f32 %v5883_v27, %v5882_v3  ;;  %v4643_v51 = vpop.f32.mrb[58].mxu1  ;;  %v4646_v29 = vmul.f32 %v1059_v59, %v4598_v10 }
 0x189   : > { %v2942_v53 = vpop.eup %2941  ;;  %v1921_v14 = vmul.f32 %v1793_v1, %v897_v54  ;;  %2949 = vtanh.f32 %v1543_v23  ;;  %v1542_v8 = vmul.f32 0.7978846, %v1414_v62  ;;  %v1062_v50 = vmul.f32 0.044715, %v4624_v0  ;;  %5885 = vst [vmem:[#allocation32_spill] sm:$0xff] %v4643_v51  ;;  %v4649_v31 = vpop.f32.mrb[59].mxu0 }
 0x18a   : > { %v2944_v18 = vpop.eup %2943  ;;  %v1795_v9 = vadd.f32 1.0, %v2942_v53  ;;  %2951 = vtanh.f32 %v1540_v16  ;;  %v1061_v57 = vmul.f32 0.044715, %v4630_v15  ;;  %5886 = vst [vmem:[#allocation38_spill] sm:$0xff] %v4649_v31  ;;  %v4651_v27 = vpop.f32.mrb[59].mxu1  ;;  %v900_v23 = vmul.f32 0.5, %v5875_v6 }
 0x18b   : > { %5887 = vst [vmem:[#allocation51_spill] sm:$0xff] %v4651_v27  ;;  %v2946_v54 = vpop.eup %2945  ;;  %2192 = vmatprep.mubr.f32.mxu1 %v1921_v14  ;;  %v1792_v1 = vadd.f32 1.0, %v2944_v18  ;;  %v4655_v62 = vmul.f32 0.5, %v5877_v11  ;;  %2953 = vtanh.f32 %v1542_v8  ;;  %v4660_v16 = vadd.f32 %v4232_v60, %v3710_v48  ;;  %v5890_v6 = vld [vmem:[#allocation44_spill] sm:$0xff]  ;;  %v5891_v11 = vld [vmem:[#allocation47_spill] sm:$0xff] }
 0x18c   : > { %v1923_v53 = vmul.f32 %v1795_v9, %v4573_v7  ;;  %v1794_v59 = vadd.f32 1.0, %v2946_v54  ;;  %v1417_v31 = vadd.f32 %v1289_v34, %v5882_v3  ;;  %v4664_v27 = vmul.f32 %v1060_v28, %v4620_v38  ;;  %v5892_v9 = vld [vmem:[#allocation40_spill] sm:$0xff]  ;;  %v5893_v54 = vld [vmem:[#allocation45_spill] sm:$0xff] }
 0x18d   : > { %v1920_v51 = vmul.f32 %v1792_v1, %v896_v35  ;;  %v4667_v14 = vmul.f32 %v1062_v50, %v4624_v0  ;;  %v1291_v18 = vmul.f32 %v5891_v11, %v5890_v6  ;;  %v4673_v8 = vmul.f32 %v1061_v57, %v4630_v15  ;;  %v5894_v28 = vld [vmem:[#allocation41_spill] sm:$0xff]  ;;  %v5895_v1 = vld [vmem:[#allocation46_spill] sm:$0xff] }
 0x18e   : > { %5888 = vst [vmem:[#allocation42_spill] sm:$0xff] %v4664_v27  ;;  %2417 = vmatprep.mubr.f32.mxu0 %v1923_v53  ;;  %v1922_v7 = vmul.f32 %v1794_v59, %v4593_v17  ;;  %v1545_v60 = vmul.f32 0.7978846, %v1417_v31  ;;  %v1288_v34 = vmul.f32 %v5893_v54, %v5892_v9  ;;  %v1290_v50 = vmul.f32 %v5895_v1, %v5894_v28  ;;  %v5899_v1 = vld [vmem:[#allocation48_spill] sm:$0xff]  ;;  %v4703_v27 = vpop.f32.mrb[60].mxu0 }
 0x18f   : > { %5889 = vst [vmem:[#allocation6_spill] sm:$0xff] %v4667_v14  ;;  %2193 = vmatmul.mubr.f32.gmra.mrb[82].mxu1 %v1920_v51  ;;  %v1419_v35 = vadd.f32 %v1291_v18, %v5890_v6  ;;  %v4682_v55 = vadd.f32 %v4251_v12, %v3704_v45  ;;  %v4686_v17 = vadd.f32 %v4262_v37, %v3706_v46  ;;  %v1063_v31 = vmul.f32 0.044715, %v4660_v16  ;;  %v4711_v38 = vpop.f32.mrb[61].mxu0 }
 0x190   : > { %v2948_v57 = vpop.eup %2947  ;;  %2418 = vmatmul.mubr.f32.gmra.mrb[82].mxu0 %v1922_v7  ;;  %2955 = vtanh.f32 %v1545_v60  ;;  %v1416_v51 = vadd.f32 %v1288_v34, %v5892_v9  ;;  %v4692_v53 = vadd.f32 %v4264_v42, %v3708_v47  ;;  %v905_v11 = vmul.f32 0.5, %v5882_v3  ;;  %v5900_v60 = vld [vmem:[#allocation3_spill] sm:$0xff]  ;;  %5901 = vst [vmem:[#allocation45_spill] sm:$0xff] %v4703_v27  ;;  %v4705_v3 = vpop.f32.mrb[60].mxu1  ;;  %5903 = vst [vmem:[#allocation46_spill] sm:$0xff] %v4711_v38 }
 0x191   : > { %5896 = vst [vmem:[#allocation44_spill] sm:$0xff] %v4682_v55  ;;  %5897 = vst [vmem:[#allocation47_spill] sm:$0xff] %v4686_v17  ;;  %v1797_v59 = vadd.f32 1.0, %v2948_v57  ;;  %v1547_v12 = vmul.f32 0.7978846, %v1419_v35  ;;  %v1418_v18 = vadd.f32 %v1290_v50, %v5894_v28  ;;  %v4697_v37 = vmul.f32 0.5, %v5890_v6 }
 0x192   : > { %5898 = vst [vmem:[#allocation40_spill] sm:$0xff] %v4692_v53  ;;  %v1544_v54 = vmul.f32 0.7978846, %v1416_v51  ;;  %v1064_v7 = vmul.f32 0.044715, %v4682_v55  ;;  %v1293_v14 = vmul.f32 %v5900_v60, %v5899_v1  ;;  %5902 = vst [vmem:[#allocation41_spill] sm:$0xff] %v4705_v3  ;;  %v4708_v6 = vmul.f32 %v1063_v31, %v4660_v16 }
 0x193   : > { %v2950_v34 = vpop.eup %2949  ;;  %v1925_v0 = vmul.f32 %v1797_v59, %v901_v39  ;;  %2957 = vtanh.f32 %v1547_v12  ;;  %v1546_v42 = vmul.f32 0.7978846, %v1418_v18  ;;  %v1066_v57 = vmul.f32 0.044715, %v4686_v17  ;;  %v4713_v60 = vpop.f32.mrb[61].mxu1 }
 0x194   : > { %v2952_v35 = vpop.eup %2951  ;;  %v1799_v50 = vadd.f32 1.0, %v2950_v34  ;;  %2959 = vtanh.f32 %v1544_v54  ;;  %v1065_v51 = vmul.f32 0.044715, %v4692_v53  ;;  %5904 = vst [vmem:[#allocation48_spill] sm:$0xff] %v4713_v60  ;;  %v904_v12 = vmul.f32 0.5, %v5892_v9  ;;  %v5905_v54 = vld [vmem:[#allocation12_spill] sm:$0xff] }
 0x195   : > { %v2954_v39 = vpop.eup %2953  ;;  %2197 = vmatprep.mubr.f32.mxu1 %v1925_v0  ;;  %v1796_v59 = vadd.f32 1.0, %v2952_v35  ;;  %v4717_v18 = vmul.f32 0.5, %v5894_v28  ;;  %2961 = vtanh.f32 %v1546_v42  ;;  %v4722_v3 = vadd.f32 %v5905_v54, %v3710_v48  ;;  %v5908_v9 = vld [vmem:[#allocation49_spill] sm:$0xff] }
 0x196   : > { %v1927_v34 = vmul.f32 %v1799_v50, %v4635_v61  ;;  %v1798_v31 = vadd.f32 1.0, %v2954_v39  ;;  %v1421_v38 = vadd.f32 %v1293_v14, %v5899_v1  ;;  %v4726_v60 = vmul.f32 %v1064_v7, %v4682_v55  ;;  %v5909_v28 = vld [vmem:[#allocation53_spill] sm:$0xff]  ;;  %v5911_v39 = vld [vmem:[#allocation2_spill] sm:$0xff]  ;;  %v5913_v7 = vld [vmem:[#allocation7_spill] sm:$0xff] }
 0x197   : > { %v1924_v27 = vmul.f32 %v1796_v59, %v900_v23  ;;  %v4729_v0 = vmul.f32 %v1066_v57, %v4686_v17  ;;  %v1295_v35 = vmul.f32 %v5909_v28, %v5908_v9  ;;  %v4735_v42 = vmul.f32 %v1065_v51, %v4692_v53  ;;  %v5912_v54 = vld [vmem:[#allocation5_spill] sm:$0xff] }
 0x198   : > { %5906 = vst [vmem:[#allocation3_spill] sm:$0xff] %v4726_v60  ;;  %2422 = vmatprep.mubr.f32.mxu0 %v1927_v34  ;;  %v1926_v61 = vmul.f32 %v1798_v31, %v4655_v62  ;;  %v1549_v50 = vmul.f32 0.7978846, %v1421_v38  ;;  %v1292_v14 = vmul.f32 %v5912_v54, %v5911_v39  ;;  %v5914_v59 = vld [vmem:[#allocation13_spill] sm:$0xff]  ;;  %v5917_v34 = vld [vmem:[#allocation54_spill] sm:$0xff]  ;;  %v5919_v31 = vld [vmem:[#allocation55_spill] sm:$0xff] }
 0x199   : > { %5907 = vst [vmem:[#allocation12_spill] sm:$0xff] %v4729_v0  ;;  %5910 = vst [vmem:[#allocation49_spill] sm:$0xff] %v4735_v42  ;;  %2198 = vmatmul.mubr.f32.gmra.mrb[84].mxu1 %v1924_v27  ;;  %v1423_v23 = vadd.f32 %v1295_v35, %v5908_v9  ;;  %v1294_v57 = vmul.f32 %v5914_v59, %v5913_v7  ;;  %v5915_v0 = vld [vmem:[#allocation52_spill] sm:$0xff]  ;;  %v4748_v62 = vadd.f32 %v5917_v34, %v3706_v46  ;;  %v4765_v42 = vpop.f32.mrb[62].mxu0 }
 0x19a   : > { %v4744_v17 = vadd.f32 %v5915_v0, %v3704_v45  ;;  %v2956_v51 = vpop.eup %2955  ;;  %2423 = vmatmul.mubr.f32.gmra.mrb[84].mxu0 %v1926_v61  ;;  %v1067_v38 = vmul.f32 0.044715, %v4722_v3  ;;  %2963 = vtanh.f32 %v1549_v50  ;;  %v1420_v27 = vadd.f32 %v1292_v14, %v5911_v39  ;;  %5920 = vst [vmem:[#allocation5_spill] sm:$0xff] %v4765_v42  ;;  %v4773_v53 = vpop.f32.mrb[63].mxu0 }
 0x19b   : > { %5918 = vst [vmem:[#allocation2_spill] sm:$0xff] %v4748_v62  ;;  %v4754_v28 = vadd.f32 %v5919_v31, %v3708_v47  ;;  %v1801_v35 = vadd.f32 1.0, %v2956_v51  ;;  %v909_v54 = vmul.f32 0.5, %v5899_v1  ;;  %v1551_v0 = vmul.f32 0.7978846, %v1423_v23  ;;  %v4767_v1 = vpop.f32.mrb[62].mxu1 }
 0x19c   : > { %5916 = vst [vmem:[#allocation53_spill] sm:$0xff] %v4744_v17  ;;  %v1422_v59 = vadd.f32 %v1294_v57, %v5913_v7  ;;  %v4759_v34 = vmul.f32 0.5, %v5908_v9  ;;  %v1548_v60 = vmul.f32 0.7978846, %v1420_v27  ;;  %v1068_v61 = vmul.f32 0.044715, %v4744_v17 }
 0x19d   : > { %v1297_v50 = vmul.f32 %v4331_v13, %v4279_v26  ;;  %v2958_v14 = vpop.eup %2957  ;;  %v1929_v55 = vmul.f32 %v1801_v35, %v905_v11  ;;  %2965 = vtanh.f32 %v1551_v0  ;;  %v1070_v51 = vmul.f32 0.044715, %v4748_v62  ;;  %5921 = vst [vmem:[#allocation7_spill] sm:$0xff] %v4767_v1  ;;  %5922 = vst [vmem:[#allocation13_spill] sm:$0xff] %v4773_v53  ;;  %v4775_v13 = vpop.f32.mrb[63].mxu1 }
 0x19e   : > { %v1550_v31 = vmul.f32 0.7978846, %v1422_v59  ;;  %v2960_v23 = vpop.eup %2959  ;;  %v1803_v57 = vadd.f32 1.0, %v2958_v14  ;;  %v4770_v9 = vmul.f32 %v1067_v38, %v4722_v3  ;;  %2967 = vtanh.f32 %v1548_v60  ;;  %5923 = vst [vmem:[#allocation52_spill] sm:$0xff] %v4775_v13  ;;  %v5924_v38 = vld [vmem:[#allocation56_spill] sm:$0xff] }
 0x19f   : > { %v1069_v27 = vmul.f32 0.044715, %v4754_v28  ;;  %v2962_v11 = vpop.eup %2961  ;;  %2202 = vmatprep.mubr.f32.mxu1 %v1929_v55  ;;  %v1800_v35 = vadd.f32 1.0, %v2960_v23  ;;  %v908_v0 = vmul.f32 0.5, %v5911_v39  ;;  %v910_v59 = vmul.f32 0.5, %v5913_v7  ;;  %v5927_v23 = vld [vmem:[#allocation11_spill] sm:$0xff] }
 0x1a0   : > { %2969 = vtanh.f32 %v1550_v31  ;;  %v1931_v14 = vmul.f32 %v1803_v57, %v4697_v37  ;;  %v1802_v1 = vadd.f32 1.0, %v2962_v11  ;;  %v4782_v60 = vadd.f32 %v5924_v38, %v3710_v48  ;;  %v5928_v57 = vld [vmem:[#allocation58_spill] sm:$0xff]  ;;  %v5930_v11 = vld [vmem:[#allocation59_spill] sm:$0xff] }
 0x1a1   : > { %v1425_v42 = vadd.f32 %v1297_v50, %v4279_v26  ;;  %v1928_v53 = vmul.f32 %v1800_v35, %v904_v12  ;;  %v4786_v13 = vmul.f32 %v1068_v61, %v4744_v17  ;;  %v4789_v55 = vmul.f32 %v1070_v51, %v4748_v62  ;;  %v5929_v61 = vld [vmem:[#allocation4_spill] sm:$0xff]  ;;  %v5931_v35 = vld [vmem:[#allocation57_spill] sm:$0xff] }
 0x1a2   : > { %v1299_v39 = vmul.f32 %v4351_v56, %v4291_v2  ;;  %2427 = vmatprep.mubr.f32.mxu0 %v1931_v14  ;;  %v1930_v37 = vmul.f32 %v1802_v1, %v4717_v18  ;;  %v4795_v7 = vmul.f32 %v1069_v27, %v4754_v28  ;;  %v1296_v50 = vmul.f32 %v5928_v57, %v5927_v23  ;;  %v5932_v56 = vld [vmem:[#allocation10_spill] sm:$0xff]  ;;  %v5933_v27 = vld [vmem:[#allocation20_spill] sm:$0xff] }
 0x1a3   : > { %5925 = vst [vmem:[#allocation54_spill] sm:$0xff] %v4786_v13  ;;  %5926 = vst [vmem:[#allocation55_spill] sm:$0xff] %v4789_v55  ;;  %v1553_v31 = vmul.f32 0.7978846, %v1425_v42  ;;  %2203 = vmatmul.mubr.f32.gmra.mrb[86].mxu1 %v1928_v53  ;;  %v1298_v51 = vmul.f32 %v5930_v11, %v5929_v61  ;;  %v4804_v38 = vadd.f32 %v5931_v35, %v3704_v45  ;;  %v1071_v42 = vmul.f32 0.044715, %v4782_v60 }
 0x1a4   : > { %v1427_v12 = vadd.f32 %v1299_v39, %v4291_v2  ;;  %v4808_v18 = vadd.f32 %v5932_v56, %v3706_v46  ;;  %v2964_v1 = vpop.eup %2963  ;;  %2428 = vmatmul.mubr.f32.gmra.mrb[86].mxu0 %v1930_v37  ;;  %v1424_v53 = vadd.f32 %v1296_v50, %v5927_v23  ;;  %v4814_v14 = vadd.f32 %v5933_v27, %v3708_v47 }
 0x1a5   : > { %2971 = vtanh.f32 %v1553_v31  ;;  %v1805_v39 = vadd.f32 1.0, %v2964_v1  ;;  %v913_v57 = vmul.f32 0.5, %v4279_v26  ;;  %v1426_v35 = vadd.f32 %v1298_v51, %v5929_v61 }
 0x1a6   : > { %v1555_v11 = vmul.f32 0.7978846, %v1427_v12  ;;  %v4819_v56 = vmul.f32 0.5, %v4291_v2  ;;  %v1552_v55 = vmul.f32 0.7978846, %v1424_v53  ;;  %v1301_v31 = vmul.f32 %v4424_v41, %v4360_v4 }
 0x1a7   : > { %v1072_v37 = vmul.f32 0.044715, %v4804_v38  ;;  %v2966_v50 = vpop.eup %2965  ;;  %v1933_v62 = vmul.f32 %v1805_v39, %v909_v54  ;;  %v1554_v27 = vmul.f32 0.7978846, %v1426_v35  ;;  %v1074_v1 = vmul.f32 0.044715, %v4808_v18 }
 0x1a8   : > { %2973 = vtanh.f32 %v1555_v11  ;;  %v2968_v13 = vpop.eup %2967  ;;  %v1807_v26 = vadd.f32 1.0, %v2966_v50  ;;  %v4826_v12 = vmul.f32 %v1071_v42, %v4782_v60  ;;  %v1073_v2 = vmul.f32 0.044715, %v4814_v14  ;;  %v5934_v11 = vld [vmem:[#allocation8_spill] sm:$0xff] }
 0x1a9   : > { %2975 = vtanh.f32 %v1552_v55  ;;  %2207 = vmatprep.mubr.f32.mxu1 %v1933_v62  ;;  %v1804_v53 = vadd.f32 1.0, %v2968_v13  ;;  %v912_v17 = vmul.f32 0.5, %v5927_v23  ;;  %v914_v41 = vmul.f32 0.5, %v5929_v61 }
 0x1aa   : > { %v2970_v51 = vpop.eup %2969  ;;  %2977 = vtanh.f32 %v1554_v27  ;;  %v1935_v54 = vmul.f32 %v1807_v26, %v4759_v34  ;;  %v4834_v35 = vadd.f32 %v5934_v11, %v3710_v48  ;;  %v1429_v42 = vadd.f32 %v1301_v31, %v4360_v4  ;;  %v5935_v31 = vld [vmem:[#allocation17_spill] sm:$0xff] }
 0x1ab   : > { %v1806_v39 = vadd.f32 1.0, %v2970_v51  ;;  %v1932_v55 = vmul.f32 %v1804_v53, %v908_v0  ;;  %v4838_v50 = vmul.f32 %v1072_v37, %v4804_v38  ;;  %v4841_v62 = vmul.f32 %v1074_v1, %v4808_v18  ;;  %v5937_v51 = vld [vmem:[#allocation18_spill] sm:$0xff] }
 0x1ac   : > { %v1303_v13 = vmul.f32 %v4434_v22, %v4366_v24  ;;  %2432 = vmatprep.mubr.f32.mxu0 %v1935_v54  ;;  %v4846_v34 = vmul.f32 %v1073_v2, %v4814_v14  ;;  %v1557_v61 = vmul.f32 0.7978846, %v1429_v42  ;;  %v1300_v27 = vmul.f32 %v4395_v36, %v4338_v5  ;;  %v5936_v22 = vld [vmem:[#allocation9_spill] sm:$0xff] }
 0x1ad   : > { %v1934_v23 = vmul.f32 %v1806_v39, %v910_v59  ;;  %2208 = vmatmul.mubr.f32.gmra.mrb[88].mxu1 %v1932_v55  ;;  %v1302_v37 = vmul.f32 %v4402_v21, %v4346_v63  ;;  %v4855_v1 = vadd.f32 %v5935_v31, %v3704_v45  ;;  %v4859_v59 = vadd.f32 %v5936_v22, %v3706_v46 }
 0x1ae   : > { %v1431_v0 = vadd.f32 %v1303_v13, %v4366_v24  ;;  %v1075_v2 = vmul.f32 0.044715, %v4834_v35  ;;  %2979 = vtanh.f32 %v1557_v61  ;;  %v1428_v36 = vadd.f32 %v1300_v27, %v4338_v5 }
 0x1af   : > { %v2972_v26 = vpop.eup %2971  ;;  %2433 = vmatmul.mubr.f32.gmra.mrb[88].mxu0 %v1934_v23  ;;  %v4865_v53 = vadd.f32 %v5937_v51, %v3708_v47  ;;  %v917_v54 = vmul.f32 0.5, %v4360_v4  ;;  %v1430_v11 = vadd.f32 %v1302_v37, %v4346_v63  ;;  %v4870_v42 = vmul.f32 0.5, %v4366_v24 }
 0x1b0   : > { %v1809_v21 = vadd.f32 1.0, %v2972_v26  ;;  %v1559_v39 = vmul.f32 0.7978846, %v1431_v0  ;;  %v1556_v55 = vmul.f32 0.7978846, %v1428_v36  ;;  %v1305_v23 = vmul.f32 %v4484_v20, %v4429_v52 }
 0x1b1   : > { %v1076_v13 = vmul.f32 0.044715, %v4855_v1  ;;  %v1558_v31 = vmul.f32 0.7978846, %v1430_v11  ;;  %v1078_v22 = vmul.f32 0.044715, %v4859_v59  ;;  %v4877_v0 = vmul.f32 %v1075_v2, %v4834_v35 }
 0x1b2   : > { %v2974_v61 = vpop.eup %2973  ;;  %v1937_v27 = vmul.f32 %v1809_v21, %v913_v57  ;;  %2981 = vtanh.f32 %v1559_v39  ;;  %v1077_v24 = vmul.f32 0.044715, %v4865_v53  ;;  %v916_v51 = vmul.f32 0.5, %v4338_v5  ;;  %v5938_v39 = vld [vmem:[#allocation16_spill] sm:$0xff] }
 0x1b3   : > { %v2976_v26 = vpop.eup %2975  ;;  %v1811_v4 = vadd.f32 1.0, %v2974_v61  ;;  %2983 = vtanh.f32 %v1556_v55  ;;  %v918_v20 = vmul.f32 0.5, %v4346_v63  ;;  %v4885_v11 = vadd.f32 %v5938_v39, %v3710_v48 }
 0x1b4   : > { %v2978_v37 = vpop.eup %2977  ;;  %2212 = vmatprep.mubr.f32.mxu1 %v1937_v27  ;;  %v1808_v36 = vadd.f32 1.0, %v2976_v26  ;;  %2985 = vtanh.f32 %v1558_v31  ;;  %v1433_v2 = vadd.f32 %v1305_v23, %v4429_v52  ;;  %v4889_v61 = vmul.f32 %v1076_v13, %v4855_v1  ;;  %v5940_v13 = vld [vmem:[#allocation68_spill] sm:$0xff] }
 0x1b5   : > { %v1939_v57 = vmul.f32 %v1811_v4, %v4819_v56  ;;  %v1810_v21 = vadd.f32 1.0, %v2978_v37  ;;  %v4892_v27 = vmul.f32 %v1078_v22, %v4859_v59  ;;  %v1307_v5 = vmul.f32 %v4521_v43, %v4464_v33  ;;  %v5941_v22 = vld [vmem:[#allocation24_spill] sm:$0xff] }
 0x1b6   : > { %v1936_v55 = vmul.f32 %v1808_v36, %v912_v17  ;;  %v4897_v56 = vmul.f32 %v1077_v24, %v4865_v53  ;;  %v1561_v31 = vmul.f32 0.7978846, %v1433_v2  ;;  %v1304_v26 = vmul.f32 %v4471_v58, %v4413_v44  ;;  %v5943_v43 = vld [vmem:[#allocation60_spill] sm:$0xff]  ;;  %v5945_v36 = vld [vmem:[#allocation61_spill] sm:$0xff] }
 0x1b7   : > { %5939 = vst [vmem:[#allocation56_spill] sm:$0xff] %v4892_v27  ;;  %2437 = vmatprep.mubr.f32.mxu0 %v1939_v57  ;;  %v1938_v63 = vmul.f32 %v1810_v21, %v914_v41  ;;  %v1435_v17 = vadd.f32 %v1307_v5, %v4464_v33  ;;  %v1306_v23 = vmul.f32 %v5940_v13, %v4417_v30  ;;  %v1079_v37 = vmul.f32 0.044715, %v4885_v11 }
 0x1b8   : > { %2213 = vmatmul.mubr.f32.gmra.mrb[90].mxu1 %v1936_v55  ;;  %v4906_v4 = vadd.f32 %v5941_v22, %v3704_v45  ;;  %v4910_v41 = vadd.f32 %v5943_v43, %v3706_v46  ;;  %v2980_v24 = vpop.eup %2979  ;;  %2987 = vtanh.f32 %v1561_v31  ;;  %v1432_v58 = vadd.f32 %v1304_v26, %v4413_v44 }
 0x1b9   : > { %2438 = vmatmul.mubr.f32.gmra.mrb[90].mxu0 %v1938_v63  ;;  %v4916_v57 = vadd.f32 %v5945_v36, %v3708_v47  ;;  %v1813_v21 = vadd.f32 1.0, %v2980_v24  ;;  %v921_v39 = vmul.f32 0.5, %v4429_v52  ;;  %v1563_v2 = vmul.f32 0.7978846, %v1435_v17 }
 0x1ba   : > { %5942 = vst [vmem:[#allocation11_spill] sm:$0xff] %v4906_v4  ;;  %5944 = vst [vmem:[#allocation58_spill] sm:$0xff] %v4910_v41  ;;  %v1434_v55 = vadd.f32 %v1306_v23, %v4417_v30  ;;  %v4921_v5 = vmul.f32 0.5, %v4464_v33  ;;  %v1560_v13 = vmul.f32 0.7978846, %v1432_v58  ;;  %v1309_v31 = vmul.f32 %v4549_v19, %v4505_v49 }
 0x1bb   : > { %v1080_v63 = vmul.f32 0.044715, %v4906_v4  ;;  %v1941_v22 = vmul.f32 %v1813_v21, %v917_v54  ;;  %2989 = vtanh.f32 %v1563_v2  ;;  %v1082_v24 = vmul.f32 0.044715, %v4910_v41  ;;  %v5946_v2 = vld [vmem:[#allocation62_spill] sm:$0xff] }
 0x1bc   : > { %v2982_v26 = vpop.eup %2981  ;;  %v1562_v43 = vmul.f32 0.7978846, %v1434_v55  ;;  %v4928_v17 = vmul.f32 %v1079_v37, %v4885_v11  ;;  %2991 = vtanh.f32 %v1560_v13  ;;  %v1081_v33 = vmul.f32 0.044715, %v4916_v57 }
 0x1bd   : > { %v2984_v36 = vpop.eup %2983  ;;  %v1815_v52 = vadd.f32 1.0, %v2982_v26  ;;  %2217 = vmatprep.mubr.f32.mxu1 %v1941_v22  ;;  %v920_v27 = vmul.f32 0.5, %v4413_v44  ;;  %v922_v19 = vmul.f32 0.5, %v4417_v30  ;;  %v4936_v55 = vadd.f32 %v5946_v2, %v3710_v48  ;;  %v5957_v2 = vld [vmem:[#allocation15_spill] sm:$0xff] }
 0x1be   : > { %v2986_v23 = vpop.eup %2985  ;;  %v1812_v58 = vadd.f32 1.0, %v2984_v36  ;;  %2993 = vtanh.f32 %v1562_v43  ;;  %v1437_v37 = vadd.f32 %v1309_v31, %v4505_v49  ;;  %v4940_v26 = vmul.f32 %v1080_v63, %v4906_v4  ;;  %v5950_v36 = vld [vmem:[#allocation72_spill] sm:$0xff]  ;;  %v5951_v63 = vld [vmem:[#allocation27_spill] sm:$0xff]  ;;  %v5952_v31 = vld [vmem:[#allocation73_spill] sm:$0xff] }
 0x1bf   : > { %v1943_v54 = vmul.f32 %v1815_v52, %v4870_v42  ;;  %v1814_v21 = vadd.f32 1.0, %v2986_v23  ;;  %v4943_v22 = vmul.f32 %v1082_v24, %v4910_v41  ;;  %v1311_v44 = vmul.f32 %v4584_v32, %v4535_v40  ;;  %v5953_v24 = vld [vmem:[#allocation14_spill] sm:$0xff] }
 0x1c0   : > { %v1940_v13 = vmul.f32 %v1812_v58, %v916_v51  ;;  %5947 = vst [vmem:[#allocation4_spill] sm:$0xff] %v4940_v26  ;;  %v4948_v42 = vmul.f32 %v1081_v33, %v4916_v57  ;;  %v1565_v43 = vmul.f32 0.7978846, %v1437_v37  ;;  %v1308_v52 = vmul.f32 %v5950_v36, %v4495_v25  ;;  %v5955_v32 = vld [vmem:[#allocation22_spill] sm:$0xff] }
 0x1c1   : > { %5948 = vst [vmem:[#allocation59_spill] sm:$0xff] %v4943_v22  ;;  %2442 = vmatprep.mubr.f32.mxu0 %v1943_v54  ;;  %v1942_v30 = vmul.f32 %v1814_v21, %v918_v20  ;;  %v1439_v51 = vadd.f32 %v1311_v44, %v4535_v40  ;;  %v1310_v23 = vmul.f32 %v5952_v31, %v5951_v63  ;;  %v1083_v54 = vmul.f32 0.044715, %v4936_v55  ;;  %v5958_v22 = vld [vmem:[#allocation25_spill] sm:$0xff] }
 0x1c2   : > { %5949 = vst [vmem:[#allocation57_spill] sm:$0xff] %v4948_v42  ;;  %2218 = vmatmul.mubr.f32.gmra.mrb[92].mxu1 %v1940_v13  ;;  %v4957_v58 = vadd.f32 %v5953_v24, %v3704_v45  ;;  %v4961_v20 = vadd.f32 %v5955_v32, %v3706_v46  ;;  %v2988_v33 = vpop.eup %2987  ;;  %2995 = vtanh.f32 %v1565_v43  ;;  %v1436_v21 = vadd.f32 %v1308_v52, %v4495_v25  ;;  %v5959_v43 = vld [vmem:[#allocation36_spill] sm:$0xff] }
 0x1c3   : > { %2443 = vmatmul.mubr.f32.gmra.mrb[92].mxu0 %v1942_v30  ;;  %v4967_v37 = vadd.f32 %v5957_v2, %v3708_v47  ;;  %v1817_v13 = vadd.f32 1.0, %v2988_v33  ;;  %v925_v44 = vmul.f32 0.5, %v4505_v49  ;;  %v1567_v36 = vmul.f32 0.7978846, %v1439_v51 }
 0x1c4   : > { %5954 = vst [vmem:[#allocation10_spill] sm:$0xff] %v4957_v58  ;;  %5956 = vst [vmem:[#allocation20_spill] sm:$0xff] %v4961_v20  ;;  %v1438_v31 = vadd.f32 %v1310_v23, %v5951_v63  ;;  %v4972_v24 = vmul.f32 0.5, %v4535_v40  ;;  %v1564_v32 = vmul.f32 0.7978846, %v1436_v21  ;;  %v1313_v41 = vmul.f32 %v5959_v43, %v5958_v22 }
 0x1c5   : > { %v1084_v30 = vmul.f32 0.044715, %v4957_v58  ;;  %v2990_v52 = vpop.eup %2989  ;;  %v1945_v26 = vmul.f32 %v1817_v13, %v921_v39  ;;  %2997 = vtanh.f32 %v1567_v36  ;;  %v1086_v33 = vmul.f32 0.044715, %v4961_v20  ;;  %v5960_v36 = vld [vmem:[#allocation23_spill] sm:$0xff] }
 0x1c6   : > { %v1566_v2 = vmul.f32 0.7978846, %v1438_v31  ;;  %v2992_v4 = vpop.eup %2991  ;;  %v1819_v49 = vadd.f32 1.0, %v2990_v52  ;;  %v4979_v51 = vmul.f32 %v1083_v54, %v4936_v55  ;;  %2999 = vtanh.f32 %v1564_v32 }
 0x1c7   : > { %v1085_v40 = vmul.f32 0.044715, %v4967_v37  ;;  %2222 = vmatprep.mubr.f32.mxu1 %v1945_v26  ;;  %v1816_v21 = vadd.f32 1.0, %v2992_v4  ;;  %v924_v42 = vmul.f32 0.5, %v4495_v25  ;;  %v926_v43 = vmul.f32 0.5, %v5951_v63 }
 0x1c8   : > { %v2994_v23 = vpop.eup %2993  ;;  %3001 = vtanh.f32 %v1566_v2  ;;  %v1947_v39 = vmul.f32 %v1819_v49, %v4921_v5  ;;  %v4987_v31 = vadd.f32 %v5960_v36, %v3710_v48  ;;  %v1441_v54 = vadd.f32 %v1313_v41, %v5958_v22  ;;  %v5963_v2 = vld [vmem:[#allocation28_spill] sm:$0xff]  ;;  %v5964_v49 = vld [vmem:[#allocation50_spill] sm:$0xff]  ;;  %v5965_v41 = vld [vmem:[#allocation35_spill] sm:$0xff] }
 0x1c9   : > { %v1818_v13 = vadd.f32 1.0, %v2994_v23  ;;  %v1944_v32 = vmul.f32 %v1816_v21, %v920_v27  ;;  %v4991_v52 = vmul.f32 %v1084_v30, %v4957_v58  ;;  %v4994_v4 = vmul.f32 %v1086_v33, %v4961_v20  ;;  %v5966_v30 = vld [vmem:[#allocation74_spill] sm:$0xff]  ;;  %v5967_v33 = vld [vmem:[#allocation63_spill] sm:$0xff] }
 0x1ca   : > { %v1315_v25 = vmul.f32 %v4646_v29, %v4598_v10  ;;  %2447 = vmatprep.mubr.f32.mxu0 %v1947_v39  ;;  %v4999_v5 = vmul.f32 %v1085_v40, %v4967_v37  ;;  %v1569_v63 = vmul.f32 0.7978846, %v1441_v54  ;;  %v1312_v23 = vmul.f32 %v5964_v49, %v5963_v2  ;;  %v5969_v29 = vld [vmem:[#allocation64_spill] sm:$0xff]  ;;  %v5971_v54 = vld [vmem:[#allocation65_spill] sm:$0xff] }
 0x1cb   : > { %5961 = vst [vmem:[#allocation8_spill] sm:$0xff] %v4991_v52  ;;  %5962 = vst [vmem:[#allocation17_spill] sm:$0xff] %v4994_v4  ;;  %v1946_v26 = vmul.f32 %v1818_v13, %v922_v19  ;;  %2223 = vmatmul.mubr.f32.gmra.mrb[94].mxu1 %v1944_v32  ;;  %v1314_v21 = vmul.f32 %v5966_v30, %v5965_v41  ;;  %v5008_v36 = vadd.f32 %v5967_v33, %v3704_v45 }
 0x1cc   : > { %v1443_v27 = vadd.f32 %v1315_v25, %v4598_v10  ;;  %v5012_v19 = vadd.f32 %v5969_v29, %v3706_v46  ;;  %v2996_v40 = vpop.eup %2995  ;;  %v1087_v39 = vmul.f32 0.044715, %v4987_v31  ;;  %3003 = vtanh.f32 %v1569_v63 }
 0x1cd   : > { %5968 = vst [vmem:[#allocation9_spill] sm:$0xff] %v5008_v36  ;;  %2448 = vmatmul.mubr.f32.gmra.mrb[94].mxu0 %v1946_v26  ;;  %v1440_v13 = vadd.f32 %v1312_v23, %v5963_v2  ;;  %v5018_v32 = vadd.f32 %v5971_v54, %v3708_v47  ;;  %v1821_v25 = vadd.f32 1.0, %v2996_v40  ;;  %v929_v49 = vmul.f32 0.5, %v5958_v22 }
 0x1ce   : > { %5970 = vst [vmem:[#allocation18_spill] sm:$0xff] %v5012_v19  ;;  %v1571_v30 = vmul.f32 0.7978846, %v1443_v27  ;;  %v1442_v33 = vadd.f32 %v1314_v21, %v5965_v41  ;;  %v5023_v29 = vmul.f32 0.5, %v4598_v10  ;;  %v1088_v26 = vmul.f32 0.044715, %v5008_v36 }
 0x1cf   : > { %5972 = vst [vmem:[#allocation16_spill] sm:$0xff] %v5018_v32  ;;  %v1568_v4 = vmul.f32 0.7978846, %v1440_v13  ;;  %v1317_v63 = vmul.f32 %v4673_v8, %v4630_v15  ;;  %v2998_v23 = vpop.eup %2997  ;;  %v1949_v20 = vmul.f32 %v1821_v25, %v925_v44  ;;  %v1090_v40 = vmul.f32 0.044715, %v5012_v19 }
 0x1d0   : > { %3005 = vtanh.f32 %v1571_v30  ;;  %v1570_v54 = vmul.f32 0.7978846, %v1442_v33  ;;  %v3000_v52 = vpop.eup %2999  ;;  %v1823_v22 = vadd.f32 1.0, %v2998_v23  ;;  %v5030_v27 = vmul.f32 %v1087_v39, %v4987_v31  ;;  %v5973_v30 = vld [vmem:[#allocation66_spill] sm:$0xff] }
 0x1d1   : > { %3007 = vtanh.f32 %v1568_v4  ;;  %v1089_v10 = vmul.f32 0.044715, %v5018_v32  ;;  %2227 = vmatprep.mubr.f32.mxu1 %v1949_v20  ;;  %v1820_v13 = vadd.f32 1.0, %v3000_v52  ;;  %v928_v58 = vmul.f32 0.5, %v5963_v2 }
 0x1d2   : > { %v3002_v21 = vpop.eup %3001  ;;  %v930_v8 = vmul.f32 0.5, %v5965_v41  ;;  %3009 = vtanh.f32 %v1570_v54  ;;  %v1951_v44 = vmul.f32 %v1823_v22, %v4972_v24  ;;  %v5038_v33 = vadd.f32 %v5973_v30, %v3710_v48  ;;  %v5977_v54 = vld [vmem:[#allocation43_spill] sm:$0xff]  ;;  %v5978_v22 = vld [vmem:[#allocation42_spill] sm:$0xff] }
 0x1d3   : > { %v1822_v25 = vadd.f32 1.0, %v3002_v21  ;;  %v1445_v39 = vadd.f32 %v1317_v63, %v4630_v15  ;;  %v1948_v4 = vmul.f32 %v1820_v13, %v924_v42  ;;  %v5042_v23 = vmul.f32 %v1088_v26, %v5008_v36  ;;  %v5979_v26 = vld [vmem:[#allocation31_spill] sm:$0xff]  ;;  %v5980_v63 = vld [vmem:[#allocation6_spill] sm:$0xff] }
 0x1d4   : > { %v5045_v20 = vmul.f32 %v1090_v40, %v5012_v19  ;;  %v1319_v52 = vmul.f32 %v4708_v6, %v4660_v16  ;;  %2452 = vmatprep.mubr.f32.mxu0 %v1951_v44  ;;  %v5050_v24 = vmul.f32 %v1089_v10, %v5018_v32  ;;  %v1316_v21 = vmul.f32 %v5978_v22, %v5977_v54  ;;  %v5981_v40 = vld [vmem:[#allocation67_spill] sm:$0xff]  ;;  %v5983_v6 = vld [vmem:[#allocation69_spill] sm:$0xff]  ;;  %v5986_v19 = vld [vmem:[#allocation40_spill] sm:$0xff] }
 0x1d5   : > { %5974 = vst [vmem:[#allocation68_spill] sm:$0xff] %v5042_v23  ;;  %v1950_v2 = vmul.f32 %v1822_v25, %v926_v43  ;;  %v1573_v41 = vmul.f32 0.7978846, %v1445_v39  ;;  %2228 = vmatmul.mubr.f32.gmra.mrb[96].mxu1 %v1948_v4  ;;  %v1318_v13 = vmul.f32 %v5980_v63, %v5979_v26  ;;  %v5059_v30 = vadd.f32 %v5981_v40, %v3704_v45  ;;  %v5985_v39 = vld [vmem:[#allocation70_spill] sm:$0xff] }
 0x1d6   : > { %5975 = vst [vmem:[#allocation24_spill] sm:$0xff] %v5045_v20  ;;  %5976 = vst [vmem:[#allocation60_spill] sm:$0xff] %v5050_v24  ;;  %v1447_v42 = vadd.f32 %v1319_v52, %v4660_v16  ;;  %v5063_v43 = vadd.f32 %v5983_v6, %v3706_v46  ;;  %v3004_v10 = vpop.eup %3003  ;;  %v1091_v44 = vmul.f32 0.044715, %v5038_v33  ;;  %v1444_v25 = vadd.f32 %v1316_v21, %v5977_v54 }
 0x1d7   : > { %5982 = vst [vmem:[#allocation61_spill] sm:$0xff] %v5059_v30  ;;  %2453 = vmatmul.mubr.f32.gmra.mrb[96].mxu0 %v1950_v2  ;;  %3011 = vtanh.f32 %v1573_v41  ;;  %v5069_v4 = vadd.f32 %v5985_v39, %v3708_v47  ;;  %v1825_v52 = vadd.f32 1.0, %v3004_v10  ;;  %v933_v22 = vmul.f32 0.5, %v4630_v15  ;;  %v5987_v41 = vld [vmem:[#allocation49_spill] sm:$0xff] }
 0x1d8   : > { %5984 = vst [vmem:[#allocation62_spill] sm:$0xff] %v5063_v43  ;;  %v1575_v63 = vmul.f32 0.7978846, %v1447_v42  ;;  %v1446_v40 = vadd.f32 %v1318_v13, %v5979_v26  ;;  %v5074_v6 = vmul.f32 0.5, %v4660_v16  ;;  %v1572_v20 = vmul.f32 0.7978846, %v1444_v25 }
 0x1d9   : > { %v1092_v2 = vmul.f32 0.044715, %v5059_v30  ;;  %v1321_v23 = vmul.f32 %v5987_v41, %v5986_v19  ;;  %v1953_v36 = vmul.f32 %v1825_v52, %v929_v49  ;;  %v1094_v10 = vmul.f32 0.044715, %v5063_v43 }
 0x1da   : > { %v3006_v21 = vpop.eup %3005  ;;  %3013 = vtanh.f32 %v1575_v63  ;;  %v1574_v39 = vmul.f32 0.7978846, %v1446_v40  ;;  %v5081_v42 = vmul.f32 %v1091_v44, %v5038_v33  ;;  %v1093_v16 = vmul.f32 0.044715, %v5069_v4  ;;  %v5988_v63 = vld [vmem:[#allocation19_spill] sm:$0xff] }
 0x1db   : > { %v3008_v24 = vpop.eup %3007  ;;  %v1827_v15 = vadd.f32 1.0, %v3006_v21  ;;  %3015 = vtanh.f32 %v1572_v20  ;;  %2232 = vmatprep.mubr.f32.mxu1 %v1953_v36  ;;  %v932_v32 = vmul.f32 0.5, %v5977_v54  ;;  %v934_v41 = vmul.f32 0.5, %v5979_v26 }
 0x1dc   : > { %v3010_v13 = vpop.eup %3009  ;;  %v1824_v25 = vadd.f32 1.0, %v3008_v24  ;;  %3017 = vtanh.f32 %v1574_v39  ;;  %v5089_v40 = vadd.f32 %v5988_v63, %v3710_v48  ;;  %v1449_v44 = vadd.f32 %v1321_v23, %v5986_v19  ;;  %v5991_v39 = vld [vmem:[#allocation44_spill] sm:$0xff]  ;;  %v5993_v23 = vld [vmem:[#allocation47_spill] sm:$0xff] }
 0x1dd   : > { %v1955_v49 = vmul.f32 %v1827_v15, %v5023_v29  ;;  %v1826_v52 = vadd.f32 1.0, %v3010_v13  ;;  %v5093_v21 = vmul.f32 %v1092_v2, %v5059_v30  ;;  %v5096_v36 = vmul.f32 %v1094_v10, %v5063_v43  ;;  %v5992_v15 = vld [vmem:[#allocation3_spill] sm:$0xff]  ;;  %v5994_v2 = vld [vmem:[#allocation12_spill] sm:$0xff]  ;;  %v5995_v10 = vld [vmem:[#allocation21_spill] sm:$0xff] }
 0x1de   : > { %v1952_v20 = vmul.f32 %v1824_v25, %v928_v58  ;;  %v1323_v24 = vmul.f32 %v4770_v9, %v4722_v3  ;;  %v5101_v29 = vmul.f32 %v1093_v16, %v5069_v4  ;;  %v1577_v26 = vmul.f32 0.7978846, %v1449_v44  ;;  %v5997_v9 = vld [vmem:[#allocation29_spill] sm:$0xff]  ;;  %v5999_v44 = vld [vmem:[#allocation34_spill] sm:$0xff] }
 0x1df   : > { %5989 = vst [vmem:[#allocation72_spill] sm:$0xff] %v5093_v21  ;;  %5990 = vst [vmem:[#allocation27_spill] sm:$0xff] %v5096_v36  ;;  %2457 = vmatprep.mubr.f32.mxu0 %v1955_v49  ;;  %v1954_v54 = vmul.f32 %v1826_v52, %v930_v8  ;;  %v1320_v13 = vmul.f32 %v5992_v15, %v5991_v39  ;;  %v1322_v25 = vmul.f32 %v5994_v2, %v5993_v23 }
 0x1e0   : > { %2233 = vmatmul.mubr.f32.gmra.mrb[98].mxu1 %v1952_v20  ;;  %v1451_v58 = vadd.f32 %v1323_v24, %v4722_v3  ;;  %v5110_v63 = vadd.f32 %v5995_v10, %v3704_v45  ;;  %v5114_v8 = vadd.f32 %v5997_v9, %v3706_v46  ;;  %v1095_v49 = vmul.f32 0.044715, %v5089_v40 }
 0x1e1   : > { %v3012_v16 = vpop.eup %3011  ;;  %2458 = vmatmul.mubr.f32.gmra.mrb[98].mxu0 %v1954_v54  ;;  %3019 = vtanh.f32 %v1577_v26  ;;  %v1448_v52 = vadd.f32 %v1320_v13, %v5991_v39  ;;  %v5120_v20 = vadd.f32 %v5999_v44, %v3708_v47  ;;  %v937_v15 = vmul.f32 0.5, %v5986_v19 }
 0x1e2   : > { %5996 = vst [vmem:[#allocation73_spill] sm:$0xff] %v5110_v63  ;;  %5998 = vst [vmem:[#allocation14_spill] sm:$0xff] %v5114_v8  ;;  %v1829_v24 = vadd.f32 1.0, %v3012_v16  ;;  %v1579_v2 = vmul.f32 0.7978846, %v1451_v58  ;;  %v1450_v10 = vadd.f32 %v1322_v25, %v5993_v23  ;;  %v5125_v9 = vmul.f32 0.5, %v4722_v3 }
 0x1e3   : > { %v1576_v36 = vmul.f32 0.7978846, %v1448_v52  ;;  %v1096_v54 = vmul.f32 0.044715, %v5110_v63  ;;  %v1325_v26 = vmul.f32 %v4795_v7, %v4754_v28  ;;  %v1098_v16 = vmul.f32 0.044715, %v5114_v8 }
 0x1e4   : > { %v3014_v13 = vpop.eup %3013  ;;  %v1957_v43 = vmul.f32 %v1829_v24, %v933_v22  ;;  %3021 = vtanh.f32 %v1579_v2  ;;  %v1578_v44 = vmul.f32 0.7978846, %v1450_v10  ;;  %v5132_v58 = vmul.f32 %v1095_v49, %v5089_v40  ;;  %v6000_v2 = vld [vmem:[#allocation71_spill] sm:$0xff] }
 0x1e5   : > { %v3016_v21 = vpop.eup %3015  ;;  %v1831_v19 = vadd.f32 1.0, %v3014_v13  ;;  %3023 = vtanh.f32 %v1576_v36  ;;  %v1097_v3 = vmul.f32 0.044715, %v5120_v20  ;;  %v936_v30 = vmul.f32 0.5, %v5991_v39 }
 0x1e6   : > { %v3018_v25 = vpop.eup %3017  ;;  %2237 = vmatprep.mubr.f32.mxu1 %v1957_v43  ;;  %v1828_v52 = vadd.f32 1.0, %v3016_v21  ;;  %v938_v7 = vmul.f32 0.5, %v5993_v23  ;;  %3025 = vtanh.f32 %v1578_v44  ;;  %v5140_v10 = vadd.f32 %v6000_v2, %v3710_v48  ;;  %v6003_v44 = vld [vmem:[#allocation53_spill] sm:$0xff] }
 0x1e7   : > { %v1959_v22 = vmul.f32 %v1831_v19, %v5074_v6  ;;  %v1830_v24 = vadd.f32 1.0, %v3018_v25  ;;  %v1453_v49 = vadd.f32 %v1325_v26, %v4754_v28  ;;  %v5144_v13 = vmul.f32 %v1096_v54, %v5110_v63  ;;  %v6004_v19 = vld [vmem:[#allocation54_spill] sm:$0xff]  ;;  %v6006_v26 = vld [vmem:[#allocation55_spill] sm:$0xff] }
 0x1e8   : > { %v1956_v36 = vmul.f32 %v1828_v52, %v932_v32  ;;  %v5147_v43 = vmul.f32 %v1098_v16, %v5114_v8  ;;  %v1327_v21 = vmul.f32 %v4826_v12, %v4782_v60  ;;  %v5152_v6 = vmul.f32 %v1097_v3, %v5120_v20  ;;  %v6005_v54 = vld [vmem:[#allocation2_spill] sm:$0xff] }
 0x1e9   : > { %6001 = vst [vmem:[#allocation22_spill] sm:$0xff] %v5144_v13  ;;  %2462 = vmatprep.mubr.f32.mxu0 %v1959_v22  ;;  %v1958_v39 = vmul.f32 %v1830_v24, %v934_v41  ;;  %v1581_v23 = vmul.f32 0.7978846, %v1453_v49  ;;  %v1324_v25 = vmul.f32 %v6004_v19, %v6003_v44  ;;  %v1326_v52 = vmul.f32 %v6006_v26, %v6005_v54  ;;  %v6007_v16 = vld [vmem:[#allocation30_spill] sm:$0xff]  ;;  %v6009_v49 = vld [vmem:[#allocation33_spill] sm:$0xff] }
 0x1ea   : > { %6002 = vst [vmem:[#allocation15_spill] sm:$0xff] %v5147_v43  ;;  %2238 = vmatmul.mubr.f32.gmra.mrb[100].mxu1 %v1956_v36  ;;  %v1455_v32 = vadd.f32 %v1327_v21, %v4782_v60  ;;  %v5161_v2 = vadd.f32 %v6007_v16, %v3704_v45  ;;  %v6008_v12 = vld [vmem:[#allocation26_spill] sm:$0xff]  ;;  %v1099_v22 = vmul.f32 0.044715, %v5140_v10  ;;  %v5171_v36 = vadd.f32 %v6009_v49, %v3708_v47 }
 0x1eb   : > { %v5165_v41 = vadd.f32 %v6008_v12, %v3706_v46  ;;  %v3020_v3 = vpop.eup %3019  ;;  %2463 = vmatmul.mubr.f32.gmra.mrb[100].mxu0 %v1958_v39  ;;  %3027 = vtanh.f32 %v1581_v23  ;;  %v1452_v24 = vadd.f32 %v1324_v25, %v6003_v44  ;;  %v941_v19 = vmul.f32 0.5, %v4754_v28 }
 0x1ec   : > { %v1833_v21 = vadd.f32 1.0, %v3020_v3  ;;  %v1583_v26 = vmul.f32 0.7978846, %v1455_v32  ;;  %v1454_v16 = vadd.f32 %v1326_v52, %v6005_v54  ;;  %v5176_v12 = vmul.f32 0.5, %v4782_v60 }
 0x1ed   : > { %v1580_v43 = vmul.f32 0.7978846, %v1452_v24  ;;  %v1100_v39 = vmul.f32 0.044715, %v5161_v2  ;;  %v1329_v23 = vmul.f32 %v4846_v34, %v4814_v14  ;;  %v1102_v3 = vmul.f32 0.044715, %v5165_v41 }
 0x1ee   : > { %v3022_v25 = vpop.eup %3021  ;;  %v1961_v8 = vmul.f32 %v1833_v21, %v937_v15  ;;  %3029 = vtanh.f32 %v1583_v26  ;;  %v1582_v49 = vmul.f32 0.7978846, %v1454_v16  ;;  %v5183_v32 = vmul.f32 %v1099_v22, %v5140_v10  ;;  %v6010_v26 = vld [vmem:[#allocation39_spill] sm:$0xff] }
 0x1ef   : > { %v3024_v13 = vpop.eup %3023  ;;  %v1835_v28 = vadd.f32 1.0, %v3022_v25  ;;  %3031 = vtanh.f32 %v1580_v43  ;;  %v1101_v60 = vmul.f32 0.044715, %v5171_v36  ;;  %v940_v63 = vmul.f32 0.5, %v6003_v44 }
 0x1f0   : > { %v3026_v52 = vpop.eup %3025  ;;  %2242 = vmatprep.mubr.f32.mxu1 %v1961_v8  ;;  %v1832_v24 = vadd.f32 1.0, %v3024_v13  ;;  %v942_v34 = vmul.f32 0.5, %v6005_v54  ;;  %3033 = vtanh.f32 %v1582_v49  ;;  %v5191_v16 = vadd.f32 %v6010_v26, %v3710_v48 }
 0x1f1   : > { %v1963_v15 = vmul.f32 %v1835_v28, %v5125_v9  ;;  %v1834_v21 = vadd.f32 1.0, %v3026_v52  ;;  %v1457_v22 = vadd.f32 %v1329_v23, %v4814_v14  ;;  %v5195_v25 = vmul.f32 %v1100_v39, %v5161_v2  ;;  %v6011_v23 = vld [vmem:[#allocation37_spill] sm:$0xff]  ;;  %v6014_v52 = vld [vmem:[#allocation38_spill] sm:$0xff] }
 0x1f2   : > { %v1960_v43 = vmul.f32 %v1832_v24, %v936_v30  ;;  %v5198_v8 = vmul.f32 %v1102_v3, %v5165_v41  ;;  %v1331_v13 = vmul.f32 %v4877_v0, %v4834_v35  ;;  %v5203_v9 = vmul.f32 %v1101_v60, %v5171_v36  ;;  %v6012_v0 = vld [vmem:[#allocation32_spill] sm:$0xff] }
 0x1f3   : > { %2467 = vmatprep.mubr.f32.mxu0 %v1963_v15  ;;  %v1962_v44 = vmul.f32 %v1834_v21, %v938_v7  ;;  %v1585_v54 = vmul.f32 0.7978846, %v1457_v22  ;;  %v1328_v49 = vmul.f32 %v4838_v50, %v4804_v38  ;;  %v1330_v39 = vmul.f32 %v4841_v62, %v4808_v18 }
 0x1f4   : > { %2243 = vmatmul.mubr.f32.gmra.mrb[102].mxu1 %v1960_v43  ;;  %v1459_v30 = vadd.f32 %v1331_v13, %v4834_v35  ;;  %v5212_v3 = vadd.f32 %v6011_v23, %v3704_v45  ;;  %v5216_v7 = vadd.f32 %v6012_v0, %v3706_v46  ;;  %v1103_v60 = vmul.f32 0.044715, %v5191_v16 }
 0x1f5   : > { %v3028_v28 = vpop.eup %3027  ;;  %2468 = vmatmul.mubr.f32.gmra.mrb[102].mxu0 %v1962_v44  ;;  %3035 = vtanh.f32 %v1585_v54  ;;  %v1456_v50 = vadd.f32 %v1328_v49, %v4804_v38  ;;  %v5222_v24 = vadd.f32 %v6014_v52, %v3708_v47  ;;  %v945_v15 = vmul.f32 0.5, %v4814_v14 }
 0x1f6   : > { %6013 = vst [vmem:[#allocation25_spill] sm:$0xff] %v5216_v7  ;;  %v1837_v62 = vadd.f32 1.0, %v3028_v28  ;;  %v1587_v21 = vmul.f32 0.7978846, %v1459_v30  ;;  %v1458_v26 = vadd.f32 %v1330_v39, %v4808_v18  ;;  %v5227_v22 = vmul.f32 0.5, %v4834_v35 }
 0x1f7   : > { %v1584_v43 = vmul.f32 0.7978846, %v1456_v50  ;;  %v1104_v13 = vmul.f32 0.044715, %v5212_v3  ;;  %v1333_v44 = vmul.f32 %v4897_v56, %v4865_v53  ;;  %v1106_v0 = vmul.f32 0.044715, %v5216_v7 }
 0x1f8   : > { %v3030_v54 = vpop.eup %3029  ;;  %v1965_v49 = vmul.f32 %v1837_v62, %v941_v19  ;;  %3037 = vtanh.f32 %v1587_v21  ;;  %v1586_v23 = vmul.f32 0.7978846, %v1458_v26  ;;  %v5234_v30 = vmul.f32 %v1103_v60, %v5191_v16  ;;  %v6015_v21 = vld [vmem:[#allocation51_spill] sm:$0xff] }
 0x1f9   : > { %v3032_v28 = vpop.eup %3031  ;;  %v1839_v14 = vadd.f32 1.0, %v3030_v54  ;;  %3039 = vtanh.f32 %v1584_v43  ;;  %v1105_v35 = vmul.f32 0.044715, %v5222_v24  ;;  %v944_v52 = vmul.f32 0.5, %v4804_v38 }
 0x1fa   : > { %v3034_v39 = vpop.eup %3033  ;;  %2247 = vmatprep.mubr.f32.mxu1 %v1965_v49  ;;  %v1836_v50 = vadd.f32 1.0, %v3032_v28  ;;  %v5239_v56 = vmul.f32 0.5, %v4808_v18  ;;  %3041 = vtanh.f32 %v1586_v23  ;;  %v5244_v26 = vadd.f32 %v6015_v21, %v3710_v48  ;;  %v5255_v18 = vpop.f32.mrb[64].mxu1 }
 0x1fb   : > { %v1967_v19 = vmul.f32 %v1839_v14, %v5176_v12  ;;  %v1838_v62 = vadd.f32 1.0, %v3034_v39  ;;  %v1461_v60 = vadd.f32 %v1333_v44, %v4865_v53  ;;  %v5248_v54 = vmul.f32 %v1104_v13, %v5212_v3  ;;  %6017 = vst [vmem:[#allocation23_spill] sm:$0xff] %v5255_v18  ;;  %v2151_v44 = vpop.f32.mrb[65].mxu1 }
 0x1fc   : > { %v1964_v43 = vmul.f32 %v1836_v50, %v940_v63  ;;  %v5251_v49 = vmul.f32 %v1106_v0, %v5216_v7  ;;  %v1335_v38 = vmul.f32 %v4928_v17, %v4885_v11  ;;  %v5258_v23 = vmul.f32 %v1105_v35, %v5222_v24  ;;  %v6018_v0 = vld [vmem:[#allocation56_spill] sm:$0xff]  ;;  %v6019_v17 = vld [vmem:[#allocation45_spill] sm:$0xff] }
 0x1fd   : > { %2472 = vmatprep.mubr.f32.mxu0 %v1967_v19  ;;  %v1966_v12 = vmul.f32 %v1838_v62, %v942_v34  ;;  %v1589_v28 = vmul.f32 0.7978846, %v1461_v60  ;;  %v1332_v63 = vmul.f32 %v4889_v61, %v4855_v1  ;;  %v1334_v14 = vmul.f32 %v6018_v0, %v4859_v59  ;;  %v6020_v34 = vld [vmem:[#allocation41_spill] sm:$0xff]  ;;  %v6021_v62 = vld [vmem:[#allocation46_spill] sm:$0xff] }
 0x1fe   : > { %6016 = vst [vmem:[#allocation36_spill] sm:$0xff] %v5251_v49  ;;  %2248 = vmatmul.mubr.f32.gmra.mrb[104].mxu1 %v1964_v43  ;;  %v1463_v13 = vadd.f32 %v1335_v38, %v4885_v11  ;;  %v5267_v39 = vadd.f32 %v6019_v17, %v3704_v45  ;;  %v5271_v50 = vadd.f32 %v6020_v34, %v3706_v46  ;;  %v1107_v19 = vmul.f32 0.044715, %v5244_v26 }
 0x1ff   : > { %v3036_v35 = vpop.eup %3035  ;;  %2473 = vmatmul.mubr.f32.gmra.mrb[104].mxu0 %v1966_v12  ;;  %3043 = vtanh.f32 %v1589_v28  ;;  %v1460_v61 = vadd.f32 %v1332_v63, %v4855_v1  ;;  %v5277_v21 = vadd.f32 %v6021_v62, %v3708_v47  ;;  %v949_v43 = vmul.f32 0.5, %v4865_v53  ;;  %v6022_v28 = vld [vmem:[#allocation57_spill] sm:$0xff] }
 0x200   : > { %v1841_v60 = vadd.f32 1.0, %v3036_v35  ;;  %v1591_v38 = vmul.f32 0.7978846, %v1463_v13  ;;  %v1462_v44 = vadd.f32 %v1334_v14, %v4859_v59  ;;  %v5282_v0 = vmul.f32 0.5, %v4885_v11 }
 0x201   : > { %v1588_v17 = vmul.f32 0.7978846, %v1460_v61  ;;  %v1108_v12 = vmul.f32 0.044715, %v5267_v39  ;;  %v1337_v34 = vmul.f32 %v6022_v28, %v4916_v57  ;;  %v1110_v35 = vmul.f32 0.044715, %v5271_v50 }
 0x202   : > { %v3038_v63 = vpop.eup %3037  ;;  %v1969_v18 = vmul.f32 %v1841_v60, %v945_v15  ;;  %3045 = vtanh.f32 %v1591_v38  ;;  %v1590_v62 = vmul.f32 0.7978846, %v1462_v44  ;;  %v5289_v13 = vmul.f32 %v1107_v19, %v5244_v26  ;;  %v6023_v38 = vld [vmem:[#allocation48_spill] sm:$0xff] }
 0x203   : > { %v3040_v49 = vpop.eup %3039  ;;  %v1843_v53 = vadd.f32 1.0, %v3038_v63  ;;  %3047 = vtanh.f32 %v1588_v17  ;;  %v1109_v11 = vmul.f32 0.044715, %v5277_v21  ;;  %v948_v7 = vmul.f32 0.5, %v4855_v1  ;;  %v5300_v17 = vpop.f32.mrb[64].mxu0 }
 0x204   : > { %v3042_v14 = vpop.eup %3041  ;;  %2252 = vmatprep.mubr.f32.mxu1 %v1969_v18  ;;  %v1840_v61 = vadd.f32 1.0, %v3040_v49  ;;  %v950_v28 = vmul.f32 0.5, %v4859_v59  ;;  %3049 = vtanh.f32 %v1590_v62  ;;  %v5297_v44 = vadd.f32 %v6023_v38, %v3710_v48  ;;  %6024 = vst [vmem:[#allocation28_spill] sm:$0xff] %v5300_v17  ;;  %v6030_v17 = vld [vmem:[#allocation5_spill] sm:$0xff] }
 0x205   : > { %v1971_v15 = vmul.f32 %v1843_v53, %v5227_v22  ;;  %v1842_v60 = vadd.f32 1.0, %v3042_v14  ;;  %v1465_v19 = vadd.f32 %v1337_v34, %v4916_v57  ;;  %v5303_v18 = vmul.f32 %v1108_v12, %v5267_v39  ;;  %v2376_v22 = vpop.f32.mrb[65].mxu0  ;;  %v6026_v53 = vld [vmem:[#allocation11_spill] sm:$0xff]  ;;  %v6027_v14 = vld [vmem:[#allocation4_spill] sm:$0xff] }
 0x206   : > { %v1968_v63 = vmul.f32 %v1840_v61, %v944_v52  ;;  %v5306_v1 = vmul.f32 %v1110_v35, %v5271_v50  ;;  %v1339_v59 = vmul.f32 %v4979_v51, %v4936_v55  ;;  %v5312_v62 = vmul.f32 %v1109_v11, %v5277_v21  ;;  %v6028_v61 = vld [vmem:[#allocation58_spill] sm:$0xff]  ;;  %v6029_v35 = vld [vmem:[#allocation59_spill] sm:$0xff] }
 0x207   : > { %2477 = vmatprep.mubr.f32.mxu0 %v1971_v15  ;;  %v1970_v49 = vmul.f32 %v1842_v60, %v5239_v56  ;;  %v1593_v34 = vmul.f32 0.7978846, %v1465_v19  ;;  %v1336_v52 = vmul.f32 %v6027_v14, %v6026_v53  ;;  %v1338_v38 = vmul.f32 %v6029_v35, %v6028_v61  ;;  %v6032_v15 = vld [vmem:[#allocation7_spill] sm:$0xff] }
 0x208   : > { %6025 = vst [vmem:[#allocation50_spill] sm:$0xff] %v5306_v1  ;;  %2253 = vmatmul.mubr.f32.gmra.mrb[106].mxu1 %v1968_v63  ;;  %v1467_v12 = vadd.f32 %v1339_v59, %v4936_v55  ;;  %v5321_v51 = vadd.f32 %v6030_v17, %v3704_v45  ;;  %v5325_v56 = vadd.f32 %v6032_v15, %v3706_v46  ;;  %v1111_v60 = vmul.f32 0.044715, %v5297_v44  ;;  %v6034_v63 = vld [vmem:[#allocation13_spill] sm:$0xff] }
 0x209   : > { %v3044_v11 = vpop.eup %3043  ;;  %2478 = vmatmul.mubr.f32.gmra.mrb[106].mxu0 %v1970_v49  ;;  %3051 = vtanh.f32 %v1593_v34  ;;  %v1464_v19 = vadd.f32 %v1336_v52, %v6026_v53  ;;  %v5331_v59 = vadd.f32 %v6034_v63, %v3708_v47  ;;  %v953_v14 = vmul.f32 0.5, %v4916_v57 }
 0x20a   : > { %6031 = vst [vmem:[#allocation35_spill] sm:$0xff] %v5321_v51  ;;  %6033 = vst [vmem:[#allocation74_spill] sm:$0xff] %v5325_v56  ;;  %v1845_v22 = vadd.f32 1.0, %v3044_v11  ;;  %v1595_v45 = vmul.f32 0.7978846, %v1467_v12  ;;  %v1466_v17 = vadd.f32 %v1338_v38, %v6028_v61  ;;  %v5336_v46 = vmul.f32 0.5, %v4936_v55 }
 0x20b   : > { %v1592_v35 = vmul.f32 0.7978846, %v1464_v19  ;;  %v1112_v49 = vmul.f32 0.044715, %v5321_v51  ;;  %v1341_v34 = vmul.f32 %v4999_v5, %v4967_v37  ;;  %v1114_v11 = vmul.f32 0.044715, %v5325_v56 }
 0x20c   : > { %v3046_v52 = vpop.eup %3045  ;;  %v1973_v15 = vmul.f32 %v1845_v22, %v949_v43  ;;  %3053 = vtanh.f32 %v1595_v45  ;;  %v1594_v47 = vmul.f32 0.7978846, %v1466_v17  ;;  %v5343_v12 = vmul.f32 %v1111_v60, %v5297_v44  ;;  %v6035_v5 = vld [vmem:[#allocation52_spill] sm:$0xff] }
 0x20d   : > { %v3048_v63 = vpop.eup %3047  ;;  %v1847_v57 = vadd.f32 1.0, %v3046_v52  ;;  %3055 = vtanh.f32 %v1592_v35  ;;  %v1113_v55 = vmul.f32 0.044715, %v5331_v59  ;;  %v952_v1 = vmul.f32 0.5, %v6026_v53 }
 0x20e   : > { %v3050_v38 = vpop.eup %3049  ;;  %2257 = vmatprep.mubr.f32.mxu1 %v1973_v15  ;;  %v1844_v19 = vadd.f32 1.0, %v3048_v63  ;;  %3057 = vtanh.f32 %v1594_v47  ;;  %v5349_v43 = vadd.f32 %v6035_v5, %v3710_v48  ;;  %v954_v17 = vmul.f32 0.5, %v6028_v61  ;;  %v6039_v63 = vld [vmem:[#allocation10_spill] sm:$0xff]  ;;  %v6040_v61 = vld [vmem:[#allocation8_spill] sm:$0xff] }
 0x20f   : > { %v1975_v22 = vmul.f32 %v1847_v57, %v5282_v0  ;;  %v1846_v45 = vadd.f32 1.0, %v3050_v38  ;;  %v1469_v60 = vadd.f32 %v1341_v34, %v4967_v37  ;;  %v5355_v52 = vmul.f32 %v1112_v49, %v5321_v51  ;;  %v6041_v34 = vld [vmem:[#allocation20_spill] sm:$0xff] }
 0x210   : > { %v1972_v35 = vmul.f32 %v1844_v19, %v948_v7  ;;  %v5358_v15 = vmul.f32 %v1114_v11, %v5325_v56  ;;  %v1343_v53 = vmul.f32 %v5030_v27, %v4987_v31  ;;  %v5363_v47 = vmul.f32 %v1113_v55, %v5331_v59  ;;  %v6042_v11 = vld [vmem:[#allocation17_spill] sm:$0xff]  ;;  %v6043_v19 = vld [vmem:[#allocation16_spill] sm:$0xff] }
 0x211   : > { %6036 = vst [vmem:[#allocation63_spill] sm:$0xff] %v5355_v52  ;;  %2482 = vmatprep.mubr.f32.mxu0 %v1975_v22  ;;  %v1974_v48 = vmul.f32 %v1846_v45, %v950_v28  ;;  %v1597_v0 = vmul.f32 0.7978846, %v1469_v60  ;;  %v1340_v57 = vmul.f32 %v6040_v61, %v6039_v63  ;;  %v1115_v7 = vmul.f32 0.044715, %v5349_v43  ;;  %v6044_v5 = vld [vmem:[#allocation60_spill] sm:$0xff] }
 0x212   : > { %6037 = vst [vmem:[#allocation64_spill] sm:$0xff] %v5358_v15  ;;  %6038 = vst [vmem:[#allocation65_spill] sm:$0xff] %v5363_v47  ;;  %2258 = vmatmul.mubr.f32.gmra.mrb[108].mxu1 %v1972_v35  ;;  %v1471_v49 = vadd.f32 %v1343_v53, %v4987_v31  ;;  %v1342_v38 = vmul.f32 %v6042_v11, %v6041_v34  ;;  %v1345_v27 = vmul.f32 %v6044_v5, %v6043_v19  ;;  %v5381_v11 = vpop.f32.mrb[66].mxu1  ;;  %v6047_v15 = vld [vmem:[#allocation68_spill] sm:$0xff] }
 0x213   : > { %v3052_v22 = vpop.eup %3051  ;;  %2483 = vmatmul.mubr.f32.gmra.mrb[108].mxu0 %v1974_v48  ;;  %v5374_v28 = vmul.f32 0.5, %v4967_v37  ;;  %3059 = vtanh.f32 %v1597_v0  ;;  %v1468_v55 = vadd.f32 %v1340_v57, %v6039_v63  ;;  %v1347_v45 = vmul.f32 %v5081_v42, %v5038_v33  ;;  %6045 = vst [vmem:[#allocation66_spill] sm:$0xff] %v5381_v11  ;;  %v6046_v0 = vld [vmem:[#allocation9_spill] sm:$0xff]  ;;  %v2156_v56 = vpop.f32.mrb[67].mxu1 }
 0x214   : > { %v1849_v60 = vadd.f32 1.0, %v3052_v22  ;;  %v1599_v35 = vmul.f32 0.7978846, %v1471_v49  ;;  %v1470_v53 = vadd.f32 %v1342_v38, %v6041_v34  ;;  %v1473_v61 = vadd.f32 %v1345_v27, %v6043_v19  ;;  %v5389_v38 = vpop.f32.mrb[66].mxu0  ;;  %v6048_v56 = vld [vmem:[#allocation18_spill] sm:$0xff] }
 0x215   : > { %v5384_v5 = vmul.f32 0.5, %v4987_v31  ;;  %v1596_v48 = vmul.f32 0.7978846, %v1468_v55  ;;  %v1475_v37 = vadd.f32 %v1347_v45, %v5038_v33  ;;  %v1344_v57 = vmul.f32 %v6047_v15, %v6046_v0  ;;  %v2381_v55 = vpop.f32.mrb[67].mxu0 }
 0x216   : > { %v3054_v52 = vpop.eup %3053  ;;  %v1977_v42 = vmul.f32 %v1849_v60, %v953_v14  ;;  %3061 = vtanh.f32 %v1599_v35  ;;  %v1598_v49 = vmul.f32 0.7978846, %v1470_v53  ;;  %v1601_v22 = vmul.f32 0.7978846, %v1473_v61  ;;  %v6049_v14 = vld [vmem:[#allocation24_spill] sm:$0xff] }
 0x217   : > { %v3056_v27 = vpop.eup %3055  ;;  %v1851_v51 = vadd.f32 1.0, %v3054_v52  ;;  %3063 = vtanh.f32 %v1596_v48  ;;  %v1603_v11 = vmul.f32 0.7978846, %v1475_v37  ;;  %v1472_v31 = vadd.f32 %v1344_v57, %v6046_v0 }
 0x218   : > { %v3058_v47 = vpop.eup %3057  ;;  %2262 = vmatprep.mubr.f32.mxu1 %v1977_v42  ;;  %v1848_v45 = vadd.f32 1.0, %v3056_v27  ;;  %v5393_v15 = vmul.f32 %v1115_v7, %v5349_v43  ;;  %3065 = vtanh.f32 %v1598_v49  ;;  %v1346_v60 = vmul.f32 %v6049_v14, %v6048_v56  ;;  %v6052_v27 = vld [vmem:[#allocation62_spill] sm:$0xff] }
 0x219   : > { %v1979_v35 = vmul.f32 %v1851_v51, %v5336_v46  ;;  %v1850_v53 = vadd.f32 1.0, %v3058_v47  ;;  %3067 = vtanh.f32 %v1601_v22  ;;  %v1600_v52 = vmul.f32 0.7978846, %v1472_v31  ;;  %v6050_v47 = vld [vmem:[#allocation61_spill] sm:$0xff] }
 0x21a   : > { %v1976_v61 = vmul.f32 %v1848_v45, %v952_v1  ;;  %v956_v48 = vmul.f32 0.5, %v6039_v63  ;;  %3069 = vtanh.f32 %v1603_v11  ;;  %v1474_v37 = vadd.f32 %v1346_v60, %v6048_v56  ;;  %v6051_v63 = vld [vmem:[#allocation72_spill] sm:$0xff]  ;;  %v5413_v55 = vpop.f32.mrb[68].mxu1 }
 0x21b   : > { %2487 = vmatprep.mubr.f32.mxu0 %v1979_v35  ;;  %v1978_v57 = vmul.f32 %v1850_v53, %v954_v17  ;;  %v958_v7 = vmul.f32 0.5, %v6041_v34  ;;  %3071 = vtanh.f32 %v1600_v52  ;;  %v1349_v42 = vmul.f32 %v5101_v29, %v5069_v4  ;;  %v6053_v29 = vld [vmem:[#allocation27_spill] sm:$0xff]  ;;  %v5417_v14 = vpop.f32.mrb[68].mxu0  ;;  %v2161_v60 = vpop.f32.mrb[69].mxu1 }
 0x21c   : > { %2263 = vmatmul.mubr.f32.gmra.mrb[110].mxu1 %v1976_v61  ;;  %v961_v51 = vmul.f32 0.5, %v6043_v19  ;;  %v1602_v46 = vmul.f32 0.7978846, %v1474_v37  ;;  %v1351_v1 = vmul.f32 %v5132_v58, %v5089_v40  ;;  %v1348_v11 = vmul.f32 %v6051_v63, %v6050_v47  ;;  %v2386_v52 = vpop.f32.mrb[69].mxu0 }
 0x21d   : > { %v3060_v49 = vpop.eup %3059  ;;  %2488 = vmatmul.mubr.f32.gmra.mrb[110].mxu0 %v1978_v57  ;;  %v963_v17 = vmul.f32 0.5, %v5038_v33  ;;  %v960_v34 = vmul.f32 0.5, %v6046_v0  ;;  %v1477_v22 = vadd.f32 %v1349_v42, %v5069_v4  ;;  %v1350_v31 = vmul.f32 %v6053_v29, %v6052_v27 }
 0x21e   : > { %v1853_v19 = vadd.f32 1.0, %v3060_v49  ;;  %3073 = vtanh.f32 %v1602_v46  ;;  %v1479_v58 = vadd.f32 %v1351_v1, %v5089_v40  ;;  %v1476_v45 = vadd.f32 %v1348_v11, %v6050_v47 }
 0x21f   : > { %v5420_v33 = vmul.f32 0.5, %v6048_v56  ;;  %v1605_v0 = vmul.f32 0.7978846, %v1477_v22  ;;  %v1478_v35 = vadd.f32 %v1350_v31, %v6052_v27  ;;  %v1353_v53 = vmul.f32 %v5152_v6, %v5120_v20 }
 0x220   : > { %v3062_v61 = vpop.eup %3061  ;;  %v1981_v37 = vmul.f32 %v1853_v19, %v5374_v28  ;;  %v1607_v57 = vmul.f32 0.7978846, %v1479_v58  ;;  %v1604_v42 = vmul.f32 0.7978846, %v1476_v45  ;;  %v1355_v46 = vmul.f32 %v5183_v32, %v5140_v10 }
 0x221   : > { %v3064_v1 = vpop.eup %3063  ;;  %v1855_v63 = vadd.f32 1.0, %v3062_v61  ;;  %3075 = vtanh.f32 %v1605_v0  ;;  %v1606_v56 = vmul.f32 0.7978846, %v1478_v35  ;;  %v1481_v11 = vadd.f32 %v1353_v53, %v5120_v20  ;;  %v6055_v61 = vld [vmem:[#allocation22_spill] sm:$0xff] }
 0x222   : > { %v3066_v49 = vpop.eup %3065  ;;  %2267 = vmatprep.mubr.f32.mxu1 %v1981_v37  ;;  %v1852_v22 = vadd.f32 1.0, %v3064_v1  ;;  %v5430_v6 = vmul.f32 0.5, %v5069_v4  ;;  %3077 = vtanh.f32 %v1607_v57  ;;  %v1483_v28 = vadd.f32 %v1355_v46, %v5140_v10  ;;  %v6054_v4 = vld [vmem:[#allocation73_spill] sm:$0xff] }
 0x223   : > { %v3068_v29 = vpop.eup %3067  ;;  %v1983_v31 = vmul.f32 %v1855_v63, %v5384_v5  ;;  %v1854_v19 = vadd.f32 1.0, %v3066_v49  ;;  %3079 = vtanh.f32 %v1604_v42  ;;  %v1609_v32 = vmul.f32 0.7978846, %v1481_v11  ;;  %v5437_v42 = vpop.f32.mrb[70].mxu1 }
 0x224   : > { %v3070_v58 = vpop.eup %3069  ;;  %v1980_v45 = vmul.f32 %v1852_v22, %v956_v48  ;;  %v1857_v60 = vadd.f32 1.0, %v3068_v29  ;;  %3081 = vtanh.f32 %v1606_v56  ;;  %v1611_v0 = vmul.f32 0.7978846, %v1483_v28  ;;  %v6057_v56 = vld [vmem:[#allocation15_spill] sm:$0xff]  ;;  %v5443_v49 = vpop.f32.mrb[70].mxu0 }
 0x225   : > { %v3072_v35 = vpop.eup %3071  ;;  %2492 = vmatprep.mubr.f32.mxu0 %v1983_v31  ;;  %v1982_v53 = vmul.f32 %v1854_v19, %v958_v7  ;;  %v1859_v52 = vadd.f32 1.0, %v3070_v58  ;;  %3083 = vtanh.f32 %v1609_v32  ;;  %v1352_v37 = vmul.f32 %v6055_v61, %v6054_v4  ;;  %v6056_v7 = vld [vmem:[#allocation14_spill] sm:$0xff]  ;;  %v2166_v22 = vpop.f32.mrb[71].mxu1 }
 0x226   : > { %2268 = vmatmul.mubr.f32.gmra.mrb[112].mxu1 %v1980_v45  ;;  %v1985_v57 = vmul.f32 %v1857_v60, %v961_v51  ;;  %v1856_v46 = vadd.f32 1.0, %v3072_v35  ;;  %v967_v5 = vmul.f32 0.5, %v5089_v40  ;;  %3085 = vtanh.f32 %v1611_v0 }
 0x227   : > { %2493 = vmatmul.mubr.f32.gmra.mrb[112].mxu0 %v1982_v53  ;;  %v1987_v48 = vmul.f32 %v1859_v52, %v963_v17  ;;  %v964_v1 = vmul.f32 0.5, %v6050_v47  ;;  %v1480_v63 = vadd.f32 %v1352_v37, %v6054_v4  ;;  %v1354_v11 = vmul.f32 %v6057_v56, %v6056_v7  ;;  %v2391_v47 = vpop.f32.mrb[71].mxu0 }
 0x228   : > { %v3074_v28 = vpop.eup %3073  ;;  %2272 = vmatprep.mubr.f32.mxu1 %v1985_v57  ;;  %v1984_v51 = vmul.f32 %v1856_v46, %v960_v34  ;;  %v966_v40 = vmul.f32 0.5, %v6052_v27  ;;  %v1357_v29 = vmul.f32 %v5203_v9, %v5171_v36  ;;  %v1359_v17 = vmul.f32 %v5234_v30, %v5191_v16 }
 0x229   : > { %2497 = vmatprep.mubr.f32.mxu0 %v1987_v48  ;;  %v1858_v31 = vadd.f32 1.0, %v3074_v28  ;;  %v969_v19 = vmul.f32 0.5, %v5120_v20  ;;  %v1608_v32 = vmul.f32 0.7978846, %v1480_v63  ;;  %v1482_v58 = vadd.f32 %v1354_v11, %v6056_v7 }
 0x22a   : > { %2273 = vmatmul.mubr.f32.gmra.mrb[114].mxu1 %v1984_v51  ;;  %v971_v45 = vmul.f32 0.5, %v5140_v10  ;;  %v1485_v34 = vadd.f32 %v1357_v29, %v5171_v36  ;;  %v1487_v27 = vadd.f32 %v1359_v17, %v5191_v16  ;;  %v1356_v9 = vmul.f32 %v5195_v25, %v5161_v2 }
 0x22b   : > { %v3076_v60 = vpop.eup %3075  ;;  %v1986_v30 = vmul.f32 %v1858_v31, %v5420_v33  ;;  %3087 = vtanh.f32 %v1608_v32  ;;  %v1610_v0 = vmul.f32 0.7978846, %v1482_v58  ;;  %v1358_v20 = vmul.f32 %v5198_v8, %v5165_v41 }
 0x22c   : > { %v3078_v35 = vpop.eup %3077  ;;  %v1861_v53 = vadd.f32 1.0, %v3076_v60  ;;  %v1613_v52 = vmul.f32 0.7978846, %v1485_v34  ;;  %v1615_v61 = vmul.f32 0.7978846, %v1487_v27  ;;  %v1484_v10 = vadd.f32 %v1356_v9, %v5161_v2  ;;  %v6058_v60 = vld [vmem:[#allocation25_spill] sm:$0xff] }
 0x22d   : > { %v3080_v37 = vpop.eup %3079  ;;  %2498 = vmatmul.mubr.f32.gmra.mrb[114].mxu0 %v1986_v30  ;;  %v1863_v57 = vadd.f32 1.0, %v3078_v35  ;;  %v968_v46 = vmul.f32 0.5, %v6054_v4  ;;  %3089 = vtanh.f32 %v1610_v0  ;;  %v1486_v25 = vadd.f32 %v1358_v20, %v5165_v41  ;;  %v6059_v30 = vld [vmem:[#allocation36_spill] sm:$0xff] }
 0x22e   : > { %v3082_v33 = vpop.eup %3081  ;;  %v1989_v48 = vmul.f32 %v1861_v53, %v5430_v6  ;;  %v1860_v63 = vadd.f32 1.0, %v3080_v37  ;;  %3091 = vtanh.f32 %v1613_v52  ;;  %v1612_v8 = vmul.f32 0.7978846, %v1484_v10  ;;  %v5467_v32 = vpop.f32.mrb[72].mxu1 }
 0x22f   : > { %v3084_v56 = vpop.eup %3083  ;;  %v1991_v11 = vmul.f32 %v1863_v57, %v967_v5  ;;  %v1862_v22 = vadd.f32 1.0, %v3082_v33  ;;  %3093 = vtanh.f32 %v1615_v61  ;;  %v1614_v28 = vmul.f32 0.7978846, %v1486_v25  ;;  %v5473_v27 = vpop.f32.mrb[72].mxu0 }
 0x230   : > { %v3086_v51 = vpop.eup %3085  ;;  %2277 = vmatprep.mubr.f32.mxu1 %v1989_v48  ;;  %v1988_v29 = vmul.f32 %v1860_v63, %v964_v1  ;;  %v1865_v17 = vadd.f32 1.0, %v3084_v56  ;;  %3095 = vtanh.f32 %v1612_v8  ;;  %v1361_v4 = vmul.f32 %v5258_v23, %v5222_v24  ;;  %v2171_v23 = vpop.f32.mrb[73].mxu1 }
 0x231   : > { %2502 = vmatprep.mubr.f32.mxu0 %v1991_v11  ;;  %v1990_v47 = vmul.f32 %v1862_v22, %v966_v40  ;;  %v1867_v31 = vadd.f32 1.0, %v3086_v51  ;;  %v970_v6 = vmul.f32 0.5, %v6056_v7  ;;  %3097 = vtanh.f32 %v1614_v28  ;;  %v2396_v0 = vpop.f32.mrb[73].mxu0 }
 0x232   : > { %2278 = vmatmul.mubr.f32.gmra.mrb[116].mxu1 %v1988_v29  ;;  %v1993_v5 = vmul.f32 %v1865_v17, %v969_v19  ;;  %v973_v58 = vmul.f32 0.5, %v5171_v36  ;;  %v1489_v34 = vadd.f32 %v1361_v4, %v5222_v24  ;;  %v1363_v1 = vmul.f32 %v5289_v13, %v5244_v26 }
 0x233   : > { %2503 = vmatmul.mubr.f32.gmra.mrb[116].mxu0 %v1990_v47  ;;  %v1995_v40 = vmul.f32 %v1867_v31, %v971_v45  ;;  %v975_v9 = vmul.f32 0.5, %v5191_v16  ;;  %v1360_v7 = vmul.f32 %v5248_v54, %v5212_v3  ;;  %v1362_v19 = vmul.f32 %v6059_v30, %v6058_v60 }
 0x234   : > { %2282 = vmatprep.mubr.f32.mxu1 %v1993_v5  ;;  %v972_v36 = vmul.f32 0.5, %v5161_v2  ;;  %v1617_v20 = vmul.f32 0.7978846, %v1489_v34  ;;  %v1491_v13 = vadd.f32 %v1363_v1, %v5244_v26  ;;  %v1365_v35 = vmul.f32 %v5312_v62, %v5277_v21 }
 0x235   : > { %v3088_v53 = vpop.eup %3087  ;;  %2507 = vmatprep.mubr.f32.mxu0 %v1995_v40  ;;  %v974_v16 = vmul.f32 0.5, %v5165_v41  ;;  %v1488_v45 = vadd.f32 %v1360_v7, %v5212_v3  ;;  %v1490_v54 = vadd.f32 %v1362_v19, %v6058_v60  ;;  %v1367_v52 = vmul.f32 %v5343_v12, %v5297_v44  ;;  %v6061_v7 = vld [vmem:[#allocation65_spill] sm:$0xff] }
 0x236   : > { %v1864_v61 = vadd.f32 1.0, %v3088_v53  ;;  %3099 = vtanh.f32 %v1617_v20  ;;  %v1619_v2 = vmul.f32 0.7978846, %v1491_v13  ;;  %v1493_v10 = vadd.f32 %v1365_v35, %v5277_v21  ;;  %v6062_v53 = vld [vmem:[#allocation35_spill] sm:$0xff] }
 0x237   : > { %v3090_v37 = vpop.eup %3089  ;;  %v5491_v57 = vmul.f32 0.5, %v5222_v24  ;;  %v1616_v62 = vmul.f32 0.7978846, %v1488_v45  ;;  %v1618_v25 = vmul.f32 0.7978846, %v1490_v54  ;;  %v1495_v41 = vadd.f32 %v1367_v52, %v5297_v44 }
 0x238   : > { %v3092_v33 = vpop.eup %3091  ;;  %v1992_v48 = vmul.f32 %v1864_v61, %v968_v46  ;;  %v1866_v63 = vadd.f32 1.0, %v3090_v37  ;;  %3101 = vtanh.f32 %v1619_v2  ;;  %v1621_v8 = vmul.f32 0.7978846, %v1493_v10  ;;  %v6064_v61 = vld [vmem:[#allocation74_spill] sm:$0xff]  ;;  %v6065_v2 = vld [vmem:[#allocation64_spill] sm:$0xff] }
 0x239   : > { %v3094_v56 = vpop.eup %3093  ;;  %v1869_v12 = vadd.f32 1.0, %v3092_v33  ;;  %3103 = vtanh.f32 %v1616_v62  ;;  %v1623_v11 = vmul.f32 0.7978846, %v1495_v41  ;;  %v1364_v22 = vmul.f32 %v5303_v18, %v5267_v39  ;;  %v6060_v18 = vld [vmem:[#allocation50_spill] sm:$0xff] }
 0x23a   : > { %v3096_v28 = vpop.eup %3095  ;;  %2283 = vmatmul.mubr.f32.gmra.mrb[118].mxu1 %v1992_v48  ;;  %v1994_v24 = vmul.f32 %v1866_v63, %v970_v6  ;;  %v1871_v51 = vadd.f32 1.0, %v3094_v56  ;;  %v979_v29 = vmul.f32 0.5, %v5244_v26  ;;  %3105 = vtanh.f32 %v1618_v25  ;;  %v5498_v31 = vpop.f32.mrb[74].mxu1  ;;  %v6066_v25 = vld [vmem:[#allocation23_spill] sm:$0xff] }
 0x23b   : > { %v3098_v17 = vpop.eup %3097  ;;  %v1997_v4 = vmul.f32 %v1869_v12, %v973_v58  ;;  %v1868_v46 = vadd.f32 1.0, %v3096_v28  ;;  %3107 = vtanh.f32 %v1621_v8  ;;  %v1492_v47 = vadd.f32 %v1364_v22, %v5267_v39  ;;  %v5502_v6 = vpop.f32.mrb[74].mxu0 }
 0x23c   : > { %2508 = vmatmul.mubr.f32.gmra.mrb[118].mxu0 %v1994_v24  ;;  %v1999_v5 = vmul.f32 %v1871_v51, %v975_v9  ;;  %v1870_v34 = vadd.f32 1.0, %v3098_v17  ;;  %3109 = vtanh.f32 %v1623_v11  ;;  %v1366_v1 = vmul.f32 %v6060_v18, %v5271_v50  ;;  %v2176_v23 = vpop.f32.mrb[75].mxu1  ;;  %v2401_v19 = vpop.f32.mrb[75].mxu0  ;;  %v6068_v17 = vld [vmem:[#allocation28_spill] sm:$0xff] }
 0x23d   : > { %2287 = vmatprep.mubr.f32.mxu1 %v1997_v4  ;;  %v1996_v26 = vmul.f32 %v1868_v46, %v972_v36  ;;  %v976_v58 = vmul.f32 0.5, %v5212_v3  ;;  %v1620_v40 = vmul.f32 0.7978846, %v1492_v47  ;;  %v1369_v30 = vmul.f32 %v6061_v7, %v5331_v59  ;;  %v5514_v36 = vld [vmem:[%s5623_s4] ss:$0 sm:$0xff] }
 0x23e   : > { %2512 = vmatprep.mubr.f32.mxu0 %v1999_v5  ;;  %v1998_v0 = vmul.f32 %v1870_v34, %v974_v16  ;;  %v978_v9 = vmul.f32 0.5, %v6058_v60  ;;  %v1494_v20 = vadd.f32 %v1366_v1, %v5271_v50  ;;  %v1371_v13 = vmul.f32 %v5393_v15, %v5349_v43  ;;  %v6063_v16 = vld [vmem:[#allocation63_spill] sm:$0xff] }
 0x23f   : > { %2288 = vmatmul.mubr.f32.gmra.mrb[120].mxu1 %v1996_v26  ;;  %v981_v3 = vmul.f32 0.5, %v5277_v21  ;;  %3111 = vtanh.f32 %v1620_v40  ;;  %v1497_v35 = vadd.f32 %v1369_v30, %v5331_v59  ;;  %v1368_v45 = vmul.f32 %v6063_v16, %v6062_v53 }
 0x240   : > { %v3100_v60 = vpop.eup %3099  ;;  %2513 = vmatmul.mubr.f32.gmra.mrb[120].mxu0 %v1998_v0  ;;  %v983_v54 = vmul.f32 0.5, %v5297_v44  ;;  %v1622_v52 = vmul.f32 0.7978846, %v1494_v20  ;;  %v1499_v15 = vadd.f32 %v1371_v13, %v5349_v43  ;;  %v1370_v10 = vmul.f32 %v6065_v2, %v6064_v61  ;;  %v6067_v44 = vld [vmem:[#allocation66_spill] sm:$0xff] }
 0x241   : > { %v1873_v37 = vadd.f32 1.0, %v3100_v60  ;;  %v1625_v62 = vmul.f32 0.7978846, %v1497_v35  ;;  %v1496_v21 = vadd.f32 %v1368_v45, %v6062_v53  ;;  %v2150_v41 = vadd.f32 %v5514_v36, %v6066_v25 }
 0x242   : > { %v3102_v33 = vpop.eup %3101  ;;  %3113 = vtanh.f32 %v1622_v52  ;;  %v1627_v48 = vmul.f32 0.7978846, %v1499_v15  ;;  %v1498_v63 = vadd.f32 %v1370_v10, %v6064_v61  ;;  %v2155_v8 = vadd.f32 %v5514_v36, %v6067_v44 }
 0x243   : > { %v3104_v56 = vpop.eup %3103  ;;  %v2001_v12 = vmul.f32 %v1873_v37, %v5491_v57  ;;  %v1875_v11 = vadd.f32 1.0, %v3102_v33  ;;  %3115 = vtanh.f32 %v1625_v62  ;;  %v1624_v22 = vmul.f32 0.7978846, %v1496_v21  ;;  %v2179_v34 = vpop.f32.mrb[76].mxu1 }
 0x244   : > { %v3106_v28 = vpop.eup %3105  ;;  %v1872_v24 = vadd.f32 1.0, %v3104_v56  ;;  %3117 = vtanh.f32 %v1627_v48  ;;  %v1626_v51 = vmul.f32 0.7978846, %v1498_v63  ;;  %v2375_v4 = vadd.f32 %v6068_v17, %v2150_v41  ;;  %v2404_v40 = vpop.f32.mrb[76].mxu0 }
 0x245   : > { %v3108_v46 = vpop.eup %3107  ;;  %2292 = vmatprep.mubr.f32.mxu1 %v2001_v12  ;;  %v2003_v47 = vmul.f32 %v1875_v11, %v979_v29  ;;  %v1874_v57 = vadd.f32 1.0, %v3106_v28  ;;  %3119 = vtanh.f32 %v1624_v22  ;;  %v2380_v5 = vadd.f32 %v5389_v38, %v2155_v8  ;;  %v2181_v7 = vpop.f32.mrb[77].mxu1 }
 0x246   : > { %v3110_v18 = vpop.eup %3109  ;;  %v2000_v1 = vmul.f32 %v1872_v24, %v976_v58  ;;  %v1877_v23 = vadd.f32 1.0, %v3108_v46  ;;  %3121 = vtanh.f32 %v1626_v51  ;;  %2533 = vst [vmem:[%s5536_s22] sm:$0xff] %v2375_v4  ;;  %v2160_v26 = vadd.f32 %v5514_v36, %v5413_v55  ;;  %v2406_v58 = vpop.f32.mrb[77].mxu0 }
 0x247   : > { %2517 = vmatprep.mubr.f32.mxu0 %v2003_v47  ;;  %v2002_v30 = vmul.f32 %v1874_v57, %v978_v9  ;;  %v1879_v19 = vadd.f32 1.0, %v3110_v18  ;;  %2534 = vst [vmem:[%s5536_s22 + $0x8] sm:$0xff] %v2380_v5  ;;  %v2165_v29 = vadd.f32 %v5514_v36, %v5437_v42  ;;  %v2170_v38 = vadd.f32 %v5514_v36, %v5467_v32 }
 0x248   : > { %2293 = vmatmul.mubr.f32.gmra.mrb[122].mxu1 %v2000_v1  ;;  %v2005_v0 = vmul.f32 %v1877_v23, %v981_v3  ;;  %v2385_v20 = vadd.f32 %v5417_v14, %v2160_v26  ;;  %v2175_v55 = vadd.f32 %v5514_v36, %v5498_v31  ;;  %v2180_v9 = vadd.f32 %v5514_v36, %v2179_v34 }
 0x249   : > { %v3112_v13 = vpop.eup %3111  ;;  %2518 = vmatmul.mubr.f32.gmra.mrb[122].mxu0 %v2002_v30  ;;  %v2007_v42 = vmul.f32 %v1879_v19, %v983_v54  ;;  %v2390_v35 = vadd.f32 %v5443_v49, %v2165_v29  ;;  %v2395_v32 = vadd.f32 %v5473_v27, %v2170_v38  ;;  %v980_v3 = vmul.f32 0.5, %v5267_v39 }
 0x24a   : > { %2297 = vmatprep.mubr.f32.mxu1 %v2005_v0  ;;  %v1876_v16 = vadd.f32 1.0, %v3112_v13  ;;  %2535 = vst [vmem:[%s5536_s22 + $0x10] sm:$0xff] %v2385_v20  ;;  %v2400_v14 = vadd.f32 %v5502_v6, %v2175_v55  ;;  %v2405_v45 = vadd.f32 %v2404_v40, %v2180_v9  ;;  %v982_v49 = vmul.f32 0.5, %v5271_v50 }
 0x24b   : > { %2522 = vmatprep.mubr.f32.mxu0 %v2007_v42  ;;  %2536 = vst [vmem:[%s5536_s22 + $0x18] sm:$0xff] %v2390_v35  ;;  %2537 = vst [vmem:[%s5536_s22 + $0x20] sm:$0xff] %v2395_v32  ;;  %v985_v39 = vmul.f32 0.5, %v5331_v59  ;;  %v987_v6 = vmul.f32 0.5, %v5349_v43  ;;  %v984_v41 = vmul.f32 0.5, %v6062_v53  ;;  %v986_v59 = vmul.f32 0.5, %v6064_v61 }
 0x24c   : > { %v3114_v31 = vpop.eup %3113  ;;  %v2004_v60 = vmul.f32 %v1876_v16, %v980_v3  ;;  %2538 = vst [vmem:[%s5536_s22 + $0x28] sm:$0xff] %v2400_v14  ;;  %2539 = vst [vmem:[%s5536_s22 + $0x30] sm:$0xff] %v2405_v45 }
 0x24d   : > { %v3116_v54 = vpop.eup %3115  ;;  %v1878_v52 = vadd.f32 1.0, %v3114_v31  ;;  %v2184_v62 = vpop.f32.mrb[78].mxu1 }
 0x24e   : > { %v3118_v27 = vpop.eup %3117  ;;  %2298 = vmatmul.mubr.f32.gmra.mrb[124].mxu1 %v2004_v60  ;;  %v1881_v15 = vadd.f32 1.0, %v3116_v54  ;;  %v2185_v50 = vadd.f32 %v5514_v36, %v2184_v62  ;;  %v2186_v63 = vpop.f32.mrb[79].mxu1 }
 0x24f   : > { %v3120_v2 = vpop.eup %3119  ;;  %v2006_v10 = vmul.f32 %v1878_v52, %v982_v49  ;;  %v1883_v37 = vadd.f32 1.0, %v3118_v27  ;;  %v2409_v48 = vpop.f32.mrb[78].mxu0 }
 0x250   : > { %v3122_v21 = vpop.eup %3121  ;;  %v2009_v25 = vmul.f32 %v1881_v15, %v985_v39  ;;  %v1880_v33 = vadd.f32 1.0, %v3120_v2  ;;  %v2411_v56 = vpop.f32.mrb[79].mxu0  ;;  %v2410_v12 = vadd.f32 %v2409_v48, %v2185_v50 }
 0x251   : > { %2523 = vmatmul.mubr.f32.gmra.mrb[124].mxu0 %v2006_v10  ;;  %v2011_v44 = vmul.f32 %v1883_v37, %v987_v6  ;;  %v1882_v8 = vadd.f32 1.0, %v3122_v21 }
 0x252   : > { %2302 = vmatprep.mubr.f32.mxu1 %v2009_v25  ;;  %v2008_v43 = vmul.f32 %v1880_v33, %v984_v41  ;;  %2540 = vst [vmem:[%s5536_s22 + $0x38] sm:$0xff] %v2410_v12 }
 0x253   : > { %2527 = vmatprep.mubr.f32.mxu0 %v2011_v44  ;;  %v2010_v11 = vmul.f32 %v1882_v8, %v986_v59 }
 0x254   : > { %2303 = vmatmul.mubr.f32.gmra.mrb[126].mxu1 %v2008_v43 }
 0x255   : > { %2528 = vmatmul.mubr.f32.gmra.mrb[126].mxu0 %v2010_v11 }
 0x258   : > { %v2189_v53 = vpop.f32.mrb[80].mxu1 }
 0x259   : > { %v2190_v22 = vadd.f32 %v5514_v36, %v2189_v53  ;;  %v2414_v28 = vpop.f32.mrb[80].mxu0  ;;  %v2191_v24 = vpop.f32.mrb[81].mxu1 }
 0x25a   : > { %v2416_v51 = vpop.f32.mrb[81].mxu0 }
 0x25b   : > { %v2415_v61 = vadd.f32 %v2414_v28, %v2190_v22 }
 0x25d   : > { %2541 = vst [vmem:[%s5536_s22 + $0x40] sm:$0xff] %v2415_v61 }
 0x262   : > { %v2194_v17 = vpop.f32.mrb[82].mxu1 }
 0x263   : > { %v2195_v4 = vadd.f32 %v5514_v36, %v2194_v17  ;;  %v2419_v46 = vpop.f32.mrb[82].mxu0  ;;  %v2196_v47 = vpop.f32.mrb[83].mxu1 }
 0x264   : > { %v2421_v57 = vpop.f32.mrb[83].mxu0 }
 0x265   : > { %v2420_v5 = vadd.f32 %v2419_v46, %v2195_v4 }
 0x267   : > { %2542 = vst [vmem:[%s5536_s22 + $0x48] sm:$0xff] %v2420_v5 }
 0x26c   : > { %v2199_v34 = vpop.f32.mrb[84].mxu1 }
 0x26d   : > { %v2200_v18 = vadd.f32 %v5514_v36, %v2199_v34  ;;  %v2424_v1 = vpop.f32.mrb[84].mxu0  ;;  %v2201_v23 = vpop.f32.mrb[85].mxu1 }
 0x26e   : > { %v2426_v26 = vpop.f32.mrb[85].mxu0 }
 0x26f   : > { %v2425_v40 = vadd.f32 %v2424_v1, %v2200_v18 }
 0x271   : > { %2543 = vst [vmem:[%s5536_s22 + $0x50] sm:$0xff] %v2425_v40 }
 0x276   : > { %v2204_v7 = vpop.f32.mrb[86].mxu1 }
 0x277   : > { %v2205_v30 = vadd.f32 %v5514_v36, %v2204_v7  ;;  %v2429_v19 = vpop.f32.mrb[86].mxu0  ;;  %v2206_v29 = vpop.f32.mrb[87].mxu1 }
 0x278   : > { %v2431_v38 = vpop.f32.mrb[87].mxu0 }
 0x279   : > { %v2430_v58 = vadd.f32 %v2429_v19, %v2205_v30 }
 0x27b   : > { %2544 = vst [vmem:[%s5536_s22 + $0x58] sm:$0xff] %v2430_v58 }
 0x280   : > { %v2209_v0 = vpop.f32.mrb[88].mxu1 }
 0x281   : > { %v2210_v20 = vadd.f32 %v5514_v36, %v2209_v0  ;;  %v2211_v9 = vpop.f32.mrb[89].mxu1 }
 0x282   : > { %v2434_v55 = vpop.f32.mrb[88].mxu0 }
 0x283   : > { %v2436_v13 = vpop.f32.mrb[89].mxu0  ;;  %v2435_v42 = vadd.f32 %v2434_v55, %v2210_v20 }
 0x285   : > { %2545 = vst [vmem:[%s5536_s22 + $0x60] sm:$0xff] %v2435_v42 }
 0x28b   : > { %v2214_v35 = vpop.f32.mrb[90].mxu1 }
 0x28c   : > { %v2215_v32 = vadd.f32 %v5514_v36, %v2214_v35  ;;  %v2439_v3 = vpop.f32.mrb[90].mxu0  ;;  %v2216_v16 = vpop.f32.mrb[91].mxu1 }
 0x28d   : > { %v2441_v14 = vpop.f32.mrb[91].mxu0 }
 0x28e   : > { %v2440_v45 = vadd.f32 %v2439_v3, %v2215_v32 }
 0x290   : > { %2546 = vst [vmem:[%s5536_s22 + $0x68] sm:$0xff] %v2440_v45 }
 0x295   : > { %v2219_v31 = vpop.f32.mrb[92].mxu1 }
 0x296   : > { %v2220_v60 = vadd.f32 %v5514_v36, %v2219_v31  ;;  %v2444_v54 = vpop.f32.mrb[92].mxu0  ;;  %v2221_v49 = vpop.f32.mrb[93].mxu1 }
 0x297   : > { %v2446_v52 = vpop.f32.mrb[93].mxu0 }
 0x298   : > { %v2445_v27 = vadd.f32 %v2444_v54, %v2220_v60 }
 0x29a   : > { %2547 = vst [vmem:[%s5536_s22 + $0x70] sm:$0xff] %v2445_v27 }
 0x29e   : > { %v2224_v39 = vpop.f32.mrb[94].mxu1 }
 0x29f   : > { %v2225_v15 = vadd.f32 %v5514_v36, %v2224_v39  ;;  %v2226_v10 = vpop.f32.mrb[95].mxu1 }
 0x2a0   : > { %v2449_v2 = vpop.f32.mrb[94].mxu0 }
 0x2a1   : > { %v2451_v6 = vpop.f32.mrb[95].mxu0  ;;  %v2450_v37 = vadd.f32 %v2449_v2, %v2225_v15 }
 0x2a3   : > { %2548 = vst [vmem:[%s5536_s22 + $0x78] sm:$0xff] %v2450_v37 }
 0x2a8   : > { %v2229_v62 = vpop.f32.mrb[96].mxu1 }
 0x2a9   : > { %v2230_v21 = vadd.f32 %v5514_v36, %v2229_v62  ;;  %v2231_v41 = vpop.f32.mrb[97].mxu1 }
 0x2aa   : > { %v2454_v25 = vpop.f32.mrb[96].mxu0 }
 0x2ab   : > { %v2456_v33 = vpop.f32.mrb[97].mxu0  ;;  %v2455_v50 = vadd.f32 %v2454_v25, %v2230_v21 }
 0x2ad   : > { %2549 = vst [vmem:[%s5536_s22 + $0x80] sm:$0xff] %v2455_v50 }
 0x2b3   : > { %v2234_v48 = vpop.f32.mrb[98].mxu1 }
 0x2b4   : > { %v2235_v63 = vadd.f32 %v5514_v36, %v2234_v48  ;;  %v2459_v44 = vpop.f32.mrb[98].mxu0  ;;  %v2236_v59 = vpop.f32.mrb[99].mxu1 }
 0x2b5   : > { %v2461_v8 = vpop.f32.mrb[99].mxu0 }
 0x2b6   : > { %v2460_v56 = vadd.f32 %v2459_v44, %v2235_v63 }
 0x2b8   : > { %2550 = vst [vmem:[%s5536_s22 + $0x88] sm:$0xff] %v2460_v56 }
 0x2bd   : > { %v2239_v43 = vpop.f32.mrb[100].mxu1 }
 0x2be   : > { %v2240_v12 = vadd.f32 %v5514_v36, %v2239_v43  ;;  %v2464_v11 = vpop.f32.mrb[100].mxu0  ;;  %v2241_v53 = vpop.f32.mrb[101].mxu1 }
 0x2bf   : > { %v2466_v22 = vpop.f32.mrb[101].mxu0 }
 0x2c0   : > { %v2465_v28 = vadd.f32 %v2464_v11, %v2240_v12 }
 0x2c2   : > { %2551 = vst [vmem:[%s5536_s22 + $0x90] sm:$0xff] %v2465_v28 }
 0x2c7   : > { %v2244_v24 = vpop.f32.mrb[102].mxu1 }
 0x2c8   : > { %v2245_v51 = vadd.f32 %v5514_v36, %v2244_v24  ;;  %v2469_v61 = vpop.f32.mrb[102].mxu0  ;;  %v2246_v17 = vpop.f32.mrb[103].mxu1 }
 0x2c9   : > { %v2471_v4 = vpop.f32.mrb[103].mxu0 }
 0x2ca   : > { %v2470_v46 = vadd.f32 %v2469_v61, %v2245_v51 }
 0x2cc   : > { %2552 = vst [vmem:[%s5536_s22 + $0x98] sm:$0xff] %v2470_v46 }
 0x2d1   : > { %v2249_v47 = vpop.f32.mrb[104].mxu1 }
 0x2d2   : > { %v2250_v57 = vadd.f32 %v5514_v36, %v2249_v47  ;;  %v2474_v5 = vpop.f32.mrb[104].mxu0  ;;  %v2251_v34 = vpop.f32.mrb[105].mxu1 }
 0x2d3   : > { %v2476_v18 = vpop.f32.mrb[105].mxu0 }
 0x2d4   : > { %v2475_v1 = vadd.f32 %v2474_v5, %v2250_v57 }
 0x2d6   : > { %2553 = vst [vmem:[%s5536_s22 + $0xa0] sm:$0xff] %v2475_v1 }
 0x2db   : > { %v2254_v23 = vpop.f32.mrb[106].mxu1 }
 0x2dc   : > { %v2255_v26 = vadd.f32 %v5514_v36, %v2254_v23  ;;  %v2479_v40 = vpop.f32.mrb[106].mxu0  ;;  %v2256_v7 = vpop.f32.mrb[107].mxu1 }
 0x2dd   : > { %v2481_v30 = vpop.f32.mrb[107].mxu0 }
 0x2de   : > { %v2480_v19 = vadd.f32 %v2479_v40, %v2255_v26 }
 0x2e0   : > { %2554 = vst [vmem:[%s5536_s22 + $0xa8] sm:$0xff] %v2480_v19 }
 0x2e5   : > { %v2259_v29 = vpop.f32.mrb[108].mxu1 }
 0x2e6   : > { %v2260_v38 = vadd.f32 %v5514_v36, %v2259_v29  ;;  %v2484_v58 = vpop.f32.mrb[108].mxu0  ;;  %v2261_v0 = vpop.f32.mrb[109].mxu1 }
 0x2e7   : > { %v2486_v20 = vpop.f32.mrb[109].mxu0 }
 0x2e8   : > { %v2485_v55 = vadd.f32 %v2484_v58, %v2260_v38 }
 0x2ea   : > { %2555 = vst [vmem:[%s5536_s22 + $0xb0] sm:$0xff] %v2485_v55 }
 0x2ef   : > { %v2264_v9 = vpop.f32.mrb[110].mxu1 }
 0x2f0   : > { %v2265_v13 = vadd.f32 %v5514_v36, %v2264_v9  ;;  %v2489_v42 = vpop.f32.mrb[110].mxu0  ;;  %v2266_v35 = vpop.f32.mrb[111].mxu1 }
 0x2f1   : > { %v2491_v32 = vpop.f32.mrb[111].mxu0 }
 0x2f2   : > { %v2490_v3 = vadd.f32 %v2489_v42, %v2265_v13 }
 0x2f4   : > { %2556 = vst [vmem:[%s5536_s22 + $0xb8] sm:$0xff] %v2490_v3 }
 0x2f9   : > { %v2269_v16 = vpop.f32.mrb[112].mxu1 }
 0x2fa   : > { %v2270_v14 = vadd.f32 %v5514_v36, %v2269_v16  ;;  %v2494_v45 = vpop.f32.mrb[112].mxu0  ;;  %v2271_v31 = vpop.f32.mrb[113].mxu1 }
 0x2fb   : > { %v2496_v60 = vpop.f32.mrb[113].mxu0 }
 0x2fc   : > { %v2495_v54 = vadd.f32 %v2494_v45, %v2270_v14 }
 0x2fd   : > { %v2274_v49 = vpop.f32.mrb[114].mxu1 }
 0x2fe   : > { %2557 = vst [vmem:[%s5536_s22 + $0xc0] sm:$0xff] %v2495_v54  ;;  %v2275_v52 = vadd.f32 %v5514_v36, %v2274_v49  ;;  %v2276_v27 = vpop.f32.mrb[115].mxu1 }
 0x300   : > { %v2499_v39 = vpop.f32.mrb[114].mxu0 }
 0x301   : > { %v2500_v15 = vadd.f32 %v2499_v39, %v2275_v52  ;;  %v2501_v2 = vpop.f32.mrb[115].mxu0 }
 0x303   : > { %2558 = vst [vmem:[%s5536_s22 + $0xc8] sm:$0xff] %v2500_v15 }
 0x305   : > { %v2279_v10 = vpop.f32.mrb[116].mxu1 }
 0x306   : > { %v2280_v6 = vadd.f32 %v5514_v36, %v2279_v10  ;;  %v2504_v37 = vpop.f32.mrb[116].mxu0  ;;  %v2281_v62 = vpop.f32.mrb[117].mxu1 }
 0x307   : > { %v2506_v21 = vpop.f32.mrb[117].mxu0 }
 0x308   : > { %v2505_v25 = vadd.f32 %v2504_v37, %v2280_v6 }
 0x30a   : > { %2559 = vst [vmem:[%s5536_s22 + $0xd0] sm:$0xff] %v2505_v25 }
 0x30d   : > { %v2284_v41 = vpop.f32.mrb[118].mxu1 }
 0x30e   : > { %v2285_v33 = vadd.f32 %v5514_v36, %v2284_v41  ;;  %v2286_v50 = vpop.f32.mrb[119].mxu1 }
 0x30f   : > { %v2509_v48 = vpop.f32.mrb[118].mxu0 }
 0x310   : > { %v2510_v63 = vadd.f32 %v2509_v48, %v2285_v33  ;;  %v2511_v44 = vpop.f32.mrb[119].mxu0 }
 0x312   : > { %2560 = vst [vmem:[%s5536_s22 + $0xd8] sm:$0xff] %v2510_v63  ;;  %v2289_v59 = vpop.f32.mrb[120].mxu1 }
 0x313   : > { %v2290_v8 = vadd.f32 %v5514_v36, %v2289_v59  ;;  %v2514_v56 = vpop.f32.mrb[120].mxu0  ;;  %v2291_v43 = vpop.f32.mrb[121].mxu1 }
 0x314   : > { %v2516_v12 = vpop.f32.mrb[121].mxu0 }
 0x315   : > { %v2515_v11 = vadd.f32 %v2514_v56, %v2290_v8 }
 0x317   : > { %2561 = vst [vmem:[%s5536_s22 + $0xe0] sm:$0xff] %v2515_v11 }
 0x31b   : > { %v2294_v53 = vpop.f32.mrb[122].mxu1 }
 0x31c   : > { %v2295_v22 = vadd.f32 %v5514_v36, %v2294_v53  ;;  %v2519_v28 = vpop.f32.mrb[122].mxu0  ;;  %v2296_v24 = vpop.f32.mrb[123].mxu1 }
 0x31d   : > { %v2521_v51 = vpop.f32.mrb[123].mxu0 }
 0x31e   : > { %v2520_v61 = vadd.f32 %v2519_v28, %v2295_v22 }
 0x320   : > { %2562 = vst [vmem:[%s5536_s22 + $0xe8] sm:$0xff] %v2520_v61 }
 0x321   : > { %v2299_v17 = vpop.f32.mrb[124].mxu1 }
 0x322   : > { %v2300_v4 = vadd.f32 %v5514_v36, %v2299_v17  ;;  %v2301_v46 = vpop.f32.mrb[125].mxu1 }
 0x324   : > { %v2524_v47 = vpop.f32.mrb[124].mxu0 }
 0x325   : > { %v2525_v57 = vadd.f32 %v2524_v47, %v2300_v4  ;;  %v2526_v5 = vpop.f32.mrb[125].mxu0 }
 0x327   : > { %2563 = vst [vmem:[%s5536_s22 + $0xf0] sm:$0xff] %v2525_v57  ;;  %v2304_v34 = vpop.f32.mrb[126].mxu1 }
 0x328   : > { %v2305_v18 = vadd.f32 %v5514_v36, %v2304_v34  ;;  %v2529_v1 = vpop.f32.mrb[126].mxu0  ;;  %v2306_v23 = vpop.f32.mrb[127].mxu1 }
 0x329   : > { %v2531_v26 = vpop.f32.mrb[127].mxu0 }
 0x32a   : > { %v2530_v40 = vadd.f32 %v2529_v1, %v2305_v18 }
 0x32c   : > { %2564 = vst [vmem:[%s5536_s22 + $0xf8] sm:$0xff] %v2530_v40 }
 0x32d PF: > { %s15_s18 = sadd.s32 1, %s3129_s18  }
 0x32e   : > { %p12_p4 = scmp.ge.s32.totalorder %s15_s18, 4  }
 0x330   :  { %14 = sbr.rel (!%p12_p4) target bundleno = 1 (0x1), region = 70 }

</bundles_post_ra>
